<compile_context>
chip_gen: v7x
topology: tpu7x:2x2x1
jax: 0.10.0
libtpu: 0.0.40
codegen_flags: <defaults>
</compile_context>

<pallas_src>
import functools

import jax
import jax.numpy as jnp
from jax import lax
from jax.experimental import pallas as pl
from jax.experimental.pallas import tpu as pltpu

_LANE = 128
_SUBLANE = 8
_MAX_PY_UNROLL_T = 32     # fully unroll the in-kernel time loop below this
_FORI_UNROLL = 8          # unroll factor for long sequences


def _rup(n, m):
    return ((n + m - 1) // m) * m


# ----------------------------------------------------------------------------
# Fused decoder kernel: one invocation per batch tile, time loop inside.
# ----------------------------------------------------------------------------
def _decoder_kernel(latent_ref, wl_ref, bl_ref,
                    whh3_ref, b3_ref,
                    w2_ref, b2_ref,
                    w1_ref, b1_ref,
                    wo_ref, bo_ref,
                    out_ref):
    f32 = jnp.float32
    bf16 = jnp.bfloat16

    T = out_ref.shape[0]
    bp = latent_ref.shape[0]
    h3p = whh3_ref.shape[0]
    h2p = w2_ref.shape[1] // 4
    h1p = w1_ref.shape[1] // 4

    # Resident bf16 weight slabs + f32 biases, loaded once and reused every step.
    wl, whh3, w2, w1, wo = (wl_ref[...], whh3_ref[...], w2_ref[...],
                            w1_ref[...], wo_ref[...])
    bl, b3, b2, b1, bo = (bl_ref[...], b3_ref[...], b2_ref[...],
                          b1_ref[...], bo_ref[...])

    def gate_update(gates, c, hp):
        # lane-aligned gate slices (PyTorch order: i, f, g, o); all elementwise math in f32
        i_g = jax.nn.sigmoid(gates[:, 0 * hp:1 * hp])
        f_g = jax.nn.sigmoid(gates[:, 1 * hp:2 * hp])
        g_g = jnp.tanh(gates[:, 2 * hp:3 * hp])
        o_g = jax.nn.sigmoid(gates[:, 3 * hp:4 * hp])
        c_new = f_g * c + i_g * g_g
        h_new = o_g * jnp.tanh(c_new)
        return h_new, c_new

    # h0 of layer 3 = latent @ W_l2h3^T + b  (the latent_to_hidden3 Linear, computed once).
    h3 = jnp.dot(latent_ref[...].astype(bf16), wl, preferred_element_type=f32) + bl
    c3 = jnp.zeros((bp, h3p), f32)
    h2 = jnp.zeros((bp, h2p), f32)
    c2 = jnp.zeros((bp, h2p), f32)
    h1 = jnp.zeros((bp, h1p), f32)
    c1 = jnp.zeros((bp, h1p), f32)

    def step(t, carry):
        h3, c3, h2, c2, h1, c1 = carry

        # layer 3: the decoder input sequence is identically zero -> x @ W_ih3 is dropped
        # entirely (its bias b_ih3 is folded into b3 on the host).
        g3 = jnp.dot(h3.astype(bf16), whh3, preferred_element_type=f32) + b3
        h3n, c3n = gate_update(g3, c3, h3p)

        # layer 2: single fused [x ; h] @ [[W_ih];[W_hh]] matmul (K = H3p + H2p = 256).
        xh2 = jnp.concatenate([h3n.astype(bf16), h2.astype(bf16)], axis=1)
        g2 = jnp.dot(xh2, w2, preferred_element_type=f32) + b2
        h2n, c2n = gate_update(g2, c2, h2p)

        # layer 1: same fusion (K = H2p + H1p = 256).
        xh1 = jnp.concatenate([h2n.astype(bf16), h1.astype(bf16)], axis=1)
        g1 = jnp.dot(xh1, w1, preferred_element_type=f32) + b1
        h1n, c1n = gate_update(g1, c1, h1p)

        # output projection; (bp, 128) slab -> unmasked, lane-dense store.
        out_ref[t] = (jnp.dot(h1n.astype(bf16), wo, preferred_element_type=f32)
                      + bo).astype(out_ref.dtype)
        return h3n, c3n, h2n, c2n, h1n, c1n

    carry = (h3, c3, h2, c2, h1, c1)
    if T <= _MAX_PY_UNROLL_T:
        for t in range(T):              # static T: full unroll in the trace
            carry = step(t, carry)
    else:
        lax.fori_loop(0, T, step, carry, unroll=_FORI_UNROLL)


# ----------------------------------------------------------------------------
# Weight packing: PyTorch layouts -> transposed, lane-aligned, zero-padded slabs.
# Zero padding keeps padded lanes of h/c exactly 0 through the recurrence.
# ----------------------------------------------------------------------------
def _pack_gate_weight(w, in_pad, h, hp):
    """PyTorch LSTM weight (4H, in_dim) -> (in_pad, 4*hp) with 128-lane-aligned gates."""
    wt = jnp.asarray(w, jnp.float32).T          # (in_dim, 4H)
    in_dim = wt.shape[0]
    blocks = [jnp.pad(wt[:, k * h:(k + 1) * h], ((0, in_pad - in_dim), (0, hp - h)))
              for k in range(4)]
    return jnp.concatenate(blocks, axis=1)      # (in_pad, 4*hp)


def _pack_gate_bias(b_ih, b_hh, h, hp):
    b = jnp.asarray(b_ih, jnp.float32) + jnp.asarray(b_hh, jnp.float32)
    blocks = [jnp.pad(b[k * h:(k + 1) * h], (0, hp - h)) for k in range(4)]
    return jnp.concatenate(blocks).reshape(1, 4 * hp)


def _pad2d(x, rows, cols):
    x = jnp.asarray(x, jnp.float32)
    return jnp.pad(x, ((0, rows - x.shape[0]), (0, cols - x.shape[1])))


# ----------------------------------------------------------------------------
# Decoder forward (single pallas_call; grid is a parallel batch-tile axis only)
# ----------------------------------------------------------------------------
def decoder_forward(latent, params, *, sequence_length, batch_size,
                    hidden_size_1, hidden_size_2, hidden_size_3,
                    latent_length, output_size):
    T, B = sequence_length, batch_size
    H1, H2, H3 = hidden_size_1, hidden_size_2, hidden_size_3
    L, O = latent_length, output_size
    bf16 = jnp.bfloat16

    H1p, H2p, H3p = _rup(H1, _LANE), _rup(H2, _LANE), _rup(H3, _LANE)
    Lp, Op = _rup(L, _LANE), _rup(O, _LANE)

    Bp = _rup(max(B, _SUBLANE), _SUBLANE)
    BT = min(Bp, 256)                 # batch-tile rows per grid step ("parallel" axis)
    Bp = _rup(Bp, BT)
    n_bt = Bp // BT

    # --- pack / pad parameters (weights bf16, biases f32) ---
    latent_p = _pad2d(latent, Bp, Lp)                                             # (Bp, Lp)  f32
    wl = _pad2d(jnp.asarray(params["l2h3_w"], jnp.float32).T, Lp, H3p).astype(bf16)
    bl = _pad2d(jnp.asarray(params["l2h3_b"], jnp.float32).reshape(1, H3), 1, H3p)

    whh3 = _pack_gate_weight(params["w_hh3"], H3p, H3, H3p).astype(bf16)          # (H3p, 4*H3p)
    b3 = _pack_gate_bias(params["b_ih3"], params["b_hh3"], H3, H3p)

    w2 = jnp.concatenate([_pack_gate_weight(params["w_ih2"], H3p, H2, H2p),
                          _pack_gate_weight(params["w_hh2"], H2p, H2, H2p)],
                         axis=0).astype(bf16)                                     # (H3p+H2p, 4*H2p)
    b2 = _pack_gate_bias(params["b_ih2"], params["b_hh2"], H2, H2p)

    w1 = jnp.concatenate([_pack_gate_weight(params["w_ih1"], H2p, H1, H1p),
                          _pack_gate_weight(params["w_hh1"], H1p, H1, H1p)],
                         axis=0).astype(bf16)                                     # (H2p+H1p, 4*H1p)
    b1 = _pack_gate_bias(params["b_ih1"], params["b_hh1"], H1, H1p)

    wout = _pad2d(jnp.asarray(params["h2o_w"], jnp.float32).T, H1p, Op).astype(bf16)
    bout = _pad2d(jnp.asarray(params["h2o_b"], jnp.float32).reshape(1, O), 1, Op)

    const = lambda b: (0, 0)   # weights/biases: resident, never re-fetched across batch tiles

    out_padded = pl.pallas_call(
        _decoder_kernel,
        out_shape=jax.ShapeDtypeStruct((T, Bp, Op), jnp.float32),
        grid_spec=pltpu.PrefetchScalarGridSpec(
            num_scalar_prefetch=0,
            grid=(n_bt,),
            in_specs=[
                pl.BlockSpec((BT, Lp), lambda b: (b, 0)),      # latent
                pl.BlockSpec((Lp, H3p), const),                # W_l2h3^T          (bf16)
                pl.BlockSpec((1, H3p), const),                 # b_l2h3
                pl.BlockSpec((H3p, 4 * H3p), const),           # W_hh3^T           (bf16)
                pl.BlockSpec((1, 4 * H3p), const),             # b_ih3 + b_hh3
                pl.BlockSpec((H3p + H2p, 4 * H2p), const),     # [[W_ih2];[W_hh2]] (bf16)
                pl.BlockSpec((1, 4 * H2p), const),             # b_ih2 + b_hh2
                pl.BlockSpec((H2p + H1p, 4 * H1p), const),     # [[W_ih1];[W_hh1]] (bf16)
                pl.BlockSpec((1, 4 * H1p), const),             # b_ih1 + b_hh1
                pl.BlockSpec((H1p, Op), const),                # W_h2o^T           (bf16)
                pl.BlockSpec((1, Op), const),                  # b_h2o
            ],
            out_specs=pl.BlockSpec((T, BT, Op), lambda b: (0, b, 0)),
        ),
        compiler_params=pltpu.CompilerParams(
            dimension_semantics=("parallel",),                 # batch tiles are independent
        ),
    )(latent_p, wl, bl, whh3, b3, w2, b2, w1, b1, wout, bout)

    return out_padded[:, :B, :O]


# ----------------------------------------------------------------------------
# Pure-JAX reference (mirrors PyTorch semantics).  quantize=True applies the same
# bf16-weight / bf16-operand, f32-accumulate matmul policy as the kernel.
# ----------------------------------------------------------------------------
def decoder_ref(latent, p, *, sequence_length, batch_size,
                hidden_size_1, hidden_size_2, hidden_size_3, output_size,
                quantize=False):
    cast = (lambda a: a.astype(jnp.bfloat16)) if quantize else (lambda a: a)

    def qdot(x, w):
        return jnp.dot(cast(x), cast(w), preferred_element_type=jnp.float32)

    def lstm(x_seq, w_ih, w_hh, b_ih, b_hh, h0, c0):
        def step(carry, xt):
            h, c = carry
            gates = qdot(xt, w_ih.T) + b_ih + qdot(h, w_hh.T) + b_hh
            i, f, g, o = jnp.split(gates, 4, axis=-1)
            i, f, o = jax.nn.sigmoid(i), jax.nn.sigmoid(f), jax.nn.sigmoid(o)
            g = jnp.tanh(g)
            c = f * c + i * g
            h = o * jnp.tanh(c)
            return (h, c), h
        _, ys = lax.scan(step, (h0, c0), x_seq)
        return ys

    T, B = sequence_length, batch_size
    h0 = qdot(latent, p["l2h3_w"].T) + p["l2h3_b"]
    x = jnp.zeros((T, B, 1), jnp.float32)
    o3 = lstm(x, p["w_ih3"], p["w_hh3"], p["b_ih3"], p["b_hh3"], h0, jnp.zeros_like(h0))
    z2 = jnp.zeros((B, hidden_size_2), jnp.float32)
    o2 = lstm(o3, p["w_ih2"], p["w_hh2"], p["b_ih2"], p["b_hh2"], z2, z2)
    z1 = jnp.zeros((B, hidden_size_1), jnp.float32)
    o1 = lstm(o2, p["w_ih1"], p["w_hh1"], p["b_ih1"], p["b_hh1"], z1, z1)
    return qdot(o1, p["h2o_w"].T) + p["h2o_b"]


# ----------------------------------------------------------------------------
# Parameter construction (deterministic, synthetic, PyTorch layouts)
# ----------------------------------------------------------------------------
def make_params(key, *, latent_length, hidden_size_1, hidden_size_2,
                hidden_size_3, output_size):
    def u(k, shape, scale=0.1):
        return jax.random.uniform(k, shape, jnp.float32, -scale, scale)

    ks = jax.random.split(key, 16)
    return {
        # nn.Linear(latent_length, hidden_size_3)
        "l2h3_w": u(ks[0], (hidden_size_3, latent_length)),
        "l2h3_b": u(ks[1], (hidden_size_3,)),
        # nn.LSTM(1, H3, 1)
        "w_ih3": u(ks[2], (4 * hidden_size_3, 1)),
        "w_hh3": u(ks[3], (4 * hidden_size_3, hidden_size_3)),
        "b_ih3": u(ks[4], (4 * hidden_size_3,)),
        "b_hh3": u(ks[5], (4 * hidden_size_3,)),
        # nn.LSTM(H3, H2, 1)
        "w_ih2": u(ks[6], (4 * hidden_size_2, hidden_size_3)),
        "w_hh2": u(ks[7], (4 * hidden_size_2, hidden_size_2)),
        "b_ih2": u(ks[8], (4 * hidden_size_2,)),
        "b_hh2": u(ks[9], (4 * hidden_size_2,)),
        # nn.LSTM(H2, H1, 1)
        "w_ih1": u(ks[10], (4 * hidden_size_1, hidden_size_2)),
        "w_hh1": u(ks[11], (4 * hidden_size_1, hidden_size_1)),
        "b_ih1": u(ks[12], (4 * hidden_size_1,)),
        "b_hh1": u(ks[13], (4 * hidden_size_1,)),
        # nn.Linear(H1, output_size)
        "h2o_w": u(ks[14], (output_size, hidden_size_1)),
        "h2o_b": u(ks[15], (output_size,)),
    }


if __name__ == "__main__":
    # small, module-consistent shapes (hidden_layer_depth == 1)
    sequence_length = 8
    batch_size = 4
    hidden_size_1 = 32
    hidden_size_2 = 24
    hidden_size_3 = 16
    latent_length = 8
    output_size = 2

    key = jax.random.PRNGKey(0)
    pkey, lkey = jax.random.split(key)
    params = make_params(pkey,
                         latent_length=latent_length,
                         hidden_size_1=hidden_size_1,
                         hidden_size_2=hidden_size_2,
                         hidden_size_3=hidden_size_3,
                         output_size=output_size)

    latent = jax.random.normal(lkey, (batch_size, latent_length), jnp.float32)

    fwd = functools.partial(decoder_forward,
                            sequence_length=sequence_length,
                            batch_size=batch_size,
                            hidden_size_1=hidden_size_1,
                            hidden_size_2=hidden_size_2,
                            hidden_size_3=hidden_size_3,
                            latent_length=latent_length,
                            output_size=output_size)

    out = jax.jit(lambda l: fwd(l, params))(latent)
    out = jax.block_until_ready(out)
    assert out.shape == (sequence_length, batch_size, output_size), out.shape
    assert bool(jnp.all(jnp.isfinite(out)))

    ref_kwargs = dict(sequence_length=sequence_length, batch_size=batch_size,
                      hidden_size_1=hidden_size_1, hidden_size_2=hidden_size_2,
                      hidden_size_3=hidden_size_3, output_size=output_size)

    # Strict check against a reference using the SAME mixed-precision matmul policy
    # (bf16 weights/operands, f32 accumulate, f32 elementwise).
    ref_q = decoder_ref(latent, params, quantize=True, **ref_kwargs)
    assert bool(jnp.allclose(out, ref_q, rtol=2e-3, atol=2e-3)), \
        "mismatch vs bf16-matmul reference"

    # Loose sanity check against the full-f32 PyTorch-equivalent reference
    # (bounds the deliberate bf16-weight precision drift).
    ref_f32 = decoder_ref(latent, params, quantize=False, **ref_kwargs)
    assert bool(jnp.allclose(out, ref_f32, rtol=2e-2, atol=2e-2)), \
        "mixed-precision drift vs f32 reference too large"

    print("KERNEL_OK")
</pallas_src>

<mosaic_0001>
module attributes {stable_mosaic.version = 11 : i64} {
  func.func @_decoder_kernel(%arg0: i32, %arg1: memref<8x128xf32, #tpu.memory_space<vmem>>, %arg2: memref<128x128xbf16, #tpu.memory_space<vmem>>, %arg3: memref<1x128xf32, #tpu.memory_space<vmem>>, %arg4: memref<128x512xbf16, #tpu.memory_space<vmem>>, %arg5: memref<1x512xf32, #tpu.memory_space<vmem>>, %arg6: memref<256x512xbf16, #tpu.memory_space<vmem>>, %arg7: memref<1x512xf32, #tpu.memory_space<vmem>>, %arg8: memref<256x512xbf16, #tpu.memory_space<vmem>>, %arg9: memref<1x512xf32, #tpu.memory_space<vmem>>, %arg10: memref<128x128xbf16, #tpu.memory_space<vmem>>, %arg11: memref<1x128xf32, #tpu.memory_space<vmem>>, %arg12: memref<8x8x128xf32, #tpu.memory_space<vmem>>) attributes {dimension_semantics = [#tpu.dimension_semantics<parallel>], iteration_bounds = array<i64: 1>, scalar_prefetch = 0 : i64, scratch_operands = 0 : i64, tpu.core_type = #tpu.core_type<tc>, window_params = [{transform_indices = @transform_0, window_bounds = array<i64: 8, 128>}, {pipeline_mode = #tpu.pipeline_mode<synchronous>, transform_indices = @transform_1, window_bounds = array<i64: 128, 128>}, {pipeline_mode = #tpu.pipeline_mode<synchronous>, transform_indices = @transform_2, window_bounds = array<i64: 1, 128>}, {pipeline_mode = #tpu.pipeline_mode<synchronous>, transform_indices = @transform_3, window_bounds = array<i64: 128, 512>}, {pipeline_mode = #tpu.pipeline_mode<synchronous>, transform_indices = @transform_4, window_bounds = array<i64: 1, 512>}, {pipeline_mode = #tpu.pipeline_mode<synchronous>, transform_indices = @transform_5, window_bounds = array<i64: 256, 512>}, {pipeline_mode = #tpu.pipeline_mode<synchronous>, transform_indices = @transform_6, window_bounds = array<i64: 1, 512>}, {pipeline_mode = #tpu.pipeline_mode<synchronous>, transform_indices = @transform_7, window_bounds = array<i64: 256, 512>}, {pipeline_mode = #tpu.pipeline_mode<synchronous>, transform_indices = @transform_8, window_bounds = array<i64: 1, 512>}, {pipeline_mode = #tpu.pipeline_mode<synchronous>, transform_indices = @transform_9, window_bounds = array<i64: 128, 128>}, {pipeline_mode = #tpu.pipeline_mode<synchronous>, transform_indices = @transform_10, window_bounds = array<i64: 1, 128>}, {transform_indices = @transform_11, window_bounds = array<i64: 8, 8, 128>}]} {
    %c0 = arith.constant 0 : index
    %c0_0 = arith.constant 0 : index
    %0 = vector.load %arg2[%c0, %c0_0] : memref<128x128xbf16, #tpu.memory_space<vmem>>, vector<128x128xbf16>
    %c0_1 = arith.constant 0 : index
    %c0_2 = arith.constant 0 : index
    %1 = vector.load %arg4[%c0_1, %c0_2] : memref<128x512xbf16, #tpu.memory_space<vmem>>, vector<128x512xbf16>
    %c0_3 = arith.constant 0 : index
    %c0_4 = arith.constant 0 : index
    %2 = vector.load %arg6[%c0_3, %c0_4] : memref<256x512xbf16, #tpu.memory_space<vmem>>, vector<256x512xbf16>
    %c0_5 = arith.constant 0 : index
    %c0_6 = arith.constant 0 : index
    %3 = vector.load %arg8[%c0_5, %c0_6] : memref<256x512xbf16, #tpu.memory_space<vmem>>, vector<256x512xbf16>
    %c0_7 = arith.constant 0 : index
    %c0_8 = arith.constant 0 : index
    %4 = vector.load %arg10[%c0_7, %c0_8] : memref<128x128xbf16, #tpu.memory_space<vmem>>, vector<128x128xbf16>
    %c0_9 = arith.constant 0 : index
    %c0_10 = arith.constant 0 : index
    %5 = vector.load %arg3[%c0_9, %c0_10] : memref<1x128xf32, #tpu.memory_space<vmem>>, vector<1x128xf32>
    %c0_11 = arith.constant 0 : index
    %c0_12 = arith.constant 0 : index
    %6 = vector.load %arg5[%c0_11, %c0_12] : memref<1x512xf32, #tpu.memory_space<vmem>>, vector<1x512xf32>
    %c0_13 = arith.constant 0 : index
    %c0_14 = arith.constant 0 : index
    %7 = vector.load %arg7[%c0_13, %c0_14] : memref<1x512xf32, #tpu.memory_space<vmem>>, vector<1x512xf32>
    %c0_15 = arith.constant 0 : index
    %c0_16 = arith.constant 0 : index
    %8 = vector.load %arg9[%c0_15, %c0_16] : memref<1x512xf32, #tpu.memory_space<vmem>>, vector<1x512xf32>
    %c0_17 = arith.constant 0 : index
    %c0_18 = arith.constant 0 : index
    %9 = vector.load %arg11[%c0_17, %c0_18] : memref<1x128xf32, #tpu.memory_space<vmem>>, vector<1x128xf32>
    %c0_19 = arith.constant 0 : index
    %c0_20 = arith.constant 0 : index
    %10 = vector.load %arg1[%c0_19, %c0_20] : memref<8x128xf32, #tpu.memory_space<vmem>>, vector<8x128xf32>
    %11 = arith.truncf %10 : vector<8x128xf32> to vector<8x128xbf16>
    %cst = arith.constant dense<0.000000e+00> : vector<8x128xf32>
    %12 = tpu.matmul %11, %0, %cst {dimension_numbers = #tpu.dot_dimension_numbers<[1], [0], [0], [1], [0, 0, 1, 1], [], []>} : vector<8x128xbf16>, vector<128x128xbf16>, vector<8x128xf32> -> vector<8x128xf32>
    %13 = vector.broadcast %5 : vector<1x128xf32> to vector<8x128xf32>
    %14 = arith.addf %12, %13 : vector<8x128xf32>
    %cst_21 = arith.constant 0.000000e+00 : f32
    %15 = vector.broadcast %cst_21 : f32 to vector<8x128xf32>
    %cst_22 = arith.constant 0.000000e+00 : f32
    %16 = vector.broadcast %cst_22 : f32 to vector<8x128xf32>
    %cst_23 = arith.constant 0.000000e+00 : f32
    %17 = vector.broadcast %cst_23 : f32 to vector<8x128xf32>
    %cst_24 = arith.constant 0.000000e+00 : f32
    %18 = vector.broadcast %cst_24 : f32 to vector<8x128xf32>
    %cst_25 = arith.constant 0.000000e+00 : f32
    %19 = vector.broadcast %cst_25 : f32 to vector<8x128xf32>
    %20 = arith.truncf %14 : vector<8x128xf32> to vector<8x128xbf16>
    %cst_26 = arith.constant dense<0.000000e+00> : vector<8x512xf32>
    %21 = tpu.matmul %20, %1, %cst_26 {dimension_numbers = #tpu.dot_dimension_numbers<[1], [0], [0], [1], [0, 0, 1, 1], [], []>} : vector<8x128xbf16>, vector<128x512xbf16>, vector<8x512xf32> -> vector<8x512xf32>
    %22 = vector.broadcast %6 : vector<1x512xf32> to vector<8x512xf32>
    %23 = arith.addf %21, %22 : vector<8x512xf32>
    %24 = vector.extract_strided_slice %23 {offsets = [0, 0], sizes = [8, 128], strides = [1, 1]} : vector<8x512xf32> to vector<8x128xf32>
    %25 = arith.negf %24 : vector<8x128xf32>
    %26 = math.exp %25 : vector<8x128xf32>
    %cst_27 = arith.constant 1.000000e+00 : f32
    %27 = vector.broadcast %cst_27 : f32 to vector<8x128xf32>
    %28 = arith.addf %27, %26 : vector<8x128xf32>
    %29 = arith.divf %27, %28 : vector<8x128xf32>
    %30 = vector.extract_strided_slice %23 {offsets = [0, 128], sizes = [8, 128], strides = [1, 1]} : vector<8x512xf32> to vector<8x128xf32>
    %31 = arith.negf %30 : vector<8x128xf32>
    %32 = math.exp %31 : vector<8x128xf32>
    %cst_28 = arith.constant 1.000000e+00 : f32
    %33 = vector.broadcast %cst_28 : f32 to vector<8x128xf32>
    %34 = arith.addf %33, %32 : vector<8x128xf32>
    %35 = arith.divf %33, %34 : vector<8x128xf32>
    %36 = vector.extract_strided_slice %23 {offsets = [0, 256], sizes = [8, 128], strides = [1, 1]} : vector<8x512xf32> to vector<8x128xf32>
    %37 = math.tanh %36 : vector<8x128xf32>
    %38 = vector.extract_strided_slice %23 {offsets = [0, 384], sizes = [8, 128], strides = [1, 1]} : vector<8x512xf32> to vector<8x128xf32>
    %39 = arith.negf %38 : vector<8x128xf32>
    %40 = math.exp %39 : vector<8x128xf32>
    %cst_29 = arith.constant 1.000000e+00 : f32
    %41 = vector.broadcast %cst_29 : f32 to vector<8x128xf32>
    %42 = arith.addf %41, %40 : vector<8x128xf32>
    %43 = arith.divf %41, %42 : vector<8x128xf32>
    %44 = arith.mulf %35, %15 : vector<8x128xf32>
    %45 = arith.mulf %29, %37 : vector<8x128xf32>
    %46 = arith.addf %44, %45 : vector<8x128xf32>
    %47 = math.tanh %46 : vector<8x128xf32>
    %48 = arith.mulf %43, %47 : vector<8x128xf32>
    %49 = arith.truncf %48 : vector<8x128xf32> to vector<8x128xbf16>
    %50 = arith.truncf %16 : vector<8x128xf32> to vector<8x128xbf16>
    %51 = tpu.concatenate %49, %50 in 1 : vector<8x128xbf16>, vector<8x128xbf16> -> vector<8x256xbf16>
    %cst_30 = arith.constant dense<0.000000e+00> : vector<8x512xf32>
    %52 = tpu.matmul %51, %2, %cst_30 {dimension_numbers = #tpu.dot_dimension_numbers<[1], [0], [0], [1], [0, 0, 1, 1], [], []>} : vector<8x256xbf16>, vector<256x512xbf16>, vector<8x512xf32> -> vector<8x512xf32>
    %53 = vector.broadcast %7 : vector<1x512xf32> to vector<8x512xf32>
    %54 = arith.addf %52, %53 : vector<8x512xf32>
    %55 = vector.extract_strided_slice %54 {offsets = [0, 0], sizes = [8, 128], strides = [1, 1]} : vector<8x512xf32> to vector<8x128xf32>
    %56 = arith.negf %55 : vector<8x128xf32>
    %57 = math.exp %56 : vector<8x128xf32>
    %cst_31 = arith.constant 1.000000e+00 : f32
    %58 = vector.broadcast %cst_31 : f32 to vector<8x128xf32>
    %59 = arith.addf %58, %57 : vector<8x128xf32>
    %60 = arith.divf %58, %59 : vector<8x128xf32>
    %61 = vector.extract_strided_slice %54 {offsets = [0, 128], sizes = [8, 128], strides = [1, 1]} : vector<8x512xf32> to vector<8x128xf32>
    %62 = arith.negf %61 : vector<8x128xf32>
    %63 = math.exp %62 : vector<8x128xf32>
    %cst_32 = arith.constant 1.000000e+00 : f32
    %64 = vector.broadcast %cst_32 : f32 to vector<8x128xf32>
    %65 = arith.addf %64, %63 : vector<8x128xf32>
    %66 = arith.divf %64, %65 : vector<8x128xf32>
    %67 = vector.extract_strided_slice %54 {offsets = [0, 256], sizes = [8, 128], strides = [1, 1]} : vector<8x512xf32> to vector<8x128xf32>
    %68 = math.tanh %67 : vector<8x128xf32>
    %69 = vector.extract_strided_slice %54 {offsets = [0, 384], sizes = [8, 128], strides = [1, 1]} : vector<8x512xf32> to vector<8x128xf32>
    %70 = arith.negf %69 : vector<8x128xf32>
    %71 = math.exp %70 : vector<8x128xf32>
    %cst_33 = arith.constant 1.000000e+00 : f32
    %72 = vector.broadcast %cst_33 : f32 to vector<8x128xf32>
    %73 = arith.addf %72, %71 : vector<8x128xf32>
    %74 = arith.divf %72, %73 : vector<8x128xf32>
    %75 = arith.mulf %66, %17 : vector<8x128xf32>
    %76 = arith.mulf %60, %68 : vector<8x128xf32>
    %77 = arith.addf %75, %76 : vector<8x128xf32>
    %78 = math.tanh %77 : vector<8x128xf32>
    %79 = arith.mulf %74, %78 : vector<8x128xf32>
    %80 = arith.truncf %79 : vector<8x128xf32> to vector<8x128xbf16>
    %81 = arith.truncf %18 : vector<8x128xf32> to vector<8x128xbf16>
    %82 = tpu.concatenate %80, %81 in 1 : vector<8x128xbf16>, vector<8x128xbf16> -> vector<8x256xbf16>
    %cst_34 = arith.constant dense<0.000000e+00> : vector<8x512xf32>
    %83 = tpu.matmul %82, %3, %cst_34 {dimension_numbers = #tpu.dot_dimension_numbers<[1], [0], [0], [1], [0, 0, 1, 1], [], []>} : vector<8x256xbf16>, vector<256x512xbf16>, vector<8x512xf32> -> vector<8x512xf32>
    %84 = vector.broadcast %8 : vector<1x512xf32> to vector<8x512xf32>
    %85 = arith.addf %83, %84 : vector<8x512xf32>
    %86 = vector.extract_strided_slice %85 {offsets = [0, 0], sizes = [8, 128], strides = [1, 1]} : vector<8x512xf32> to vector<8x128xf32>
    %87 = arith.negf %86 : vector<8x128xf32>
    %88 = math.exp %87 : vector<8x128xf32>
    %cst_35 = arith.constant 1.000000e+00 : f32
    %89 = vector.broadcast %cst_35 : f32 to vector<8x128xf32>
    %90 = arith.addf %89, %88 : vector<8x128xf32>
    %91 = arith.divf %89, %90 : vector<8x128xf32>
    %92 = vector.extract_strided_slice %85 {offsets = [0, 128], sizes = [8, 128], strides = [1, 1]} : vector<8x512xf32> to vector<8x128xf32>
    %93 = arith.negf %92 : vector<8x128xf32>
    %94 = math.exp %93 : vector<8x128xf32>
    %cst_36 = arith.constant 1.000000e+00 : f32
    %95 = vector.broadcast %cst_36 : f32 to vector<8x128xf32>
    %96 = arith.addf %95, %94 : vector<8x128xf32>
    %97 = arith.divf %95, %96 : vector<8x128xf32>
    %98 = vector.extract_strided_slice %85 {offsets = [0, 256], sizes = [8, 128], strides = [1, 1]} : vector<8x512xf32> to vector<8x128xf32>
    %99 = math.tanh %98 : vector<8x128xf32>
    %100 = vector.extract_strided_slice %85 {offsets = [0, 384], sizes = [8, 128], strides = [1, 1]} : vector<8x512xf32> to vector<8x128xf32>
    %101 = arith.negf %100 : vector<8x128xf32>
    %102 = math.exp %101 : vector<8x128xf32>
    %cst_37 = arith.constant 1.000000e+00 : f32
    %103 = vector.broadcast %cst_37 : f32 to vector<8x128xf32>
    %104 = arith.addf %103, %102 : vector<8x128xf32>
    %105 = arith.divf %103, %104 : vector<8x128xf32>
    %106 = arith.mulf %97, %19 : vector<8x128xf32>
    %107 = arith.mulf %91, %99 : vector<8x128xf32>
    %108 = arith.addf %106, %107 : vector<8x128xf32>
    %109 = math.tanh %108 : vector<8x128xf32>
    %110 = arith.mulf %105, %109 : vector<8x128xf32>
    %111 = arith.truncf %110 : vector<8x128xf32> to vector<8x128xbf16>
    %cst_38 = arith.constant dense<0.000000e+00> : vector<8x128xf32>
    %112 = tpu.matmul %111, %4, %cst_38 {dimension_numbers = #tpu.dot_dimension_numbers<[1], [0], [0], [1], [0, 0, 1, 1], [], []>} : vector<8x128xbf16>, vector<128x128xbf16>, vector<8x128xf32> -> vector<8x128xf32>
    %113 = vector.broadcast %9 : vector<1x128xf32> to vector<8x128xf32>
    %114 = arith.addf %112, %113 : vector<8x128xf32>
    %c0_39 = arith.constant 0 : index
    %c0_40 = arith.constant 0 : index
    %c0_41 = arith.constant 0 : index
    %115 = vector.load %arg12[%c0_39, %c0_40, %c0_41] : memref<8x8x128xf32, #tpu.memory_space<vmem>>, vector<1x8x128xf32>
    %116 = vector.shape_cast %115 : vector<1x8x128xf32> to vector<8x128xf32>
    %117 = vector.shape_cast %114 : vector<8x128xf32> to vector<1x8x128xf32>
    tpu.vector_store %arg12[%c0_39, %c0_40, %c0_41], %117 {strides = array<i32>} : memref<8x8x128xf32, #tpu.memory_space<vmem>>, vector<1x8x128xf32>,
    %118 = arith.truncf %48 : vector<8x128xf32> to vector<8x128xbf16>
    %cst_42 = arith.constant dense<0.000000e+00> : vector<8x512xf32>
    %119 = tpu.matmul %118, %1, %cst_42 {dimension_numbers = #tpu.dot_dimension_numbers<[1], [0], [0], [1], [0, 0, 1, 1], [], []>} : vector<8x128xbf16>, vector<128x512xbf16>, vector<8x512xf32> -> vector<8x512xf32>
    %120 = vector.broadcast %6 : vector<1x512xf32> to vector<8x512xf32>
    %121 = arith.addf %119, %120 : vector<8x512xf32>
    %122 = vector.extract_strided_slice %121 {offsets = [0, 0], sizes = [8, 128], strides = [1, 1]} : vector<8x512xf32> to vector<8x128xf32>
    %123 = arith.negf %122 : vector<8x128xf32>
    %124 = math.exp %123 : vector<8x128xf32>
    %cst_43 = arith.constant 1.000000e+00 : f32
    %125 = vector.broadcast %cst_43 : f32 to vector<8x128xf32>
    %126 = arith.addf %125, %124 : vector<8x128xf32>
    %127 = arith.divf %125, %126 : vector<8x128xf32>
    %128 = vector.extract_strided_slice %121 {offsets = [0, 128], sizes = [8, 128], strides = [1, 1]} : vector<8x512xf32> to vector<8x128xf32>
    %129 = arith.negf %128 : vector<8x128xf32>
    %130 = math.exp %129 : vector<8x128xf32>
    %cst_44 = arith.constant 1.000000e+00 : f32
    %131 = vector.broadcast %cst_44 : f32 to vector<8x128xf32>
    %132 = arith.addf %131, %130 : vector<8x128xf32>
    %133 = arith.divf %131, %132 : vector<8x128xf32>
    %134 = vector.extract_strided_slice %121 {offsets = [0, 256], sizes = [8, 128], strides = [1, 1]} : vector<8x512xf32> to vector<8x128xf32>
    %135 = math.tanh %134 : vector<8x128xf32>
    %136 = vector.extract_strided_slice %121 {offsets = [0, 384], sizes = [8, 128], strides = [1, 1]} : vector<8x512xf32> to vector<8x128xf32>
    %137 = arith.negf %136 : vector<8x128xf32>
    %138 = math.exp %137 : vector<8x128xf32>
    %cst_45 = arith.constant 1.000000e+00 : f32
    %139 = vector.broadcast %cst_45 : f32 to vector<8x128xf32>
    %140 = arith.addf %139, %138 : vector<8x128xf32>
    %141 = arith.divf %139, %140 : vector<8x128xf32>
    %142 = arith.mulf %133, %46 : vector<8x128xf32>
    %143 = arith.mulf %127, %135 : vector<8x128xf32>
    %144 = arith.addf %142, %143 : vector<8x128xf32>
    %145 = math.tanh %144 : vector<8x128xf32>
    %146 = arith.mulf %141, %145 : vector<8x128xf32>
    %147 = arith.truncf %146 : vector<8x128xf32> to vector<8x128xbf16>
    %148 = arith.truncf %79 : vector<8x128xf32> to vector<8x128xbf16>
    %149 = tpu.concatenate %147, %148 in 1 : vector<8x128xbf16>, vector<8x128xbf16> -> vector<8x256xbf16>
    %cst_46 = arith.constant dense<0.000000e+00> : vector<8x512xf32>
    %150 = tpu.matmul %149, %2, %cst_46 {dimension_numbers = #tpu.dot_dimension_numbers<[1], [0], [0], [1], [0, 0, 1, 1], [], []>} : vector<8x256xbf16>, vector<256x512xbf16>, vector<8x512xf32> -> vector<8x512xf32>
    %151 = vector.broadcast %7 : vector<1x512xf32> to vector<8x512xf32>
    %152 = arith.addf %150, %151 : vector<8x512xf32>
    %153 = vector.extract_strided_slice %152 {offsets = [0, 0], sizes = [8, 128], strides = [1, 1]} : vector<8x512xf32> to vector<8x128xf32>
    %154 = arith.negf %153 : vector<8x128xf32>
    %155 = math.exp %154 : vector<8x128xf32>
    %cst_47 = arith.constant 1.000000e+00 : f32
    %156 = vector.broadcast %cst_47 : f32 to vector<8x128xf32>
    %157 = arith.addf %156, %155 : vector<8x128xf32>
    %158 = arith.divf %156, %157 : vector<8x128xf32>
    %159 = vector.extract_strided_slice %152 {offsets = [0, 128], sizes = [8, 128], strides = [1, 1]} : vector<8x512xf32> to vector<8x128xf32>
    %160 = arith.negf %159 : vector<8x128xf32>
    %161 = math.exp %160 : vector<8x128xf32>
    %cst_48 = arith.constant 1.000000e+00 : f32
    %162 = vector.broadcast %cst_48 : f32 to vector<8x128xf32>
    %163 = arith.addf %162, %161 : vector<8x128xf32>
    %164 = arith.divf %162, %163 : vector<8x128xf32>
    %165 = vector.extract_strided_slice %152 {offsets = [0, 256], sizes = [8, 128], strides = [1, 1]} : vector<8x512xf32> to vector<8x128xf32>
    %166 = math.tanh %165 : vector<8x128xf32>
    %167 = vector.extract_strided_slice %152 {offsets = [0, 384], sizes = [8, 128], strides = [1, 1]} : vector<8x512xf32> to vector<8x128xf32>
    %168 = arith.negf %167 : vector<8x128xf32>
    %169 = math.exp %168 : vector<8x128xf32>
    %cst_49 = arith.constant 1.000000e+00 : f32
    %170 = vector.broadcast %cst_49 : f32 to vector<8x128xf32>
    %171 = arith.addf %170, %169 : vector<8x128xf32>
    %172 = arith.divf %170, %171 : vector<8x128xf32>
    %173 = arith.mulf %164, %77 : vector<8x128xf32>
    %174 = arith.mulf %158, %166 : vector<8x128xf32>
    %175 = arith.addf %173, %174 : vector<8x128xf32>
    %176 = math.tanh %175 : vector<8x128xf32>
    %177 = arith.mulf %172, %176 : vector<8x128xf32>
    %178 = arith.truncf %177 : vector<8x128xf32> to vector<8x128xbf16>
    %179 = arith.truncf %110 : vector<8x128xf32> to vector<8x128xbf16>
    %180 = tpu.concatenate %178, %179 in 1 : vector<8x128xbf16>, vector<8x128xbf16> -> vector<8x256xbf16>
    %cst_50 = arith.constant dense<0.000000e+00> : vector<8x512xf32>
    %181 = tpu.matmul %180, %3, %cst_50 {dimension_numbers = #tpu.dot_dimension_numbers<[1], [0], [0], [1], [0, 0, 1, 1], [], []>} : vector<8x256xbf16>, vector<256x512xbf16>, vector<8x512xf32> -> vector<8x512xf32>
    %182 = vector.broadcast %8 : vector<1x512xf32> to vector<8x512xf32>
    %183 = arith.addf %181, %182 : vector<8x512xf32>
    %184 = vector.extract_strided_slice %183 {offsets = [0, 0], sizes = [8, 128], strides = [1, 1]} : vector<8x512xf32> to vector<8x128xf32>
    %185 = arith.negf %184 : vector<8x128xf32>
    %186 = math.exp %185 : vector<8x128xf32>
    %cst_51 = arith.constant 1.000000e+00 : f32
    %187 = vector.broadcast %cst_51 : f32 to vector<8x128xf32>
    %188 = arith.addf %187, %186 : vector<8x128xf32>
    %189 = arith.divf %187, %188 : vector<8x128xf32>
    %190 = vector.extract_strided_slice %183 {offsets = [0, 128], sizes = [8, 128], strides = [1, 1]} : vector<8x512xf32> to vector<8x128xf32>
    %191 = arith.negf %190 : vector<8x128xf32>
    %192 = math.exp %191 : vector<8x128xf32>
    %cst_52 = arith.constant 1.000000e+00 : f32
    %193 = vector.broadcast %cst_52 : f32 to vector<8x128xf32>
    %194 = arith.addf %193, %192 : vector<8x128xf32>
    %195 = arith.divf %193, %194 : vector<8x128xf32>
    %196 = vector.extract_strided_slice %183 {offsets = [0, 256], sizes = [8, 128], strides = [1, 1]} : vector<8x512xf32> to vector<8x128xf32>
    %197 = math.tanh %196 : vector<8x128xf32>
    %198 = vector.extract_strided_slice %183 {offsets = [0, 384], sizes = [8, 128], strides = [1, 1]} : vector<8x512xf32> to vector<8x128xf32>
    %199 = arith.negf %198 : vector<8x128xf32>
    %200 = math.exp %199 : vector<8x128xf32>
    %cst_53 = arith.constant 1.000000e+00 : f32
    %201 = vector.broadcast %cst_53 : f32 to vector<8x128xf32>
    %202 = arith.addf %201, %200 : vector<8x128xf32>
    %203 = arith.divf %201, %202 : vector<8x128xf32>
    %204 = arith.mulf %195, %108 : vector<8x128xf32>
    %205 = arith.mulf %189, %197 : vector<8x128xf32>
    %206 = arith.addf %204, %205 : vector<8x128xf32>
    %207 = math.tanh %206 : vector<8x128xf32>
    %208 = arith.mulf %203, %207 : vector<8x128xf32>
    %209 = arith.truncf %208 : vector<8x128xf32> to vector<8x128xbf16>
    %cst_54 = arith.constant dense<0.000000e+00> : vector<8x128xf32>
    %210 = tpu.matmul %209, %4, %cst_54 {dimension_numbers = #tpu.dot_dimension_numbers<[1], [0], [0], [1], [0, 0, 1, 1], [], []>} : vector<8x128xbf16>, vector<128x128xbf16>, vector<8x128xf32> -> vector<8x128xf32>
    %211 = vector.broadcast %9 : vector<1x128xf32> to vector<8x128xf32>
    %212 = arith.addf %210, %211 : vector<8x128xf32>
    %c1 = arith.constant 1 : index
    %c0_55 = arith.constant 0 : index
    %c0_56 = arith.constant 0 : index
    %213 = vector.load %arg12[%c1, %c0_55, %c0_56] : memref<8x8x128xf32, #tpu.memory_space<vmem>>, vector<1x8x128xf32>
    %214 = vector.shape_cast %213 : vector<1x8x128xf32> to vector<8x128xf32>
    %215 = vector.shape_cast %212 : vector<8x128xf32> to vector<1x8x128xf32>
    tpu.vector_store %arg12[%c1, %c0_55, %c0_56], %215 {strides = array<i32>} : memref<8x8x128xf32, #tpu.memory_space<vmem>>, vector<1x8x128xf32>,
    %216 = arith.truncf %146 : vector<8x128xf32> to vector<8x128xbf16>
    %cst_57 = arith.constant dense<0.000000e+00> : vector<8x512xf32>
    %217 = tpu.matmul %216, %1, %cst_57 {dimension_numbers = #tpu.dot_dimension_numbers<[1], [0], [0], [1], [0, 0, 1, 1], [], []>} : vector<8x128xbf16>, vector<128x512xbf16>, vector<8x512xf32> -> vector<8x512xf32>
    %218 = vector.broadcast %6 : vector<1x512xf32> to vector<8x512xf32>
    %219 = arith.addf %217, %218 : vector<8x512xf32>
    %220 = vector.extract_strided_slice %219 {offsets = [0, 0], sizes = [8, 128], strides = [1, 1]} : vector<8x512xf32> to vector<8x128xf32>
    %221 = arith.negf %220 : vector<8x128xf32>
    %222 = math.exp %221 : vector<8x128xf32>
    %cst_58 = arith.constant 1.000000e+00 : f32
    %223 = vector.broadcast %cst_58 : f32 to vector<8x128xf32>
    %224 = arith.addf %223, %222 : vector<8x128xf32>
    %225 = arith.divf %223, %224 : vector<8x128xf32>
    %226 = vector.extract_strided_slice %219 {offsets = [0, 128], sizes = [8, 128], strides = [1, 1]} : vector<8x512xf32> to vector<8x128xf32>
    %227 = arith.negf %226 : vector<8x128xf32>
    %228 = math.exp %227 : vector<8x128xf32>
    %cst_59 = arith.constant 1.000000e+00 : f32
    %229 = vector.broadcast %cst_59 : f32 to vector<8x128xf32>
    %230 = arith.addf %229, %228 : vector<8x128xf32>
    %231 = arith.divf %229, %230 : vector<8x128xf32>
    %232 = vector.extract_strided_slice %219 {offsets = [0, 256], sizes = [8, 128], strides = [1, 1]} : vector<8x512xf32> to vector<8x128xf32>
    %233 = math.tanh %232 : vector<8x128xf32>
    %234 = vector.extract_strided_slice %219 {offsets = [0, 384], sizes = [8, 128], strides = [1, 1]} : vector<8x512xf32> to vector<8x128xf32>
    %235 = arith.negf %234 : vector<8x128xf32>
    %236 = math.exp %235 : vector<8x128xf32>
    %cst_60 = arith.constant 1.000000e+00 : f32
    %237 = vector.broadcast %cst_60 : f32 to vector<8x128xf32>
    %238 = arith.addf %237, %236 : vector<8x128xf32>
    %239 = arith.divf %237, %238 : vector<8x128xf32>
    %240 = arith.mulf %231, %144 : vector<8x128xf32>
    %241 = arith.mulf %225, %233 : vector<8x128xf32>
    %242 = arith.addf %240, %241 : vector<8x128xf32>
    %243 = math.tanh %242 : vector<8x128xf32>
    %244 = arith.mulf %239, %243 : vector<8x128xf32>
    %245 = arith.truncf %244 : vector<8x128xf32> to vector<8x128xbf16>
    %246 = arith.truncf %177 : vector<8x128xf32> to vector<8x128xbf16>
    %247 = tpu.concatenate %245, %246 in 1 : vector<8x128xbf16>, vector<8x128xbf16> -> vector<8x256xbf16>
    %cst_61 = arith.constant dense<0.000000e+00> : vector<8x512xf32>
    %248 = tpu.matmul %247, %2, %cst_61 {dimension_numbers = #tpu.dot_dimension_numbers<[1], [0], [0], [1], [0, 0, 1, 1], [], []>} : vector<8x256xbf16>, vector<256x512xbf16>, vector<8x512xf32> -> vector<8x512xf32>
    %249 = vector.broadcast %7 : vector<1x512xf32> to vector<8x512xf32>
    %250 = arith.addf %248, %249 : vector<8x512xf32>
    %251 = vector.extract_strided_slice %250 {offsets = [0, 0], sizes = [8, 128], strides = [1, 1]} : vector<8x512xf32> to vector<8x128xf32>
    %252 = arith.negf %251 : vector<8x128xf32>
    %253 = math.exp %252 : vector<8x128xf32>
    %cst_62 = arith.constant 1.000000e+00 : f32
    %254 = vector.broadcast %cst_62 : f32 to vector<8x128xf32>
    %255 = arith.addf %254, %253 : vector<8x128xf32>
    %256 = arith.divf %254, %255 : vector<8x128xf32>
    %257 = vector.extract_strided_slice %250 {offsets = [0, 128], sizes = [8, 128], strides = [1, 1]} : vector<8x512xf32> to vector<8x128xf32>
    %258 = arith.negf %257 : vector<8x128xf32>
    %259 = math.exp %258 : vector<8x128xf32>
    %cst_63 = arith.constant 1.000000e+00 : f32
    %260 = vector.broadcast %cst_63 : f32 to vector<8x128xf32>
    %261 = arith.addf %260, %259 : vector<8x128xf32>
    %262 = arith.divf %260, %261 : vector<8x128xf32>
    %263 = vector.extract_strided_slice %250 {offsets = [0, 256], sizes = [8, 128], strides = [1, 1]} : vector<8x512xf32> to vector<8x128xf32>
    %264 = math.tanh %263 : vector<8x128xf32>
    %265 = vector.extract_strided_slice %250 {offsets = [0, 384], sizes = [8, 128], strides = [1, 1]} : vector<8x512xf32> to vector<8x128xf32>
    %266 = arith.negf %265 : vector<8x128xf32>
    %267 = math.exp %266 : vector<8x128xf32>
    %cst_64 = arith.constant 1.000000e+00 : f32
    %268 = vector.broadcast %cst_64 : f32 to vector<8x128xf32>
    %269 = arith.addf %268, %267 : vector<8x128xf32>
    %270 = arith.divf %268, %269 : vector<8x128xf32>
    %271 = arith.mulf %262, %175 : vector<8x128xf32>
    %272 = arith.mulf %256, %264 : vector<8x128xf32>
    %273 = arith.addf %271, %272 : vector<8x128xf32>
    %274 = math.tanh %273 : vector<8x128xf32>
    %275 = arith.mulf %270, %274 : vector<8x128xf32>
    %276 = arith.truncf %275 : vector<8x128xf32> to vector<8x128xbf16>
    %277 = arith.truncf %208 : vector<8x128xf32> to vector<8x128xbf16>
    %278 = tpu.concatenate %276, %277 in 1 : vector<8x128xbf16>, vector<8x128xbf16> -> vector<8x256xbf16>
    %cst_65 = arith.constant dense<0.000000e+00> : vector<8x512xf32>
    %279 = tpu.matmul %278, %3, %cst_65 {dimension_numbers = #tpu.dot_dimension_numbers<[1], [0], [0], [1], [0, 0, 1, 1], [], []>} : vector<8x256xbf16>, vector<256x512xbf16>, vector<8x512xf32> -> vector<8x512xf32>
    %280 = vector.broadcast %8 : vector<1x512xf32> to vector<8x512xf32>
    %281 = arith.addf %279, %280 : vector<8x512xf32>
    %282 = vector.extract_strided_slice %281 {offsets = [0, 0], sizes = [8, 128], strides = [1, 1]} : vector<8x512xf32> to vector<8x128xf32>
    %283 = arith.negf %282 : vector<8x128xf32>
    %284 = math.exp %283 : vector<8x128xf32>
    %cst_66 = arith.constant 1.000000e+00 : f32
    %285 = vector.broadcast %cst_66 : f32 to vector<8x128xf32>
    %286 = arith.addf %285, %284 : vector<8x128xf32>
    %287 = arith.divf %285, %286 : vector<8x128xf32>
    %288 = vector.extract_strided_slice %281 {offsets = [0, 128], sizes = [8, 128], strides = [1, 1]} : vector<8x512xf32> to vector<8x128xf32>
    %289 = arith.negf %288 : vector<8x128xf32>
    %290 = math.exp %289 : vector<8x128xf32>
    %cst_67 = arith.constant 1.000000e+00 : f32
    %291 = vector.broadcast %cst_67 : f32 to vector<8x128xf32>
    %292 = arith.addf %291, %290 : vector<8x128xf32>
    %293 = arith.divf %291, %292 : vector<8x128xf32>
    %294 = vector.extract_strided_slice %281 {offsets = [0, 256], sizes = [8, 128], strides = [1, 1]} : vector<8x512xf32> to vector<8x128xf32>
    %295 = math.tanh %294 : vector<8x128xf32>
    %296 = vector.extract_strided_slice %281 {offsets = [0, 384], sizes = [8, 128], strides = [1, 1]} : vector<8x512xf32> to vector<8x128xf32>
    %297 = arith.negf %296 : vector<8x128xf32>
    %298 = math.exp %297 : vector<8x128xf32>
    %cst_68 = arith.constant 1.000000e+00 : f32
    %299 = vector.broadcast %cst_68 : f32 to vector<8x128xf32>
    %300 = arith.addf %299, %298 : vector<8x128xf32>
    %301 = arith.divf %299, %300 : vector<8x128xf32>
    %302 = arith.mulf %293, %206 : vector<8x128xf32>
    %303 = arith.mulf %287, %295 : vector<8x128xf32>
    %304 = arith.addf %302, %303 : vector<8x128xf32>
    %305 = math.tanh %304 : vector<8x128xf32>
    %306 = arith.mulf %301, %305 : vector<8x128xf32>
    %307 = arith.truncf %306 : vector<8x128xf32> to vector<8x128xbf16>
    %cst_69 = arith.constant dense<0.000000e+00> : vector<8x128xf32>
    %308 = tpu.matmul %307, %4, %cst_69 {dimension_numbers = #tpu.dot_dimension_numbers<[1], [0], [0], [1], [0, 0, 1, 1], [], []>} : vector<8x128xbf16>, vector<128x128xbf16>, vector<8x128xf32> -> vector<8x128xf32>
    %309 = vector.broadcast %9 : vector<1x128xf32> to vector<8x128xf32>
    %310 = arith.addf %308, %309 : vector<8x128xf32>
    %c2 = arith.constant 2 : index
    %c0_70 = arith.constant 0 : index
    %c0_71 = arith.constant 0 : index
    %311 = vector.load %arg12[%c2, %c0_70, %c0_71] : memref<8x8x128xf32, #tpu.memory_space<vmem>>, vector<1x8x128xf32>
    %312 = vector.shape_cast %311 : vector<1x8x128xf32> to vector<8x128xf32>
    %313 = vector.shape_cast %310 : vector<8x128xf32> to vector<1x8x128xf32>
    tpu.vector_store %arg12[%c2, %c0_70, %c0_71], %313 {strides = array<i32>} : memref<8x8x128xf32, #tpu.memory_space<vmem>>, vector<1x8x128xf32>,
    %314 = arith.truncf %244 : vector<8x128xf32> to vector<8x128xbf16>
    %cst_72 = arith.constant dense<0.000000e+00> : vector<8x512xf32>
    %315 = tpu.matmul %314, %1, %cst_72 {dimension_numbers = #tpu.dot_dimension_numbers<[1], [0], [0], [1], [0, 0, 1, 1], [], []>} : vector<8x128xbf16>, vector<128x512xbf16>, vector<8x512xf32> -> vector<8x512xf32>
    %316 = vector.broadcast %6 : vector<1x512xf32> to vector<8x512xf32>
    %317 = arith.addf %315, %316 : vector<8x512xf32>
    %318 = vector.extract_strided_slice %317 {offsets = [0, 0], sizes = [8, 128], strides = [1, 1]} : vector<8x512xf32> to vector<8x128xf32>
    %319 = arith.negf %318 : vector<8x128xf32>
    %320 = math.exp %319 : vector<8x128xf32>
    %cst_73 = arith.constant 1.000000e+00 : f32
    %321 = vector.broadcast %cst_73 : f32 to vector<8x128xf32>
    %322 = arith.addf %321, %320 : vector<8x128xf32>
    %323 = arith.divf %321, %322 : vector<8x128xf32>
    %324 = vector.extract_strided_slice %317 {offsets = [0, 128], sizes = [8, 128], strides = [1, 1]} : vector<8x512xf32> to vector<8x128xf32>
    %325 = arith.negf %324 : vector<8x128xf32>
    %326 = math.exp %325 : vector<8x128xf32>
    %cst_74 = arith.constant 1.000000e+00 : f32
    %327 = vector.broadcast %cst_74 : f32 to vector<8x128xf32>
    %328 = arith.addf %327, %326 : vector<8x128xf32>
    %329 = arith.divf %327, %328 : vector<8x128xf32>
    %330 = vector.extract_strided_slice %317 {offsets = [0, 256], sizes = [8, 128], strides = [1, 1]} : vector<8x512xf32> to vector<8x128xf32>
    %331 = math.tanh %330 : vector<8x128xf32>
    %332 = vector.extract_strided_slice %317 {offsets = [0, 384], sizes = [8, 128], strides = [1, 1]} : vector<8x512xf32> to vector<8x128xf32>
    %333 = arith.negf %332 : vector<8x128xf32>
    %334 = math.exp %333 : vector<8x128xf32>
    %cst_75 = arith.constant 1.000000e+00 : f32
    %335 = vector.broadcast %cst_75 : f32 to vector<8x128xf32>
    %336 = arith.addf %335, %334 : vector<8x128xf32>
    %337 = arith.divf %335, %336 : vector<8x128xf32>
    %338 = arith.mulf %329, %242 : vector<8x128xf32>
    %339 = arith.mulf %323, %331 : vector<8x128xf32>
    %340 = arith.addf %338, %339 : vector<8x128xf32>
    %341 = math.tanh %340 : vector<8x128xf32>
    %342 = arith.mulf %337, %341 : vector<8x128xf32>
    %343 = arith.truncf %342 : vector<8x128xf32> to vector<8x128xbf16>
    %344 = arith.truncf %275 : vector<8x128xf32> to vector<8x128xbf16>
    %345 = tpu.concatenate %343, %344 in 1 : vector<8x128xbf16>, vector<8x128xbf16> -> vector<8x256xbf16>
    %cst_76 = arith.constant dense<0.000000e+00> : vector<8x512xf32>
    %346 = tpu.matmul %345, %2, %cst_76 {dimension_numbers = #tpu.dot_dimension_numbers<[1], [0], [0], [1], [0, 0, 1, 1], [], []>} : vector<8x256xbf16>, vector<256x512xbf16>, vector<8x512xf32> -> vector<8x512xf32>
    %347 = vector.broadcast %7 : vector<1x512xf32> to vector<8x512xf32>
    %348 = arith.addf %346, %347 : vector<8x512xf32>
    %349 = vector.extract_strided_slice %348 {offsets = [0, 0], sizes = [8, 128], strides = [1, 1]} : vector<8x512xf32> to vector<8x128xf32>
    %350 = arith.negf %349 : vector<8x128xf32>
    %351 = math.exp %350 : vector<8x128xf32>
    %cst_77 = arith.constant 1.000000e+00 : f32
    %352 = vector.broadcast %cst_77 : f32 to vector<8x128xf32>
    %353 = arith.addf %352, %351 : vector<8x128xf32>
    %354 = arith.divf %352, %353 : vector<8x128xf32>
    %355 = vector.extract_strided_slice %348 {offsets = [0, 128], sizes = [8, 128], strides = [1, 1]} : vector<8x512xf32> to vector<8x128xf32>
    %356 = arith.negf %355 : vector<8x128xf32>
    %357 = math.exp %356 : vector<8x128xf32>
    %cst_78 = arith.constant 1.000000e+00 : f32
    %358 = vector.broadcast %cst_78 : f32 to vector<8x128xf32>
    %359 = arith.addf %358, %357 : vector<8x128xf32>
    %360 = arith.divf %358, %359 : vector<8x128xf32>
    %361 = vector.extract_strided_slice %348 {offsets = [0, 256], sizes = [8, 128], strides = [1, 1]} : vector<8x512xf32> to vector<8x128xf32>
    %362 = math.tanh %361 : vector<8x128xf32>
    %363 = vector.extract_strided_slice %348 {offsets = [0, 384], sizes = [8, 128], strides = [1, 1]} : vector<8x512xf32> to vector<8x128xf32>
    %364 = arith.negf %363 : vector<8x128xf32>
    %365 = math.exp %364 : vector<8x128xf32>
    %cst_79 = arith.constant 1.000000e+00 : f32
    %366 = vector.broadcast %cst_79 : f32 to vector<8x128xf32>
    %367 = arith.addf %366, %365 : vector<8x128xf32>
    %368 = arith.divf %366, %367 : vector<8x128xf32>
    %369 = arith.mulf %360, %273 : vector<8x128xf32>
    %370 = arith.mulf %354, %362 : vector<8x128xf32>
    %371 = arith.addf %369, %370 : vector<8x128xf32>
    %372 = math.tanh %371 : vector<8x128xf32>
    %373 = arith.mulf %368, %372 : vector<8x128xf32>
    %374 = arith.truncf %373 : vector<8x128xf32> to vector<8x128xbf16>
    %375 = arith.truncf %306 : vector<8x128xf32> to vector<8x128xbf16>
    %376 = tpu.concatenate %374, %375 in 1 : vector<8x128xbf16>, vector<8x128xbf16> -> vector<8x256xbf16>
    %cst_80 = arith.constant dense<0.000000e+00> : vector<8x512xf32>
    %377 = tpu.matmul %376, %3, %cst_80 {dimension_numbers = #tpu.dot_dimension_numbers<[1], [0], [0], [1], [0, 0, 1, 1], [], []>} : vector<8x256xbf16>, vector<256x512xbf16>, vector<8x512xf32> -> vector<8x512xf32>
    %378 = vector.broadcast %8 : vector<1x512xf32> to vector<8x512xf32>
    %379 = arith.addf %377, %378 : vector<8x512xf32>
    %380 = vector.extract_strided_slice %379 {offsets = [0, 0], sizes = [8, 128], strides = [1, 1]} : vector<8x512xf32> to vector<8x128xf32>
    %381 = arith.negf %380 : vector<8x128xf32>
    %382 = math.exp %381 : vector<8x128xf32>
    %cst_81 = arith.constant 1.000000e+00 : f32
    %383 = vector.broadcast %cst_81 : f32 to vector<8x128xf32>
    %384 = arith.addf %383, %382 : vector<8x128xf32>
    %385 = arith.divf %383, %384 : vector<8x128xf32>
    %386 = vector.extract_strided_slice %379 {offsets = [0, 128], sizes = [8, 128], strides = [1, 1]} : vector<8x512xf32> to vector<8x128xf32>
    %387 = arith.negf %386 : vector<8x128xf32>
    %388 = math.exp %387 : vector<8x128xf32>
    %cst_82 = arith.constant 1.000000e+00 : f32
    %389 = vector.broadcast %cst_82 : f32 to vector<8x128xf32>
    %390 = arith.addf %389, %388 : vector<8x128xf32>
    %391 = arith.divf %389, %390 : vector<8x128xf32>
    %392 = vector.extract_strided_slice %379 {offsets = [0, 256], sizes = [8, 128], strides = [1, 1]} : vector<8x512xf32> to vector<8x128xf32>
    %393 = math.tanh %392 : vector<8x128xf32>
    %394 = vector.extract_strided_slice %379 {offsets = [0, 384], sizes = [8, 128], strides = [1, 1]} : vector<8x512xf32> to vector<8x128xf32>
    %395 = arith.negf %394 : vector<8x128xf32>
    %396 = math.exp %395 : vector<8x128xf32>
    %cst_83 = arith.constant 1.000000e+00 : f32
    %397 = vector.broadcast %cst_83 : f32 to vector<8x128xf32>
    %398 = arith.addf %397, %396 : vector<8x128xf32>
    %399 = arith.divf %397, %398 : vector<8x128xf32>
    %400 = arith.mulf %391, %304 : vector<8x128xf32>
    %401 = arith.mulf %385, %393 : vector<8x128xf32>
    %402 = arith.addf %400, %401 : vector<8x128xf32>
    %403 = math.tanh %402 : vector<8x128xf32>
    %404 = arith.mulf %399, %403 : vector<8x128xf32>
    %405 = arith.truncf %404 : vector<8x128xf32> to vector<8x128xbf16>
    %cst_84 = arith.constant dense<0.000000e+00> : vector<8x128xf32>
    %406 = tpu.matmul %405, %4, %cst_84 {dimension_numbers = #tpu.dot_dimension_numbers<[1], [0], [0], [1], [0, 0, 1, 1], [], []>} : vector<8x128xbf16>, vector<128x128xbf16>, vector<8x128xf32> -> vector<8x128xf32>
    %407 = vector.broadcast %9 : vector<1x128xf32> to vector<8x128xf32>
    %408 = arith.addf %406, %407 : vector<8x128xf32>
    %c3 = arith.constant 3 : index
    %c0_85 = arith.constant 0 : index
    %c0_86 = arith.constant 0 : index
    %409 = vector.load %arg12[%c3, %c0_85, %c0_86] : memref<8x8x128xf32, #tpu.memory_space<vmem>>, vector<1x8x128xf32>
    %410 = vector.shape_cast %409 : vector<1x8x128xf32> to vector<8x128xf32>
    %411 = vector.shape_cast %408 : vector<8x128xf32> to vector<1x8x128xf32>
    tpu.vector_store %arg12[%c3, %c0_85, %c0_86], %411 {strides = array<i32>} : memref<8x8x128xf32, #tpu.memory_space<vmem>>, vector<1x8x128xf32>,
    %412 = arith.truncf %342 : vector<8x128xf32> to vector<8x128xbf16>
    %cst_87 = arith.constant dense<0.000000e+00> : vector<8x512xf32>
    %413 = tpu.matmul %412, %1, %cst_87 {dimension_numbers = #tpu.dot_dimension_numbers<[1], [0], [0], [1], [0, 0, 1, 1], [], []>} : vector<8x128xbf16>, vector<128x512xbf16>, vector<8x512xf32> -> vector<8x512xf32>
    %414 = vector.broadcast %6 : vector<1x512xf32> to vector<8x512xf32>
    %415 = arith.addf %413, %414 : vector<8x512xf32>
    %416 = vector.extract_strided_slice %415 {offsets = [0, 0], sizes = [8, 128], strides = [1, 1]} : vector<8x512xf32> to vector<8x128xf32>
    %417 = arith.negf %416 : vector<8x128xf32>
    %418 = math.exp %417 : vector<8x128xf32>
    %cst_88 = arith.constant 1.000000e+00 : f32
    %419 = vector.broadcast %cst_88 : f32 to vector<8x128xf32>
    %420 = arith.addf %419, %418 : vector<8x128xf32>
    %421 = arith.divf %419, %420 : vector<8x128xf32>
    %422 = vector.extract_strided_slice %415 {offsets = [0, 128], sizes = [8, 128], strides = [1, 1]} : vector<8x512xf32> to vector<8x128xf32>
    %423 = arith.negf %422 : vector<8x128xf32>
    %424 = math.exp %423 : vector<8x128xf32>
    %cst_89 = arith.constant 1.000000e+00 : f32
    %425 = vector.broadcast %cst_89 : f32 to vector<8x128xf32>
    %426 = arith.addf %425, %424 : vector<8x128xf32>
    %427 = arith.divf %425, %426 : vector<8x128xf32>
    %428 = vector.extract_strided_slice %415 {offsets = [0, 256], sizes = [8, 128], strides = [1, 1]} : vector<8x512xf32> to vector<8x128xf32>
    %429 = math.tanh %428 : vector<8x128xf32>
    %430 = vector.extract_strided_slice %415 {offsets = [0, 384], sizes = [8, 128], strides = [1, 1]} : vector<8x512xf32> to vector<8x128xf32>
    %431 = arith.negf %430 : vector<8x128xf32>
    %432 = math.exp %431 : vector<8x128xf32>
    %cst_90 = arith.constant 1.000000e+00 : f32
    %433 = vector.broadcast %cst_90 : f32 to vector<8x128xf32>
    %434 = arith.addf %433, %432 : vector<8x128xf32>
    %435 = arith.divf %433, %434 : vector<8x128xf32>
    %436 = arith.mulf %427, %340 : vector<8x128xf32>
    %437 = arith.mulf %421, %429 : vector<8x128xf32>
    %438 = arith.addf %436, %437 : vector<8x128xf32>
    %439 = math.tanh %438 : vector<8x128xf32>
    %440 = arith.mulf %435, %439 : vector<8x128xf32>
    %441 = arith.truncf %440 : vector<8x128xf32> to vector<8x128xbf16>
    %442 = arith.truncf %373 : vector<8x128xf32> to vector<8x128xbf16>
    %443 = tpu.concatenate %441, %442 in 1 : vector<8x128xbf16>, vector<8x128xbf16> -> vector<8x256xbf16>
    %cst_91 = arith.constant dense<0.000000e+00> : vector<8x512xf32>
    %444 = tpu.matmul %443, %2, %cst_91 {dimension_numbers = #tpu.dot_dimension_numbers<[1], [0], [0], [1], [0, 0, 1, 1], [], []>} : vector<8x256xbf16>, vector<256x512xbf16>, vector<8x512xf32> -> vector<8x512xf32>
    %445 = vector.broadcast %7 : vector<1x512xf32> to vector<8x512xf32>
    %446 = arith.addf %444, %445 : vector<8x512xf32>
    %447 = vector.extract_strided_slice %446 {offsets = [0, 0], sizes = [8, 128], strides = [1, 1]} : vector<8x512xf32> to vector<8x128xf32>
    %448 = arith.negf %447 : vector<8x128xf32>
    %449 = math.exp %448 : vector<8x128xf32>
    %cst_92 = arith.constant 1.000000e+00 : f32
    %450 = vector.broadcast %cst_92 : f32 to vector<8x128xf32>
    %451 = arith.addf %450, %449 : vector<8x128xf32>
    %452 = arith.divf %450, %451 : vector<8x128xf32>
    %453 = vector.extract_strided_slice %446 {offsets = [0, 128], sizes = [8, 128], strides = [1, 1]} : vector<8x512xf32> to vector<8x128xf32>
    %454 = arith.negf %453 : vector<8x128xf32>
    %455 = math.exp %454 : vector<8x128xf32>
    %cst_93 = arith.constant 1.000000e+00 : f32
    %456 = vector.broadcast %cst_93 : f32 to vector<8x128xf32>
    %457 = arith.addf %456, %455 : vector<8x128xf32>
    %458 = arith.divf %456, %457 : vector<8x128xf32>
    %459 = vector.extract_strided_slice %446 {offsets = [0, 256], sizes = [8, 128], strides = [1, 1]} : vector<8x512xf32> to vector<8x128xf32>
    %460 = math.tanh %459 : vector<8x128xf32>
    %461 = vector.extract_strided_slice %446 {offsets = [0, 384], sizes = [8, 128], strides = [1, 1]} : vector<8x512xf32> to vector<8x128xf32>
    %462 = arith.negf %461 : vector<8x128xf32>
    %463 = math.exp %462 : vector<8x128xf32>
    %cst_94 = arith.constant 1.000000e+00 : f32
    %464 = vector.broadcast %cst_94 : f32 to vector<8x128xf32>
    %465 = arith.addf %464, %463 : vector<8x128xf32>
    %466 = arith.divf %464, %465 : vector<8x128xf32>
    %467 = arith.mulf %458, %371 : vector<8x128xf32>
    %468 = arith.mulf %452, %460 : vector<8x128xf32>
    %469 = arith.addf %467, %468 : vector<8x128xf32>
    %470 = math.tanh %469 : vector<8x128xf32>
    %471 = arith.mulf %466, %470 : vector<8x128xf32>
    %472 = arith.truncf %471 : vector<8x128xf32> to vector<8x128xbf16>
    %473 = arith.truncf %404 : vector<8x128xf32> to vector<8x128xbf16>
    %474 = tpu.concatenate %472, %473 in 1 : vector<8x128xbf16>, vector<8x128xbf16> -> vector<8x256xbf16>
    %cst_95 = arith.constant dense<0.000000e+00> : vector<8x512xf32>
    %475 = tpu.matmul %474, %3, %cst_95 {dimension_numbers = #tpu.dot_dimension_numbers<[1], [0], [0], [1], [0, 0, 1, 1], [], []>} : vector<8x256xbf16>, vector<256x512xbf16>, vector<8x512xf32> -> vector<8x512xf32>
    %476 = vector.broadcast %8 : vector<1x512xf32> to vector<8x512xf32>
    %477 = arith.addf %475, %476 : vector<8x512xf32>
    %478 = vector.extract_strided_slice %477 {offsets = [0, 0], sizes = [8, 128], strides = [1, 1]} : vector<8x512xf32> to vector<8x128xf32>
    %479 = arith.negf %478 : vector<8x128xf32>
    %480 = math.exp %479 : vector<8x128xf32>
    %cst_96 = arith.constant 1.000000e+00 : f32
    %481 = vector.broadcast %cst_96 : f32 to vector<8x128xf32>
    %482 = arith.addf %481, %480 : vector<8x128xf32>
    %483 = arith.divf %481, %482 : vector<8x128xf32>
    %484 = vector.extract_strided_slice %477 {offsets = [0, 128], sizes = [8, 128], strides = [1, 1]} : vector<8x512xf32> to vector<8x128xf32>
    %485 = arith.negf %484 : vector<8x128xf32>
    %486 = math.exp %485 : vector<8x128xf32>
    %cst_97 = arith.constant 1.000000e+00 : f32
    %487 = vector.broadcast %cst_97 : f32 to vector<8x128xf32>
    %488 = arith.addf %487, %486 : vector<8x128xf32>
    %489 = arith.divf %487, %488 : vector<8x128xf32>
    %490 = vector.extract_strided_slice %477 {offsets = [0, 256], sizes = [8, 128], strides = [1, 1]} : vector<8x512xf32> to vector<8x128xf32>
    %491 = math.tanh %490 : vector<8x128xf32>
    %492 = vector.extract_strided_slice %477 {offsets = [0, 384], sizes = [8, 128], strides = [1, 1]} : vector<8x512xf32> to vector<8x128xf32>
    %493 = arith.negf %492 : vector<8x128xf32>
    %494 = math.exp %493 : vector<8x128xf32>
    %cst_98 = arith.constant 1.000000e+00 : f32
    %495 = vector.broadcast %cst_98 : f32 to vector<8x128xf32>
    %496 = arith.addf %495, %494 : vector<8x128xf32>
    %497 = arith.divf %495, %496 : vector<8x128xf32>
    %498 = arith.mulf %489, %402 : vector<8x128xf32>
    %499 = arith.mulf %483, %491 : vector<8x128xf32>
    %500 = arith.addf %498, %499 : vector<8x128xf32>
    %501 = math.tanh %500 : vector<8x128xf32>
    %502 = arith.mulf %497, %501 : vector<8x128xf32>
    %503 = arith.truncf %502 : vector<8x128xf32> to vector<8x128xbf16>
    %cst_99 = arith.constant dense<0.000000e+00> : vector<8x128xf32>
    %504 = tpu.matmul %503, %4, %cst_99 {dimension_numbers = #tpu.dot_dimension_numbers<[1], [0], [0], [1], [0, 0, 1, 1], [], []>} : vector<8x128xbf16>, vector<128x128xbf16>, vector<8x128xf32> -> vector<8x128xf32>
    %505 = vector.broadcast %9 : vector<1x128xf32> to vector<8x128xf32>
    %506 = arith.addf %504, %505 : vector<8x128xf32>
    %c4 = arith.constant 4 : index
    %c0_100 = arith.constant 0 : index
    %c0_101 = arith.constant 0 : index
    %507 = vector.load %arg12[%c4, %c0_100, %c0_101] : memref<8x8x128xf32, #tpu.memory_space<vmem>>, vector<1x8x128xf32>
    %508 = vector.shape_cast %507 : vector<1x8x128xf32> to vector<8x128xf32>
    %509 = vector.shape_cast %506 : vector<8x128xf32> to vector<1x8x128xf32>
    tpu.vector_store %arg12[%c4, %c0_100, %c0_101], %509 {strides = array<i32>} : memref<8x8x128xf32, #tpu.memory_space<vmem>>, vector<1x8x128xf32>,
    %510 = arith.truncf %440 : vector<8x128xf32> to vector<8x128xbf16>
    %cst_102 = arith.constant dense<0.000000e+00> : vector<8x512xf32>
    %511 = tpu.matmul %510, %1, %cst_102 {dimension_numbers = #tpu.dot_dimension_numbers<[1], [0], [0], [1], [0, 0, 1, 1], [], []>} : vector<8x128xbf16>, vector<128x512xbf16>, vector<8x512xf32> -> vector<8x512xf32>
    %512 = vector.broadcast %6 : vector<1x512xf32> to vector<8x512xf32>
    %513 = arith.addf %511, %512 : vector<8x512xf32>
    %514 = vector.extract_strided_slice %513 {offsets = [0, 0], sizes = [8, 128], strides = [1, 1]} : vector<8x512xf32> to vector<8x128xf32>
    %515 = arith.negf %514 : vector<8x128xf32>
    %516 = math.exp %515 : vector<8x128xf32>
    %cst_103 = arith.constant 1.000000e+00 : f32
    %517 = vector.broadcast %cst_103 : f32 to vector<8x128xf32>
    %518 = arith.addf %517, %516 : vector<8x128xf32>
    %519 = arith.divf %517, %518 : vector<8x128xf32>
    %520 = vector.extract_strided_slice %513 {offsets = [0, 128], sizes = [8, 128], strides = [1, 1]} : vector<8x512xf32> to vector<8x128xf32>
    %521 = arith.negf %520 : vector<8x128xf32>
    %522 = math.exp %521 : vector<8x128xf32>
    %cst_104 = arith.constant 1.000000e+00 : f32
    %523 = vector.broadcast %cst_104 : f32 to vector<8x128xf32>
    %524 = arith.addf %523, %522 : vector<8x128xf32>
    %525 = arith.divf %523, %524 : vector<8x128xf32>
    %526 = vector.extract_strided_slice %513 {offsets = [0, 256], sizes = [8, 128], strides = [1, 1]} : vector<8x512xf32> to vector<8x128xf32>
    %527 = math.tanh %526 : vector<8x128xf32>
    %528 = vector.extract_strided_slice %513 {offsets = [0, 384], sizes = [8, 128], strides = [1, 1]} : vector<8x512xf32> to vector<8x128xf32>
    %529 = arith.negf %528 : vector<8x128xf32>
    %530 = math.exp %529 : vector<8x128xf32>
    %cst_105 = arith.constant 1.000000e+00 : f32
    %531 = vector.broadcast %cst_105 : f32 to vector<8x128xf32>
    %532 = arith.addf %531, %530 : vector<8x128xf32>
    %533 = arith.divf %531, %532 : vector<8x128xf32>
    %534 = arith.mulf %525, %438 : vector<8x128xf32>
    %535 = arith.mulf %519, %527 : vector<8x128xf32>
    %536 = arith.addf %534, %535 : vector<8x128xf32>
    %537 = math.tanh %536 : vector<8x128xf32>
    %538 = arith.mulf %533, %537 : vector<8x128xf32>
    %539 = arith.truncf %538 : vector<8x128xf32> to vector<8x128xbf16>
    %540 = arith.truncf %471 : vector<8x128xf32> to vector<8x128xbf16>
    %541 = tpu.concatenate %539, %540 in 1 : vector<8x128xbf16>, vector<8x128xbf16> -> vector<8x256xbf16>
    %cst_106 = arith.constant dense<0.000000e+00> : vector<8x512xf32>
    %542 = tpu.matmul %541, %2, %cst_106 {dimension_numbers = #tpu.dot_dimension_numbers<[1], [0], [0], [1], [0, 0, 1, 1], [], []>} : vector<8x256xbf16>, vector<256x512xbf16>, vector<8x512xf32> -> vector<8x512xf32>
    %543 = vector.broadcast %7 : vector<1x512xf32> to vector<8x512xf32>
    %544 = arith.addf %542, %543 : vector<8x512xf32>
    %545 = vector.extract_strided_slice %544 {offsets = [0, 0], sizes = [8, 128], strides = [1, 1]} : vector<8x512xf32> to vector<8x128xf32>
    %546 = arith.negf %545 : vector<8x128xf32>
    %547 = math.exp %546 : vector<8x128xf32>
    %cst_107 = arith.constant 1.000000e+00 : f32
    %548 = vector.broadcast %cst_107 : f32 to vector<8x128xf32>
    %549 = arith.addf %548, %547 : vector<8x128xf32>
    %550 = arith.divf %548, %549 : vector<8x128xf32>
    %551 = vector.extract_strided_slice %544 {offsets = [0, 128], sizes = [8, 128], strides = [1, 1]} : vector<8x512xf32> to vector<8x128xf32>
    %552 = arith.negf %551 : vector<8x128xf32>
    %553 = math.exp %552 : vector<8x128xf32>
    %cst_108 = arith.constant 1.000000e+00 : f32
    %554 = vector.broadcast %cst_108 : f32 to vector<8x128xf32>
    %555 = arith.addf %554, %553 : vector<8x128xf32>
    %556 = arith.divf %554, %555 : vector<8x128xf32>
    %557 = vector.extract_strided_slice %544 {offsets = [0, 256], sizes = [8, 128], strides = [1, 1]} : vector<8x512xf32> to vector<8x128xf32>
    %558 = math.tanh %557 : vector<8x128xf32>
    %559 = vector.extract_strided_slice %544 {offsets = [0, 384], sizes = [8, 128], strides = [1, 1]} : vector<8x512xf32> to vector<8x128xf32>
    %560 = arith.negf %559 : vector<8x128xf32>
    %561 = math.exp %560 : vector<8x128xf32>
    %cst_109 = arith.constant 1.000000e+00 : f32
    %562 = vector.broadcast %cst_109 : f32 to vector<8x128xf32>
    %563 = arith.addf %562, %561 : vector<8x128xf32>
    %564 = arith.divf %562, %563 : vector<8x128xf32>
    %565 = arith.mulf %556, %469 : vector<8x128xf32>
    %566 = arith.mulf %550, %558 : vector<8x128xf32>
    %567 = arith.addf %565, %566 : vector<8x128xf32>
    %568 = math.tanh %567 : vector<8x128xf32>
    %569 = arith.mulf %564, %568 : vector<8x128xf32>
    %570 = arith.truncf %569 : vector<8x128xf32> to vector<8x128xbf16>
    %571 = arith.truncf %502 : vector<8x128xf32> to vector<8x128xbf16>
    %572 = tpu.concatenate %570, %571 in 1 : vector<8x128xbf16>, vector<8x128xbf16> -> vector<8x256xbf16>
    %cst_110 = arith.constant dense<0.000000e+00> : vector<8x512xf32>
    %573 = tpu.matmul %572, %3, %cst_110 {dimension_numbers = #tpu.dot_dimension_numbers<[1], [0], [0], [1], [0, 0, 1, 1], [], []>} : vector<8x256xbf16>, vector<256x512xbf16>, vector<8x512xf32> -> vector<8x512xf32>
    %574 = vector.broadcast %8 : vector<1x512xf32> to vector<8x512xf32>
    %575 = arith.addf %573, %574 : vector<8x512xf32>
    %576 = vector.extract_strided_slice %575 {offsets = [0, 0], sizes = [8, 128], strides = [1, 1]} : vector<8x512xf32> to vector<8x128xf32>
    %577 = arith.negf %576 : vector<8x128xf32>
    %578 = math.exp %577 : vector<8x128xf32>
    %cst_111 = arith.constant 1.000000e+00 : f32
    %579 = vector.broadcast %cst_111 : f32 to vector<8x128xf32>
    %580 = arith.addf %579, %578 : vector<8x128xf32>
    %581 = arith.divf %579, %580 : vector<8x128xf32>
    %582 = vector.extract_strided_slice %575 {offsets = [0, 128], sizes = [8, 128], strides = [1, 1]} : vector<8x512xf32> to vector<8x128xf32>
    %583 = arith.negf %582 : vector<8x128xf32>
    %584 = math.exp %583 : vector<8x128xf32>
    %cst_112 = arith.constant 1.000000e+00 : f32
    %585 = vector.broadcast %cst_112 : f32 to vector<8x128xf32>
    %586 = arith.addf %585, %584 : vector<8x128xf32>
    %587 = arith.divf %585, %586 : vector<8x128xf32>
    %588 = vector.extract_strided_slice %575 {offsets = [0, 256], sizes = [8, 128], strides = [1, 1]} : vector<8x512xf32> to vector<8x128xf32>
    %589 = math.tanh %588 : vector<8x128xf32>
    %590 = vector.extract_strided_slice %575 {offsets = [0, 384], sizes = [8, 128], strides = [1, 1]} : vector<8x512xf32> to vector<8x128xf32>
    %591 = arith.negf %590 : vector<8x128xf32>
    %592 = math.exp %591 : vector<8x128xf32>
    %cst_113 = arith.constant 1.000000e+00 : f32
    %593 = vector.broadcast %cst_113 : f32 to vector<8x128xf32>
    %594 = arith.addf %593, %592 : vector<8x128xf32>
    %595 = arith.divf %593, %594 : vector<8x128xf32>
    %596 = arith.mulf %587, %500 : vector<8x128xf32>
    %597 = arith.mulf %581, %589 : vector<8x128xf32>
    %598 = arith.addf %596, %597 : vector<8x128xf32>
    %599 = math.tanh %598 : vector<8x128xf32>
    %600 = arith.mulf %595, %599 : vector<8x128xf32>
    %601 = arith.truncf %600 : vector<8x128xf32> to vector<8x128xbf16>
    %cst_114 = arith.constant dense<0.000000e+00> : vector<8x128xf32>
    %602 = tpu.matmul %601, %4, %cst_114 {dimension_numbers = #tpu.dot_dimension_numbers<[1], [0], [0], [1], [0, 0, 1, 1], [], []>} : vector<8x128xbf16>, vector<128x128xbf16>, vector<8x128xf32> -> vector<8x128xf32>
    %603 = vector.broadcast %9 : vector<1x128xf32> to vector<8x128xf32>
    %604 = arith.addf %602, %603 : vector<8x128xf32>
    %c5 = arith.constant 5 : index
    %c0_115 = arith.constant 0 : index
    %c0_116 = arith.constant 0 : index
    %605 = vector.load %arg12[%c5, %c0_115, %c0_116] : memref<8x8x128xf32, #tpu.memory_space<vmem>>, vector<1x8x128xf32>
    %606 = vector.shape_cast %605 : vector<1x8x128xf32> to vector<8x128xf32>
    %607 = vector.shape_cast %604 : vector<8x128xf32> to vector<1x8x128xf32>
    tpu.vector_store %arg12[%c5, %c0_115, %c0_116], %607 {strides = array<i32>} : memref<8x8x128xf32, #tpu.memory_space<vmem>>, vector<1x8x128xf32>,
    %608 = arith.truncf %538 : vector<8x128xf32> to vector<8x128xbf16>
    %cst_117 = arith.constant dense<0.000000e+00> : vector<8x512xf32>
    %609 = tpu.matmul %608, %1, %cst_117 {dimension_numbers = #tpu.dot_dimension_numbers<[1], [0], [0], [1], [0, 0, 1, 1], [], []>} : vector<8x128xbf16>, vector<128x512xbf16>, vector<8x512xf32> -> vector<8x512xf32>
    %610 = vector.broadcast %6 : vector<1x512xf32> to vector<8x512xf32>
    %611 = arith.addf %609, %610 : vector<8x512xf32>
    %612 = vector.extract_strided_slice %611 {offsets = [0, 0], sizes = [8, 128], strides = [1, 1]} : vector<8x512xf32> to vector<8x128xf32>
    %613 = arith.negf %612 : vector<8x128xf32>
    %614 = math.exp %613 : vector<8x128xf32>
    %cst_118 = arith.constant 1.000000e+00 : f32
    %615 = vector.broadcast %cst_118 : f32 to vector<8x128xf32>
    %616 = arith.addf %615, %614 : vector<8x128xf32>
    %617 = arith.divf %615, %616 : vector<8x128xf32>
    %618 = vector.extract_strided_slice %611 {offsets = [0, 128], sizes = [8, 128], strides = [1, 1]} : vector<8x512xf32> to vector<8x128xf32>
    %619 = arith.negf %618 : vector<8x128xf32>
    %620 = math.exp %619 : vector<8x128xf32>
    %cst_119 = arith.constant 1.000000e+00 : f32
    %621 = vector.broadcast %cst_119 : f32 to vector<8x128xf32>
    %622 = arith.addf %621, %620 : vector<8x128xf32>
    %623 = arith.divf %621, %622 : vector<8x128xf32>
    %624 = vector.extract_strided_slice %611 {offsets = [0, 256], sizes = [8, 128], strides = [1, 1]} : vector<8x512xf32> to vector<8x128xf32>
    %625 = math.tanh %624 : vector<8x128xf32>
    %626 = vector.extract_strided_slice %611 {offsets = [0, 384], sizes = [8, 128], strides = [1, 1]} : vector<8x512xf32> to vector<8x128xf32>
    %627 = arith.negf %626 : vector<8x128xf32>
    %628 = math.exp %627 : vector<8x128xf32>
    %cst_120 = arith.constant 1.000000e+00 : f32
    %629 = vector.broadcast %cst_120 : f32 to vector<8x128xf32>
    %630 = arith.addf %629, %628 : vector<8x128xf32>
    %631 = arith.divf %629, %630 : vector<8x128xf32>
    %632 = arith.mulf %623, %536 : vector<8x128xf32>
    %633 = arith.mulf %617, %625 : vector<8x128xf32>
    %634 = arith.addf %632, %633 : vector<8x128xf32>
    %635 = math.tanh %634 : vector<8x128xf32>
    %636 = arith.mulf %631, %635 : vector<8x128xf32>
    %637 = arith.truncf %636 : vector<8x128xf32> to vector<8x128xbf16>
    %638 = arith.truncf %569 : vector<8x128xf32> to vector<8x128xbf16>
    %639 = tpu.concatenate %637, %638 in 1 : vector<8x128xbf16>, vector<8x128xbf16> -> vector<8x256xbf16>
    %cst_121 = arith.constant dense<0.000000e+00> : vector<8x512xf32>
    %640 = tpu.matmul %639, %2, %cst_121 {dimension_numbers = #tpu.dot_dimension_numbers<[1], [0], [0], [1], [0, 0, 1, 1], [], []>} : vector<8x256xbf16>, vector<256x512xbf16>, vector<8x512xf32> -> vector<8x512xf32>
    %641 = vector.broadcast %7 : vector<1x512xf32> to vector<8x512xf32>
    %642 = arith.addf %640, %641 : vector<8x512xf32>
    %643 = vector.extract_strided_slice %642 {offsets = [0, 0], sizes = [8, 128], strides = [1, 1]} : vector<8x512xf32> to vector<8x128xf32>
    %644 = arith.negf %643 : vector<8x128xf32>
    %645 = math.exp %644 : vector<8x128xf32>
    %cst_122 = arith.constant 1.000000e+00 : f32
    %646 = vector.broadcast %cst_122 : f32 to vector<8x128xf32>
    %647 = arith.addf %646, %645 : vector<8x128xf32>
    %648 = arith.divf %646, %647 : vector<8x128xf32>
    %649 = vector.extract_strided_slice %642 {offsets = [0, 128], sizes = [8, 128], strides = [1, 1]} : vector<8x512xf32> to vector<8x128xf32>
    %650 = arith.negf %649 : vector<8x128xf32>
    %651 = math.exp %650 : vector<8x128xf32>
    %cst_123 = arith.constant 1.000000e+00 : f32
    %652 = vector.broadcast %cst_123 : f32 to vector<8x128xf32>
    %653 = arith.addf %652, %651 : vector<8x128xf32>
    %654 = arith.divf %652, %653 : vector<8x128xf32>
    %655 = vector.extract_strided_slice %642 {offsets = [0, 256], sizes = [8, 128], strides = [1, 1]} : vector<8x512xf32> to vector<8x128xf32>
    %656 = math.tanh %655 : vector<8x128xf32>
    %657 = vector.extract_strided_slice %642 {offsets = [0, 384], sizes = [8, 128], strides = [1, 1]} : vector<8x512xf32> to vector<8x128xf32>
    %658 = arith.negf %657 : vector<8x128xf32>
    %659 = math.exp %658 : vector<8x128xf32>
    %cst_124 = arith.constant 1.000000e+00 : f32
    %660 = vector.broadcast %cst_124 : f32 to vector<8x128xf32>
    %661 = arith.addf %660, %659 : vector<8x128xf32>
    %662 = arith.divf %660, %661 : vector<8x128xf32>
    %663 = arith.mulf %654, %567 : vector<8x128xf32>
    %664 = arith.mulf %648, %656 : vector<8x128xf32>
    %665 = arith.addf %663, %664 : vector<8x128xf32>
    %666 = math.tanh %665 : vector<8x128xf32>
    %667 = arith.mulf %662, %666 : vector<8x128xf32>
    %668 = arith.truncf %667 : vector<8x128xf32> to vector<8x128xbf16>
    %669 = arith.truncf %600 : vector<8x128xf32> to vector<8x128xbf16>
    %670 = tpu.concatenate %668, %669 in 1 : vector<8x128xbf16>, vector<8x128xbf16> -> vector<8x256xbf16>
    %cst_125 = arith.constant dense<0.000000e+00> : vector<8x512xf32>
    %671 = tpu.matmul %670, %3, %cst_125 {dimension_numbers = #tpu.dot_dimension_numbers<[1], [0], [0], [1], [0, 0, 1, 1], [], []>} : vector<8x256xbf16>, vector<256x512xbf16>, vector<8x512xf32> -> vector<8x512xf32>
    %672 = vector.broadcast %8 : vector<1x512xf32> to vector<8x512xf32>
    %673 = arith.addf %671, %672 : vector<8x512xf32>
    %674 = vector.extract_strided_slice %673 {offsets = [0, 0], sizes = [8, 128], strides = [1, 1]} : vector<8x512xf32> to vector<8x128xf32>
    %675 = arith.negf %674 : vector<8x128xf32>
    %676 = math.exp %675 : vector<8x128xf32>
    %cst_126 = arith.constant 1.000000e+00 : f32
    %677 = vector.broadcast %cst_126 : f32 to vector<8x128xf32>
    %678 = arith.addf %677, %676 : vector<8x128xf32>
    %679 = arith.divf %677, %678 : vector<8x128xf32>
    %680 = vector.extract_strided_slice %673 {offsets = [0, 128], sizes = [8, 128], strides = [1, 1]} : vector<8x512xf32> to vector<8x128xf32>
    %681 = arith.negf %680 : vector<8x128xf32>
    %682 = math.exp %681 : vector<8x128xf32>
    %cst_127 = arith.constant 1.000000e+00 : f32
    %683 = vector.broadcast %cst_127 : f32 to vector<8x128xf32>
    %684 = arith.addf %683, %682 : vector<8x128xf32>
    %685 = arith.divf %683, %684 : vector<8x128xf32>
    %686 = vector.extract_strided_slice %673 {offsets = [0, 256], sizes = [8, 128], strides = [1, 1]} : vector<8x512xf32> to vector<8x128xf32>
    %687 = math.tanh %686 : vector<8x128xf32>
    %688 = vector.extract_strided_slice %673 {offsets = [0, 384], sizes = [8, 128], strides = [1, 1]} : vector<8x512xf32> to vector<8x128xf32>
    %689 = arith.negf %688 : vector<8x128xf32>
    %690 = math.exp %689 : vector<8x128xf32>
    %cst_128 = arith.constant 1.000000e+00 : f32
    %691 = vector.broadcast %cst_128 : f32 to vector<8x128xf32>
    %692 = arith.addf %691, %690 : vector<8x128xf32>
    %693 = arith.divf %691, %692 : vector<8x128xf32>
    %694 = arith.mulf %685, %598 : vector<8x128xf32>
    %695 = arith.mulf %679, %687 : vector<8x128xf32>
    %696 = arith.addf %694, %695 : vector<8x128xf32>
    %697 = math.tanh %696 : vector<8x128xf32>
    %698 = arith.mulf %693, %697 : vector<8x128xf32>
    %699 = arith.truncf %698 : vector<8x128xf32> to vector<8x128xbf16>
    %cst_129 = arith.constant dense<0.000000e+00> : vector<8x128xf32>
    %700 = tpu.matmul %699, %4, %cst_129 {dimension_numbers = #tpu.dot_dimension_numbers<[1], [0], [0], [1], [0, 0, 1, 1], [], []>} : vector<8x128xbf16>, vector<128x128xbf16>, vector<8x128xf32> -> vector<8x128xf32>
    %701 = vector.broadcast %9 : vector<1x128xf32> to vector<8x128xf32>
    %702 = arith.addf %700, %701 : vector<8x128xf32>
    %c6 = arith.constant 6 : index
    %c0_130 = arith.constant 0 : index
    %c0_131 = arith.constant 0 : index
    %703 = vector.load %arg12[%c6, %c0_130, %c0_131] : memref<8x8x128xf32, #tpu.memory_space<vmem>>, vector<1x8x128xf32>
    %704 = vector.shape_cast %703 : vector<1x8x128xf32> to vector<8x128xf32>
    %705 = vector.shape_cast %702 : vector<8x128xf32> to vector<1x8x128xf32>
    tpu.vector_store %arg12[%c6, %c0_130, %c0_131], %705 {strides = array<i32>} : memref<8x8x128xf32, #tpu.memory_space<vmem>>, vector<1x8x128xf32>,
    %706 = arith.truncf %636 : vector<8x128xf32> to vector<8x128xbf16>
    %cst_132 = arith.constant dense<0.000000e+00> : vector<8x512xf32>
    %707 = tpu.matmul %706, %1, %cst_132 {dimension_numbers = #tpu.dot_dimension_numbers<[1], [0], [0], [1], [0, 0, 1, 1], [], []>} : vector<8x128xbf16>, vector<128x512xbf16>, vector<8x512xf32> -> vector<8x512xf32>
    %708 = vector.broadcast %6 : vector<1x512xf32> to vector<8x512xf32>
    %709 = arith.addf %707, %708 : vector<8x512xf32>
    %710 = vector.extract_strided_slice %709 {offsets = [0, 0], sizes = [8, 128], strides = [1, 1]} : vector<8x512xf32> to vector<8x128xf32>
    %711 = arith.negf %710 : vector<8x128xf32>
    %712 = math.exp %711 : vector<8x128xf32>
    %cst_133 = arith.constant 1.000000e+00 : f32
    %713 = vector.broadcast %cst_133 : f32 to vector<8x128xf32>
    %714 = arith.addf %713, %712 : vector<8x128xf32>
    %715 = arith.divf %713, %714 : vector<8x128xf32>
    %716 = vector.extract_strided_slice %709 {offsets = [0, 128], sizes = [8, 128], strides = [1, 1]} : vector<8x512xf32> to vector<8x128xf32>
    %717 = arith.negf %716 : vector<8x128xf32>
    %718 = math.exp %717 : vector<8x128xf32>
    %cst_134 = arith.constant 1.000000e+00 : f32
    %719 = vector.broadcast %cst_134 : f32 to vector<8x128xf32>
    %720 = arith.addf %719, %718 : vector<8x128xf32>
    %721 = arith.divf %719, %720 : vector<8x128xf32>
    %722 = vector.extract_strided_slice %709 {offsets = [0, 256], sizes = [8, 128], strides = [1, 1]} : vector<8x512xf32> to vector<8x128xf32>
    %723 = math.tanh %722 : vector<8x128xf32>
    %724 = vector.extract_strided_slice %709 {offsets = [0, 384], sizes = [8, 128], strides = [1, 1]} : vector<8x512xf32> to vector<8x128xf32>
    %725 = arith.negf %724 : vector<8x128xf32>
    %726 = math.exp %725 : vector<8x128xf32>
    %cst_135 = arith.constant 1.000000e+00 : f32
    %727 = vector.broadcast %cst_135 : f32 to vector<8x128xf32>
    %728 = arith.addf %727, %726 : vector<8x128xf32>
    %729 = arith.divf %727, %728 : vector<8x128xf32>
    %730 = arith.mulf %721, %634 : vector<8x128xf32>
    %731 = arith.mulf %715, %723 : vector<8x128xf32>
    %732 = arith.addf %730, %731 : vector<8x128xf32>
    %733 = math.tanh %732 : vector<8x128xf32>
    %734 = arith.mulf %729, %733 : vector<8x128xf32>
    %735 = arith.truncf %734 : vector<8x128xf32> to vector<8x128xbf16>
    %736 = arith.truncf %667 : vector<8x128xf32> to vector<8x128xbf16>
    %737 = tpu.concatenate %735, %736 in 1 : vector<8x128xbf16>, vector<8x128xbf16> -> vector<8x256xbf16>
    %cst_136 = arith.constant dense<0.000000e+00> : vector<8x512xf32>
    %738 = tpu.matmul %737, %2, %cst_136 {dimension_numbers = #tpu.dot_dimension_numbers<[1], [0], [0], [1], [0, 0, 1, 1], [], []>} : vector<8x256xbf16>, vector<256x512xbf16>, vector<8x512xf32> -> vector<8x512xf32>
    %739 = vector.broadcast %7 : vector<1x512xf32> to vector<8x512xf32>
    %740 = arith.addf %738, %739 : vector<8x512xf32>
    %741 = vector.extract_strided_slice %740 {offsets = [0, 0], sizes = [8, 128], strides = [1, 1]} : vector<8x512xf32> to vector<8x128xf32>
    %742 = arith.negf %741 : vector<8x128xf32>
    %743 = math.exp %742 : vector<8x128xf32>
    %cst_137 = arith.constant 1.000000e+00 : f32
    %744 = vector.broadcast %cst_137 : f32 to vector<8x128xf32>
    %745 = arith.addf %744, %743 : vector<8x128xf32>
    %746 = arith.divf %744, %745 : vector<8x128xf32>
    %747 = vector.extract_strided_slice %740 {offsets = [0, 128], sizes = [8, 128], strides = [1, 1]} : vector<8x512xf32> to vector<8x128xf32>
    %748 = arith.negf %747 : vector<8x128xf32>
    %749 = math.exp %748 : vector<8x128xf32>
    %cst_138 = arith.constant 1.000000e+00 : f32
    %750 = vector.broadcast %cst_138 : f32 to vector<8x128xf32>
    %751 = arith.addf %750, %749 : vector<8x128xf32>
    %752 = arith.divf %750, %751 : vector<8x128xf32>
    %753 = vector.extract_strided_slice %740 {offsets = [0, 256], sizes = [8, 128], strides = [1, 1]} : vector<8x512xf32> to vector<8x128xf32>
    %754 = math.tanh %753 : vector<8x128xf32>
    %755 = vector.extract_strided_slice %740 {offsets = [0, 384], sizes = [8, 128], strides = [1, 1]} : vector<8x512xf32> to vector<8x128xf32>
    %756 = arith.negf %755 : vector<8x128xf32>
    %757 = math.exp %756 : vector<8x128xf32>
    %cst_139 = arith.constant 1.000000e+00 : f32
    %758 = vector.broadcast %cst_139 : f32 to vector<8x128xf32>
    %759 = arith.addf %758, %757 : vector<8x128xf32>
    %760 = arith.divf %758, %759 : vector<8x128xf32>
    %761 = arith.mulf %752, %665 : vector<8x128xf32>
    %762 = arith.mulf %746, %754 : vector<8x128xf32>
    %763 = arith.addf %761, %762 : vector<8x128xf32>
    %764 = math.tanh %763 : vector<8x128xf32>
    %765 = arith.mulf %760, %764 : vector<8x128xf32>
    %766 = arith.truncf %765 : vector<8x128xf32> to vector<8x128xbf16>
    %767 = arith.truncf %698 : vector<8x128xf32> to vector<8x128xbf16>
    %768 = tpu.concatenate %766, %767 in 1 : vector<8x128xbf16>, vector<8x128xbf16> -> vector<8x256xbf16>
    %cst_140 = arith.constant dense<0.000000e+00> : vector<8x512xf32>
    %769 = tpu.matmul %768, %3, %cst_140 {dimension_numbers = #tpu.dot_dimension_numbers<[1], [0], [0], [1], [0, 0, 1, 1], [], []>} : vector<8x256xbf16>, vector<256x512xbf16>, vector<8x512xf32> -> vector<8x512xf32>
    %770 = vector.broadcast %8 : vector<1x512xf32> to vector<8x512xf32>
    %771 = arith.addf %769, %770 : vector<8x512xf32>
    %772 = vector.extract_strided_slice %771 {offsets = [0, 0], sizes = [8, 128], strides = [1, 1]} : vector<8x512xf32> to vector<8x128xf32>
    %773 = arith.negf %772 : vector<8x128xf32>
    %774 = math.exp %773 : vector<8x128xf32>
    %cst_141 = arith.constant 1.000000e+00 : f32
    %775 = vector.broadcast %cst_141 : f32 to vector<8x128xf32>
    %776 = arith.addf %775, %774 : vector<8x128xf32>
    %777 = arith.divf %775, %776 : vector<8x128xf32>
    %778 = vector.extract_strided_slice %771 {offsets = [0, 128], sizes = [8, 128], strides = [1, 1]} : vector<8x512xf32> to vector<8x128xf32>
    %779 = arith.negf %778 : vector<8x128xf32>
    %780 = math.exp %779 : vector<8x128xf32>
    %cst_142 = arith.constant 1.000000e+00 : f32
    %781 = vector.broadcast %cst_142 : f32 to vector<8x128xf32>
    %782 = arith.addf %781, %780 : vector<8x128xf32>
    %783 = arith.divf %781, %782 : vector<8x128xf32>
    %784 = vector.extract_strided_slice %771 {offsets = [0, 256], sizes = [8, 128], strides = [1, 1]} : vector<8x512xf32> to vector<8x128xf32>
    %785 = math.tanh %784 : vector<8x128xf32>
    %786 = vector.extract_strided_slice %771 {offsets = [0, 384], sizes = [8, 128], strides = [1, 1]} : vector<8x512xf32> to vector<8x128xf32>
    %787 = arith.negf %786 : vector<8x128xf32>
    %788 = math.exp %787 : vector<8x128xf32>
    %cst_143 = arith.constant 1.000000e+00 : f32
    %789 = vector.broadcast %cst_143 : f32 to vector<8x128xf32>
    %790 = arith.addf %789, %788 : vector<8x128xf32>
    %791 = arith.divf %789, %790 : vector<8x128xf32>
    %792 = arith.mulf %783, %696 : vector<8x128xf32>
    %793 = arith.mulf %777, %785 : vector<8x128xf32>
    %794 = arith.addf %792, %793 : vector<8x128xf32>
    %795 = math.tanh %794 : vector<8x128xf32>
    %796 = arith.mulf %791, %795 : vector<8x128xf32>
    %797 = arith.truncf %796 : vector<8x128xf32> to vector<8x128xbf16>
    %cst_144 = arith.constant dense<0.000000e+00> : vector<8x128xf32>
    %798 = tpu.matmul %797, %4, %cst_144 {dimension_numbers = #tpu.dot_dimension_numbers<[1], [0], [0], [1], [0, 0, 1, 1], [], []>} : vector<8x128xbf16>, vector<128x128xbf16>, vector<8x128xf32> -> vector<8x128xf32>
    %799 = vector.broadcast %9 : vector<1x128xf32> to vector<8x128xf32>
    %800 = arith.addf %798, %799 : vector<8x128xf32>
    %c7 = arith.constant 7 : index
    %c0_145 = arith.constant 0 : index
    %c0_146 = arith.constant 0 : index
    %801 = vector.load %arg12[%c7, %c0_145, %c0_146] : memref<8x8x128xf32, #tpu.memory_space<vmem>>, vector<1x8x128xf32>
    %802 = vector.shape_cast %801 : vector<1x8x128xf32> to vector<8x128xf32>
    %803 = vector.shape_cast %800 : vector<8x128xf32> to vector<1x8x128xf32>
    tpu.vector_store %arg12[%c7, %c0_145, %c0_146], %803 {strides = array<i32>} : memref<8x8x128xf32, #tpu.memory_space<vmem>>, vector<1x8x128xf32>,
    return
  }
  func.func @transform_0(%arg0: i32) -> (i32, i32) {
    %c0_i32 = arith.constant 0 : i32
    %c0_i32_0 = arith.constant 0 : i32
    return %arg0, %c0_i32 : i32, i32
  }
  func.func @transform_1(%arg0: i32) -> (i32, i32) {
    %c0_i32 = arith.constant 0 : i32
    %c0_i32_0 = arith.constant 0 : i32
    %c0_i32_1 = arith.constant 0 : i32
    return %c0_i32, %c0_i32_0 : i32, i32
  }
  func.func @transform_2(%arg0: i32) -> (i32, i32) {
    %c0_i32 = arith.constant 0 : i32
    %c0_i32_0 = arith.constant 0 : i32
    %c0_i32_1 = arith.constant 0 : i32
    return %c0_i32, %c0_i32_0 : i32, i32
  }
  func.func @transform_3(%arg0: i32) -> (i32, i32) {
    %c0_i32 = arith.constant 0 : i32
    %c0_i32_0 = arith.constant 0 : i32
    %c0_i32_1 = arith.constant 0 : i32
    return %c0_i32, %c0_i32_0 : i32, i32
  }
  func.func @transform_4(%arg0: i32) -> (i32, i32) {
    %c0_i32 = arith.constant 0 : i32
    %c0_i32_0 = arith.constant 0 : i32
    %c0_i32_1 = arith.constant 0 : i32
    return %c0_i32, %c0_i32_0 : i32, i32
  }
  func.func @transform_5(%arg0: i32) -> (i32, i32) {
    %c0_i32 = arith.constant 0 : i32
    %c0_i32_0 = arith.constant 0 : i32
    %c0_i32_1 = arith.constant 0 : i32
    return %c0_i32, %c0_i32_0 : i32, i32
  }
  func.func @transform_6(%arg0: i32) -> (i32, i32) {
    %c0_i32 = arith.constant 0 : i32
    %c0_i32_0 = arith.constant 0 : i32
    %c0_i32_1 = arith.constant 0 : i32
    return %c0_i32, %c0_i32_0 : i32, i32
  }
  func.func @transform_7(%arg0: i32) -> (i32, i32) {
    %c0_i32 = arith.constant 0 : i32
    %c0_i32_0 = arith.constant 0 : i32
    %c0_i32_1 = arith.constant 0 : i32
    return %c0_i32, %c0_i32_0 : i32, i32
  }
  func.func @transform_8(%arg0: i32) -> (i32, i32) {
    %c0_i32 = arith.constant 0 : i32
    %c0_i32_0 = arith.constant 0 : i32
    %c0_i32_1 = arith.constant 0 : i32
    return %c0_i32, %c0_i32_0 : i32, i32
  }
  func.func @transform_9(%arg0: i32) -> (i32, i32) {
    %c0_i32 = arith.constant 0 : i32
    %c0_i32_0 = arith.constant 0 : i32
    %c0_i32_1 = arith.constant 0 : i32
    return %c0_i32, %c0_i32_0 : i32, i32
  }
  func.func @transform_10(%arg0: i32) -> (i32, i32) {
    %c0_i32 = arith.constant 0 : i32
    %c0_i32_0 = arith.constant 0 : i32
    %c0_i32_1 = arith.constant 0 : i32
    return %c0_i32, %c0_i32_0 : i32, i32
  }
  func.func @transform_11(%arg0: i32) -> (i32, i32, i32) {
    %c0_i32 = arith.constant 0 : i32
    %c0_i32_0 = arith.constant 0 : i32
    %c0_i32_1 = arith.constant 0 : i32
    return %c0_i32, %arg0, %c0_i32_0 : i32, i32, i32
  }
}

</mosaic_0001>

<bundles_post_ra>
// kernel: _lambda_.1
= control target key start
LH: loop header
LB: loop body
LE: loop exit
PB: predicated region body
PF: predicated region fallthrough
CT: control target
= control target key end

     0   :  { %v11190_v0 = vmov 0.0   ;;  %vm5885_vm0 = vmmov 0   ;;  %v11192_v43 = vmov 0   ;;  %s11178_s1 = inlined_call_operand.vmem [shape: bf16[128,128], index: 1, kind: input, shape index: {}]   ;;  %s11179_s3 = inlined_call_operand.vmem [shape: bf16[128,512], index: 3, kind: input, shape index: {}]   ;;  %s11180_s0 = inlined_call_operand.vmem [shape: f32[8,128], index: 0, kind: input, shape index: {}]   ;;  %s11181_s5 = inlined_call_operand.vmem [shape: bf16[256,512], index: 5, kind: input, shape index: {}]   ;;  %s11182_s2 = inlined_call_operand.vmem [shape: f32[1,128], index: 2, kind: input, shape index: {}]   ;;  %s11183_s7 = inlined_call_operand.vmem [shape: bf16[256,512], index: 7, kind: input, shape index: {}]   ;;  %s11184_s4 = inlined_call_operand.vmem [shape: f32[1,512], index: 4, kind: input, shape index: {}]   ;;  %s11185_s6 = inlined_call_operand.vmem [shape: f32[1,512], index: 6, kind: input, shape index: {}]   ;;  %s11186_s9 = inlined_call_operand.vmem [shape: bf16[128,128], index: 9, kind: input, shape index: {}]   ;;  %s11187_s8 = inlined_call_operand.vmem [shape: f32[1,512], index: 8, kind: input, shape index: {}]   ;;  %s11188_s10 = inlined_call_operand.vmem [shape: f32[1,128], index: 10, kind: input, shape index: {}]   ;;  %s11189_s11 = inlined_call_operand.vmem [shape: f32[8,8,128], index: 11, kind: output, shape index: {}]  }
   0x1   :  { %4495 = vmatprep.subr.bf16.mxu0 %v11190_v0  ;;  %v4678_v1 = vld [vmem:[%s11178_s1] sm:$0xff]   ;;  %4511 = vmatprep.mubr.msk.bf16.mxu0 %vm5885_vm0, %v11190_v0  ;;  %v4679_v2 = vld [vmem:[%s11178_s1 + $0x8] sm:$0xff]   ;;  %v4680_v3 = vld [vmem:[%s11178_s1 + $0x10] sm:$0xff]  }
   0x2   :  { %4496 = vmatpush3.bf16.msra.mxu0 %v4678_v1  ;;  %v4686_v4 = vld [vmem:[%s11179_s3 + $0x4] ss:$16 sps:$4 sm:$0xff]   ;;  %v4681_v5 = vld [vmem:[%s11178_s1 + $0x18] sm:$0xff]   ;;  %v4690_v6 = vld [vmem:[%s11179_s3] ss:$16 sps:$4 sm:$0xff]   ;;  %546 = vmatprep.mubr.bf16.mxu1 %v11192_v43 }
   0x3   :  { %4497 = vmatprep.subr.bf16.mxu0 %v11190_v0  ;;  %514 = vmatprep.subr.bf16.mxu1 %v4686_v4  ;;  %v4692_v7 = vld [vmem:[%s11179_s3 + $0x24] ss:$16 sps:$4 sm:$0xff]   ;;  %v4696_v9 = vld [vmem:[%s11179_s3 + $0x20] ss:$16 sps:$4 sm:$0xff]   ;;  %v4683_v13 = vld [vmem:[%s11178_s1 + $0x28] sm:$0xff]  }
   0x4   :  { %515 = vmatpush1.bf16.msra.mxu1 %v4690_v6  ;;  %v4682_v8 = vld [vmem:[%s11178_s1 + $0x20] sm:$0xff]   ;;  %v4684_v16 = vld [vmem:[%s11178_s1 + $0x30] sm:$0xff]   ;;  %v4685_v19 = vld [vmem:[%s11178_s1 + $0x38] sm:$0xff]  }
   0x5   :  { %516 = vmatprep.subr.bf16.mxu1 %v4692_v7  ;;  %v4698_v10 = vld [vmem:[%s11179_s3 + $0x44] ss:$16 sps:$4 sm:$0xff]   ;;  %v4702_v11 = vld [vmem:[%s11179_s3 + $0x40] ss:$16 sps:$4 sm:$0xff]   ;;  %v4688_v21 = vld [vmem:[%s11179_s3 + $0xc] ss:$16 sps:$4 sm:$0xff]  }
   0x6   :  { %4498 = vmatpush3.bf16.msra.mxu0 %v4679_v2  ;;  %v4704_v12 = vld [vmem:[%s11179_s3 + $0x64] ss:$16 sps:$4 sm:$0xff]   ;;  %v4708_v14 = vld [vmem:[%s11179_s3 + $0x60] ss:$16 sps:$4 sm:$0xff]   ;;  %v4691_v25 = vld [vmem:[%s11179_s3 + $0x8] ss:$16 sps:$4 sm:$0xff]  }
   0x7   :  { %4499 = vmatprep.subr.bf16.mxu0 %v11190_v0  ;;  %v4710_v15 = vld [vmem:[%s11179_s3 + $0x84] ss:$16 sps:$4 sm:$0xff]   ;;  %v4714_v17 = vld [vmem:[%s11179_s3 + $0x80] ss:$16 sps:$4 sm:$0xff]   ;;  %v4694_v26 = vld [vmem:[%s11179_s3 + $0x2c] ss:$16 sps:$4 sm:$0xff]  }
   0x8   :  { %517 = vmatpush1.bf16.msra.mxu1 %v4696_v9  ;;  %v4716_v18 = vld [vmem:[%s11179_s3 + $0xa4] ss:$16 sps:$4 sm:$0xff]   ;;  %v4720_v22 = vld [vmem:[%s11179_s3 + $0xa0] ss:$16 sps:$4 sm:$0xff]   ;;  %v4697_v28 = vld [vmem:[%s11179_s3 + $0x28] ss:$16 sps:$4 sm:$0xff]  }
   0x9   :  { %518 = vmatprep.subr.bf16.mxu1 %v4698_v10  ;;  %v236_v20 = vld [vmem:[%s11180_s0] sm:$0xff]  ;;  %v4700_v29 = vld [vmem:[%s11179_s3 + $0x4c] ss:$16 sps:$4 sm:$0xff]   ;;  %v4703_v30 = vld [vmem:[%s11179_s3 + $0x48] ss:$16 sps:$4 sm:$0xff]  }
   0xa   :  { %4500 = vmatpush3.bf16.msra.mxu0 %v4680_v3  ;;  %v237_v23 = vpack.c.bf16 %v236_v20, %v236_v20  ;;  %v4722_v24 = vld [vmem:[%s11179_s3 + $0xc4] ss:$16 sps:$4 sm:$0xff]   ;;  %v4726_v27 = vld [vmem:[%s11179_s3 + $0xc0] ss:$16 sps:$4 sm:$0xff]   ;;  %v4706_v31 = vld [vmem:[%s11179_s3 + $0x6c] ss:$16 sps:$4 sm:$0xff]  }
   0xb   :  { %4501 = vmatprep.subr.bf16.mxu0 %v11190_v0  ;;  %v4709_v32 = vld [vmem:[%s11179_s3 + $0x68] ss:$16 sps:$4 sm:$0xff]   ;;  %v4712_v33 = vld [vmem:[%s11179_s3 + $0x8c] ss:$16 sps:$4 sm:$0xff]   ;;  %v4728_v39 = vld [vmem:[%s11179_s3 + $0xe4] ss:$16 sps:$4 sm:$0xff]  }
   0xc   :  { %519 = vmatpush1.bf16.msra.mxu1 %v4702_v11  ;;  %v4715_v34 = vld [vmem:[%s11179_s3 + $0x88] ss:$16 sps:$4 sm:$0xff]   ;;  %v4718_v35 = vld [vmem:[%s11179_s3 + $0xac] ss:$16 sps:$4 sm:$0xff]   ;;  %v4732_v41 = vld [vmem:[%s11179_s3 + $0xe0] ss:$16 sps:$4 sm:$0xff]  }
   0xd   :  { %520 = vmatprep.subr.bf16.mxu1 %v4704_v12  ;;  %v4721_v36 = vld [vmem:[%s11179_s3 + $0xa8] ss:$16 sps:$4 sm:$0xff]   ;;  %v4724_v37 = vld [vmem:[%s11179_s3 + $0xcc] ss:$16 sps:$4 sm:$0xff]   ;;  %v4734_v44 = vld [vmem:[%s11181_s5 + $0x4] ss:$16 sps:$4 sm:$0xff]  }
   0xe   :  { %4502 = vmatpush3.bf16.msra.mxu0 %v4681_v5  ;;  %v4727_v38 = vld [vmem:[%s11179_s3 + $0xc8] ss:$16 sps:$4 sm:$0xff]   ;;  %v4730_v40 = vld [vmem:[%s11179_s3 + $0xec] ss:$16 sps:$4 sm:$0xff]   ;;  %v4157_v46 = vld [vmem:[%s11182_s2] ss:$0 sm:$0xff] }
   0xf   :  { %4503 = vmatprep.subr.bf16.mxu0 %v11190_v0  ;;  %v4733_v42 = vld [vmem:[%s11179_s3 + $0xe8] ss:$16 sps:$4 sm:$0xff]   ;;  %v4736_v45 = vld [vmem:[%s11181_s5 + $0xc] ss:$16 sps:$4 sm:$0xff]   ;;  %v6094_v51 = vld [vmem:[%s11181_s5] ss:$16 sps:$4 sm:$0xff]  }
  0x10   :  { %521 = vmatpush1.bf16.msra.mxu1 %v4708_v14  ;;  %v4739_v52 = vld [vmem:[%s11181_s5 + $0x8] ss:$16 sps:$4 sm:$0xff]   ;;  %v6102_v55 = vld [vmem:[%s11181_s5 + $0x24] ss:$16 sps:$4 sm:$0xff]   ;;  %v4742_v56 = vld [vmem:[%s11181_s5 + $0x2c] ss:$16 sps:$4 sm:$0xff]  }
  0x11   :  { %522 = vmatprep.subr.bf16.mxu1 %v4710_v15  ;;  %v6111_v57 = vld [vmem:[%s11181_s5 + $0x20] ss:$16 sps:$4 sm:$0xff]   ;;  %v4745_v58 = vld [vmem:[%s11181_s5 + $0x28] ss:$16 sps:$4 sm:$0xff]   ;;  %v6120_v59 = vld [vmem:[%s11181_s5 + $0x44] ss:$16 sps:$4 sm:$0xff]  }
  0x12   :  { %4504 = vmatpush3.bf16.msra.mxu0 %v4682_v8  ;;  %v4748_v60 = vld [vmem:[%s11181_s5 + $0x4c] ss:$16 sps:$4 sm:$0xff]   ;;  %v6131_v61 = vld [vmem:[%s11181_s5 + $0x40] ss:$16 sps:$4 sm:$0xff]   ;;  %v4751_v62 = vld [vmem:[%s11181_s5 + $0x48] ss:$16 sps:$4 sm:$0xff]  }
  0x13   :  { %4505 = vmatprep.subr.bf16.mxu0 %v11190_v0  ;;  %v6140_v63 = vld [vmem:[%s11181_s5 + $0x64] ss:$16 sps:$4 sm:$0xff]   ;;  %v4754_v1 = vld [vmem:[%s11181_s5 + $0x6c] ss:$16 sps:$4 sm:$0xff]   ;;  %v6149_v2 = vld [vmem:[%s11181_s5 + $0x60] ss:$16 sps:$4 sm:$0xff]  }
  0x14   :  { %523 = vmatpush1.bf16.msra.mxu1 %v4714_v17  ;;  %v4757_v3 = vld [vmem:[%s11181_s5 + $0x68] ss:$16 sps:$4 sm:$0xff]   ;;  %v6159_v4 = vld [vmem:[%s11181_s5 + $0x84] ss:$16 sps:$4 sm:$0xff]   ;;  %v4760_v5 = vld [vmem:[%s11181_s5 + $0x8c] ss:$16 sps:$4 sm:$0xff]  }
  0x15   :  { %524 = vmatprep.subr.bf16.mxu1 %v4716_v18  ;;  %v6167_v6 = vld [vmem:[%s11181_s5 + $0x80] ss:$16 sps:$4 sm:$0xff]   ;;  %v4763_v7 = vld [vmem:[%s11181_s5 + $0x88] ss:$16 sps:$4 sm:$0xff]   ;;  %v6177_v8 = vld [vmem:[%s11181_s5 + $0xa4] ss:$16 sps:$4 sm:$0xff]  }
  0x16   :  { %4506 = vmatpush3.bf16.msra.mxu0 %v4683_v13  ;;  %v4766_v9 = vld [vmem:[%s11181_s5 + $0xac] ss:$16 sps:$4 sm:$0xff]   ;;  %v6185_v10 = vld [vmem:[%s11181_s5 + $0xa0] ss:$16 sps:$4 sm:$0xff]   ;;  %v4769_v11 = vld [vmem:[%s11181_s5 + $0xa8] ss:$16 sps:$4 sm:$0xff]  }
  0x17   :  { %4507 = vmatprep.subr.bf16.mxu0 %v11190_v0  ;;  %v6195_v12 = vld [vmem:[%s11181_s5 + $0xc4] ss:$16 sps:$4 sm:$0xff]   ;;  %v4772_v13 = vld [vmem:[%s11181_s5 + $0xcc] ss:$16 sps:$4 sm:$0xff]   ;;  %v6203_v14 = vld [vmem:[%s11181_s5 + $0xc0] ss:$16 sps:$4 sm:$0xff]  }
  0x18   :  { %525 = vmatpush1.bf16.msra.mxu1 %v4720_v22  ;;  %v4775_v15 = vld [vmem:[%s11181_s5 + $0xc8] ss:$16 sps:$4 sm:$0xff]   ;;  %v4778_v17 = vld [vmem:[%s11181_s5 + $0xec] ss:$16 sps:$4 sm:$0xff]   ;;  %v6221_v18 = vld [vmem:[%s11181_s5 + $0xe0] ss:$16 sps:$4 sm:$0xff]  }
  0x19   :  { %526 = vmatprep.subr.bf16.mxu1 %v4722_v24  ;;  %v6231_v20 = vld [vmem:[%s11181_s5 + $0x104] ss:$16 sps:$4 sm:$0xff]   ;;  %v6239_v22 = vld [vmem:[%s11181_s5 + $0x100] ss:$16 sps:$4 sm:$0xff]  }
  0x1a   :  { %4508 = vmatpush3.bf16.msra.mxu0 %v4684_v16  ;;  %v6213_v16 = vld [vmem:[%s11181_s5 + $0xe4] ss:$16 sps:$4 sm:$0xff]  }
  0x1b   :  { %4509 = vmatprep.subr.bf16.mxu0 %v11190_v0  ;;  %v6249_v24 = vld [vmem:[%s11181_s5 + $0x124] ss:$16 sps:$4 sm:$0xff]  }
  0x1c   :  { %527 = vmatpush1.bf16.msra.mxu1 %v4726_v27  ;;  %v4793_v27 = vld [vmem:[%s11181_s5 + $0x128] ss:$16 sps:$4 sm:$0xff]  }
  0x1d   :  { %528 = vmatprep.subr.bf16.mxu1 %v4728_v39  ;;  %v4811_v39 = vld [vmem:[%s11181_s5 + $0x188] ss:$16 sps:$4 sm:$0xff]  }
  0x1e   :  { %4510 = vmatpush3.bf16.msra.mxu0 %v4685_v19  ;;  %v4781_v19 = vld [vmem:[%s11181_s5 + $0xe8] ss:$16 sps:$4 sm:$0xff]  }
  0x1f   :  { %555 = vmatprep.subr.bf16.mxu0 %v4688_v21  ;;  %v4784_v21 = vld [vmem:[%s11181_s5 + $0x10c] ss:$16 sps:$4 sm:$0xff]  }
  0x20   :  { %529 = vmatpush1.bf16.msra.mxu1 %v4732_v41  ;;  %v6325_v41 = vld [vmem:[%s11181_s5 + $0x1ac] ss:$16 sps:$4 sm:$0xff]  }
  0x21   :  { %4512 = vmatmul.mubr.bf16.vlgmr.msra.gmra.mrb[0].mxu0 %v237_v23  ;;  %962 = vmatprep.subr.bf16.mxu1 %v4734_v44  ;;  %v4787_v23 = vld [vmem:[%s11181_s5 + $0x108] ss:$16 sps:$4 sm:$0xff]  }
  0x22   :  { %556 = vmatpush1.bf16.msra.mxu0 %v4691_v25  ;;  %587 = vmatprep.mubr.bf16.mxu0 %v11192_v43  ;;  %v4790_v25 = vld [vmem:[%s11181_s5 + $0x12c] ss:$16 sps:$4 sm:$0xff]   ;;  %v6336_v44 = vld [vmem:[%s11181_s5 + $0x1a8] ss:$16 sps:$4 sm:$0xff]  }
  0x23   :  { %557 = vmatprep.subr.bf16.mxu0 %v4694_v26  ;;  %v6257_v26 = vld [vmem:[%s11181_s5 + $0x120] ss:$16 sps:$4 sm:$0xff]  }
  0x26   :  { %558 = vmatpush1.bf16.msra.mxu0 %v4697_v28  ;;  %v6267_v28 = vld [vmem:[%s11181_s5 + $0x144] ss:$16 sps:$4 sm:$0xff]  }
  0x27   :  { %559 = vmatprep.subr.bf16.mxu0 %v4700_v29  ;;  %v4796_v29 = vld [vmem:[%s11181_s5 + $0x14c] ss:$16 sps:$4 sm:$0xff]  }
  0x2a   :  { %560 = vmatpush1.bf16.msra.mxu0 %v4703_v30  ;;  %v6275_v30 = vld [vmem:[%s11181_s5 + $0x140] ss:$16 sps:$4 sm:$0xff]  }
  0x2b   :  { %561 = vmatprep.subr.bf16.mxu0 %v4706_v31  ;;  %v4799_v31 = vld [vmem:[%s11181_s5 + $0x148] ss:$16 sps:$4 sm:$0xff]  }
  0x2e   :  { %562 = vmatpush1.bf16.msra.mxu0 %v4709_v32  ;;  %v6285_v32 = vld [vmem:[%s11181_s5 + $0x164] ss:$16 sps:$4 sm:$0xff]  }
  0x2f   :  { %563 = vmatprep.subr.bf16.mxu0 %v4712_v33  ;;  %v4802_v33 = vld [vmem:[%s11181_s5 + $0x16c] ss:$16 sps:$4 sm:$0xff]  }
  0x32   :  { %564 = vmatpush1.bf16.msra.mxu0 %v4715_v34  ;;  %v6293_v34 = vld [vmem:[%s11181_s5 + $0x160] ss:$16 sps:$4 sm:$0xff]  }
  0x33   :  { %565 = vmatprep.subr.bf16.mxu0 %v4718_v35  ;;  %v4805_v35 = vld [vmem:[%s11181_s5 + $0x168] ss:$16 sps:$4 sm:$0xff]  }
  0x36   :  { %566 = vmatpush1.bf16.msra.mxu0 %v4721_v36  ;;  %v6303_v36 = vld [vmem:[%s11181_s5 + $0x184] ss:$16 sps:$4 sm:$0xff]  }
  0x37   :  { %567 = vmatprep.subr.bf16.mxu0 %v4724_v37  ;;  %v4808_v37 = vld [vmem:[%s11181_s5 + $0x18c] ss:$16 sps:$4 sm:$0xff]  }
  0x3a   :  { %568 = vmatpush1.bf16.msra.mxu0 %v4727_v38  ;;  %v6311_v38 = vld [vmem:[%s11181_s5 + $0x180] ss:$16 sps:$4 sm:$0xff]  }
  0x3b   :  { %569 = vmatprep.subr.bf16.mxu0 %v4730_v40  ;;  %v6320_v40 = vld [vmem:[%s11181_s5 + $0x1a4] ss:$16 sps:$4 sm:$0xff]  }
  0x3e   :  { %570 = vmatpush1.bf16.msra.mxu0 %v4733_v42  ;;  %v6331_v42 = vld [vmem:[%s11181_s5 + $0x1a0] ss:$16 sps:$4 sm:$0xff]  }
  0x3f   :  { %1003 = vmatprep.subr.bf16.mxu0 %v4736_v45  ;;  %v6343_v45 = vld [vmem:[%s11181_s5 + $0x1c4] ss:$16 sps:$4 sm:$0xff]  }
  0xf4   :  { %v326_v47 = vpop.f32.mrb[0].mxu0 }
  0xf5   :  { %v327_v48 = vadd.f32 %v4157_v46, %v326_v47  ;;  %v4513_v49 = vpop.f32.mrb[1].mxu0  ;;  %v6348_v46 = vld [vmem:[%s11181_s5 + $0x1cc] ss:$16 sps:$4 sm:$0xff]   ;;  %v6355_v47 = vld [vmem:[%s11181_s5 + $0x1c0] ss:$16 sps:$4 sm:$0xff]  }
  0xf6   :  { %v329_v50 = vpop.f32.mrb[2].mxu0  ;;  %v6367_v49 = vld [vmem:[%s11181_s5 + $0x1e4] ss:$16 sps:$4 sm:$0xff]  }
  0xf7   :  { %v332_v53 = vpack.c.bf16 %v327_v48, %v327_v48  ;;  %v4514_v54 = vpop.f32.mrb[3].mxu0  ;;  %v6360_v48 = vld [vmem:[%s11181_s5 + $0x1c8] ss:$16 sps:$4 sm:$0xff]   ;;  %v6372_v50 = vld [vmem:[%s11181_s5 + $0x1ec] ss:$16 sps:$4 sm:$0xff]  }
  0xf8   :  { %v6393_v54 = vld [vmem:[%s11183_s7 + $0xc] ss:$16 sps:$4 sm:$0xff]  }
  0xf9   :  { %547 = vmatmul.mubr.bf16.vlgmr.msra.gmra.mrb[0].mxu1 %v332_v53  ;;  %588 = vmatmul.mubr.bf16.vlgmr.msra.gmra.mrb[4].mxu0 %v332_v53  ;;  %v6384_v53 = vld [vmem:[%s11181_s5 + $0x1e8] ss:$16 sps:$4 sm:$0xff]  }
  0xfa   :  { %963 = vmatpush1.bf16.msra.mxu1 %v6094_v51  ;;  %1004 = vmatpush1.bf16.msra.mxu0 %v4739_v52  ;;  %v6379_v52 = vld [vmem:[%s11181_s5 + $0x1e0] ss:$16 sps:$4 sm:$0xff]  }
  0xfb   :  { %964 = vmatprep.subr.bf16.mxu1 %v6102_v55  ;;  %1005 = vmatprep.subr.bf16.mxu0 %v4742_v56  ;;  %v6398_v56 = vld [vmem:[%s11183_s7 + $0x4] ss:$16 sps:$4 sm:$0xff]  }
  0xfc   :  { %994 = vmatprep.mubr.bf16.mxu1 %v11192_v43  ;;  %1035 = vmatprep.mubr.bf16.mxu0 %v11192_v43 }
  0xfe   :  { %965 = vmatpush1.bf16.msra.mxu1 %v6111_v57  ;;  %1006 = vmatpush1.bf16.msra.mxu0 %v4745_v58  ;;  %v334_v58 = vlaneseq }
  0xff   :  { %966 = vmatprep.subr.bf16.mxu1 %v6120_v59  ;;  %1007 = vmatprep.subr.bf16.mxu0 %v4748_v60 }
 0x100   :  { %v335_v60 = vshrl.u32 %v334_v58, 7 }
 0x102   :  { %967 = vmatpush1.bf16.msra.mxu1 %v6131_v61  ;;  %1008 = vmatpush1.bf16.msra.mxu0 %v4751_v62  ;;  %v6402_v62 = vsub.s32 0, %v335_v60 }
 0x103   :  { %968 = vmatprep.subr.bf16.mxu1 %v6140_v63  ;;  %1009 = vmatprep.subr.bf16.mxu0 %v4754_v1  ;;  %v232_v1 = vld [vmem:[%s11184_s4] sm:$0xf] }
 0x106   :  { %969 = vmatpush1.bf16.msra.mxu1 %v6149_v2  ;;  %1010 = vmatpush1.bf16.msra.mxu0 %v4757_v3  ;;  %v6407_v3 = vsub.s32 1, %v335_v60 }
 0x107   :  { %970 = vmatprep.subr.bf16.mxu1 %v6159_v4  ;;  %1011 = vmatprep.subr.bf16.mxu0 %v4760_v5  ;;  %v6410_v5 = vrot.slane %v232_v1, %v6402_v62 }
 0x109   :  { %11602 = vst [vmem:[#allocation2_spill] sm:$0xff] %v6410_v5 }
 0x10a   :  { %971 = vmatpush1.bf16.msra.mxu1 %v6167_v6  ;;  %1012 = vmatpush1.bf16.msra.mxu0 %v4763_v7  ;;  %v6413_v7 = vrot.slane %v232_v1, %v6407_v3 }
 0x10b   :  { %972 = vmatprep.subr.bf16.mxu1 %v6177_v8  ;;  %1013 = vmatprep.subr.bf16.mxu0 %v4766_v9 }
 0x10c   :  { %11603 = vst [vmem:[#allocation3_spill] sm:$0xff] %v6413_v7 }
 0x10e   :  { %973 = vmatpush1.bf16.msra.mxu1 %v6185_v10  ;;  %1014 = vmatpush1.bf16.msra.mxu0 %v4769_v11 }
 0x10f   :  { %974 = vmatprep.subr.bf16.mxu1 %v6195_v12  ;;  %1015 = vmatprep.subr.bf16.mxu0 %v4772_v13  ;;  %v6415_v13 = vsub.s32 3, %v335_v60 }
 0x112   :  { %975 = vmatpush1.bf16.msra.mxu1 %v6203_v14  ;;  %1016 = vmatpush1.bf16.msra.mxu0 %v4775_v15 }
 0x113   :  { %976 = vmatprep.subr.bf16.mxu1 %v6213_v16  ;;  %1017 = vmatprep.subr.bf16.mxu0 %v4778_v17 }
 0x116   :  { %977 = vmatpush1.bf16.msra.mxu1 %v6221_v18  ;;  %1018 = vmatpush1.bf16.msra.mxu0 %v4781_v19 }
 0x117   :  { %978 = vmatprep.subr.bf16.mxu1 %v6231_v20  ;;  %1019 = vmatprep.subr.bf16.mxu0 %v4784_v21 }
 0x11a   :  { %979 = vmatpush1.bf16.msra.mxu1 %v6239_v22  ;;  %1020 = vmatpush1.bf16.msra.mxu0 %v4787_v23 }
 0x11b   :  { %980 = vmatprep.subr.bf16.mxu1 %v6249_v24  ;;  %1021 = vmatprep.subr.bf16.mxu0 %v4790_v25 }
 0x11e   :  { %981 = vmatpush1.bf16.msra.mxu1 %v6257_v26  ;;  %1022 = vmatpush1.bf16.msra.mxu0 %v4793_v27 }
 0x11f   :  { %982 = vmatprep.subr.bf16.mxu1 %v6267_v28  ;;  %1023 = vmatprep.subr.bf16.mxu0 %v4796_v29 }
 0x122   :  { %983 = vmatpush1.bf16.msra.mxu1 %v6275_v30  ;;  %1024 = vmatpush1.bf16.msra.mxu0 %v4799_v31 }
 0x123   :  { %984 = vmatprep.subr.bf16.mxu1 %v6285_v32  ;;  %1025 = vmatprep.subr.bf16.mxu0 %v4802_v33 }
 0x126   :  { %985 = vmatpush1.bf16.msra.mxu1 %v6293_v34  ;;  %1026 = vmatpush1.bf16.msra.mxu0 %v4805_v35  ;;  %v6420_v35 = vrot.slane %v232_v1, %v6415_v13 }
 0x127   :  { %986 = vmatprep.subr.bf16.mxu1 %v6303_v36  ;;  %1027 = vmatprep.subr.bf16.mxu0 %v4808_v37  ;;  %v6422_v37 = vsub.s32 2, %v335_v60 }
 0x128   :  { %11604 = vst [vmem:[#allocation4_spill] sm:$0xff] %v6420_v35 }
 0x129   :  { %v6426_v58 = vrot.slane %v232_v1, %v6422_v37 }
 0x12a   :  { %987 = vmatpush1.bf16.msra.mxu1 %v6311_v38  ;;  %1028 = vmatpush1.bf16.msra.mxu0 %v4811_v39 }
 0x12b   :  { %988 = vmatprep.subr.bf16.mxu1 %v6320_v40  ;;  %1029 = vmatprep.subr.bf16.mxu0 %v6325_v41  ;;  %11605 = vst [vmem:[#allocation5_spill] sm:$0xff] %v6426_v58 }
 0x12e   :  { %989 = vmatpush1.bf16.msra.mxu1 %v6331_v42  ;;  %1030 = vmatpush1.bf16.msra.mxu0 %v6336_v44 }
 0x12f   :  { %990 = vmatprep.subr.bf16.mxu1 %v6343_v45  ;;  %1031 = vmatprep.subr.bf16.mxu0 %v6348_v46 }
 0x132   :  { %991 = vmatpush1.bf16.msra.mxu1 %v6355_v47  ;;  %1032 = vmatpush1.bf16.msra.mxu0 %v6360_v48 }
 0x133   :  { %992 = vmatprep.subr.bf16.mxu1 %v6367_v49  ;;  %1033 = vmatprep.subr.bf16.mxu0 %v6372_v50 }
 0x136   :  { %993 = vmatpush1.bf16.msra.mxu1 %v6379_v52  ;;  %1034 = vmatpush1.bf16.msra.mxu0 %v6384_v53 }
 0x137   :  { %1451 = vmatprep.subr.bf16.mxu0 %v6393_v54  ;;  %1410 = vmatprep.subr.bf16.mxu1 %v6398_v56 }
 0x1cc   :  { %v548_v9 = vpop.f32.mrb[0].mxu1  ;;  %v589_v11 = vpop.f32.mrb[4].mxu0 }
 0x1cd   :  { %v549_v15 = vadd.f32 %v548_v9, %v6410_v5  ;;  %v550_v17 = vpop.f32.mrb[1].mxu1  ;;  %v591_v19 = vpop.f32.mrb[5].mxu0 }
 0x1ce   :  { %v551_v21 = vadd.f32 %v550_v17, %v6413_v7  ;;  %v552_v23 = vpop.f32.mrb[2].mxu1  ;;  %v593_v25 = vpop.f32.mrb[6].mxu0  ;;  %v592_v39 = vadd.f32 %v591_v19, %v6420_v35  ;;  %v590_v17 = vadd.f32 %v589_v11, %v6426_v58 }
 0x1cf   :  { %v4198_v27 = vmul.f32 -1.442695, %v549_v15  ;;  %v553_v29 = vpop.f32.mrb[3].mxu1  ;;  %v594_v31 = vpop.f32.mrb[7].mxu0 }
 0x1d0   :  { %v4199_v33 = vmul.f32 -1.442695, %v551_v21  ;;  %v4200_v9 = vmul.f32 -1.442695, %v592_v39 }
 0x1d1   :  { %4934 = vpow2.f32 %v4198_v27 }
 0x1d2   :  { %4936 = vpow2.f32 %v4199_v33 }
 0x1d3   :  { %4938 = vpow2.f32 %v4200_v9  ;;  %v6435_v9 = vld [vmem:[%s11183_s7 + $0x8] ss:$16 sps:$4 sm:$0xff]  }
 0x1d4   :  { %4940 = vtanh.f32 %v590_v17  ;;  %11607 = vst [vmem:[#allocation7_spill] sm:$0xff] %v6435_v9  ;;  %v6440_v17 = vld [vmem:[%s11183_s7] ss:$16 sps:$4 sm:$0xff]  }
 0x1d5   :  { %11608 = vst [vmem:[#allocation8_spill] sm:$0xff] %v6440_v17 }
 0x1db   :  { %v4935_v23 = vpop.eup %4934 }
 0x1dc   :  { %v4937_v15 = vpop.eup %4936  ;;  %v599_v25 = vadd.f32 1.0, %v4935_v23 }
 0x1dd   :  { %v605_v21 = vadd.f32 1.0, %v4937_v15  ;;  %v4939_v27 = vpop.eup %4938 }
 0x1de   :  { %4942 = vrcp.f32 %v599_v25  ;;  %v4941_v60 = vpop.eup %4940  ;;  %v612_v19 = vadd.f32 1.0, %v4939_v27  ;;  %v6452_v25 = vld [vmem:[%s11183_s7 + $0x24] ss:$16 sps:$4 sm:$0xff]   ;;  %v6466_v27 = vld [vmem:[%s11183_s7 + $0x20] ss:$16 sps:$4 sm:$0xff]  }
 0x1df   :  { %4944 = vrcp.f32 %v605_v21  ;;  %11610 = vst [vmem:[#allocation10_spill] sm:$0xff] %v6452_v25  ;;  %v6461_v21 = vld [vmem:[%s11183_s7 + $0x28] ss:$16 sps:$4 sm:$0xff]   ;;  %11612 = vst [vmem:[#allocation12_spill] sm:$0xff] %v6466_v27 }
 0x1e0   :  { %4946 = vrcp.f32 %v612_v19  ;;  %11611 = vst [vmem:[#allocation11_spill] sm:$0xff] %v6461_v21  ;;  %v6499_v19 = vld [vmem:[%s11183_s7 + $0x6c] ss:$16 sps:$4 sm:$0xff]  }
 0x1e1   :  { %11617 = vst [vmem:[#allocation17_spill] sm:$0xff] %v6499_v19 }
 0x1e8   :  { %v4943_v29 = vpop.eup %4942 }
 0x1e9   :  { %v4945_v31 = vpop.eup %4944  ;;  %v616_v33 = vmul.f32 %v4943_v29, %v4941_v60  ;;  %v6473_v60 = vld [vmem:[%s11183_s7 + $0x4c] ss:$16 sps:$4 sm:$0xff]   ;;  %v6478_v29 = vld [vmem:[%s11183_s7 + $0x44] ss:$16 sps:$4 sm:$0xff]  }
 0x1ea   :  { %v615_v0 = vmul.f32 0.0, %v4945_v31  ;;  %v4947_v11 = vpop.eup %4946  ;;  %11613 = vst [vmem:[#allocation13_spill] sm:$0xff] %v6473_v60  ;;  %11614 = vst [vmem:[#allocation14_spill] sm:$0xff] %v6478_v29  ;;  %v6487_v31 = vld [vmem:[%s11183_s7 + $0x48] ss:$16 sps:$4 sm:$0xff]  }
 0x1eb   :  { %11615 = vst [vmem:[#allocation15_spill] sm:$0xff] %v6487_v31 }
 0x1ec   :  { %v6429_v1 = vadd.f32 %v616_v33, %v615_v0  ;;  %v6447_v0 = vld [vmem:[%s11183_s7 + $0x2c] ss:$16 sps:$4 sm:$0xff]   ;;  %v6492_v33 = vld [vmem:[%s11183_s7 + $0x40] ss:$16 sps:$4 sm:$0xff]  }
 0x1ed   :  { %11609 = vst [vmem:[#allocation9_spill] sm:$0xff] %v6447_v0  ;;  %11616 = vst [vmem:[#allocation16_spill] sm:$0xff] %v6492_v33 }
 0x1ee   :  { %11606 = vst [vmem:[#allocation6_spill] sm:$0xff] %v6429_v1  ;;  %4948 = vtanh.f32 %v6429_v1 }
 0x1f8   :  { %v4949_v39 = vpop.eup %4948 }
 0x1f9   :  { %v619_v23 = vmul.f32 %v4949_v39, %v4947_v11  ;;  %v6504_v11 = vld [vmem:[%s11183_s7 + $0x64] ss:$16 sps:$4 sm:$0xff]   ;;  %v6511_v39 = vld [vmem:[%s11183_s7 + $0x68] ss:$16 sps:$4 sm:$0xff]  }
 0x1fa   :  { %11618 = vst [vmem:[#allocation18_spill] sm:$0xff] %v6504_v11  ;;  %11619 = vst [vmem:[#allocation19_spill] sm:$0xff] %v6511_v39 }
 0x1fb   :  { %v6442_v15 = vpack.c.bf16 %v619_v23, %v619_v23  ;;  %v6516_v23 = vld [vmem:[%s11183_s7 + $0x60] ss:$16 sps:$4 sm:$0xff]  }
 0x1fc   :  { %11620 = vst [vmem:[#allocation20_spill] sm:$0xff] %v6516_v23 }
 0x1fd   :  { %995 = vmatmul.mubr.bf16.vlgmr.msra.gmra.mrb[4].mxu1 %v6442_v15  ;;  %1036 = vmatmul.mubr.bf16.vlgmr.msra.gmra.mrb[8].mxu0 %v6442_v15 }
 0x1fe   :  { %1452 = vmatpush1.bf16.msra.mxu0 %v6435_v9  ;;  %1411 = vmatpush1.bf16.msra.mxu1 %v6440_v17 }
 0x1ff   :  { %1453 = vmatprep.subr.bf16.mxu0 %v6447_v0  ;;  %1412 = vmatprep.subr.bf16.mxu1 %v6452_v25 }
 0x200   :  { %1442 = vmatprep.mubr.bf16.mxu1 %v11192_v43  ;;  %1483 = vmatprep.mubr.bf16.mxu0 %v11192_v43  ;;  %v6525_v43 = vld [vmem:[%s11183_s7 + $0x8c] ss:$16 sps:$4 sm:$0xff]  }
 0x201   :  { %11621 = vst [vmem:[#allocation21_spill] sm:$0xff] %v6525_v43 }
 0x202   :  { %1454 = vmatpush1.bf16.msra.mxu0 %v6461_v21  ;;  %1413 = vmatpush1.bf16.msra.mxu1 %v6466_v27 }
 0x203   :  { %1455 = vmatprep.subr.bf16.mxu0 %v6473_v60  ;;  %1414 = vmatprep.subr.bf16.mxu1 %v6478_v29 }
 0x206   :  { %1456 = vmatpush1.bf16.msra.mxu0 %v6487_v31  ;;  %1415 = vmatpush1.bf16.msra.mxu1 %v6492_v33  ;;  %v6530_v33 = vld [vmem:[%s11183_s7 + $0x84] ss:$16 sps:$4 sm:$0xff]  }
 0x207   :  { %1457 = vmatprep.subr.bf16.mxu0 %v6499_v19  ;;  %1416 = vmatprep.subr.bf16.mxu1 %v6504_v11  ;;  %11622 = vst [vmem:[#allocation22_spill] sm:$0xff] %v6530_v33  ;;  %v6535_v19 = vld [vmem:[%s11183_s7 + $0x88] ss:$16 sps:$4 sm:$0xff]   ;;  %v6768_v31 = vld [vmem:[%s11183_s7 + $0x1c4] ss:$16 sps:$4 sm:$0xff]  }
 0x208   :  { %11623 = vst [vmem:[#allocation23_spill] sm:$0xff] %v6535_v19  ;;  %v6559_v11 = vld [vmem:[%s11183_s7 + $0xa8] ss:$16 sps:$4 sm:$0xff]   ;;  %11662 = vst [vmem:[#allocation62_spill] sm:$0xff] %v6768_v31 }
 0x209   :  { %11627 = vst [vmem:[#allocation27_spill] sm:$0xff] %v6559_v11 }
 0x20a   :  { %1458 = vmatpush1.bf16.msra.mxu0 %v6511_v39  ;;  %1417 = vmatpush1.bf16.msra.mxu1 %v6516_v23  ;;  %v6541_v23 = vld [vmem:[%s11183_s7 + $0x80] ss:$16 sps:$4 sm:$0xff]   ;;  %v6549_v39 = vld [vmem:[%s11183_s7 + $0xac] ss:$16 sps:$4 sm:$0xff]  }
 0x20b   :  { %1459 = vmatprep.subr.bf16.mxu0 %v6525_v43  ;;  %11624 = vst [vmem:[#allocation24_spill] sm:$0xff] %v6541_v23  ;;  %1418 = vmatprep.subr.bf16.mxu1 %v6530_v33  ;;  %11625 = vst [vmem:[#allocation25_spill] sm:$0xff] %v6549_v39  ;;  %v6554_v43 = vld [vmem:[%s11183_s7 + $0xa4] ss:$16 sps:$4 sm:$0xff]   ;;  %v6583_v33 = vld [vmem:[%s11183_s7 + $0xc8] ss:$16 sps:$4 sm:$0xff]  }
 0x20c   :  { %11626 = vst [vmem:[#allocation26_spill] sm:$0xff] %v6554_v43  ;;  %11631 = vst [vmem:[#allocation31_spill] sm:$0xff] %v6583_v33 }
 0x20e   :  { %1460 = vmatpush1.bf16.msra.mxu0 %v6535_v19  ;;  %1419 = vmatpush1.bf16.msra.mxu1 %v6541_v23  ;;  %v6565_v23 = vld [vmem:[%s11183_s7 + $0xa0] ss:$16 sps:$4 sm:$0xff]   ;;  %v6573_v19 = vld [vmem:[%s11183_s7 + $0xcc] ss:$16 sps:$4 sm:$0xff]  }
 0x20f   :  { %1461 = vmatprep.subr.bf16.mxu0 %v6549_v39  ;;  %11628 = vst [vmem:[#allocation28_spill] sm:$0xff] %v6565_v23  ;;  %1420 = vmatprep.subr.bf16.mxu1 %v6554_v43  ;;  %11629 = vst [vmem:[#allocation29_spill] sm:$0xff] %v6573_v19  ;;  %v6578_v39 = vld [vmem:[%s11183_s7 + $0xc4] ss:$16 sps:$4 sm:$0xff]   ;;  %v6607_v43 = vld [vmem:[%s11183_s7 + $0xe8] ss:$16 sps:$4 sm:$0xff]  }
 0x210   :  { %11630 = vst [vmem:[#allocation30_spill] sm:$0xff] %v6578_v39  ;;  %11635 = vst [vmem:[#allocation35_spill] sm:$0xff] %v6607_v43 }
 0x212   :  { %1462 = vmatpush1.bf16.msra.mxu0 %v6559_v11  ;;  %1421 = vmatpush1.bf16.msra.mxu1 %v6565_v23  ;;  %v6589_v23 = vld [vmem:[%s11183_s7 + $0xc0] ss:$16 sps:$4 sm:$0xff]   ;;  %v6597_v11 = vld [vmem:[%s11183_s7 + $0xec] ss:$16 sps:$4 sm:$0xff]  }
 0x213   :  { %1463 = vmatprep.subr.bf16.mxu0 %v6573_v19  ;;  %11632 = vst [vmem:[#allocation32_spill] sm:$0xff] %v6589_v23  ;;  %1422 = vmatprep.subr.bf16.mxu1 %v6578_v39  ;;  %11633 = vst [vmem:[#allocation33_spill] sm:$0xff] %v6597_v11  ;;  %v6602_v19 = vld [vmem:[%s11183_s7 + $0xe4] ss:$16 sps:$4 sm:$0xff]   ;;  %v6631_v39 = vld [vmem:[%s11183_s7 + $0x108] ss:$16 sps:$4 sm:$0xff]  }
 0x214   :  { %11634 = vst [vmem:[#allocation34_spill] sm:$0xff] %v6602_v19  ;;  %11639 = vst [vmem:[#allocation39_spill] sm:$0xff] %v6631_v39 }
 0x216   :  { %1464 = vmatpush1.bf16.msra.mxu0 %v6583_v33  ;;  %1423 = vmatpush1.bf16.msra.mxu1 %v6589_v23  ;;  %v6613_v23 = vld [vmem:[%s11183_s7 + $0xe0] ss:$16 sps:$4 sm:$0xff]   ;;  %v6621_v33 = vld [vmem:[%s11183_s7 + $0x10c] ss:$16 sps:$4 sm:$0xff]  }
 0x217   :  { %1465 = vmatprep.subr.bf16.mxu0 %v6597_v11  ;;  %11636 = vst [vmem:[#allocation36_spill] sm:$0xff] %v6613_v23  ;;  %1424 = vmatprep.subr.bf16.mxu1 %v6602_v19  ;;  %11637 = vst [vmem:[#allocation37_spill] sm:$0xff] %v6621_v33  ;;  %v6626_v11 = vld [vmem:[%s11183_s7 + $0x104] ss:$16 sps:$4 sm:$0xff]   ;;  %v6655_v19 = vld [vmem:[%s11183_s7 + $0x128] ss:$16 sps:$4 sm:$0xff]  }
 0x218   :  { %11638 = vst [vmem:[#allocation38_spill] sm:$0xff] %v6626_v11  ;;  %11643 = vst [vmem:[#allocation43_spill] sm:$0xff] %v6655_v19 }
 0x21a   :  { %1466 = vmatpush1.bf16.msra.mxu0 %v6607_v43  ;;  %1425 = vmatpush1.bf16.msra.mxu1 %v6613_v23  ;;  %v6637_v23 = vld [vmem:[%s11183_s7 + $0x100] ss:$16 sps:$4 sm:$0xff]   ;;  %v6645_v43 = vld [vmem:[%s11183_s7 + $0x12c] ss:$16 sps:$4 sm:$0xff]  }
 0x21b   :  { %1467 = vmatprep.subr.bf16.mxu0 %v6621_v33  ;;  %11640 = vst [vmem:[#allocation40_spill] sm:$0xff] %v6637_v23  ;;  %1426 = vmatprep.subr.bf16.mxu1 %v6626_v11  ;;  %11641 = vst [vmem:[#allocation41_spill] sm:$0xff] %v6645_v43  ;;  %v6650_v33 = vld [vmem:[%s11183_s7 + $0x124] ss:$16 sps:$4 sm:$0xff]   ;;  %v6679_v11 = vld [vmem:[%s11183_s7 + $0x148] ss:$16 sps:$4 sm:$0xff]  }
 0x21c   :  { %11642 = vst [vmem:[#allocation42_spill] sm:$0xff] %v6650_v33  ;;  %11647 = vst [vmem:[#allocation47_spill] sm:$0xff] %v6679_v11 }
 0x21e   :  { %1468 = vmatpush1.bf16.msra.mxu0 %v6631_v39  ;;  %1427 = vmatpush1.bf16.msra.mxu1 %v6637_v23  ;;  %v6661_v23 = vld [vmem:[%s11183_s7 + $0x120] ss:$16 sps:$4 sm:$0xff]   ;;  %v6669_v39 = vld [vmem:[%s11183_s7 + $0x14c] ss:$16 sps:$4 sm:$0xff]  }
 0x21f   :  { %1469 = vmatprep.subr.bf16.mxu0 %v6645_v43  ;;  %11644 = vst [vmem:[#allocation44_spill] sm:$0xff] %v6661_v23  ;;  %1428 = vmatprep.subr.bf16.mxu1 %v6650_v33  ;;  %11645 = vst [vmem:[#allocation45_spill] sm:$0xff] %v6669_v39  ;;  %v6674_v43 = vld [vmem:[%s11183_s7 + $0x144] ss:$16 sps:$4 sm:$0xff]   ;;  %v6703_v33 = vld [vmem:[%s11183_s7 + $0x168] ss:$16 sps:$4 sm:$0xff]  }
 0x220   :  { %11646 = vst [vmem:[#allocation46_spill] sm:$0xff] %v6674_v43  ;;  %11651 = vst [vmem:[#allocation51_spill] sm:$0xff] %v6703_v33 }
 0x222   :  { %1470 = vmatpush1.bf16.msra.mxu0 %v6655_v19  ;;  %1429 = vmatpush1.bf16.msra.mxu1 %v6661_v23  ;;  %v6685_v23 = vld [vmem:[%s11183_s7 + $0x140] ss:$16 sps:$4 sm:$0xff]   ;;  %v6693_v19 = vld [vmem:[%s11183_s7 + $0x16c] ss:$16 sps:$4 sm:$0xff]  }
 0x223   :  { %1471 = vmatprep.subr.bf16.mxu0 %v6669_v39  ;;  %11648 = vst [vmem:[#allocation48_spill] sm:$0xff] %v6685_v23  ;;  %1430 = vmatprep.subr.bf16.mxu1 %v6674_v43  ;;  %11649 = vst [vmem:[#allocation49_spill] sm:$0xff] %v6693_v19  ;;  %v6698_v39 = vld [vmem:[%s11183_s7 + $0x164] ss:$16 sps:$4 sm:$0xff]   ;;  %v6727_v43 = vld [vmem:[%s11183_s7 + $0x188] ss:$16 sps:$4 sm:$0xff]  }
 0x224   :  { %11650 = vst [vmem:[#allocation50_spill] sm:$0xff] %v6698_v39  ;;  %11655 = vst [vmem:[#allocation55_spill] sm:$0xff] %v6727_v43 }
 0x226   :  { %1472 = vmatpush1.bf16.msra.mxu0 %v6679_v11  ;;  %1431 = vmatpush1.bf16.msra.mxu1 %v6685_v23  ;;  %v6709_v23 = vld [vmem:[%s11183_s7 + $0x160] ss:$16 sps:$4 sm:$0xff]   ;;  %v6717_v11 = vld [vmem:[%s11183_s7 + $0x18c] ss:$16 sps:$4 sm:$0xff]  }
 0x227   :  { %1473 = vmatprep.subr.bf16.mxu0 %v6693_v19  ;;  %11652 = vst [vmem:[#allocation52_spill] sm:$0xff] %v6709_v23  ;;  %1432 = vmatprep.subr.bf16.mxu1 %v6698_v39  ;;  %11653 = vst [vmem:[#allocation53_spill] sm:$0xff] %v6717_v11  ;;  %v6722_v19 = vld [vmem:[%s11183_s7 + $0x184] ss:$16 sps:$4 sm:$0xff]  }
 0x228   :  { %11654 = vst [vmem:[#allocation54_spill] sm:$0xff] %v6722_v19  ;;  %v6745_v39 = vld [vmem:[%s11183_s7 + $0x1a4] ss:$16 sps:$4 sm:$0xff]  }
 0x229   :  { %11658 = vst [vmem:[#allocation58_spill] sm:$0xff] %v6745_v39 }
 0x22a   :  { %1474 = vmatpush1.bf16.msra.mxu0 %v6703_v33  ;;  %1433 = vmatpush1.bf16.msra.mxu1 %v6709_v23  ;;  %v6733_v23 = vld [vmem:[%s11183_s7 + $0x180] ss:$16 sps:$4 sm:$0xff]   ;;  %v6740_v33 = vld [vmem:[%s11183_s7 + $0x1ac] ss:$16 sps:$4 sm:$0xff]  }
 0x22b   :  { %1475 = vmatprep.subr.bf16.mxu0 %v6717_v11  ;;  %11656 = vst [vmem:[#allocation56_spill] sm:$0xff] %v6733_v23  ;;  %1434 = vmatprep.subr.bf16.mxu1 %v6722_v19  ;;  %11657 = vst [vmem:[#allocation57_spill] sm:$0xff] %v6740_v33  ;;  %v6750_v11 = vld [vmem:[%s11183_s7 + $0x1a8] ss:$16 sps:$4 sm:$0xff]   ;;  %v6761_v19 = vld [vmem:[%s11183_s7 + $0x1cc] ss:$16 sps:$4 sm:$0xff]  }
 0x22c   :  { %11659 = vst [vmem:[#allocation59_spill] sm:$0xff] %v6750_v11  ;;  %11661 = vst [vmem:[#allocation61_spill] sm:$0xff] %v6761_v19 }
 0x22e   :  { %1476 = vmatpush1.bf16.msra.mxu0 %v6727_v43  ;;  %1435 = vmatpush1.bf16.msra.mxu1 %v6733_v23  ;;  %v6756_v43 = vld [vmem:[%s11183_s7 + $0x1a0] ss:$16 sps:$4 sm:$0xff]   ;;  %v6774_v23 = vld [vmem:[%s11183_s7 + $0x1c8] ss:$16 sps:$4 sm:$0xff]  }
 0x22f   :  { %11660 = vst [vmem:[#allocation60_spill] sm:$0xff] %v6756_v43  ;;  %1477 = vmatprep.subr.bf16.mxu0 %v6740_v33  ;;  %1436 = vmatprep.subr.bf16.mxu1 %v6745_v39  ;;  %11663 = vst [vmem:[#allocation63_spill] sm:$0xff] %v6774_v23  ;;  %v6781_v39 = vld [vmem:[%s11183_s7 + $0x1c0] ss:$16 sps:$4 sm:$0xff]   ;;  %v6786_v33 = vld [vmem:[%s11183_s7 + $0x1ec] ss:$16 sps:$4 sm:$0xff]  }
 0x230   :  { %11664 = vst [vmem:[#allocation64_spill] sm:$0xff] %v6781_v39  ;;  %11665 = vst [vmem:[#allocation65_spill] sm:$0xff] %v6786_v33 }
 0x232   :  { %1478 = vmatpush1.bf16.msra.mxu0 %v6750_v11  ;;  %1437 = vmatpush1.bf16.msra.mxu1 %v6756_v43  ;;  %v6792_v11 = vld [vmem:[%s11183_s7 + $0x1e4] ss:$16 sps:$4 sm:$0xff]  }
 0x233   :  { %1479 = vmatprep.subr.bf16.mxu0 %v6761_v19  ;;  %1438 = vmatprep.subr.bf16.mxu1 %v6768_v31  ;;  %11666 = vst [vmem:[#allocation66_spill] sm:$0xff] %v6792_v11  ;;  %v6798_v19 = vld [vmem:[%s11183_s7 + $0x1e8] ss:$16 sps:$4 sm:$0xff]   ;;  %v6805_v31 = vld [vmem:[%s11183_s7 + $0x1e0] ss:$16 sps:$4 sm:$0xff]  }
 0x234   :  { %11667 = vst [vmem:[#allocation67_spill] sm:$0xff] %v6798_v19  ;;  %11668 = vst [vmem:[#allocation68_spill] sm:$0xff] %v6805_v31 }
 0x236   :  { %1480 = vmatpush1.bf16.msra.mxu0 %v6774_v23  ;;  %1439 = vmatpush1.bf16.msra.mxu1 %v6781_v39  ;;  %v6813_v23 = vld [vmem:[%s11179_s3 + $0x4] ss:$16 sps:$4 sm:$0xff]   ;;  %v11670_v39 = vmov 0.0  }
 0x237   :  { %1481 = vmatprep.subr.bf16.mxu0 %v6786_v33  ;;  %1440 = vmatprep.subr.bf16.mxu1 %v6792_v11  ;;  %11669 = vst [vmem:[#allocation69_spill] sm:$0xff] %v6813_v23  ;;  %v233_v33 = vld [vmem:[%s11185_s6] sm:$0xf] }
 0x238   :  { %v6821_v43 = vrot.slane %v233_v33, %v6402_v62  ;;  %v6829_v35 = vrot.slane %v233_v33, %v6415_v13  ;;  %v6833_v5 = vrot.slane %v233_v33, %v6422_v37 }
 0x23a   :  { %1482 = vmatpush1.bf16.msra.mxu0 %v6798_v19  ;;  %1441 = vmatpush1.bf16.msra.mxu1 %v6805_v31  ;;  %11671 = vst [vmem:[#allocation70_spill] sm:$0xff] %v6821_v43  ;;  %v6824_v19 = vrot.slane %v233_v33, %v6407_v3  ;;  %11672 = vst [vmem:[#allocation71_spill] sm:$0xff] %v6829_v35 }
 0x23b   :  { %1612 = vmatprep.subr.bf16.mxu0 %v6813_v23  ;;  %4515 = vmatprep.subr.bf16.mxu1 %v11670_v39 }
 0x2d0   :  { %v996_v31 = vpop.f32.mrb[4].mxu1  ;;  %v1037_v11 = vpop.f32.mrb[8].mxu0 }
 0x2d1   :  { %v997_v29 = vadd.f32 %v996_v31, %v6821_v43  ;;  %v998_v60 = vpop.f32.mrb[5].mxu1  ;;  %v1039_v27 = vpop.f32.mrb[9].mxu0  ;;  %v1038_v43 = vadd.f32 %v1037_v11, %v6833_v5 }
 0x2d2   :  { %v999_v23 = vadd.f32 %v998_v60, %v6824_v19  ;;  %v1000_v21 = vpop.f32.mrb[6].mxu1  ;;  %v1041_v25 = vpop.f32.mrb[10].mxu0  ;;  %v1040_v58 = vadd.f32 %v1039_v27, %v6829_v35 }
 0x2d3   :  { %v4265_v0 = vmul.f32 -1.442695, %v997_v29  ;;  %v1001_v17 = vpop.f32.mrb[7].mxu1  ;;  %v1042_v9 = vpop.f32.mrb[11].mxu0 }
 0x2d4   :  { %v4266_v1 = vmul.f32 -1.442695, %v999_v23  ;;  %v4267_v31 = vmul.f32 -1.442695, %v1040_v58 }
 0x2d5   :  { %4950 = vpow2.f32 %v4265_v0 }
 0x2d6   :  { %4952 = vpow2.f32 %v4266_v1 }
 0x2d7   :  { %4954 = vpow2.f32 %v4267_v31 }
 0x2d8   :  { %4956 = vtanh.f32 %v1038_v43  ;;  %v6846_v43 = vld [vmem:[%s11179_s3] ss:$16 sps:$4 sm:$0xff]  }
 0x2df   :  { %v4951_v60 = vpop.eup %4950 }
 0x2e0   :  { %v4953_v21 = vpop.eup %4952  ;;  %v1047_v25 = vadd.f32 1.0, %v4951_v60 }
 0x2e1   :  { %v1053_v9 = vadd.f32 1.0, %v4953_v21  ;;  %v4955_v17 = vpop.eup %4954  ;;  %v6853_v21 = vld [vmem:[%s11179_s3 + $0x24] ss:$16 sps:$4 sm:$0xff]  }
 0x2e2   :  { %4958 = vrcp.f32 %v1047_v25  ;;  %v4957_v29 = vpop.eup %4956  ;;  %v1060_v27 = vadd.f32 1.0, %v4955_v17  ;;  %v6861_v25 = vld [vmem:[%s11179_s3 + $0x20] ss:$16 sps:$4 sm:$0xff]  }
 0x2e3   :  { %4960 = vrcp.f32 %v1053_v9  ;;  %v6867_v9 = vld [vmem:[%s11179_s3 + $0x44] ss:$16 sps:$4 sm:$0xff]   ;;  %v6873_v17 = vld [vmem:[%s11179_s3 + $0x40] ss:$16 sps:$4 sm:$0xff]  }
 0x2e4   :  { %4962 = vrcp.f32 %v1060_v27  ;;  %v6903_v27 = vld [vmem:[%s11179_s3 + $0xa4] ss:$16 sps:$4 sm:$0xff]  }
 0x2e5   :  { %11674 = vst [vmem:[#allocation72_spill] sm:$0xff] %v6903_v27 }
 0x2ec   :  { %v4959_v0 = vpop.eup %4958 }
 0x2ed   :  { %v4961_v1 = vpop.eup %4960  ;;  %v1064_v23 = vmul.f32 %v4959_v0, %v4957_v29  ;;  %v6879_v29 = vld [vmem:[%s11179_s3 + $0x64] ss:$16 sps:$4 sm:$0xff]   ;;  %v6885_v0 = vld [vmem:[%s11179_s3 + $0x60] ss:$16 sps:$4 sm:$0xff]  }
 0x2ee   :  { %v1063_v35 = vmul.f32 0.0, %v4961_v1  ;;  %v4963_v58 = vpop.eup %4962  ;;  %v6891_v1 = vld [vmem:[%s11179_s3 + $0x84] ss:$16 sps:$4 sm:$0xff]  }
 0x2f0   :  { %v6836_v33 = vadd.f32 %v1064_v23, %v1063_v35  ;;  %v11673_v35 = vmov 0   ;;  %v6897_v23 = vld [vmem:[%s11179_s3 + $0x80] ss:$16 sps:$4 sm:$0xff]  }
 0x2f2   :  { %4964 = vtanh.f32 %v6836_v33 }
 0x2fc   :  { %v4965_v11 = vpop.eup %4964 }
 0x2fd   :  { %v1067_v60 = vmul.f32 %v4965_v11, %v4963_v58  ;;  %v6909_v58 = vld [vmem:[%s11179_s3 + $0xa0] ss:$16 sps:$4 sm:$0xff]   ;;  %v6915_v11 = vld [vmem:[%s11179_s3 + $0xc4] ss:$16 sps:$4 sm:$0xff]  }
 0x2fe   :  { %11675 = vst [vmem:[#allocation73_spill] sm:$0xff] %v6909_v58  ;;  %11676 = vst [vmem:[#allocation74_spill] sm:$0xff] %v6915_v11 }
 0x2ff   :  { %v6839_v31 = vpack.c.bf16 %v1067_v60, %v1067_v60  ;;  %v6921_v60 = vld [vmem:[%s11179_s3 + $0xc0] ss:$16 sps:$4 sm:$0xff]  }
 0x301   :  { %1443 = vmatmul.mubr.bf16.vlgmr.msra.gmra.mrb[8].mxu1 %v6839_v31  ;;  %1484 = vmatmul.mubr.bf16.vlgmr.msra.gmra.mrb[12].mxu0 %v6839_v31 }
 0x302   :  { %1613 = vmatpush1.bf16.msra.mxu0 %v6846_v43  ;;  %1644 = vmatprep.mubr.bf16.mxu0 %v11673_v35 }
 0x303   :  { %1614 = vmatprep.subr.bf16.mxu0 %v6853_v21  ;;  %4531 = vmatprep.mubr.msk.bf16.mxu1 %vm5885_vm0, %v11670_v39 }
 0x306   :  { %1615 = vmatpush1.bf16.msra.mxu0 %v6861_v25 }
 0x307   :  { %1616 = vmatprep.subr.bf16.mxu0 %v6867_v9 }
 0x30a   :  { %1617 = vmatpush1.bf16.msra.mxu0 %v6873_v17 }
 0x30b   :  { %1618 = vmatprep.subr.bf16.mxu0 %v6879_v29 }
 0x30e   :  { %1619 = vmatpush1.bf16.msra.mxu0 %v6885_v0 }
 0x30f   :  { %1620 = vmatprep.subr.bf16.mxu0 %v6891_v1 }
 0x312   :  { %1621 = vmatpush1.bf16.msra.mxu0 %v6897_v23 }
 0x313   :  { %1622 = vmatprep.subr.bf16.mxu0 %v6903_v27  ;;  %v6927_v27 = vld [vmem:[%s11179_s3 + $0xe4] ss:$16 sps:$4 sm:$0xff]  }
 0x316   :  { %1623 = vmatpush1.bf16.msra.mxu0 %v6909_v58  ;;  %v6933_v58 = vld [vmem:[%s11179_s3 + $0xe0] ss:$16 sps:$4 sm:$0xff]  }
 0x317   :  { %1624 = vmatprep.subr.bf16.mxu0 %v6915_v11  ;;  %v6939_v11 = vld [vmem:[%s11181_s5 + $0x4] ss:$16 sps:$4 sm:$0xff]  }
 0x31a   :  { %1625 = vmatpush1.bf16.msra.mxu0 %v6921_v60 }
 0x31b   :  { %1626 = vmatprep.subr.bf16.mxu0 %v6927_v27 }
 0x31e   :  { %1627 = vmatpush1.bf16.msra.mxu0 %v6933_v58 }
 0x31f   :  { %1719 = vmatprep.subr.bf16.mxu0 %v6939_v11 }
 0x321   :  { %1645 = vmatmul.mubr.bf16.vlgmr.msra.gmra.mrb[16].mxu0 %v6442_v15 }
 0x322   :  { %1751 = vmatprep.mubr.bf16.mxu0 %v6839_v31  ;;  %1720 = vmatpush1.bf16.msra.mxu0 %v6094_v51  ;;  %v6979_v51 = vld [vmem:[%s11186_s9] sm:$0xff]  }
 0x323   :  { %1721 = vmatprep.subr.bf16.mxu0 %v6102_v55  ;;  %4516 = vmatpush3.bf16.msra.mxu1 %v6979_v51  ;;  %v6986_v55 = vld [vmem:[%s11186_s9 + $0x8] sm:$0xff]  }
 0x324   :  { %4517 = vmatprep.subr.bf16.mxu1 %v11670_v39 }
 0x326   :  { %1722 = vmatpush1.bf16.msra.mxu0 %v6111_v57  ;;  %v6993_v57 = vld [vmem:[%s11186_s9 + $0x10] sm:$0xff]  }
 0x327   :  { %1723 = vmatprep.subr.bf16.mxu0 %v6120_v59  ;;  %4518 = vmatpush3.bf16.msra.mxu1 %v6986_v55  ;;  %v7000_v59 = vld [vmem:[%s11186_s9 + $0x18] sm:$0xff]  }
 0x328   :  { %4519 = vmatprep.subr.bf16.mxu1 %v11670_v39 }
 0x32a   :  { %1724 = vmatpush1.bf16.msra.mxu0 %v6131_v61  ;;  %v7007_v61 = vld [vmem:[%s11186_s9 + $0x20] sm:$0xff]  }
 0x32b   :  { %1725 = vmatprep.subr.bf16.mxu0 %v6140_v63  ;;  %4520 = vmatpush3.bf16.msra.mxu1 %v6993_v57  ;;  %v7014_v63 = vld [vmem:[%s11186_s9 + $0x28] sm:$0xff]  }
 0x32c   :  { %4521 = vmatprep.subr.bf16.mxu1 %v11670_v39 }
 0x32e   :  { %1726 = vmatpush1.bf16.msra.mxu0 %v6149_v2  ;;  %v7021_v2 = vld [vmem:[%s11186_s9 + $0x30] sm:$0xff]  }
 0x32f   :  { %1727 = vmatprep.subr.bf16.mxu0 %v6159_v4  ;;  %4522 = vmatpush3.bf16.msra.mxu1 %v7000_v59  ;;  %v7028_v4 = vld [vmem:[%s11186_s9 + $0x38] sm:$0xff]  }
 0x330   :  { %4523 = vmatprep.subr.bf16.mxu1 %v11670_v39 }
 0x332   :  { %1728 = vmatpush1.bf16.msra.mxu0 %v6167_v6  ;;  %v7034_v6 = vld [vmem:[%s11179_s3 + $0xc] ss:$16 sps:$4 sm:$0xff]  }
 0x333   :  { %1729 = vmatprep.subr.bf16.mxu0 %v6177_v8  ;;  %4524 = vmatpush3.bf16.msra.mxu1 %v7007_v61  ;;  %v234_v8 = vld [vmem:[%s11187_s8] sm:$0xf] }
 0x334   :  { %4525 = vmatprep.subr.bf16.mxu1 %v11670_v39 }
 0x336   :  { %1730 = vmatpush1.bf16.msra.mxu0 %v6185_v10  ;;  %v7041_v10 = vrot.slane %v234_v8, %v6402_v62 }
 0x337   :  { %1731 = vmatprep.subr.bf16.mxu0 %v6195_v12  ;;  %4526 = vmatpush3.bf16.msra.mxu1 %v7014_v63  ;;  %v7044_v12 = vrot.slane %v234_v8, %v6407_v3 }
 0x338   :  { %4527 = vmatprep.subr.bf16.mxu1 %v11670_v39  ;;  %11677 = vst [vmem:[#allocation75_spill] sm:$0xff] %v7041_v10 }
 0x33a   :  { %1732 = vmatpush1.bf16.msra.mxu0 %v6203_v14 }
 0x33b   :  { %1733 = vmatprep.subr.bf16.mxu0 %v6213_v16  ;;  %4528 = vmatpush3.bf16.msra.mxu1 %v7021_v2 }
 0x33c   :  { %4529 = vmatprep.subr.bf16.mxu1 %v11670_v39 }
 0x33e   :  { %1734 = vmatpush1.bf16.msra.mxu0 %v6221_v18 }
 0x33f   :  { %1735 = vmatprep.subr.bf16.mxu0 %v6231_v20  ;;  %4530 = vmatpush3.bf16.msra.mxu1 %v7028_v4 }
 0x340   :  { %1653 = vmatprep.subr.bf16.mxu1 %v7034_v6 }
 0x342   :  { %1736 = vmatpush1.bf16.msra.mxu0 %v6239_v22 }
 0x343   :  { %1737 = vmatprep.subr.bf16.mxu0 %v6249_v24 }
 0x346   :  { %1738 = vmatpush1.bf16.msra.mxu0 %v6257_v26 }
 0x347   :  { %1739 = vmatprep.subr.bf16.mxu0 %v6267_v28 }
 0x34a   :  { %1740 = vmatpush1.bf16.msra.mxu0 %v6275_v30 }
 0x34b   :  { %1741 = vmatprep.subr.bf16.mxu0 %v6285_v32 }
 0x34e   :  { %1742 = vmatpush1.bf16.msra.mxu0 %v6293_v34 }
 0x34f   :  { %1743 = vmatprep.subr.bf16.mxu0 %v6303_v36 }
 0x352   :  { %1744 = vmatpush1.bf16.msra.mxu0 %v6311_v38  ;;  %v7049_v38 = vrot.slane %v234_v8, %v6415_v13 }
 0x353   :  { %1745 = vmatprep.subr.bf16.mxu0 %v6320_v40 }
 0x356   :  { %1746 = vmatpush1.bf16.msra.mxu0 %v6331_v42  ;;  %v7053_v42 = vrot.slane %v234_v8, %v6422_v37 }
 0x357   :  { %1747 = vmatprep.subr.bf16.mxu0 %v6343_v45 }
 0x35a   :  { %1748 = vmatpush1.bf16.msra.mxu0 %v6355_v47 }
 0x35b   :  { %1749 = vmatprep.subr.bf16.mxu0 %v6367_v49 }
 0x35e   :  { %1750 = vmatpush1.bf16.msra.mxu0 %v6379_v52 }
 0x35f   :  { %1826 = vmatprep.subr.bf16.mxu0 %v6398_v56 }
 0x3d4   :  { %v1444_v14 = vpop.f32.mrb[8].mxu1  ;;  %v1485_v16 = vpop.f32.mrb[12].mxu0 }
 0x3d5   :  { %v1445_v18 = vadd.f32 %v1444_v14, %v7041_v10  ;;  %v1446_v20 = vpop.f32.mrb[9].mxu1  ;;  %v1487_v22 = vpop.f32.mrb[13].mxu0  ;;  %v1486_v47 = vadd.f32 %v1485_v16, %v7053_v42 }
 0x3d6   :  { %v1447_v24 = vadd.f32 %v1446_v20, %v7044_v12  ;;  %v1448_v26 = vpop.f32.mrb[10].mxu1  ;;  %v1489_v28 = vpop.f32.mrb[14].mxu0  ;;  %v1488_v40 = vadd.f32 %v1487_v22, %v7049_v38 }
 0x3d7   :  { %v4332_v30 = vmul.f32 -1.442695, %v1445_v18  ;;  %v1449_v32 = vpop.f32.mrb[11].mxu1  ;;  %v1490_v34 = vpop.f32.mrb[15].mxu0 }
 0x3d8   :  { %v4333_v36 = vmul.f32 -1.442695, %v1447_v24  ;;  %v4334_v45 = vmul.f32 -1.442695, %v1488_v40  ;;  %v7069_v40 = vld [vmem:[%s11179_s3 + $0x8] ss:$16 sps:$4 sm:$0xff]  }
 0x3d9   :  { %4966 = vpow2.f32 %v4332_v30 }
 0x3da   :  { %4968 = vpow2.f32 %v4333_v36 }
 0x3db   :  { %4970 = vpow2.f32 %v4334_v45  ;;  %v7076_v45 = vld [vmem:[%s11179_s3 + $0x2c] ss:$16 sps:$4 sm:$0xff]  }
 0x3dc   :  { %4972 = vtanh.f32 %v1486_v47  ;;  %v7082_v47 = vld [vmem:[%s11179_s3 + $0x28] ss:$16 sps:$4 sm:$0xff]  }
 0x3e3   :  { %v4967_v49 = vpop.eup %4966 }
 0x3e4   :  { %v4969_v52 = vpop.eup %4968  ;;  %v1495_v56 = vadd.f32 1.0, %v4967_v49  ;;  %v7088_v49 = vld [vmem:[%s11179_s3 + $0x4c] ss:$16 sps:$4 sm:$0xff]  }
 0x3e5   :  { %v1501_v62 = vadd.f32 1.0, %v4969_v52  ;;  %v4971_v3 = vpop.eup %4970  ;;  %v7094_v52 = vld [vmem:[%s11179_s3 + $0x48] ss:$16 sps:$4 sm:$0xff]  }
 0x3e6   :  { %4974 = vrcp.f32 %v1495_v56  ;;  %v4973_v13 = vpop.eup %4972  ;;  %v1508_v22 = vadd.f32 1.0, %v4971_v3  ;;  %v7100_v56 = vld [vmem:[%s11179_s3 + $0x6c] ss:$16 sps:$4 sm:$0xff]  }
 0x3e7   :  { %4976 = vrcp.f32 %v1501_v62  ;;  %v7106_v62 = vld [vmem:[%s11179_s3 + $0x68] ss:$16 sps:$4 sm:$0xff]   ;;  %v7112_v3 = vld [vmem:[%s11179_s3 + $0x8c] ss:$16 sps:$4 sm:$0xff]  }
 0x3e8   :  { %4978 = vrcp.f32 %v1508_v22  ;;  %v7142_v22 = vld [vmem:[%s11179_s3 + $0xc8] ss:$16 sps:$4 sm:$0xff]  }
 0x3e9   :  { %11678 = vst [vmem:[#allocation76_spill] sm:$0xff] %v7142_v22 }
 0x3f0   :  { %v4975_v14 = vpop.eup %4974 }
 0x3f1   :  { %v4977_v18 = vpop.eup %4976  ;;  %v1512_v20 = vmul.f32 %v4975_v14, %v4973_v13  ;;  %v7118_v13 = vld [vmem:[%s11179_s3 + $0x88] ss:$16 sps:$4 sm:$0xff]   ;;  %v7124_v14 = vld [vmem:[%s11179_s3 + $0xac] ss:$16 sps:$4 sm:$0xff]  }
 0x3f2   :  { %v1511_v24 = vmul.f32 0.0, %v4977_v18  ;;  %v4979_v30 = vpop.eup %4978  ;;  %v7130_v18 = vld [vmem:[%s11179_s3 + $0xa8] ss:$16 sps:$4 sm:$0xff]  }
 0x3f4   :  { %v7056_v37 = vadd.f32 %v1512_v20, %v1511_v24  ;;  %v7058_v8 = vpop.f32.mrb[16].mxu0  ;;  %v7136_v20 = vld [vmem:[%s11179_s3 + $0xcc] ss:$16 sps:$4 sm:$0xff]  }
 0x3f5   :  { %v7060_v16 = vpop.f32.mrb[17].mxu0  ;;  %v7148_v24 = vld [vmem:[%s11179_s3 + $0xec] ss:$16 sps:$4 sm:$0xff]  }
 0x3f6   :  { %4980 = vtanh.f32 %v7056_v37  ;;  %v1650_v26 = vpop.f32.mrb[18].mxu0  ;;  %11679 = vst [vmem:[#allocation77_spill] sm:$0xff] %v7148_v24 }
 0x3f7   :  { %v1651_v28 = vpop.f32.mrb[19].mxu0  ;;  %v7154_v26 = vld [vmem:[%s11179_s3 + $0xe8] ss:$16 sps:$4 sm:$0xff]  }
 0x3f8   :  { %11680 = vst [vmem:[#allocation78_spill] sm:$0xff] %v7154_v26  ;;  %v7160_v28 = vld [vmem:[%s11181_s5 + $0xc] ss:$16 sps:$4 sm:$0xff]  }
 0x3f9   :  { %11681 = vst [vmem:[#allocation79_spill] sm:$0xff] %v7160_v28 }
 0x400   :  { %v4981_v32 = vpop.eup %4980 }
 0x401   :  { %v1515_v34 = vmul.f32 %v4981_v32, %v4979_v30  ;;  %v7168_v30 = vld [vmem:[%s11181_s5 + $0x8] ss:$16 sps:$4 sm:$0xff]   ;;  %v7174_v32 = vld [vmem:[%s11181_s5 + $0x2c] ss:$16 sps:$4 sm:$0xff]  }
 0x402   :  { %11682 = vst [vmem:[#allocation80_spill] sm:$0xff] %v7168_v30  ;;  %11683 = vst [vmem:[#allocation81_spill] sm:$0xff] %v7174_v32 }
 0x403   :  { %v7063_v36 = vpack.c.bf16 %v1515_v34, %v1515_v34  ;;  %v7192_v34 = vld [vmem:[%s11181_s5 + $0x48] ss:$16 sps:$4 sm:$0xff]  }
 0x404   :  { %11686 = vst [vmem:[#allocation84_spill] sm:$0xff] %v7192_v34 }
 0x405   :  { %4532 = vmatmul.mubr.bf16.vlgmr.msra.gmra.mrb[12].mxu1 %v7063_v36 }
 0x406   :  { %1654 = vmatpush1.bf16.msra.mxu1 %v7069_v40  ;;  %1685 = vmatprep.mubr.bf16.mxu1 %v11673_v35 }
 0x407   :  { %1655 = vmatprep.subr.bf16.mxu1 %v7076_v45 }
 0x40a   :  { %1656 = vmatpush1.bf16.msra.mxu1 %v7082_v47 }
 0x40b   :  { %1657 = vmatprep.subr.bf16.mxu1 %v7088_v49 }
 0x40e   :  { %1658 = vmatpush1.bf16.msra.mxu1 %v7094_v52 }
 0x40f   :  { %1659 = vmatprep.subr.bf16.mxu1 %v7100_v56 }
 0x412   :  { %1660 = vmatpush1.bf16.msra.mxu1 %v7106_v62 }
 0x413   :  { %1661 = vmatprep.subr.bf16.mxu1 %v7112_v3 }
 0x416   :  { %1662 = vmatpush1.bf16.msra.mxu1 %v7118_v13 }
 0x417   :  { %1663 = vmatprep.subr.bf16.mxu1 %v7124_v14 }
 0x41a   :  { %1664 = vmatpush1.bf16.msra.mxu1 %v7130_v18 }
 0x41b   :  { %1665 = vmatprep.subr.bf16.mxu1 %v7136_v20 }
 0x41e   :  { %1666 = vmatpush1.bf16.msra.mxu1 %v7142_v22 }
 0x41f   :  { %1667 = vmatprep.subr.bf16.mxu1 %v7148_v24 }
 0x422   :  { %1668 = vmatpush1.bf16.msra.mxu1 %v7154_v26 }
 0x423   :  { %1760 = vmatprep.subr.bf16.mxu1 %v7160_v28 }
 0x425   :  { %1686 = vmatmul.mubr.bf16.vlgmr.msra.gmra.mrb[16].mxu1 %v6442_v15  ;;  %v7180_v15 = vld [vmem:[%s11181_s5 + $0x28] ss:$16 sps:$4 sm:$0xff]  }
 0x426   :  { %1792 = vmatprep.mubr.bf16.mxu1 %v6839_v31  ;;  %1761 = vmatpush1.bf16.msra.mxu1 %v7168_v30  ;;  %11684 = vst [vmem:[#allocation82_spill] sm:$0xff] %v7180_v15  ;;  %v7186_v31 = vld [vmem:[%s11181_s5 + $0x4c] ss:$16 sps:$4 sm:$0xff]  }
 0x427   :  { %1762 = vmatprep.subr.bf16.mxu1 %v7174_v32  ;;  %11685 = vst [vmem:[#allocation83_spill] sm:$0xff] %v7186_v31  ;;  %v7198_v32 = vld [vmem:[%s11181_s5 + $0x6c] ss:$16 sps:$4 sm:$0xff]  }
 0x428   :  { %11687 = vst [vmem:[#allocation85_spill] sm:$0xff] %v7198_v32 }
 0x42a   :  { %1763 = vmatpush1.bf16.msra.mxu1 %v7180_v15  ;;  %v7204_v15 = vld [vmem:[%s11181_s5 + $0x68] ss:$16 sps:$4 sm:$0xff]  }
 0x42b   :  { %1764 = vmatprep.subr.bf16.mxu1 %v7186_v31  ;;  %11688 = vst [vmem:[#allocation86_spill] sm:$0xff] %v7204_v15  ;;  %v7210_v31 = vld [vmem:[%s11181_s5 + $0x8c] ss:$16 sps:$4 sm:$0xff]  }
 0x42c   :  { %11689 = vst [vmem:[#allocation87_spill] sm:$0xff] %v7210_v31 }
 0x42e   :  { %1765 = vmatpush1.bf16.msra.mxu1 %v7192_v34  ;;  %v7216_v34 = vld [vmem:[%s11181_s5 + $0x88] ss:$16 sps:$4 sm:$0xff]  }
 0x42f   :  { %1766 = vmatprep.subr.bf16.mxu1 %v7198_v32  ;;  %11690 = vst [vmem:[#allocation88_spill] sm:$0xff] %v7216_v34  ;;  %v7222_v32 = vld [vmem:[%s11181_s5 + $0xac] ss:$16 sps:$4 sm:$0xff]  }
 0x430   :  { %11691 = vst [vmem:[#allocation89_spill] sm:$0xff] %v7222_v32 }
 0x432   :  { %1767 = vmatpush1.bf16.msra.mxu1 %v7204_v15  ;;  %v7228_v15 = vld [vmem:[%s11181_s5 + $0xa8] ss:$16 sps:$4 sm:$0xff]  }
 0x433   :  { %1768 = vmatprep.subr.bf16.mxu1 %v7210_v31  ;;  %11692 = vst [vmem:[#allocation90_spill] sm:$0xff] %v7228_v15  ;;  %v7234_v31 = vld [vmem:[%s11181_s5 + $0xcc] ss:$16 sps:$4 sm:$0xff]  }
 0x434   :  { %11693 = vst [vmem:[#allocation91_spill] sm:$0xff] %v7234_v31 }
 0x436   :  { %1769 = vmatpush1.bf16.msra.mxu1 %v7216_v34  ;;  %v7240_v34 = vld [vmem:[%s11181_s5 + $0xc8] ss:$16 sps:$4 sm:$0xff]  }
 0x437   :  { %1770 = vmatprep.subr.bf16.mxu1 %v7222_v32  ;;  %11694 = vst [vmem:[#allocation92_spill] sm:$0xff] %v7240_v34  ;;  %v7246_v32 = vld [vmem:[%s11181_s5 + $0xec] ss:$16 sps:$4 sm:$0xff]  }
 0x438   :  { %11695 = vst [vmem:[#allocation93_spill] sm:$0xff] %v7246_v32 }
 0x43a   :  { %1771 = vmatpush1.bf16.msra.mxu1 %v7228_v15  ;;  %v7252_v15 = vld [vmem:[%s11181_s5 + $0xe8] ss:$16 sps:$4 sm:$0xff]  }
 0x43b   :  { %1772 = vmatprep.subr.bf16.mxu1 %v7234_v31  ;;  %11696 = vst [vmem:[#allocation94_spill] sm:$0xff] %v7252_v15  ;;  %v7258_v31 = vld [vmem:[%s11181_s5 + $0x10c] ss:$16 sps:$4 sm:$0xff]  }
 0x43c   :  { %11697 = vst [vmem:[#allocation95_spill] sm:$0xff] %v7258_v31 }
 0x43e   :  { %1773 = vmatpush1.bf16.msra.mxu1 %v7240_v34  ;;  %v7264_v34 = vld [vmem:[%s11181_s5 + $0x108] ss:$16 sps:$4 sm:$0xff]  }
 0x43f   :  { %1774 = vmatprep.subr.bf16.mxu1 %v7246_v32  ;;  %11698 = vst [vmem:[#allocation96_spill] sm:$0xff] %v7264_v34  ;;  %v7270_v32 = vld [vmem:[%s11181_s5 + $0x12c] ss:$16 sps:$4 sm:$0xff]  }
 0x440   :  { %11699 = vst [vmem:[#allocation97_spill] sm:$0xff] %v7270_v32 }
 0x442   :  { %1775 = vmatpush1.bf16.msra.mxu1 %v7252_v15  ;;  %v7276_v15 = vld [vmem:[%s11181_s5 + $0x128] ss:$16 sps:$4 sm:$0xff]  }
 0x443   :  { %1776 = vmatprep.subr.bf16.mxu1 %v7258_v31  ;;  %11700 = vst [vmem:[#allocation98_spill] sm:$0xff] %v7276_v15  ;;  %v7282_v31 = vld [vmem:[%s11181_s5 + $0x14c] ss:$16 sps:$4 sm:$0xff]  }
 0x444   :  { %11701 = vst [vmem:[#allocation99_spill] sm:$0xff] %v7282_v31 }
 0x446   :  { %1777 = vmatpush1.bf16.msra.mxu1 %v7264_v34  ;;  %v7288_v34 = vld [vmem:[%s11181_s5 + $0x148] ss:$16 sps:$4 sm:$0xff]  }
 0x447   :  { %1778 = vmatprep.subr.bf16.mxu1 %v7270_v32  ;;  %11702 = vst [vmem:[#allocation100_spill] sm:$0xff] %v7288_v34  ;;  %v7294_v32 = vld [vmem:[%s11181_s5 + $0x16c] ss:$16 sps:$4 sm:$0xff]  }
 0x448   :  { %11703 = vst [vmem:[#allocation101_spill] sm:$0xff] %v7294_v32 }
 0x44a   :  { %1779 = vmatpush1.bf16.msra.mxu1 %v7276_v15  ;;  %v7300_v15 = vld [vmem:[%s11181_s5 + $0x168] ss:$16 sps:$4 sm:$0xff]  }
 0x44b   :  { %1780 = vmatprep.subr.bf16.mxu1 %v7282_v31  ;;  %11704 = vst [vmem:[#allocation102_spill] sm:$0xff] %v7300_v15  ;;  %v7306_v31 = vld [vmem:[%s11181_s5 + $0x18c] ss:$16 sps:$4 sm:$0xff]  }
 0x44c   :  { %11705 = vst [vmem:[#allocation103_spill] sm:$0xff] %v7306_v31 }
 0x44e   :  { %1781 = vmatpush1.bf16.msra.mxu1 %v7288_v34  ;;  %v7312_v34 = vld [vmem:[%s11181_s5 + $0x188] ss:$16 sps:$4 sm:$0xff]  }
 0x44f   :  { %1782 = vmatprep.subr.bf16.mxu1 %v7294_v32  ;;  %11706 = vst [vmem:[#allocation104_spill] sm:$0xff] %v7312_v34 }
 0x452   :  { %1783 = vmatpush1.bf16.msra.mxu1 %v7300_v15 }
 0x453   :  { %1784 = vmatprep.subr.bf16.mxu1 %v7306_v31  ;;  %v7325_v31 = vld [vmem:[%s11188_s10] ss:$0 sm:$0xff] }
 0x454   :  { %11707 = vst [vmem:[#allocation105_spill] sm:$0xff] %v7325_v31 }
 0x456   :  { %1785 = vmatpush1.bf16.msra.mxu1 %v7312_v34 }
 0x457   :  { %1786 = vmatprep.subr.bf16.mxu1 %v6325_v41 }
 0x45a   :  { %1787 = vmatpush1.bf16.msra.mxu1 %v6336_v44 }
 0x45b   :  { %1788 = vmatprep.subr.bf16.mxu1 %v6348_v46 }
 0x45e   :  { %1789 = vmatpush1.bf16.msra.mxu1 %v6360_v48  ;;  %v1649_v48 = vadd.f32 %v7060_v16, %v6413_v7 }
 0x45f   :  { %1790 = vmatprep.subr.bf16.mxu1 %v6372_v50  ;;  %v11708_v50 = vld [vmem:[#allocation2_spill] sm:$0xff] }
 0x462   :  { %1791 = vmatpush1.bf16.msra.mxu1 %v6384_v53  ;;  %v1647_v53 = vadd.f32 %v7058_v8, %v11708_v50 }
 0x463   :  { %1867 = vmatprep.subr.bf16.mxu1 %v6393_v54  ;;  %v4345_v54 = vmul.f32 -1.442695, %v1649_v48 }
 0x464   :  { %v4344_v32 = vmul.f32 -1.442695, %v1647_v53 }
 0x465   :  { %4982 = vpow2.f32 %v4345_v54  ;;  %v11711_v54 = vld [vmem:[#allocation6_spill] sm:$0xff] }
 0x466   :  { %4984 = vpow2.f32 %v4344_v32 }
 0x46f   :  { %v4983_v30 = vpop.eup %4982 }
 0x470   :  { %v4985_v28 = vpop.eup %4984 }
 0x4d8   :  { %v1605_v34 = vpop.f32.mrb[12].mxu1 }
 0x4d9   :  { %v1606_v41 = vadd.f32 %v7325_v31, %v1605_v34  ;;  %v4533_v15 = vpop.f32.mrb[13].mxu1  ;;  %v1703_v34 = vadd.f32 1.0, %v4983_v30  ;;  %v11709_v31 = vld [vmem:[#allocation5_spill] sm:$0xff] }
 0x4da   :  { %v1608_v44 = vpop.f32.mrb[14].mxu1  ;;  %v1697_v15 = vadd.f32 1.0, %v4985_v28 }
 0x4db   :  { %1611 = vst [vmem:[%s11189_s11] sm:$0xff] %v1606_v41  ;;  %v4534_v46 = vpop.f32.mrb[15].mxu1  ;;  %4986 = vrcp.f32 %v1703_v34 }
 0x4dc   :  { %4988 = vrcp.f32 %v1697_v15  ;;  %v11710_v46 = vld [vmem:[#allocation4_spill] sm:$0xff] }
 0x4e5   :  { %v4987_v48 = vpop.eup %4986 }
 0x4e6   :  { %v4989_v53 = vpop.eup %4988  ;;  %v1713_v50 = vmul.f32 %v4987_v48, %v11711_v54  ;;  %v11718_v48 = vld [vmem:[#allocation12_spill] sm:$0xff]  ;;  %v11721_v54 = vld [vmem:[#allocation15_spill] sm:$0xff] }
 0x4f8   :  { %v1687_v44 = vpop.f32.mrb[16].mxu1 }
 0x4f9   :  { %v1688_v26 = vadd.f32 %v1687_v44, %v11709_v31  ;;  %v1689_v41 = vpop.f32.mrb[17].mxu1 }
 0x4fa   :  { %v1690_v24 = vadd.f32 %v1689_v41, %v11710_v46  ;;  %v1691_v16 = vpop.f32.mrb[18].mxu1 }
 0x4fb   :  { %4990 = vtanh.f32 %v1688_v26  ;;  %v1692_v7 = vpop.f32.mrb[19].mxu1  ;;  %v11716_v16 = vld [vmem:[#allocation10_spill] sm:$0xff] }
 0x4fc   :  { %v4346_v8 = vmul.f32 -1.442695, %v1690_v24  ;;  %v11713_v7 = vld [vmem:[#allocation7_spill] sm:$0xff]  ;;  %v11714_v24 = vld [vmem:[#allocation8_spill] sm:$0xff] }
 0x4fe   :  { %4992 = vpow2.f32 %v4346_v8  ;;  %v11717_v8 = vld [vmem:[#allocation11_spill] sm:$0xff] }
 0x505   :  { %v4991_v32 = vpop.eup %4990 }
 0x506   :  { %v1714_v30 = vmul.f32 %v4991_v32, %v4989_v53  ;;  %v11719_v53 = vld [vmem:[#allocation13_spill] sm:$0xff]  ;;  %v11720_v32 = vld [vmem:[#allocation14_spill] sm:$0xff] }
 0x508   :  { %v4993_v28 = vpop.eup %4992  ;;  %v7338_v22 = vadd.f32 %v1714_v30, %v1713_v50  ;;  %v11715_v50 = vld [vmem:[#allocation9_spill] sm:$0xff]  ;;  %v11722_v30 = vld [vmem:[#allocation16_spill] sm:$0xff] }
 0x509   :  { %v1710_v34 = vadd.f32 1.0, %v4993_v28  ;;  %v11724_v28 = vld [vmem:[#allocation18_spill] sm:$0xff] }
 0x50a   :  { %11712 = vst [vmem:[#allocation6_spill] sm:$0xff] %v7338_v22  ;;  %4994 = vtanh.f32 %v7338_v22 }
 0x50b   :  { %4996 = vrcp.f32 %v1710_v34  ;;  %v11725_v34 = vld [vmem:[#allocation19_spill] sm:$0xff] }
 0x514   :  { %v4995_v15 = vpop.eup %4994 }
 0x515   :  { %v4997_v44 = vpop.eup %4996 }
 0x516   :  { %v1717_v41 = vmul.f32 %v4997_v44, %v4995_v15  ;;  %v11726_v15 = vld [vmem:[#allocation20_spill] sm:$0xff]  ;;  %v11727_v44 = vld [vmem:[#allocation21_spill] sm:$0xff] }
 0x518   :  { %v7341_v26 = vpack.c.bf16 %v1717_v41, %v1717_v41  ;;  %v11728_v41 = vld [vmem:[#allocation22_spill] sm:$0xff] }
 0x51a   :  { %1752 = vmatmul.mubr.bf16.vlgmr.msra.gmra.mrb[20].mxu0 %v7341_v26  ;;  %1793 = vmatmul.mubr.bf16.vlgmr.msra.gmra.mrb[20].mxu1 %v7341_v26 }
 0x51b   :  { %1858 = vmatprep.mubr.bf16.mxu0 %v7063_v36  ;;  %1899 = vmatprep.mubr.bf16.mxu1 %v7063_v36  ;;  %v11723_v36 = vld [vmem:[#allocation17_spill] sm:$0xff] }
 0x51c   :  { %1868 = vmatpush1.bf16.msra.mxu1 %v11713_v7  ;;  %1827 = vmatpush1.bf16.msra.mxu0 %v11714_v24  ;;  %v11729_v7 = vld [vmem:[#allocation23_spill] sm:$0xff]  ;;  %v11730_v24 = vld [vmem:[#allocation24_spill] sm:$0xff] }
 0x51d   :  { %1869 = vmatprep.subr.bf16.mxu1 %v11715_v50  ;;  %1828 = vmatprep.subr.bf16.mxu0 %v11716_v16  ;;  %v11731_v50 = vld [vmem:[#allocation25_spill] sm:$0xff]  ;;  %v11732_v16 = vld [vmem:[#allocation26_spill] sm:$0xff] }
 0x520   :  { %1870 = vmatpush1.bf16.msra.mxu1 %v11717_v8  ;;  %1829 = vmatpush1.bf16.msra.mxu0 %v11718_v48  ;;  %v11733_v8 = vld [vmem:[#allocation27_spill] sm:$0xff]  ;;  %v11734_v48 = vld [vmem:[#allocation28_spill] sm:$0xff] }
 0x521   :  { %1871 = vmatprep.subr.bf16.mxu1 %v11719_v53  ;;  %1830 = vmatprep.subr.bf16.mxu0 %v11720_v32  ;;  %v11735_v53 = vld [vmem:[#allocation29_spill] sm:$0xff]  ;;  %v11736_v32 = vld [vmem:[#allocation30_spill] sm:$0xff] }
 0x524   :  { %1872 = vmatpush1.bf16.msra.mxu1 %v11721_v54  ;;  %1831 = vmatpush1.bf16.msra.mxu0 %v11722_v30  ;;  %v11737_v54 = vld [vmem:[#allocation31_spill] sm:$0xff]  ;;  %v11738_v30 = vld [vmem:[#allocation32_spill] sm:$0xff] }
 0x525   :  { %1873 = vmatprep.subr.bf16.mxu1 %v11723_v36  ;;  %1832 = vmatprep.subr.bf16.mxu0 %v11724_v28  ;;  %v11739_v36 = vld [vmem:[#allocation33_spill] sm:$0xff]  ;;  %v11740_v28 = vld [vmem:[#allocation34_spill] sm:$0xff] }
 0x528   :  { %1874 = vmatpush1.bf16.msra.mxu1 %v11725_v34  ;;  %1833 = vmatpush1.bf16.msra.mxu0 %v11726_v15  ;;  %v11741_v34 = vld [vmem:[#allocation35_spill] sm:$0xff]  ;;  %v11742_v15 = vld [vmem:[#allocation36_spill] sm:$0xff] }
 0x529   :  { %1875 = vmatprep.subr.bf16.mxu1 %v11727_v44  ;;  %1834 = vmatprep.subr.bf16.mxu0 %v11728_v41  ;;  %v11743_v44 = vld [vmem:[#allocation37_spill] sm:$0xff]  ;;  %v11744_v41 = vld [vmem:[#allocation38_spill] sm:$0xff] }
 0x52c   :  { %1876 = vmatpush1.bf16.msra.mxu1 %v11729_v7  ;;  %1835 = vmatpush1.bf16.msra.mxu0 %v11730_v24  ;;  %v11745_v7 = vld [vmem:[#allocation39_spill] sm:$0xff]  ;;  %v11746_v24 = vld [vmem:[#allocation40_spill] sm:$0xff] }
 0x52d   :  { %1877 = vmatprep.subr.bf16.mxu1 %v11731_v50  ;;  %1836 = vmatprep.subr.bf16.mxu0 %v11732_v16  ;;  %v11747_v50 = vld [vmem:[#allocation41_spill] sm:$0xff]  ;;  %v11748_v16 = vld [vmem:[#allocation42_spill] sm:$0xff] }
 0x530   :  { %1878 = vmatpush1.bf16.msra.mxu1 %v11733_v8  ;;  %1837 = vmatpush1.bf16.msra.mxu0 %v11734_v48  ;;  %v11749_v8 = vld [vmem:[#allocation43_spill] sm:$0xff]  ;;  %v11750_v48 = vld [vmem:[#allocation44_spill] sm:$0xff] }
 0x531   :  { %1879 = vmatprep.subr.bf16.mxu1 %v11735_v53  ;;  %1838 = vmatprep.subr.bf16.mxu0 %v11736_v32  ;;  %v11751_v53 = vld [vmem:[#allocation45_spill] sm:$0xff]  ;;  %v11752_v32 = vld [vmem:[#allocation46_spill] sm:$0xff] }
 0x534   :  { %1880 = vmatpush1.bf16.msra.mxu1 %v11737_v54  ;;  %1839 = vmatpush1.bf16.msra.mxu0 %v11738_v30  ;;  %v11753_v54 = vld [vmem:[#allocation47_spill] sm:$0xff]  ;;  %v11754_v30 = vld [vmem:[#allocation48_spill] sm:$0xff] }
 0x535   :  { %1881 = vmatprep.subr.bf16.mxu1 %v11739_v36  ;;  %1840 = vmatprep.subr.bf16.mxu0 %v11740_v28  ;;  %v11755_v36 = vld [vmem:[#allocation49_spill] sm:$0xff]  ;;  %v11756_v28 = vld [vmem:[#allocation50_spill] sm:$0xff] }
 0x538   :  { %1882 = vmatpush1.bf16.msra.mxu1 %v11741_v34  ;;  %1841 = vmatpush1.bf16.msra.mxu0 %v11742_v15  ;;  %v11757_v34 = vld [vmem:[#allocation51_spill] sm:$0xff]  ;;  %v11758_v15 = vld [vmem:[#allocation52_spill] sm:$0xff] }
 0x539   :  { %1883 = vmatprep.subr.bf16.mxu1 %v11743_v44  ;;  %1842 = vmatprep.subr.bf16.mxu0 %v11744_v41  ;;  %v11759_v44 = vld [vmem:[#allocation53_spill] sm:$0xff]  ;;  %v11760_v41 = vld [vmem:[#allocation54_spill] sm:$0xff] }
 0x53c   :  { %1884 = vmatpush1.bf16.msra.mxu1 %v11745_v7  ;;  %1843 = vmatpush1.bf16.msra.mxu0 %v11746_v24  ;;  %v11761_v7 = vld [vmem:[#allocation55_spill] sm:$0xff]  ;;  %v11762_v24 = vld [vmem:[#allocation56_spill] sm:$0xff] }
 0x53d   :  { %1885 = vmatprep.subr.bf16.mxu1 %v11747_v50  ;;  %1844 = vmatprep.subr.bf16.mxu0 %v11748_v16  ;;  %v11763_v50 = vld [vmem:[#allocation57_spill] sm:$0xff]  ;;  %v11764_v16 = vld [vmem:[#allocation58_spill] sm:$0xff] }
 0x540   :  { %1886 = vmatpush1.bf16.msra.mxu1 %v11749_v8  ;;  %1845 = vmatpush1.bf16.msra.mxu0 %v11750_v48  ;;  %v11765_v8 = vld [vmem:[#allocation59_spill] sm:$0xff]  ;;  %v11766_v48 = vld [vmem:[#allocation60_spill] sm:$0xff] }
 0x541   :  { %1887 = vmatprep.subr.bf16.mxu1 %v11751_v53  ;;  %1846 = vmatprep.subr.bf16.mxu0 %v11752_v32  ;;  %v11767_v53 = vld [vmem:[#allocation61_spill] sm:$0xff]  ;;  %v11768_v32 = vld [vmem:[#allocation62_spill] sm:$0xff] }
 0x544   :  { %1888 = vmatpush1.bf16.msra.mxu1 %v11753_v54  ;;  %1847 = vmatpush1.bf16.msra.mxu0 %v11754_v30  ;;  %v11769_v54 = vld [vmem:[#allocation63_spill] sm:$0xff]  ;;  %v11770_v30 = vld [vmem:[#allocation64_spill] sm:$0xff] }
 0x545   :  { %1889 = vmatprep.subr.bf16.mxu1 %v11755_v36  ;;  %1848 = vmatprep.subr.bf16.mxu0 %v11756_v28  ;;  %v11771_v36 = vld [vmem:[#allocation65_spill] sm:$0xff]  ;;  %v11772_v28 = vld [vmem:[#allocation66_spill] sm:$0xff] }
 0x548   :  { %1890 = vmatpush1.bf16.msra.mxu1 %v11757_v34  ;;  %1849 = vmatpush1.bf16.msra.mxu0 %v11758_v15  ;;  %v11773_v34 = vld [vmem:[#allocation67_spill] sm:$0xff]  ;;  %v11774_v15 = vld [vmem:[#allocation68_spill] sm:$0xff] }
 0x549   :  { %1891 = vmatprep.subr.bf16.mxu1 %v11759_v44  ;;  %1850 = vmatprep.subr.bf16.mxu0 %v11760_v41  ;;  %v11775_v44 = vld [vmem:[#allocation69_spill] sm:$0xff] }
 0x54c   :  { %1892 = vmatpush1.bf16.msra.mxu1 %v11761_v7  ;;  %1851 = vmatpush1.bf16.msra.mxu0 %v11762_v24  ;;  %v11776_v24 = vld [vmem:[#allocation70_spill] sm:$0xff] }
 0x54d   :  { %1893 = vmatprep.subr.bf16.mxu1 %v11763_v50  ;;  %1852 = vmatprep.subr.bf16.mxu0 %v11764_v16 }
 0x550   :  { %1894 = vmatpush1.bf16.msra.mxu1 %v11765_v8  ;;  %1853 = vmatpush1.bf16.msra.mxu0 %v11766_v48 }
 0x551   :  { %1895 = vmatprep.subr.bf16.mxu1 %v11767_v53  ;;  %1854 = vmatprep.subr.bf16.mxu0 %v11768_v32 }
 0x554   :  { %1896 = vmatpush1.bf16.msra.mxu1 %v11769_v54  ;;  %1855 = vmatpush1.bf16.msra.mxu0 %v11770_v30 }
 0x555   :  { %1897 = vmatprep.subr.bf16.mxu1 %v11771_v36  ;;  %1856 = vmatprep.subr.bf16.mxu0 %v11772_v28 }
 0x558   :  { %1898 = vmatpush1.bf16.msra.mxu1 %v11773_v34  ;;  %1857 = vmatpush1.bf16.msra.mxu0 %v11774_v15  ;;  %v11777_v34 = vld [vmem:[#allocation71_spill] sm:$0xff] }
 0x559   :  { %1975 = vmatprep.subr.bf16.mxu1 %v11775_v44  ;;  %4535 = vmatprep.subr.bf16.mxu0 %v11670_v39 }
 0x5ed   :  { %v1753_v41 = vpop.f32.mrb[20].mxu0  ;;  %v1794_v7 = vpop.f32.mrb[20].mxu1 }
 0x5ee   :  { %v1754_v50 = vadd.f32 %v1753_v41, %v11776_v24  ;;  %v1755_v16 = vpop.f32.mrb[21].mxu0  ;;  %v1796_v8 = vpop.f32.mrb[21].mxu1  ;;  %v1795_v22 = vadd.f32 %v1794_v7, %v6833_v5 }
 0x5ef   :  { %v1756_v48 = vadd.f32 %v1755_v16, %v6824_v19  ;;  %v1757_v53 = vpop.f32.mrb[22].mxu0  ;;  %v1798_v32 = vpop.f32.mrb[22].mxu1  ;;  %v1797_v15 = vadd.f32 %v1796_v8, %v11777_v34 }
 0x5f0   :  { %v4347_v54 = vmul.f32 -1.442695, %v1754_v50  ;;  %v1758_v30 = vpop.f32.mrb[23].mxu0  ;;  %v1799_v36 = vpop.f32.mrb[23].mxu1 }
 0x5f1   :  { %v4348_v28 = vmul.f32 -1.442695, %v1756_v48  ;;  %v4349_v44 = vmul.f32 -1.442695, %v1797_v15  ;;  %v7601_v15 = vld [vmem:[%s11181_s5 + $0x184] ss:$16 sps:$4 sm:$0xff]  }
 0x5f2   :  { %4998 = vpow2.f32 %v4347_v54  ;;  %11782 = vst [vmem:[#allocation8_spill] sm:$0xff] %v7601_v15 }
 0x5f3   :  { %5000 = vpow2.f32 %v4348_v28  ;;  %v7595_v28 = vld [vmem:[%s11181_s5 + $0x160] ss:$16 sps:$4 sm:$0xff]  }
 0x5f4   :  { %5002 = vpow2.f32 %v4349_v44  ;;  %11781 = vst [vmem:[#allocation7_spill] sm:$0xff] %v7595_v28  ;;  %v7607_v44 = vld [vmem:[%s11181_s5 + $0x180] ss:$16 sps:$4 sm:$0xff]  }
 0x5f5   :  { %5004 = vtanh.f32 %v1795_v22  ;;  %11783 = vst [vmem:[#allocation9_spill] sm:$0xff] %v7607_v44 }
 0x5fc   :  { %v4999_v46 = vpop.eup %4998 }
 0x5fd   :  { %v5001_v31 = vpop.eup %5000  ;;  %v1804_v41 = vadd.f32 1.0, %v4999_v46 }
 0x5fe   :  { %v1810_v24 = vadd.f32 1.0, %v5001_v31  ;;  %v5003_v16 = vpop.eup %5002  ;;  %v7583_v31 = vld [vmem:[%s11181_s5 + $0x140] ss:$16 sps:$4 sm:$0xff]  }
 0x5ff   :  { %5006 = vrcp.f32 %v1804_v41  ;;  %v5005_v50 = vpop.eup %5004  ;;  %v1817_v54 = vadd.f32 1.0, %v5003_v16  ;;  %v7613_v41 = vld [vmem:[%s11181_s5 + $0x1a4] ss:$16 sps:$4 sm:$0xff]   ;;  %v7619_v16 = vld [vmem:[%s11181_s5 + $0x1a0] ss:$16 sps:$4 sm:$0xff]  }
 0x600   :  { %5008 = vrcp.f32 %v1810_v24  ;;  %v7589_v24 = vld [vmem:[%s11181_s5 + $0x164] ss:$16 sps:$4 sm:$0xff]   ;;  %11784 = vst [vmem:[#allocation10_spill] sm:$0xff] %v7613_v41  ;;  %11785 = vst [vmem:[#allocation11_spill] sm:$0xff] %v7619_v16 }
 0x601   :  { %5010 = vrcp.f32 %v1817_v54  ;;  %v7649_v54 = vld [vmem:[%s11183_s7 + $0x4] ss:$16 sps:$4 sm:$0xff]  }
 0x602   :  { %11790 = vst [vmem:[#allocation16_spill] sm:$0xff] %v7649_v54 }
 0x609   :  { %v5007_v53 = vpop.eup %5006 }
 0x60a   :  { %v5009_v32 = vpop.eup %5008  ;;  %v1821_v48 = vmul.f32 %v5007_v53, %v5005_v50  ;;  %v7625_v50 = vld [vmem:[%s11181_s5 + $0x1c4] ss:$16 sps:$4 sm:$0xff]   ;;  %v7631_v53 = vld [vmem:[%s11181_s5 + $0x1c0] ss:$16 sps:$4 sm:$0xff]  }
 0x60b   :  { %v1820_v30 = vmul.f32 %v5009_v32, %v6836_v33  ;;  %v5011_v7 = vpop.eup %5010  ;;  %v11778_v33 = vld [vmem:[#allocation72_spill] sm:$0xff]  ;;  %11786 = vst [vmem:[#allocation12_spill] sm:$0xff] %v7625_v50  ;;  %11787 = vst [vmem:[#allocation13_spill] sm:$0xff] %v7631_v53 }
 0x60c   :  { %v7637_v32 = vld [vmem:[%s11181_s5 + $0x1e4] ss:$16 sps:$4 sm:$0xff]  }
 0x60d   :  { %v7416_v8 = vadd.f32 %v1821_v48, %v1820_v30  ;;  %11788 = vst [vmem:[#allocation14_spill] sm:$0xff] %v7637_v32  ;;  %v7643_v48 = vld [vmem:[%s11181_s5 + $0x1e0] ss:$16 sps:$4 sm:$0xff]  }
 0x60e   :  { %11789 = vst [vmem:[#allocation15_spill] sm:$0xff] %v7643_v48 }
 0x60f   :  { %5012 = vtanh.f32 %v7416_v8 }
 0x619   :  { %v5013_v46 = vpop.eup %5012 }
 0x61a   :  { %v1824_v36 = vmul.f32 %v5013_v46, %v5011_v7 }
 0x61c   :  { %v7419_v22 = vpack.c.bf16 %v1824_v36, %v1824_v36 }
 0x61e   :  { %1859 = vmatmul.mubr.bf16.vlgmr.msra.gmra.mrb[24].mxu0 %v7419_v22  ;;  %1900 = vmatmul.mubr.bf16.vlgmr.msra.gmra.mrb[24].mxu1 %v7419_v22 }
 0x61f   :  { %1976 = vmatpush1.bf16.msra.mxu1 %v6846_v43  ;;  %2007 = vmatprep.mubr.bf16.mxu1 %v11673_v35  ;;  %v11779_v43 = vld [vmem:[#allocation73_spill] sm:$0xff] }
 0x620   :  { %1977 = vmatprep.subr.bf16.mxu1 %v6853_v21  ;;  %4536 = vmatpush3.bf16.msra.mxu0 %v6979_v51  ;;  %v11780_v21 = vld [vmem:[#allocation74_spill] sm:$0xff] }
 0x621   :  { %4537 = vmatprep.subr.bf16.mxu0 %v11670_v39  ;;  %4551 = vmatprep.mubr.msk.bf16.mxu0 %vm5885_vm0, %v11670_v39  ;;  %v7529_v51 = vld [vmem:[%s11181_s5 + $0xc4] ss:$16 sps:$4 sm:$0xff]  }
 0x623   :  { %1978 = vmatpush1.bf16.msra.mxu1 %v6861_v25  ;;  %v7463_v25 = vld [vmem:[%s11181_s5] ss:$16 sps:$4 sm:$0xff]  }
 0x624   :  { %1979 = vmatprep.subr.bf16.mxu1 %v6867_v9  ;;  %4538 = vmatpush3.bf16.msra.mxu0 %v6986_v55  ;;  %v7469_v9 = vld [vmem:[%s11181_s5 + $0x24] ss:$16 sps:$4 sm:$0xff]   ;;  %v7535_v55 = vld [vmem:[%s11181_s5 + $0xc0] ss:$16 sps:$4 sm:$0xff]  }
 0x625   :  { %4539 = vmatprep.subr.bf16.mxu0 %v11670_v39 }
 0x627   :  { %1980 = vmatpush1.bf16.msra.mxu1 %v6873_v17  ;;  %v7475_v17 = vld [vmem:[%s11181_s5 + $0x20] ss:$16 sps:$4 sm:$0xff]  }
 0x628   :  { %1981 = vmatprep.subr.bf16.mxu1 %v6879_v29  ;;  %4540 = vmatpush3.bf16.msra.mxu0 %v6993_v57  ;;  %v7481_v29 = vld [vmem:[%s11181_s5 + $0x44] ss:$16 sps:$4 sm:$0xff]  }
 0x629   :  { %4541 = vmatprep.subr.bf16.mxu0 %v11670_v39  ;;  %v7541_v57 = vld [vmem:[%s11181_s5 + $0xe4] ss:$16 sps:$4 sm:$0xff]  }
 0x62b   :  { %1982 = vmatpush1.bf16.msra.mxu1 %v6885_v0  ;;  %v7487_v0 = vld [vmem:[%s11181_s5 + $0x40] ss:$16 sps:$4 sm:$0xff]  }
 0x62c   :  { %1983 = vmatprep.subr.bf16.mxu1 %v6891_v1  ;;  %4542 = vmatpush3.bf16.msra.mxu0 %v7000_v59  ;;  %v7493_v1 = vld [vmem:[%s11181_s5 + $0x64] ss:$16 sps:$4 sm:$0xff]   ;;  %v7547_v59 = vld [vmem:[%s11181_s5 + $0xe0] ss:$16 sps:$4 sm:$0xff]  }
 0x62d   :  { %4543 = vmatprep.subr.bf16.mxu0 %v11670_v39 }
 0x62f   :  { %1984 = vmatpush1.bf16.msra.mxu1 %v6897_v23  ;;  %v7499_v23 = vld [vmem:[%s11181_s5 + $0x60] ss:$16 sps:$4 sm:$0xff]  }
 0x630   :  { %1985 = vmatprep.subr.bf16.mxu1 %v11778_v33  ;;  %4544 = vmatpush3.bf16.msra.mxu0 %v7007_v61  ;;  %v7553_v61 = vld [vmem:[%s11181_s5 + $0x104] ss:$16 sps:$4 sm:$0xff]  }
 0x631   :  { %4545 = vmatprep.subr.bf16.mxu0 %v11670_v39 }
 0x633   :  { %1986 = vmatpush1.bf16.msra.mxu1 %v11779_v43 }
 0x634   :  { %1987 = vmatprep.subr.bf16.mxu1 %v11780_v21  ;;  %4546 = vmatpush3.bf16.msra.mxu0 %v7014_v63  ;;  %v7559_v63 = vld [vmem:[%s11181_s5 + $0x100] ss:$16 sps:$4 sm:$0xff]  }
 0x635   :  { %4547 = vmatprep.subr.bf16.mxu0 %v11670_v39 }
 0x637   :  { %1988 = vmatpush1.bf16.msra.mxu1 %v6921_v60  ;;  %v7523_v60 = vld [vmem:[%s11181_s5 + $0xa0] ss:$16 sps:$4 sm:$0xff]  }
 0x638   :  { %1989 = vmatprep.subr.bf16.mxu1 %v6927_v27  ;;  %4548 = vmatpush3.bf16.msra.mxu0 %v7021_v2  ;;  %v7505_v27 = vld [vmem:[%s11181_s5 + $0x84] ss:$16 sps:$4 sm:$0xff]  }
 0x639   :  { %4549 = vmatprep.subr.bf16.mxu0 %v11670_v39  ;;  %v7565_v2 = vld [vmem:[%s11181_s5 + $0x124] ss:$16 sps:$4 sm:$0xff]  }
 0x63b   :  { %1990 = vmatpush1.bf16.msra.mxu1 %v6933_v58  ;;  %v7511_v58 = vld [vmem:[%s11181_s5 + $0x80] ss:$16 sps:$4 sm:$0xff]  }
 0x63c   :  { %4550 = vmatpush3.bf16.msra.mxu0 %v7028_v4  ;;  %2082 = vmatprep.subr.bf16.mxu1 %v6939_v11  ;;  %v7517_v11 = vld [vmem:[%s11181_s5 + $0xa4] ss:$16 sps:$4 sm:$0xff]   ;;  %v7571_v4 = vld [vmem:[%s11181_s5 + $0x120] ss:$16 sps:$4 sm:$0xff]  }
 0x63d   :  { %2016 = vmatprep.subr.bf16.mxu0 %v7034_v6  ;;  %v7577_v6 = vld [vmem:[%s11181_s5 + $0x144] ss:$16 sps:$4 sm:$0xff]  }
 0x63e   :  { %2008 = vmatmul.mubr.bf16.vlgmr.msra.gmra.mrb[28].mxu1 %v7341_v26 }
 0x63f   :  { %2114 = vmatprep.mubr.bf16.mxu1 %v7419_v22  ;;  %2083 = vmatpush1.bf16.msra.mxu1 %v7463_v25 }
 0x640   :  { %2084 = vmatprep.subr.bf16.mxu1 %v7469_v9 }
 0x643   :  { %2085 = vmatpush1.bf16.msra.mxu1 %v7475_v17 }
 0x644   :  { %2086 = vmatprep.subr.bf16.mxu1 %v7481_v29 }
 0x647   :  { %2087 = vmatpush1.bf16.msra.mxu1 %v7487_v0 }
 0x648   :  { %2088 = vmatprep.subr.bf16.mxu1 %v7493_v1 }
 0x64b   :  { %2089 = vmatpush1.bf16.msra.mxu1 %v7499_v23 }
 0x64c   :  { %2090 = vmatprep.subr.bf16.mxu1 %v7505_v27 }
 0x64f   :  { %2091 = vmatpush1.bf16.msra.mxu1 %v7511_v58 }
 0x650   :  { %2092 = vmatprep.subr.bf16.mxu1 %v7517_v11 }
 0x653   :  { %2093 = vmatpush1.bf16.msra.mxu1 %v7523_v60 }
 0x654   :  { %2094 = vmatprep.subr.bf16.mxu1 %v7529_v51 }
 0x657   :  { %2095 = vmatpush1.bf16.msra.mxu1 %v7535_v55 }
 0x658   :  { %2096 = vmatprep.subr.bf16.mxu1 %v7541_v57 }
 0x65b   :  { %2097 = vmatpush1.bf16.msra.mxu1 %v7547_v59 }
 0x65c   :  { %2098 = vmatprep.subr.bf16.mxu1 %v7553_v61 }
 0x65f   :  { %2099 = vmatpush1.bf16.msra.mxu1 %v7559_v63 }
 0x660   :  { %2100 = vmatprep.subr.bf16.mxu1 %v7565_v2 }
 0x663   :  { %2101 = vmatpush1.bf16.msra.mxu1 %v7571_v4 }
 0x664   :  { %2102 = vmatprep.subr.bf16.mxu1 %v7577_v6 }
 0x667   :  { %2103 = vmatpush1.bf16.msra.mxu1 %v7583_v31 }
 0x668   :  { %2104 = vmatprep.subr.bf16.mxu1 %v7589_v24 }
 0x66b   :  { %2105 = vmatpush1.bf16.msra.mxu1 %v7595_v28 }
 0x66c   :  { %2106 = vmatprep.subr.bf16.mxu1 %v7601_v15 }
 0x66f   :  { %2107 = vmatpush1.bf16.msra.mxu1 %v7607_v44 }
 0x670   :  { %2108 = vmatprep.subr.bf16.mxu1 %v7613_v41 }
 0x673   :  { %2109 = vmatpush1.bf16.msra.mxu1 %v7619_v16 }
 0x674   :  { %2110 = vmatprep.subr.bf16.mxu1 %v7625_v50 }
 0x677   :  { %2111 = vmatpush1.bf16.msra.mxu1 %v7631_v53 }
 0x678   :  { %2112 = vmatprep.subr.bf16.mxu1 %v7637_v32 }
 0x67b   :  { %2113 = vmatpush1.bf16.msra.mxu1 %v7643_v48 }
 0x67c   :  { %2189 = vmatprep.subr.bf16.mxu1 %v7649_v54 }
 0x6f1   :  { %v1860_v30 = vpop.f32.mrb[24].mxu0  ;;  %v1901_v7 = vpop.f32.mrb[24].mxu1 }
 0x6f2   :  { %v1861_v46 = vadd.f32 %v1860_v30, %v7041_v10  ;;  %v1862_v36 = vpop.f32.mrb[25].mxu0  ;;  %v1903_v33 = vpop.f32.mrb[25].mxu1  ;;  %v1902_v54 = vadd.f32 %v1901_v7, %v7053_v42 }
 0x6f3   :  { %v1863_v43 = vadd.f32 %v1862_v36, %v7044_v12  ;;  %v1864_v21 = vpop.f32.mrb[26].mxu0  ;;  %v1905_v32 = vpop.f32.mrb[26].mxu1  ;;  %v1904_v41 = vadd.f32 %v1903_v33, %v7049_v38 }
 0x6f4   :  { %v4350_v53 = vmul.f32 -1.442695, %v1861_v46  ;;  %v1865_v50 = vpop.f32.mrb[27].mxu0  ;;  %v1906_v48 = vpop.f32.mrb[27].mxu1  ;;  %v11806_v21 = vld [vmem:[#allocation91_spill] sm:$0xff] }
 0x6f5   :  { %v4351_v16 = vmul.f32 -1.442695, %v1863_v43  ;;  %v4352_v44 = vmul.f32 -1.442695, %v1904_v41 }
 0x6f6   :  { %5014 = vpow2.f32 %v4350_v53 }
 0x6f7   :  { %5016 = vpow2.f32 %v4351_v16 }
 0x6f8   :  { %5018 = vpow2.f32 %v4352_v44 }
 0x6f9   :  { %5020 = vtanh.f32 %v1902_v54 }
 0x700   :  { %v5015_v15 = vpop.eup %5014 }
 0x701   :  { %v5017_v28 = vpop.eup %5016  ;;  %v1911_v30 = vadd.f32 1.0, %v5015_v15 }
 0x702   :  { %v1917_v10 = vadd.f32 1.0, %v5017_v28  ;;  %v5019_v32 = vpop.eup %5018 }
 0x703   :  { %5022 = vrcp.f32 %v1911_v30  ;;  %v5021_v46 = vpop.eup %5020  ;;  %v1924_v53 = vadd.f32 1.0, %v5019_v32  ;;  %v11807_v30 = vld [vmem:[#allocation92_spill] sm:$0xff]  ;;  %v11808_v32 = vld [vmem:[#allocation93_spill] sm:$0xff] }
 0x704   :  { %5024 = vrcp.f32 %v1917_v10 }
 0x705   :  { %5026 = vrcp.f32 %v1924_v53  ;;  %v11813_v53 = vld [vmem:[#allocation98_spill] sm:$0xff] }
 0x70d   :  { %v5023_v50 = vpop.eup %5022 }
 0x70e   :  { %v5025_v48 = vpop.eup %5024  ;;  %v1928_v36 = vmul.f32 %v5023_v50, %v5021_v46  ;;  %v11809_v46 = vld [vmem:[#allocation94_spill] sm:$0xff]  ;;  %v11810_v50 = vld [vmem:[#allocation95_spill] sm:$0xff] }
 0x70f   :  { %v1927_v16 = vmul.f32 %v5025_v48, %v7056_v37  ;;  %v5027_v10 = vpop.eup %5026  ;;  %v11791_v37 = vld [vmem:[#allocation76_spill] sm:$0xff] }
 0x710   :  { %v11811_v48 = vld [vmem:[#allocation96_spill] sm:$0xff] }
 0x711   :  { %v7657_v33 = vadd.f32 %v1928_v36, %v1927_v16  ;;  %v7659_v41 = vpop.f32.mrb[28].mxu1  ;;  %v11812_v36 = vld [vmem:[#allocation97_spill] sm:$0xff]  ;;  %v11814_v16 = vld [vmem:[#allocation99_spill] sm:$0xff] }
 0x712   :  { %v7661_v7 = vpop.f32.mrb[29].mxu1 }
 0x713   :  { %v2013_v15 = vpop.f32.mrb[30].mxu1  ;;  %5028 = vtanh.f32 %v7657_v33 }
 0x714   :  { %v2014_v28 = vpop.f32.mrb[31].mxu1  ;;  %v11815_v15 = vld [vmem:[#allocation100_spill] sm:$0xff] }
 0x715   :  { %v11816_v28 = vld [vmem:[#allocation101_spill] sm:$0xff] }
 0x71d   :  { %v5029_v44 = vpop.eup %5028 }
 0x71e   :  { %v1931_v54 = vmul.f32 %v5029_v44, %v5027_v10  ;;  %v11817_v10 = vld [vmem:[#allocation102_spill] sm:$0xff]  ;;  %v11818_v44 = vld [vmem:[#allocation103_spill] sm:$0xff] }
 0x720   :  { %v7664_v43 = vpack.c.bf16 %v1931_v54, %v1931_v54  ;;  %v11819_v54 = vld [vmem:[#allocation104_spill] sm:$0xff] }
 0x722   :  { %4552 = vmatmul.mubr.bf16.vlgmr.msra.gmra.mrb[28].mxu0 %v7664_v43 }
 0x723   :  { %2017 = vmatpush1.bf16.msra.mxu0 %v7069_v40  ;;  %2048 = vmatprep.mubr.bf16.mxu0 %v11673_v35  ;;  %v11792_v40 = vld [vmem:[#allocation77_spill] sm:$0xff] }
 0x724   :  { %2018 = vmatprep.subr.bf16.mxu0 %v7076_v45  ;;  %v11793_v45 = vld [vmem:[#allocation78_spill] sm:$0xff] }
 0x727   :  { %2019 = vmatpush1.bf16.msra.mxu0 %v7082_v47  ;;  %v11794_v47 = vld [vmem:[#allocation79_spill] sm:$0xff] }
 0x728   :  { %2020 = vmatprep.subr.bf16.mxu0 %v7088_v49  ;;  %v11795_v49 = vld [vmem:[#allocation80_spill] sm:$0xff] }
 0x72b   :  { %2021 = vmatpush1.bf16.msra.mxu0 %v7094_v52  ;;  %v11796_v52 = vld [vmem:[#allocation81_spill] sm:$0xff] }
 0x72c   :  { %2022 = vmatprep.subr.bf16.mxu0 %v7100_v56  ;;  %v11797_v56 = vld [vmem:[#allocation82_spill] sm:$0xff] }
 0x72f   :  { %2023 = vmatpush1.bf16.msra.mxu0 %v7106_v62  ;;  %v11798_v62 = vld [vmem:[#allocation83_spill] sm:$0xff] }
 0x730   :  { %2024 = vmatprep.subr.bf16.mxu0 %v7112_v3  ;;  %v11799_v3 = vld [vmem:[#allocation84_spill] sm:$0xff] }
 0x733   :  { %2025 = vmatpush1.bf16.msra.mxu0 %v7118_v13  ;;  %v11800_v13 = vld [vmem:[#allocation85_spill] sm:$0xff] }
 0x734   :  { %2026 = vmatprep.subr.bf16.mxu0 %v7124_v14  ;;  %v11801_v14 = vld [vmem:[#allocation86_spill] sm:$0xff] }
 0x737   :  { %2027 = vmatpush1.bf16.msra.mxu0 %v7130_v18  ;;  %v11802_v18 = vld [vmem:[#allocation87_spill] sm:$0xff] }
 0x738   :  { %2028 = vmatprep.subr.bf16.mxu0 %v7136_v20  ;;  %v11803_v20 = vld [vmem:[#allocation88_spill] sm:$0xff] }
 0x73b   :  { %2029 = vmatpush1.bf16.msra.mxu0 %v11791_v37  ;;  %v7714_v37 = vld [vmem:[%s11181_s5 + $0x1ac] ss:$16 sps:$4 sm:$0xff]  }
 0x73c   :  { %2030 = vmatprep.subr.bf16.mxu0 %v11792_v40  ;;  %v7720_v40 = vld [vmem:[%s11181_s5 + $0x1a8] ss:$16 sps:$4 sm:$0xff]  }
 0x73f   :  { %2031 = vmatpush1.bf16.msra.mxu0 %v11793_v45  ;;  %v7726_v45 = vld [vmem:[%s11181_s5 + $0x1cc] ss:$16 sps:$4 sm:$0xff]  }
 0x740   :  { %2123 = vmatprep.subr.bf16.mxu0 %v11794_v47  ;;  %v7732_v47 = vld [vmem:[%s11181_s5 + $0x1c8] ss:$16 sps:$4 sm:$0xff]  }
 0x742   :  { %2049 = vmatmul.mubr.bf16.vlgmr.msra.gmra.mrb[32].mxu0 %v7341_v26  ;;  %v11804_v26 = vld [vmem:[#allocation89_spill] sm:$0xff] }
 0x743   :  { %2155 = vmatprep.mubr.bf16.mxu0 %v7419_v22  ;;  %2124 = vmatpush1.bf16.msra.mxu0 %v11795_v49  ;;  %v11805_v22 = vld [vmem:[#allocation90_spill] sm:$0xff]  ;;  %v7738_v49 = vld [vmem:[%s11181_s5 + $0x1ec] ss:$16 sps:$4 sm:$0xff]  }
 0x744   :  { %2125 = vmatprep.subr.bf16.mxu0 %v11796_v52  ;;  %v7744_v52 = vld [vmem:[%s11181_s5 + $0x1e8] ss:$16 sps:$4 sm:$0xff]  }
 0x747   :  { %2126 = vmatpush1.bf16.msra.mxu0 %v11797_v56  ;;  %v7750_v56 = vld [vmem:[%s11183_s7 + $0xc] ss:$16 sps:$4 sm:$0xff]  }
 0x748   :  { %2127 = vmatprep.subr.bf16.mxu0 %v11798_v62 }
 0x74b   :  { %2128 = vmatpush1.bf16.msra.mxu0 %v11799_v3  ;;  %v11820_v3 = vld [vmem:[#allocation105_spill] sm:$0xff] }
 0x74c   :  { %2129 = vmatprep.subr.bf16.mxu0 %v11800_v13 }
 0x74f   :  { %2130 = vmatpush1.bf16.msra.mxu0 %v11801_v14 }
 0x750   :  { %2131 = vmatprep.subr.bf16.mxu0 %v11802_v18 }
 0x753   :  { %2132 = vmatpush1.bf16.msra.mxu0 %v11803_v20 }
 0x754   :  { %2133 = vmatprep.subr.bf16.mxu0 %v11804_v26  ;;  %v11821_v26 = vld [vmem:[#allocation3_spill] sm:$0xff] }
 0x757   :  { %2134 = vmatpush1.bf16.msra.mxu0 %v11805_v22  ;;  %v2012_v22 = vadd.f32 %v7661_v7, %v11821_v26 }
 0x758   :  { %2135 = vmatprep.subr.bf16.mxu0 %v11806_v21  ;;  %v11822_v21 = vld [vmem:[#allocation2_spill] sm:$0xff] }
 0x75b   :  { %2136 = vmatpush1.bf16.msra.mxu0 %v11807_v30  ;;  %v2010_v30 = vadd.f32 %v7659_v41, %v11822_v21 }
 0x75c   :  { %2137 = vmatprep.subr.bf16.mxu0 %v11808_v32  ;;  %v4355_v32 = vmul.f32 -1.442695, %v2012_v22 }
 0x75e   :  { %5030 = vpow2.f32 %v4355_v32 }
 0x75f   :  { %2138 = vmatpush1.bf16.msra.mxu0 %v11809_v46  ;;  %v4354_v46 = vmul.f32 -1.442695, %v2010_v30 }
 0x760   :  { %2139 = vmatprep.subr.bf16.mxu0 %v11810_v50 }
 0x761   :  { %5032 = vpow2.f32 %v4354_v46 }
 0x763   :  { %2140 = vmatpush1.bf16.msra.mxu0 %v11811_v48 }
 0x764   :  { %2141 = vmatprep.subr.bf16.mxu0 %v11812_v36 }
 0x767   :  { %2142 = vmatpush1.bf16.msra.mxu0 %v11813_v53 }
 0x768   :  { %2143 = vmatprep.subr.bf16.mxu0 %v11814_v16  ;;  %v5031_v50 = vpop.eup %5030 }
 0x769   :  { %v2066_v36 = vadd.f32 1.0, %v5031_v50 }
 0x76b   :  { %2144 = vmatpush1.bf16.msra.mxu0 %v11815_v15  ;;  %v5033_v48 = vpop.eup %5032  ;;  %5034 = vrcp.f32 %v2066_v36  ;;  %v11823_v15 = vld [vmem:[#allocation5_spill] sm:$0xff] }
 0x76c   :  { %2145 = vmatprep.subr.bf16.mxu0 %v11816_v28  ;;  %v2060_v53 = vadd.f32 1.0, %v5033_v48 }
 0x76e   :  { %5036 = vrcp.f32 %v2060_v53 }
 0x76f   :  { %2146 = vmatpush1.bf16.msra.mxu0 %v11817_v10 }
 0x770   :  { %2147 = vmatprep.subr.bf16.mxu0 %v11818_v44  ;;  %v11824_v44 = vld [vmem:[#allocation4_spill] sm:$0xff] }
 0x773   :  { %2148 = vmatpush1.bf16.msra.mxu0 %v11819_v54 }
 0x774   :  { %2149 = vmatprep.subr.bf16.mxu0 %v7714_v37 }
 0x777   :  { %2150 = vmatpush1.bf16.msra.mxu0 %v7720_v40 }
 0x778   :  { %2151 = vmatprep.subr.bf16.mxu0 %v7726_v45 }
 0x77b   :  { %2152 = vmatpush1.bf16.msra.mxu0 %v7732_v47 }
 0x77c   :  { %2153 = vmatprep.subr.bf16.mxu0 %v7738_v49 }
 0x77f   :  { %2154 = vmatpush1.bf16.msra.mxu0 %v7744_v52 }
 0x780   :  { %2230 = vmatprep.subr.bf16.mxu0 %v7750_v56 }
 0x7f5   :  { %v1967_v62 = vpop.f32.mrb[28].mxu0 }
 0x7f6   :  { %v1968_v13 = vadd.f32 %v11820_v3, %v1967_v62  ;;  %v4553_v14 = vpop.f32.mrb[29].mxu0  ;;  %v5035_v3 = vpop.eup %5034 }
 0x7f7   :  { %v1970_v18 = vpop.f32.mrb[30].mxu0 }
 0x7f8   :  { %4353 = vst [vmem:[%s11189_s11 + $0x8] sm:$0xff] %v1968_v13  ;;  %v4554_v20 = vpop.f32.mrb[31].mxu0  ;;  %v5037_v13 = vpop.eup %5036  ;;  %v11825_v18 = vld [vmem:[#allocation6_spill] sm:$0xff] }
 0x7f9   :  { %v2076_v20 = vmul.f32 %v5035_v3, %v11825_v18  ;;  %v7824_v3 = vld [vmem:[%s11183_s7 + $0x48] ss:$16 sps:$4 sm:$0xff]   ;;  %v7842_v18 = vld [vmem:[%s11183_s7 + $0x64] ss:$16 sps:$4 sm:$0xff]  }
 0x7fa   :  { %11833 = vst [vmem:[#allocation24_spill] sm:$0xff] %v7824_v3  ;;  %11836 = vst [vmem:[#allocation27_spill] sm:$0xff] %v7842_v18 }
 0x815   :  { %v2050_v16 = vpop.f32.mrb[32].mxu0 }
 0x816   :  { %v2051_v28 = vadd.f32 %v2050_v16, %v11823_v15  ;;  %v2052_v10 = vpop.f32.mrb[33].mxu0  ;;  %v7776_v16 = vld [vmem:[%s11183_s7 + $0x8] ss:$16 sps:$4 sm:$0xff]  }
 0x817   :  { %v2053_v54 = vadd.f32 %v2052_v10, %v11824_v44  ;;  %v2054_v7 = vpop.f32.mrb[34].mxu0  ;;  %v7788_v10 = vld [vmem:[%s11183_s7 + $0x2c] ss:$16 sps:$4 sm:$0xff]  }
 0x818   :  { %5038 = vtanh.f32 %v2051_v28  ;;  %v2055_v62 = vpop.f32.mrb[35].mxu0  ;;  %v7782_v28 = vld [vmem:[%s11183_s7] ss:$16 sps:$4 sm:$0xff]   ;;  %11827 = vst [vmem:[#allocation18_spill] sm:$0xff] %v7788_v10 }
 0x819   :  { %v4356_v41 = vmul.f32 -1.442695, %v2053_v54  ;;  %11826 = vst [vmem:[#allocation17_spill] sm:$0xff] %v7782_v28  ;;  %v7800_v54 = vld [vmem:[%s11183_s7 + $0x28] ss:$16 sps:$4 sm:$0xff]  }
 0x81a   :  { %11829 = vst [vmem:[#allocation20_spill] sm:$0xff] %v7800_v54  ;;  %v7806_v7 = vld [vmem:[%s11183_s7 + $0x20] ss:$16 sps:$4 sm:$0xff]   ;;  %v7812_v62 = vld [vmem:[%s11183_s7 + $0x4c] ss:$16 sps:$4 sm:$0xff]  }
 0x81b   :  { %5040 = vpow2.f32 %v4356_v41  ;;  %11830 = vst [vmem:[#allocation21_spill] sm:$0xff] %v7806_v7  ;;  %11831 = vst [vmem:[#allocation22_spill] sm:$0xff] %v7812_v62  ;;  %v7818_v41 = vld [vmem:[%s11183_s7 + $0x44] ss:$16 sps:$4 sm:$0xff]  }
 0x81c   :  { %11832 = vst [vmem:[#allocation23_spill] sm:$0xff] %v7818_v41 }
 0x822   :  { %v5039_v14 = vpop.eup %5038 }
 0x823   :  { %v2077_v22 = vmul.f32 %v5039_v14, %v5037_v13  ;;  %v7830_v13 = vld [vmem:[%s11183_s7 + $0x40] ss:$16 sps:$4 sm:$0xff]   ;;  %v7836_v14 = vld [vmem:[%s11183_s7 + $0x6c] ss:$16 sps:$4 sm:$0xff]  }
 0x824   :  { %11834 = vst [vmem:[#allocation25_spill] sm:$0xff] %v7830_v13  ;;  %11835 = vst [vmem:[#allocation26_spill] sm:$0xff] %v7836_v14 }
 0x825   :  { %v5041_v30 = vpop.eup %5040  ;;  %v7764_v32 = vadd.f32 %v2077_v22, %v2076_v20  ;;  %v7848_v20 = vld [vmem:[%s11183_s7 + $0x68] ss:$16 sps:$4 sm:$0xff]   ;;  %v7854_v22 = vld [vmem:[%s11183_s7 + $0x60] ss:$16 sps:$4 sm:$0xff]  }
 0x826   :  { %v2073_v46 = vadd.f32 1.0, %v5041_v30  ;;  %11837 = vst [vmem:[#allocation28_spill] sm:$0xff] %v7848_v20  ;;  %11838 = vst [vmem:[#allocation29_spill] sm:$0xff] %v7854_v22  ;;  %v7860_v30 = vld [vmem:[%s11183_s7 + $0x8c] ss:$16 sps:$4 sm:$0xff]  }
 0x827   :  { %5042 = vtanh.f32 %v7764_v32  ;;  %11839 = vst [vmem:[#allocation30_spill] sm:$0xff] %v7860_v30 }
 0x828   :  { %5044 = vrcp.f32 %v2073_v46  ;;  %v7866_v46 = vld [vmem:[%s11183_s7 + $0x84] ss:$16 sps:$4 sm:$0xff]  }
 0x829   :  { %11840 = vst [vmem:[#allocation31_spill] sm:$0xff] %v7866_v46 }
 0x831   :  { %v5043_v50 = vpop.eup %5042 }
 0x832   :  { %v5045_v48 = vpop.eup %5044 }
 0x833   :  { %v2080_v36 = vmul.f32 %v5045_v48, %v5043_v50  ;;  %v7872_v50 = vld [vmem:[%s11183_s7 + $0x88] ss:$16 sps:$4 sm:$0xff]   ;;  %v7878_v48 = vld [vmem:[%s11183_s7 + $0x80] ss:$16 sps:$4 sm:$0xff]  }
 0x834   :  { %11841 = vst [vmem:[#allocation32_spill] sm:$0xff] %v7872_v50  ;;  %11842 = vst [vmem:[#allocation33_spill] sm:$0xff] %v7878_v48 }
 0x835   :  { %v7767_v53 = vpack.c.bf16 %v2080_v36, %v2080_v36  ;;  %v7884_v36 = vld [vmem:[%s11183_s7 + $0xac] ss:$16 sps:$4 sm:$0xff]  }
 0x836   :  { %11843 = vst [vmem:[#allocation34_spill] sm:$0xff] %v7884_v36 }
 0x837   :  { %2115 = vmatmul.mubr.bf16.vlgmr.msra.gmra.mrb[32].mxu1 %v7767_v53  ;;  %2156 = vmatmul.mubr.bf16.vlgmr.msra.gmra.mrb[36].mxu0 %v7767_v53 }
 0x838   :  { %2221 = vmatprep.mubr.bf16.mxu1 %v7664_v43  ;;  %2262 = vmatprep.mubr.bf16.mxu0 %v7664_v43  ;;  %v7794_v43 = vld [vmem:[%s11183_s7 + $0x24] ss:$16 sps:$4 sm:$0xff]  }
 0x839   :  { %2231 = vmatpush1.bf16.msra.mxu0 %v7776_v16  ;;  %2190 = vmatpush1.bf16.msra.mxu1 %v7782_v28  ;;  %11828 = vst [vmem:[#allocation19_spill] sm:$0xff] %v7794_v43 }
 0x83a   :  { %2232 = vmatprep.subr.bf16.mxu0 %v7788_v10  ;;  %2191 = vmatprep.subr.bf16.mxu1 %v7794_v43 }
 0x83d   :  { %2233 = vmatpush1.bf16.msra.mxu0 %v7800_v54  ;;  %2192 = vmatpush1.bf16.msra.mxu1 %v7806_v7 }
 0x83e   :  { %2234 = vmatprep.subr.bf16.mxu0 %v7812_v62  ;;  %2193 = vmatprep.subr.bf16.mxu1 %v7818_v41 }
 0x841   :  { %2235 = vmatpush1.bf16.msra.mxu0 %v7824_v3  ;;  %2194 = vmatpush1.bf16.msra.mxu1 %v7830_v13 }
 0x842   :  { %2236 = vmatprep.subr.bf16.mxu0 %v7836_v14  ;;  %2195 = vmatprep.subr.bf16.mxu1 %v7842_v18 }
 0x845   :  { %2237 = vmatpush1.bf16.msra.mxu0 %v7848_v20  ;;  %2196 = vmatpush1.bf16.msra.mxu1 %v7854_v22  ;;  %v11888_v22 = vld [vmem:[#allocation70_spill] sm:$0xff] }
 0x846   :  { %2238 = vmatprep.subr.bf16.mxu0 %v7860_v30  ;;  %2197 = vmatprep.subr.bf16.mxu1 %v7866_v46  ;;  %v7890_v46 = vld [vmem:[%s11183_s7 + $0xa4] ss:$16 sps:$4 sm:$0xff]  }
 0x847   :  { %11844 = vst [vmem:[#allocation35_spill] sm:$0xff] %v7890_v46 }
 0x849   :  { %2239 = vmatpush1.bf16.msra.mxu0 %v7872_v50  ;;  %2198 = vmatpush1.bf16.msra.mxu1 %v7878_v48  ;;  %v7896_v50 = vld [vmem:[%s11183_s7 + $0xa8] ss:$16 sps:$4 sm:$0xff]   ;;  %v7902_v48 = vld [vmem:[%s11183_s7 + $0xa0] ss:$16 sps:$4 sm:$0xff]  }
 0x84a   :  { %2240 = vmatprep.subr.bf16.mxu0 %v7884_v36  ;;  %2199 = vmatprep.subr.bf16.mxu1 %v7890_v46  ;;  %11845 = vst [vmem:[#allocation36_spill] sm:$0xff] %v7896_v50  ;;  %11846 = vst [vmem:[#allocation37_spill] sm:$0xff] %v7902_v48  ;;  %v7908_v36 = vld [vmem:[%s11183_s7 + $0xcc] ss:$16 sps:$4 sm:$0xff]   ;;  %v7914_v46 = vld [vmem:[%s11183_s7 + $0xc4] ss:$16 sps:$4 sm:$0xff]  }
 0x84b   :  { %11847 = vst [vmem:[#allocation38_spill] sm:$0xff] %v7908_v36  ;;  %11848 = vst [vmem:[#allocation39_spill] sm:$0xff] %v7914_v46 }
 0x84d   :  { %2241 = vmatpush1.bf16.msra.mxu0 %v7896_v50  ;;  %2200 = vmatpush1.bf16.msra.mxu1 %v7902_v48  ;;  %v7920_v50 = vld [vmem:[%s11183_s7 + $0xc8] ss:$16 sps:$4 sm:$0xff]   ;;  %v7926_v48 = vld [vmem:[%s11183_s7 + $0xc0] ss:$16 sps:$4 sm:$0xff]  }
 0x84e   :  { %2242 = vmatprep.subr.bf16.mxu0 %v7908_v36  ;;  %2201 = vmatprep.subr.bf16.mxu1 %v7914_v46  ;;  %11849 = vst [vmem:[#allocation40_spill] sm:$0xff] %v7920_v50  ;;  %11850 = vst [vmem:[#allocation41_spill] sm:$0xff] %v7926_v48  ;;  %v7932_v36 = vld [vmem:[%s11183_s7 + $0xec] ss:$16 sps:$4 sm:$0xff]   ;;  %v7938_v46 = vld [vmem:[%s11183_s7 + $0xe4] ss:$16 sps:$4 sm:$0xff]  }
 0x84f   :  { %11851 = vst [vmem:[#allocation42_spill] sm:$0xff] %v7932_v36  ;;  %11852 = vst [vmem:[#allocation43_spill] sm:$0xff] %v7938_v46 }
 0x851   :  { %2243 = vmatpush1.bf16.msra.mxu0 %v7920_v50  ;;  %2202 = vmatpush1.bf16.msra.mxu1 %v7926_v48  ;;  %v7944_v50 = vld [vmem:[%s11183_s7 + $0xe8] ss:$16 sps:$4 sm:$0xff]   ;;  %v7950_v48 = vld [vmem:[%s11183_s7 + $0xe0] ss:$16 sps:$4 sm:$0xff]  }
 0x852   :  { %2244 = vmatprep.subr.bf16.mxu0 %v7932_v36  ;;  %2203 = vmatprep.subr.bf16.mxu1 %v7938_v46  ;;  %11853 = vst [vmem:[#allocation44_spill] sm:$0xff] %v7944_v50  ;;  %11854 = vst [vmem:[#allocation45_spill] sm:$0xff] %v7950_v48  ;;  %v7956_v36 = vld [vmem:[%s11183_s7 + $0x10c] ss:$16 sps:$4 sm:$0xff]   ;;  %v7962_v46 = vld [vmem:[%s11183_s7 + $0x104] ss:$16 sps:$4 sm:$0xff]  }
 0x853   :  { %11855 = vst [vmem:[#allocation46_spill] sm:$0xff] %v7956_v36  ;;  %11856 = vst [vmem:[#allocation47_spill] sm:$0xff] %v7962_v46 }
 0x855   :  { %2245 = vmatpush1.bf16.msra.mxu0 %v7944_v50  ;;  %2204 = vmatpush1.bf16.msra.mxu1 %v7950_v48  ;;  %v7968_v50 = vld [vmem:[%s11183_s7 + $0x108] ss:$16 sps:$4 sm:$0xff]   ;;  %v7974_v48 = vld [vmem:[%s11183_s7 + $0x100] ss:$16 sps:$4 sm:$0xff]  }
 0x856   :  { %2246 = vmatprep.subr.bf16.mxu0 %v7956_v36  ;;  %2205 = vmatprep.subr.bf16.mxu1 %v7962_v46  ;;  %11857 = vst [vmem:[#allocation48_spill] sm:$0xff] %v7968_v50  ;;  %11858 = vst [vmem:[#allocation49_spill] sm:$0xff] %v7974_v48  ;;  %v7980_v36 = vld [vmem:[%s11183_s7 + $0x12c] ss:$16 sps:$4 sm:$0xff]   ;;  %v7986_v46 = vld [vmem:[%s11183_s7 + $0x124] ss:$16 sps:$4 sm:$0xff]  }
 0x857   :  { %11859 = vst [vmem:[#allocation50_spill] sm:$0xff] %v7980_v36  ;;  %11860 = vst [vmem:[#allocation51_spill] sm:$0xff] %v7986_v46 }
 0x859   :  { %2247 = vmatpush1.bf16.msra.mxu0 %v7968_v50  ;;  %2206 = vmatpush1.bf16.msra.mxu1 %v7974_v48  ;;  %v7992_v50 = vld [vmem:[%s11183_s7 + $0x128] ss:$16 sps:$4 sm:$0xff]   ;;  %v7998_v48 = vld [vmem:[%s11183_s7 + $0x120] ss:$16 sps:$4 sm:$0xff]  }
 0x85a   :  { %2248 = vmatprep.subr.bf16.mxu0 %v7980_v36  ;;  %2207 = vmatprep.subr.bf16.mxu1 %v7986_v46  ;;  %11861 = vst [vmem:[#allocation52_spill] sm:$0xff] %v7992_v50  ;;  %11862 = vst [vmem:[#allocation53_spill] sm:$0xff] %v7998_v48  ;;  %v8004_v36 = vld [vmem:[%s11183_s7 + $0x14c] ss:$16 sps:$4 sm:$0xff]   ;;  %v8010_v46 = vld [vmem:[%s11183_s7 + $0x144] ss:$16 sps:$4 sm:$0xff]  }
 0x85b   :  { %11863 = vst [vmem:[#allocation54_spill] sm:$0xff] %v8004_v36  ;;  %11864 = vst [vmem:[#allocation55_spill] sm:$0xff] %v8010_v46 }
 0x85d   :  { %2249 = vmatpush1.bf16.msra.mxu0 %v7992_v50  ;;  %2208 = vmatpush1.bf16.msra.mxu1 %v7998_v48  ;;  %v8016_v50 = vld [vmem:[%s11183_s7 + $0x148] ss:$16 sps:$4 sm:$0xff]   ;;  %v8022_v48 = vld [vmem:[%s11183_s7 + $0x140] ss:$16 sps:$4 sm:$0xff]  }
 0x85e   :  { %2250 = vmatprep.subr.bf16.mxu0 %v8004_v36  ;;  %2209 = vmatprep.subr.bf16.mxu1 %v8010_v46  ;;  %11865 = vst [vmem:[#allocation56_spill] sm:$0xff] %v8016_v50  ;;  %11866 = vst [vmem:[#allocation57_spill] sm:$0xff] %v8022_v48  ;;  %v8028_v36 = vld [vmem:[%s11183_s7 + $0x16c] ss:$16 sps:$4 sm:$0xff]   ;;  %v8034_v46 = vld [vmem:[%s11183_s7 + $0x164] ss:$16 sps:$4 sm:$0xff]  }
 0x85f   :  { %11867 = vst [vmem:[#allocation58_spill] sm:$0xff] %v8028_v36  ;;  %11868 = vst [vmem:[#allocation59_spill] sm:$0xff] %v8034_v46 }
 0x861   :  { %2251 = vmatpush1.bf16.msra.mxu0 %v8016_v50  ;;  %2210 = vmatpush1.bf16.msra.mxu1 %v8022_v48  ;;  %v8040_v50 = vld [vmem:[%s11183_s7 + $0x168] ss:$16 sps:$4 sm:$0xff]   ;;  %v8046_v48 = vld [vmem:[%s11183_s7 + $0x160] ss:$16 sps:$4 sm:$0xff]  }
 0x862   :  { %2252 = vmatprep.subr.bf16.mxu0 %v8028_v36  ;;  %2211 = vmatprep.subr.bf16.mxu1 %v8034_v46  ;;  %11869 = vst [vmem:[#allocation60_spill] sm:$0xff] %v8040_v50  ;;  %11870 = vst [vmem:[#allocation61_spill] sm:$0xff] %v8046_v48  ;;  %v8052_v36 = vld [vmem:[%s11183_s7 + $0x18c] ss:$16 sps:$4 sm:$0xff]   ;;  %v8058_v46 = vld [vmem:[%s11183_s7 + $0x184] ss:$16 sps:$4 sm:$0xff]  }
 0x863   :  { %11871 = vst [vmem:[#allocation62_spill] sm:$0xff] %v8052_v36  ;;  %11872 = vst [vmem:[#allocation63_spill] sm:$0xff] %v8058_v46 }
 0x865   :  { %2253 = vmatpush1.bf16.msra.mxu0 %v8040_v50  ;;  %2212 = vmatpush1.bf16.msra.mxu1 %v8046_v48  ;;  %v8064_v50 = vld [vmem:[%s11183_s7 + $0x188] ss:$16 sps:$4 sm:$0xff]   ;;  %v8070_v48 = vld [vmem:[%s11183_s7 + $0x180] ss:$16 sps:$4 sm:$0xff]  }
 0x866   :  { %2254 = vmatprep.subr.bf16.mxu0 %v8052_v36  ;;  %2213 = vmatprep.subr.bf16.mxu1 %v8058_v46  ;;  %11873 = vst [vmem:[#allocation64_spill] sm:$0xff] %v8064_v50  ;;  %11874 = vst [vmem:[#allocation65_spill] sm:$0xff] %v8070_v48  ;;  %v8076_v36 = vld [vmem:[%s11183_s7 + $0x1ac] ss:$16 sps:$4 sm:$0xff]   ;;  %v8082_v46 = vld [vmem:[%s11183_s7 + $0x1a4] ss:$16 sps:$4 sm:$0xff]  }
 0x867   :  { %11875 = vst [vmem:[#allocation66_spill] sm:$0xff] %v8076_v36  ;;  %11876 = vst [vmem:[#allocation67_spill] sm:$0xff] %v8082_v46 }
 0x869   :  { %2255 = vmatpush1.bf16.msra.mxu0 %v8064_v50  ;;  %2214 = vmatpush1.bf16.msra.mxu1 %v8070_v48  ;;  %v8088_v50 = vld [vmem:[%s11183_s7 + $0x1a8] ss:$16 sps:$4 sm:$0xff]   ;;  %v8094_v48 = vld [vmem:[%s11183_s7 + $0x1a0] ss:$16 sps:$4 sm:$0xff]  }
 0x86a   :  { %2256 = vmatprep.subr.bf16.mxu0 %v8076_v36  ;;  %2215 = vmatprep.subr.bf16.mxu1 %v8082_v46  ;;  %11877 = vst [vmem:[#allocation68_spill] sm:$0xff] %v8088_v50  ;;  %11878 = vst [vmem:[#allocation69_spill] sm:$0xff] %v8094_v48  ;;  %v8100_v36 = vld [vmem:[%s11183_s7 + $0x1cc] ss:$16 sps:$4 sm:$0xff]   ;;  %v8106_v46 = vld [vmem:[%s11183_s7 + $0x1c4] ss:$16 sps:$4 sm:$0xff]  }
 0x86b   :  { %11879 = vst [vmem:[#allocation71_spill] sm:$0xff] %v8100_v36  ;;  %11880 = vst [vmem:[#allocation72_spill] sm:$0xff] %v8106_v46 }
 0x86d   :  { %2257 = vmatpush1.bf16.msra.mxu0 %v8088_v50  ;;  %2216 = vmatpush1.bf16.msra.mxu1 %v8094_v48  ;;  %v8112_v50 = vld [vmem:[%s11183_s7 + $0x1c8] ss:$16 sps:$4 sm:$0xff]   ;;  %v8118_v48 = vld [vmem:[%s11183_s7 + $0x1c0] ss:$16 sps:$4 sm:$0xff]  }
 0x86e   :  { %2258 = vmatprep.subr.bf16.mxu0 %v8100_v36  ;;  %2217 = vmatprep.subr.bf16.mxu1 %v8106_v46  ;;  %11881 = vst [vmem:[#allocation73_spill] sm:$0xff] %v8112_v50  ;;  %11882 = vst [vmem:[#allocation74_spill] sm:$0xff] %v8118_v48  ;;  %v8124_v36 = vld [vmem:[%s11183_s7 + $0x1ec] ss:$16 sps:$4 sm:$0xff]   ;;  %v8130_v46 = vld [vmem:[%s11183_s7 + $0x1e4] ss:$16 sps:$4 sm:$0xff]  }
 0x86f   :  { %11883 = vst [vmem:[#allocation76_spill] sm:$0xff] %v8124_v36  ;;  %11884 = vst [vmem:[#allocation77_spill] sm:$0xff] %v8130_v46 }
 0x871   :  { %2259 = vmatpush1.bf16.msra.mxu0 %v8112_v50  ;;  %2218 = vmatpush1.bf16.msra.mxu1 %v8118_v48  ;;  %v8136_v50 = vld [vmem:[%s11183_s7 + $0x1e8] ss:$16 sps:$4 sm:$0xff]   ;;  %v8142_v48 = vld [vmem:[%s11183_s7 + $0x1e0] ss:$16 sps:$4 sm:$0xff]  }
 0x872   :  { %2260 = vmatprep.subr.bf16.mxu0 %v8124_v36  ;;  %2219 = vmatprep.subr.bf16.mxu1 %v8130_v46  ;;  %11885 = vst [vmem:[#allocation78_spill] sm:$0xff] %v8136_v50  ;;  %11886 = vst [vmem:[#allocation79_spill] sm:$0xff] %v8142_v48  ;;  %v8148_v36 = vld [vmem:[%s11179_s3 + $0x4] ss:$16 sps:$4 sm:$0xff]  }
 0x873   :  { %11887 = vst [vmem:[#allocation80_spill] sm:$0xff] %v8148_v36 }
 0x875   :  { %2261 = vmatpush1.bf16.msra.mxu0 %v8136_v50  ;;  %2220 = vmatpush1.bf16.msra.mxu1 %v8142_v48 }
 0x876   :  { %2338 = vmatprep.subr.bf16.mxu0 %v8148_v36  ;;  %4555 = vmatprep.subr.bf16.mxu1 %v11670_v39 }
 0x90a   :  { %v2116_v46 = vpop.f32.mrb[32].mxu1  ;;  %v2157_v30 = vpop.f32.mrb[36].mxu0 }
 0x90b   :  { %v2117_v50 = vadd.f32 %v2116_v46, %v11888_v22  ;;  %v2118_v20 = vpop.f32.mrb[33].mxu1  ;;  %v2159_v18 = vpop.f32.mrb[37].mxu0  ;;  %v2158_v43 = vadd.f32 %v2157_v30, %v6833_v5 }
 0x90c   :  { %v2119_v14 = vadd.f32 %v2118_v20, %v6824_v19  ;;  %v2120_v13 = vpop.f32.mrb[34].mxu1  ;;  %v2161_v3 = vpop.f32.mrb[38].mxu0  ;;  %v2160_v36 = vadd.f32 %v2159_v18, %v11777_v34 }
 0x90d   :  { %v4357_v48 = vmul.f32 -1.442695, %v2117_v50  ;;  %v2121_v41 = vpop.f32.mrb[35].mxu1  ;;  %v2162_v62 = vpop.f32.mrb[39].mxu0  ;;  %v8189_v50 = vld [vmem:[%s11179_s3 + $0x20] ss:$16 sps:$4 sm:$0xff]  }
 0x90e   :  { %v4358_v7 = vmul.f32 -1.442695, %v2119_v14  ;;  %v4359_v54 = vmul.f32 -1.442695, %v2160_v36  ;;  %v8201_v36 = vld [vmem:[%s11186_s9 + $0x8] sm:$0xff]  }
 0x90f   :  { %5046 = vpow2.f32 %v4357_v48  ;;  %v8195_v48 = vld [vmem:[%s11179_s3 + $0x44] ss:$16 sps:$4 sm:$0xff]  }
 0x910   :  { %5048 = vpow2.f32 %v4358_v7 }
 0x911   :  { %5050 = vpow2.f32 %v4359_v54 }
 0x912   :  { %5052 = vtanh.f32 %v2158_v43 }
 0x919   :  { %v5047_v10 = vpop.eup %5046 }
 0x91a   :  { %v5049_v28 = vpop.eup %5048  ;;  %v2167_v46 = vadd.f32 1.0, %v5047_v10 }
 0x91b   :  { %v2173_v22 = vadd.f32 1.0, %v5049_v28  ;;  %v5051_v3 = vpop.eup %5050  ;;  %v8167_v28 = vld [vmem:[%s11179_s3] ss:$16 sps:$4 sm:$0xff]  }
 0x91c   :  { %5054 = vrcp.f32 %v2167_v46  ;;  %v5053_v13 = vpop.eup %5052  ;;  %v2180_v20 = vadd.f32 1.0, %v5051_v3  ;;  %v8208_v46 = vld [vmem:[%s11179_s3 + $0x40] ss:$16 sps:$4 sm:$0xff]   ;;  %v8214_v3 = vld [vmem:[%s11179_s3 + $0x64] ss:$16 sps:$4 sm:$0xff]  }
 0x91d   :  { %5056 = vrcp.f32 %v2173_v22  ;;  %v8180_v22 = vld [vmem:[%s11186_s9] sm:$0xff]  }
 0x91e   :  { %5058 = vrcp.f32 %v2180_v20  ;;  %v8246_v20 = vld [vmem:[%s11179_s3 + $0x80] ss:$16 sps:$4 sm:$0xff]  }
 0x926   :  { %v5055_v41 = vpop.eup %5054 }
 0x927   :  { %v5057_v62 = vpop.eup %5056  ;;  %v2184_v14 = vmul.f32 %v5055_v41, %v5053_v13  ;;  %v8220_v13 = vld [vmem:[%s11186_s9 + $0x10] sm:$0xff]  }
 0x928   :  { %v2183_v7 = vmul.f32 %v5057_v62, %v7416_v8  ;;  %v5059_v30 = vpop.eup %5058  ;;  %v8174_v8 = vld [vmem:[%s11179_s3 + $0x24] ss:$16 sps:$4 sm:$0xff]   ;;  %v8227_v41 = vld [vmem:[%s11179_s3 + $0x60] ss:$16 sps:$4 sm:$0xff]  }
 0x929   :  { %v8233_v62 = vld [vmem:[%s11179_s3 + $0x84] ss:$16 sps:$4 sm:$0xff]  }
 0x92a   :  { %v8157_v18 = vadd.f32 %v2184_v14, %v2183_v7  ;;  %v8239_v14 = vld [vmem:[%s11186_s9 + $0x18] sm:$0xff]   ;;  %v8252_v7 = vld [vmem:[%s11179_s3 + $0xa4] ss:$16 sps:$4 sm:$0xff]  }
 0x92b   :  { %11889 = vst [vmem:[#allocation81_spill] sm:$0xff] %v8252_v7 }
 0x92c   :  { %5060 = vtanh.f32 %v8157_v18 }
 0x936   :  { %v5061_v10 = vpop.eup %5060 }
 0x937   :  { %v2187_v54 = vmul.f32 %v5061_v10, %v5059_v30  ;;  %v8258_v30 = vld [vmem:[%s11186_s9 + $0x20] sm:$0xff]  }
 0x938   :  { %11890 = vst [vmem:[#allocation82_spill] sm:$0xff] %v8258_v30  ;;  %v8265_v10 = vld [vmem:[%s11179_s3 + $0xa0] ss:$16 sps:$4 sm:$0xff]  }
 0x939   :  { %v8160_v43 = vpack.c.bf16 %v2187_v54, %v2187_v54  ;;  %11891 = vst [vmem:[#allocation83_spill] sm:$0xff] %v8265_v10  ;;  %v8271_v54 = vld [vmem:[%s11179_s3 + $0xc4] ss:$16 sps:$4 sm:$0xff]  }
 0x93a   :  { %11892 = vst [vmem:[#allocation84_spill] sm:$0xff] %v8271_v54 }
 0x93b   :  { %2222 = vmatmul.mubr.bf16.vlgmr.msra.gmra.mrb[36].mxu1 %v8160_v43  ;;  %2263 = vmatmul.mubr.bf16.vlgmr.msra.gmra.mrb[40].mxu0 %v8160_v43 }
 0x93c   :  { %2339 = vmatpush1.bf16.msra.mxu0 %v8167_v28  ;;  %2370 = vmatprep.mubr.bf16.mxu0 %v11673_v35 }
 0x93d   :  { %2340 = vmatprep.subr.bf16.mxu0 %v8174_v8  ;;  %4556 = vmatpush3.bf16.msra.mxu1 %v8180_v22 }
 0x93e   :  { %4557 = vmatprep.subr.bf16.mxu1 %v11670_v39  ;;  %4571 = vmatprep.mubr.msk.bf16.mxu1 %vm5885_vm0, %v11670_v39 }
 0x940   :  { %2341 = vmatpush1.bf16.msra.mxu0 %v8189_v50 }
 0x941   :  { %2342 = vmatprep.subr.bf16.mxu0 %v8195_v48  ;;  %4558 = vmatpush3.bf16.msra.mxu1 %v8201_v36 }
 0x942   :  { %4559 = vmatprep.subr.bf16.mxu1 %v11670_v39 }
 0x944   :  { %2343 = vmatpush1.bf16.msra.mxu0 %v8208_v46 }
 0x945   :  { %2344 = vmatprep.subr.bf16.mxu0 %v8214_v3  ;;  %4560 = vmatpush3.bf16.msra.mxu1 %v8220_v13 }
 0x946   :  { %4561 = vmatprep.subr.bf16.mxu1 %v11670_v39 }
 0x948   :  { %2345 = vmatpush1.bf16.msra.mxu0 %v8227_v41 }
 0x949   :  { %2346 = vmatprep.subr.bf16.mxu0 %v8233_v62  ;;  %4562 = vmatpush3.bf16.msra.mxu1 %v8239_v14 }
 0x94a   :  { %4563 = vmatprep.subr.bf16.mxu1 %v11670_v39 }
 0x94c   :  { %2347 = vmatpush1.bf16.msra.mxu0 %v8246_v20 }
 0x94d   :  { %2348 = vmatprep.subr.bf16.mxu0 %v8252_v7  ;;  %4564 = vmatpush3.bf16.msra.mxu1 %v8258_v30  ;;  %v8277_v30 = vld [vmem:[%s11186_s9 + $0x28] sm:$0xff]  }
 0x94e   :  { %4565 = vmatprep.subr.bf16.mxu1 %v11670_v39  ;;  %11893 = vst [vmem:[#allocation85_spill] sm:$0xff] %v8277_v30  ;;  %v8321_v7 = vld [vmem:[%s11179_s3 + $0xc] ss:$16 sps:$4 sm:$0xff]  }
 0x950   :  { %2349 = vmatpush1.bf16.msra.mxu0 %v8265_v10  ;;  %v8284_v10 = vld [vmem:[%s11179_s3 + $0xc0] ss:$16 sps:$4 sm:$0xff]  }
 0x951   :  { %2350 = vmatprep.subr.bf16.mxu0 %v8271_v54  ;;  %4566 = vmatpush3.bf16.msra.mxu1 %v8277_v30  ;;  %11894 = vst [vmem:[#allocation86_spill] sm:$0xff] %v8284_v10  ;;  %v8290_v54 = vld [vmem:[%s11179_s3 + $0xe4] ss:$16 sps:$4 sm:$0xff]  }
 0x952   :  { %4567 = vmatprep.subr.bf16.mxu1 %v11670_v39  ;;  %11895 = vst [vmem:[#allocation87_spill] sm:$0xff] %v8290_v54  ;;  %v8296_v30 = vld [vmem:[%s11186_s9 + $0x30] sm:$0xff]  }
 0x953   :  { %11896 = vst [vmem:[#allocation88_spill] sm:$0xff] %v8296_v30 }
 0x954   :  { %2351 = vmatpush1.bf16.msra.mxu0 %v8284_v10  ;;  %v8303_v10 = vld [vmem:[%s11179_s3 + $0xe0] ss:$16 sps:$4 sm:$0xff]  }
 0x955   :  { %2352 = vmatprep.subr.bf16.mxu0 %v8290_v54  ;;  %4568 = vmatpush3.bf16.msra.mxu1 %v8296_v30  ;;  %v8309_v54 = vld [vmem:[%s11186_s9 + $0x38] sm:$0xff]   ;;  %v8315_v30 = vld [vmem:[%s11181_s5 + $0x4] ss:$16 sps:$4 sm:$0xff]  }
 0x956   :  { %4569 = vmatprep.subr.bf16.mxu1 %v11670_v39 }
 0x958   :  { %2353 = vmatpush1.bf16.msra.mxu0 %v8303_v10 }
 0x959   :  { %4570 = vmatpush3.bf16.msra.mxu1 %v8309_v54  ;;  %2445 = vmatprep.subr.bf16.mxu0 %v8315_v30 }
 0x95a   :  { %2379 = vmatprep.subr.bf16.mxu1 %v8321_v7 }
 0x95b   :  { %2371 = vmatmul.mubr.bf16.vlgmr.msra.gmra.mrb[44].mxu0 %v7767_v53 }
 0x95c   :  { %2477 = vmatprep.mubr.bf16.mxu0 %v8160_v43  ;;  %2446 = vmatpush1.bf16.msra.mxu0 %v7463_v25  ;;  %v11897_v25 = vld [vmem:[#allocation7_spill] sm:$0xff] }
 0x95d   :  { %2447 = vmatprep.subr.bf16.mxu0 %v7469_v9  ;;  %v11898_v9 = vld [vmem:[#allocation8_spill] sm:$0xff] }
 0x960   :  { %2448 = vmatpush1.bf16.msra.mxu0 %v7475_v17  ;;  %v11899_v17 = vld [vmem:[#allocation9_spill] sm:$0xff] }
 0x961   :  { %2449 = vmatprep.subr.bf16.mxu0 %v7481_v29  ;;  %v11900_v29 = vld [vmem:[#allocation10_spill] sm:$0xff] }
 0x964   :  { %2450 = vmatpush1.bf16.msra.mxu0 %v7487_v0  ;;  %v11901_v0 = vld [vmem:[#allocation11_spill] sm:$0xff] }
 0x965   :  { %2451 = vmatprep.subr.bf16.mxu0 %v7493_v1  ;;  %v11902_v1 = vld [vmem:[#allocation12_spill] sm:$0xff] }
 0x968   :  { %2452 = vmatpush1.bf16.msra.mxu0 %v7499_v23  ;;  %v11903_v23 = vld [vmem:[#allocation13_spill] sm:$0xff] }
 0x969   :  { %2453 = vmatprep.subr.bf16.mxu0 %v7505_v27  ;;  %v11904_v27 = vld [vmem:[#allocation14_spill] sm:$0xff] }
 0x96c   :  { %2454 = vmatpush1.bf16.msra.mxu0 %v7511_v58  ;;  %v11905_v58 = vld [vmem:[#allocation15_spill] sm:$0xff] }
 0x96d   :  { %2455 = vmatprep.subr.bf16.mxu0 %v7517_v11  ;;  %v11906_v11 = vld [vmem:[#allocation16_spill] sm:$0xff] }
 0x970   :  { %2456 = vmatpush1.bf16.msra.mxu0 %v7523_v60 }
 0x971   :  { %2457 = vmatprep.subr.bf16.mxu0 %v7529_v51 }
 0x974   :  { %2458 = vmatpush1.bf16.msra.mxu0 %v7535_v55  ;;  %v11907_v55 = vld [vmem:[#allocation75_spill] sm:$0xff] }
 0x975   :  { %2459 = vmatprep.subr.bf16.mxu0 %v7541_v57 }
 0x978   :  { %2460 = vmatpush1.bf16.msra.mxu0 %v7547_v59 }
 0x979   :  { %2461 = vmatprep.subr.bf16.mxu0 %v7553_v61 }
 0x97c   :  { %2462 = vmatpush1.bf16.msra.mxu0 %v7559_v63 }
 0x97d   :  { %2463 = vmatprep.subr.bf16.mxu0 %v7565_v2 }
 0x980   :  { %2464 = vmatpush1.bf16.msra.mxu0 %v7571_v4 }
 0x981   :  { %2465 = vmatprep.subr.bf16.mxu0 %v7577_v6 }
 0x984   :  { %2466 = vmatpush1.bf16.msra.mxu0 %v7583_v31 }
 0x985   :  { %2467 = vmatprep.subr.bf16.mxu0 %v7589_v24 }
 0x988   :  { %2468 = vmatpush1.bf16.msra.mxu0 %v11897_v25 }
 0x989   :  { %2469 = vmatprep.subr.bf16.mxu0 %v11898_v9 }
 0x98c   :  { %2470 = vmatpush1.bf16.msra.mxu0 %v11899_v17 }
 0x98d   :  { %2471 = vmatprep.subr.bf16.mxu0 %v11900_v29 }
 0x990   :  { %2472 = vmatpush1.bf16.msra.mxu0 %v11901_v0 }
 0x991   :  { %2473 = vmatprep.subr.bf16.mxu0 %v11902_v1 }
 0x994   :  { %2474 = vmatpush1.bf16.msra.mxu0 %v11903_v23 }
 0x995   :  { %2475 = vmatprep.subr.bf16.mxu0 %v11904_v27 }
 0x998   :  { %2476 = vmatpush1.bf16.msra.mxu0 %v11905_v58 }
 0x999   :  { %2552 = vmatprep.subr.bf16.mxu0 %v11906_v11 }
 0xa0e   :  { %v2223_v60 = vpop.f32.mrb[36].mxu1  ;;  %v2264_v51 = vpop.f32.mrb[40].mxu0 }
 0xa0f   :  { %v2224_v57 = vadd.f32 %v2223_v60, %v11907_v55  ;;  %v2225_v59 = vpop.f32.mrb[37].mxu1  ;;  %v2266_v61 = vpop.f32.mrb[41].mxu0  ;;  %v2265_v29 = vadd.f32 %v2264_v51, %v7053_v42 }
 0xa10   :  { %v2226_v63 = vadd.f32 %v2225_v59, %v7044_v12  ;;  %v2227_v2 = vpop.f32.mrb[38].mxu1  ;;  %v2268_v4 = vpop.f32.mrb[42].mxu0  ;;  %v2267_v9 = vadd.f32 %v2266_v61, %v7049_v38 }
 0xa11   :  { %v4360_v6 = vmul.f32 -1.442695, %v2224_v57  ;;  %v2228_v31 = vpop.f32.mrb[39].mxu1  ;;  %v2269_v24 = vpop.f32.mrb[43].mxu0 }
 0xa12   :  { %v4361_v25 = vmul.f32 -1.442695, %v2226_v63  ;;  %v4362_v17 = vmul.f32 -1.442695, %v2267_v9 }
 0xa13   :  { %5062 = vpow2.f32 %v4360_v6 }
 0xa14   :  { %5064 = vpow2.f32 %v4361_v25 }
 0xa15   :  { %5066 = vpow2.f32 %v4362_v17 }
 0xa16   :  { %5068 = vtanh.f32 %v2265_v29  ;;  %v8383_v29 = vld [vmem:[%s11179_s3 + $0x2c] ss:$16 sps:$4 sm:$0xff]  }
 0xa1d   :  { %v5063_v0 = vpop.eup %5062 }
 0xa1e   :  { %v5065_v1 = vpop.eup %5064  ;;  %v2274_v23 = vadd.f32 1.0, %v5063_v0  ;;  %v8389_v0 = vld [vmem:[%s11179_s3 + $0x28] ss:$16 sps:$4 sm:$0xff]  }
 0xa1f   :  { %v2280_v27 = vadd.f32 1.0, %v5065_v1  ;;  %v5067_v58 = vpop.eup %5066  ;;  %v8395_v1 = vld [vmem:[%s11179_s3 + $0x4c] ss:$16 sps:$4 sm:$0xff]  }
 0xa20   :  { %5070 = vrcp.f32 %v2274_v23  ;;  %v5069_v11 = vpop.eup %5068  ;;  %v2287_v63 = vadd.f32 1.0, %v5067_v58  ;;  %v8401_v23 = vld [vmem:[%s11179_s3 + $0x48] ss:$16 sps:$4 sm:$0xff]  }
 0xa21   :  { %5072 = vrcp.f32 %v2280_v27  ;;  %v8407_v27 = vld [vmem:[%s11179_s3 + $0x6c] ss:$16 sps:$4 sm:$0xff]   ;;  %v8413_v58 = vld [vmem:[%s11179_s3 + $0x68] ss:$16 sps:$4 sm:$0xff]  }
 0xa22   :  { %5074 = vrcp.f32 %v2287_v63  ;;  %v8443_v63 = vld [vmem:[%s11179_s3 + $0xcc] ss:$16 sps:$4 sm:$0xff]  }
 0xa2a   :  { %v5071_v60 = vpop.eup %5070 }
 0xa2b   :  { %v5073_v57 = vpop.eup %5072  ;;  %v2291_v59 = vmul.f32 %v5071_v60, %v5069_v11  ;;  %v8419_v11 = vld [vmem:[%s11179_s3 + $0x8c] ss:$16 sps:$4 sm:$0xff]   ;;  %v8425_v60 = vld [vmem:[%s11179_s3 + $0x88] ss:$16 sps:$4 sm:$0xff]  }
 0xa2c   :  { %v2290_v2 = vmul.f32 %v5073_v57, %v7657_v33  ;;  %v5075_v24 = vpop.eup %5074  ;;  %v8376_v33 = vld [vmem:[%s11179_s3 + $0x8] ss:$16 sps:$4 sm:$0xff]   ;;  %v8431_v57 = vld [vmem:[%s11179_s3 + $0xac] ss:$16 sps:$4 sm:$0xff]  }
 0xa2e   :  { %v8363_v61 = vadd.f32 %v2291_v59, %v2290_v2  ;;  %v8365_v4 = vpop.f32.mrb[44].mxu0  ;;  %v8437_v59 = vld [vmem:[%s11179_s3 + $0xa8] ss:$16 sps:$4 sm:$0xff]  }
 0xa2f   :  { %v8367_v51 = vpop.f32.mrb[45].mxu0  ;;  %v8449_v2 = vld [vmem:[%s11179_s3 + $0xc8] ss:$16 sps:$4 sm:$0xff]  }
 0xa30   :  { %v2376_v6 = vpop.f32.mrb[46].mxu0  ;;  %5076 = vtanh.f32 %v8363_v61 }
 0xa31   :  { %v2377_v31 = vpop.f32.mrb[47].mxu0  ;;  %v8455_v6 = vld [vmem:[%s11179_s3 + $0xec] ss:$16 sps:$4 sm:$0xff]  }
 0xa32   :  { %v8461_v31 = vld [vmem:[%s11179_s3 + $0xe8] ss:$16 sps:$4 sm:$0xff]  }
 0xa3a   :  { %v5077_v25 = vpop.eup %5076 }
 0xa3b   :  { %v2294_v9 = vmul.f32 %v5077_v25, %v5075_v24  ;;  %v8467_v24 = vld [vmem:[%s11181_s5 + $0xc] ss:$16 sps:$4 sm:$0xff]   ;;  %v8475_v25 = vld [vmem:[%s11181_s5 + $0x8] ss:$16 sps:$4 sm:$0xff]  }
 0xa3c   :  { %11908 = vst [vmem:[#allocation89_spill] sm:$0xff] %v8467_v24  ;;  %11909 = vst [vmem:[#allocation90_spill] sm:$0xff] %v8475_v25 }
 0xa3d   :  { %v8370_v17 = vpack.c.bf16 %v2294_v9, %v2294_v9  ;;  %v8481_v9 = vld [vmem:[%s11181_s5 + $0x2c] ss:$16 sps:$4 sm:$0xff]  }
 0xa3e   :  { %11910 = vst [vmem:[#allocation91_spill] sm:$0xff] %v8481_v9 }
 0xa3f   :  { %4572 = vmatmul.mubr.bf16.vlgmr.msra.gmra.mrb[40].mxu1 %v8370_v17 }
 0xa40   :  { %2380 = vmatpush1.bf16.msra.mxu1 %v8376_v33  ;;  %2411 = vmatprep.mubr.bf16.mxu1 %v11673_v35 }
 0xa41   :  { %2381 = vmatprep.subr.bf16.mxu1 %v8383_v29 }
 0xa44   :  { %2382 = vmatpush1.bf16.msra.mxu1 %v8389_v0 }
 0xa45   :  { %2383 = vmatprep.subr.bf16.mxu1 %v8395_v1 }
 0xa48   :  { %2384 = vmatpush1.bf16.msra.mxu1 %v8401_v23 }
 0xa49   :  { %2385 = vmatprep.subr.bf16.mxu1 %v8407_v27 }
 0xa4c   :  { %2386 = vmatpush1.bf16.msra.mxu1 %v8413_v58 }
 0xa4d   :  { %2387 = vmatprep.subr.bf16.mxu1 %v8419_v11 }
 0xa50   :  { %2388 = vmatpush1.bf16.msra.mxu1 %v8425_v60 }
 0xa51   :  { %2389 = vmatprep.subr.bf16.mxu1 %v8431_v57 }
 0xa54   :  { %2390 = vmatpush1.bf16.msra.mxu1 %v8437_v59 }
 0xa55   :  { %2391 = vmatprep.subr.bf16.mxu1 %v8443_v63 }
 0xa58   :  { %2392 = vmatpush1.bf16.msra.mxu1 %v8449_v2 }
 0xa59   :  { %2393 = vmatprep.subr.bf16.mxu1 %v8455_v6 }
 0xa5c   :  { %2394 = vmatpush1.bf16.msra.mxu1 %v8461_v31 }
 0xa5d   :  { %2486 = vmatprep.subr.bf16.mxu1 %v8467_v24 }
 0xa5f   :  { %2412 = vmatmul.mubr.bf16.vlgmr.msra.gmra.mrb[44].mxu1 %v7767_v53  ;;  %v8487_v53 = vld [vmem:[%s11181_s5 + $0x28] ss:$16 sps:$4 sm:$0xff]  }
 0xa60   :  { %2518 = vmatprep.mubr.bf16.mxu1 %v8160_v43  ;;  %2487 = vmatpush1.bf16.msra.mxu1 %v8475_v25  ;;  %11911 = vst [vmem:[#allocation92_spill] sm:$0xff] %v8487_v53  ;;  %v8493_v43 = vld [vmem:[%s11181_s5 + $0x4c] ss:$16 sps:$4 sm:$0xff]   ;;  %v8499_v25 = vld [vmem:[%s11181_s5 + $0x48] ss:$16 sps:$4 sm:$0xff]  }
 0xa61   :  { %2488 = vmatprep.subr.bf16.mxu1 %v8481_v9  ;;  %11912 = vst [vmem:[#allocation93_spill] sm:$0xff] %v8493_v43  ;;  %11913 = vst [vmem:[#allocation94_spill] sm:$0xff] %v8499_v25  ;;  %v8505_v9 = vld [vmem:[%s11181_s5 + $0x6c] ss:$16 sps:$4 sm:$0xff]  }
 0xa62   :  { %11914 = vst [vmem:[#allocation95_spill] sm:$0xff] %v8505_v9 }
 0xa64   :  { %2489 = vmatpush1.bf16.msra.mxu1 %v8487_v53  ;;  %v8511_v53 = vld [vmem:[%s11181_s5 + $0x68] ss:$16 sps:$4 sm:$0xff]  }
 0xa65   :  { %2490 = vmatprep.subr.bf16.mxu1 %v8493_v43  ;;  %11915 = vst [vmem:[#allocation96_spill] sm:$0xff] %v8511_v53  ;;  %v8517_v43 = vld [vmem:[%s11181_s5 + $0x8c] ss:$16 sps:$4 sm:$0xff]  }
 0xa66   :  { %11916 = vst [vmem:[#allocation97_spill] sm:$0xff] %v8517_v43 }
 0xa68   :  { %2491 = vmatpush1.bf16.msra.mxu1 %v8499_v25  ;;  %v8523_v25 = vld [vmem:[%s11181_s5 + $0x88] ss:$16 sps:$4 sm:$0xff]  }
 0xa69   :  { %2492 = vmatprep.subr.bf16.mxu1 %v8505_v9  ;;  %11917 = vst [vmem:[#allocation98_spill] sm:$0xff] %v8523_v25  ;;  %v8529_v9 = vld [vmem:[%s11181_s5 + $0xac] ss:$16 sps:$4 sm:$0xff]  }
 0xa6a   :  { %11918 = vst [vmem:[#allocation99_spill] sm:$0xff] %v8529_v9 }
 0xa6c   :  { %2493 = vmatpush1.bf16.msra.mxu1 %v8511_v53  ;;  %v8535_v53 = vld [vmem:[%s11181_s5 + $0xa8] ss:$16 sps:$4 sm:$0xff]  }
 0xa6d   :  { %2494 = vmatprep.subr.bf16.mxu1 %v8517_v43  ;;  %11919 = vst [vmem:[#allocation100_spill] sm:$0xff] %v8535_v53  ;;  %v8541_v43 = vld [vmem:[%s11181_s5 + $0xcc] ss:$16 sps:$4 sm:$0xff]  }
 0xa6e   :  { %11920 = vst [vmem:[#allocation101_spill] sm:$0xff] %v8541_v43 }
 0xa70   :  { %2495 = vmatpush1.bf16.msra.mxu1 %v8523_v25  ;;  %v8547_v25 = vld [vmem:[%s11181_s5 + $0xc8] ss:$16 sps:$4 sm:$0xff]  }
 0xa71   :  { %2496 = vmatprep.subr.bf16.mxu1 %v8529_v9  ;;  %11921 = vst [vmem:[#allocation102_spill] sm:$0xff] %v8547_v25  ;;  %v8553_v9 = vld [vmem:[%s11181_s5 + $0xec] ss:$16 sps:$4 sm:$0xff]  }
 0xa72   :  { %11922 = vst [vmem:[#allocation103_spill] sm:$0xff] %v8553_v9 }
 0xa74   :  { %2497 = vmatpush1.bf16.msra.mxu1 %v8535_v53  ;;  %v8559_v53 = vld [vmem:[%s11181_s5 + $0xe8] ss:$16 sps:$4 sm:$0xff]  }
 0xa75   :  { %2498 = vmatprep.subr.bf16.mxu1 %v8541_v43  ;;  %11923 = vst [vmem:[#allocation104_spill] sm:$0xff] %v8559_v53  ;;  %v8565_v43 = vld [vmem:[%s11181_s5 + $0x10c] ss:$16 sps:$4 sm:$0xff]  }
 0xa76   :  { %11924 = vst [vmem:[#allocation105_spill] sm:$0xff] %v8565_v43 }
 0xa78   :  { %2499 = vmatpush1.bf16.msra.mxu1 %v8547_v25  ;;  %v8571_v25 = vld [vmem:[%s11181_s5 + $0x108] ss:$16 sps:$4 sm:$0xff]  }
 0xa79   :  { %2500 = vmatprep.subr.bf16.mxu1 %v8553_v9  ;;  %11925 = vst [vmem:[#allocation5_spill] sm:$0xff] %v8571_v25  ;;  %v8577_v9 = vld [vmem:[%s11181_s5 + $0x12c] ss:$16 sps:$4 sm:$0xff]  }
 0xa7a   :  { %11926 = vst [vmem:[#allocation4_spill] sm:$0xff] %v8577_v9 }
 0xa7c   :  { %2501 = vmatpush1.bf16.msra.mxu1 %v8559_v53  ;;  %v8583_v53 = vld [vmem:[%s11181_s5 + $0x128] ss:$16 sps:$4 sm:$0xff]  }
 0xa7d   :  { %2502 = vmatprep.subr.bf16.mxu1 %v8565_v43  ;;  %11927 = vst [vmem:[#allocation6_spill] sm:$0xff] %v8583_v53  ;;  %v8589_v43 = vld [vmem:[%s11181_s5 + $0x14c] ss:$16 sps:$4 sm:$0xff]  }
 0xa7e   :  { %11928 = vst [vmem:[#allocation7_spill] sm:$0xff] %v8589_v43 }
 0xa80   :  { %2503 = vmatpush1.bf16.msra.mxu1 %v8571_v25  ;;  %v8595_v25 = vld [vmem:[%s11181_s5 + $0x148] ss:$16 sps:$4 sm:$0xff]  }
 0xa81   :  { %2504 = vmatprep.subr.bf16.mxu1 %v8577_v9  ;;  %11929 = vst [vmem:[#allocation8_spill] sm:$0xff] %v8595_v25  ;;  %v8601_v9 = vld [vmem:[%s11181_s5 + $0x16c] ss:$16 sps:$4 sm:$0xff]  }
 0xa82   :  { %11930 = vst [vmem:[#allocation9_spill] sm:$0xff] %v8601_v9 }
 0xa84   :  { %2505 = vmatpush1.bf16.msra.mxu1 %v8583_v53  ;;  %v8607_v53 = vld [vmem:[%s11181_s5 + $0x168] ss:$16 sps:$4 sm:$0xff]  }
 0xa85   :  { %2506 = vmatprep.subr.bf16.mxu1 %v8589_v43  ;;  %11931 = vst [vmem:[#allocation10_spill] sm:$0xff] %v8607_v53  ;;  %v8613_v43 = vld [vmem:[%s11181_s5 + $0x18c] ss:$16 sps:$4 sm:$0xff]  }
 0xa86   :  { %11932 = vst [vmem:[#allocation11_spill] sm:$0xff] %v8613_v43 }
 0xa88   :  { %2507 = vmatpush1.bf16.msra.mxu1 %v8595_v25  ;;  %v8619_v25 = vld [vmem:[%s11181_s5 + $0x188] ss:$16 sps:$4 sm:$0xff]  }
 0xa89   :  { %2508 = vmatprep.subr.bf16.mxu1 %v8601_v9  ;;  %11933 = vst [vmem:[#allocation12_spill] sm:$0xff] %v8619_v25 }
 0xa8c   :  { %2509 = vmatpush1.bf16.msra.mxu1 %v8607_v53  ;;  %v8632_v53 = vld [vmem:[%s11188_s10] ss:$0 sm:$0xff] }
 0xa8d   :  { %2510 = vmatprep.subr.bf16.mxu1 %v8613_v43  ;;  %11934 = vst [vmem:[#allocation13_spill] sm:$0xff] %v8632_v53 }
 0xa90   :  { %2511 = vmatpush1.bf16.msra.mxu1 %v8619_v25 }
 0xa91   :  { %2512 = vmatprep.subr.bf16.mxu1 %v7714_v37 }
 0xa94   :  { %2513 = vmatpush1.bf16.msra.mxu1 %v7720_v40 }
 0xa95   :  { %2514 = vmatprep.subr.bf16.mxu1 %v7726_v45 }
 0xa98   :  { %2515 = vmatpush1.bf16.msra.mxu1 %v7732_v47  ;;  %v2375_v47 = vadd.f32 %v8367_v51, %v11821_v26 }
 0xa99   :  { %2516 = vmatprep.subr.bf16.mxu1 %v7738_v49  ;;  %v2373_v49 = vadd.f32 %v8365_v4, %v11822_v21 }
 0xa9c   :  { %2517 = vmatpush1.bf16.msra.mxu1 %v7744_v52  ;;  %v4365_v52 = vmul.f32 -1.442695, %v2375_v47 }
 0xa9d   :  { %2593 = vmatprep.subr.bf16.mxu1 %v7750_v56  ;;  %v4364_v56 = vmul.f32 -1.442695, %v2373_v49 }
 0xa9e   :  { %5078 = vpow2.f32 %v4365_v52 }
 0xa9f   :  { %5080 = vpow2.f32 %v4364_v56 }
 0xaa8   :  { %v5079_v9 = vpop.eup %5078 }
 0xaa9   :  { %v5081_v24 = vpop.eup %5080 }
 0xb12   :  { %v2330_v43 = vpop.f32.mrb[40].mxu1 }
 0xb13   :  { %v2331_v37 = vadd.f32 %v8632_v53, %v2330_v43  ;;  %v4573_v25 = vpop.f32.mrb[41].mxu1  ;;  %v2429_v43 = vadd.f32 1.0, %v5079_v9 }
 0xb14   :  { %v2333_v40 = vpop.f32.mrb[42].mxu1  ;;  %v2423_v25 = vadd.f32 1.0, %v5081_v24 }
 0xb15   :  { %4363 = vst [vmem:[%s11189_s11 + $0x10] sm:$0xff] %v2331_v37  ;;  %v4574_v45 = vpop.f32.mrb[43].mxu1  ;;  %5082 = vrcp.f32 %v2429_v43 }
 0xb16   :  { %5084 = vrcp.f32 %v2423_v25 }
 0xb1f   :  { %v5083_v47 = vpop.eup %5082 }
 0xb20   :  { %v5085_v49 = vpop.eup %5084  ;;  %v2439_v56 = vmul.f32 %v5083_v47, %v7764_v32  ;;  %v11937_v32 = vld [vmem:[#allocation18_spill] sm:$0xff] }
 0xb21   :  { %v11941_v47 = vld [vmem:[#allocation22_spill] sm:$0xff] }
 0xb32   :  { %v2413_v40 = vpop.f32.mrb[44].mxu1 }
 0xb33   :  { %v2414_v53 = vadd.f32 %v2413_v40, %v11823_v15  ;;  %v2415_v37 = vpop.f32.mrb[45].mxu1 }
 0xb34   :  { %v2416_v45 = vadd.f32 %v2415_v37, %v11824_v44  ;;  %v2417_v51 = vpop.f32.mrb[46].mxu1 }
 0xb35   :  { %5086 = vtanh.f32 %v2414_v53  ;;  %v2418_v26 = vpop.f32.mrb[47].mxu1  ;;  %v11939_v51 = vld [vmem:[#allocation20_spill] sm:$0xff] }
 0xb36   :  { %v4366_v4 = vmul.f32 -1.442695, %v2416_v45  ;;  %v11936_v26 = vld [vmem:[#allocation17_spill] sm:$0xff]  ;;  %v11938_v45 = vld [vmem:[#allocation19_spill] sm:$0xff] }
 0xb38   :  { %5088 = vpow2.f32 %v4366_v4  ;;  %v11940_v4 = vld [vmem:[#allocation21_spill] sm:$0xff] }
 0xb3f   :  { %v5087_v52 = vpop.eup %5086 }
 0xb40   :  { %v2440_v9 = vmul.f32 %v5087_v52, %v5085_v49  ;;  %v11942_v49 = vld [vmem:[#allocation23_spill] sm:$0xff]  ;;  %v11943_v52 = vld [vmem:[#allocation24_spill] sm:$0xff] }
 0xb42   :  { %v5089_v24 = vpop.eup %5088  ;;  %v8645_v21 = vadd.f32 %v2440_v9, %v2439_v56  ;;  %v11944_v56 = vld [vmem:[#allocation25_spill] sm:$0xff]  ;;  %v11947_v9 = vld [vmem:[#allocation28_spill] sm:$0xff] }
 0xb43   :  { %v2436_v43 = vadd.f32 1.0, %v5089_v24  ;;  %v11948_v24 = vld [vmem:[#allocation29_spill] sm:$0xff] }
 0xb44   :  { %11935 = vst [vmem:[#allocation14_spill] sm:$0xff] %v8645_v21  ;;  %5090 = vtanh.f32 %v8645_v21 }
 0xb45   :  { %5092 = vrcp.f32 %v2436_v43  ;;  %v11949_v43 = vld [vmem:[#allocation30_spill] sm:$0xff] }
 0xb4e   :  { %v5091_v25 = vpop.eup %5090 }
 0xb4f   :  { %v5093_v40 = vpop.eup %5092 }
 0xb50   :  { %v2443_v37 = vmul.f32 %v5093_v40, %v5091_v25  ;;  %v11950_v25 = vld [vmem:[#allocation31_spill] sm:$0xff]  ;;  %v11951_v40 = vld [vmem:[#allocation32_spill] sm:$0xff] }
 0xb52   :  { %v8648_v53 = vpack.c.bf16 %v2443_v37, %v2443_v37  ;;  %v11952_v37 = vld [vmem:[#allocation33_spill] sm:$0xff] }
 0xb54   :  { %2478 = vmatmul.mubr.bf16.vlgmr.msra.gmra.mrb[48].mxu0 %v8648_v53  ;;  %2519 = vmatmul.mubr.bf16.vlgmr.msra.gmra.mrb[48].mxu1 %v8648_v53 }
 0xb55   :  { %2584 = vmatprep.mubr.bf16.mxu0 %v8370_v17  ;;  %2625 = vmatprep.mubr.bf16.mxu1 %v8370_v17  ;;  %v11945_v17 = vld [vmem:[#allocation26_spill] sm:$0xff] }
 0xb56   :  { %2594 = vmatpush1.bf16.msra.mxu1 %v7776_v16  ;;  %2553 = vmatpush1.bf16.msra.mxu0 %v11936_v26  ;;  %v11946_v16 = vld [vmem:[#allocation27_spill] sm:$0xff]  ;;  %v11953_v26 = vld [vmem:[#allocation34_spill] sm:$0xff] }
 0xb57   :  { %2595 = vmatprep.subr.bf16.mxu1 %v11937_v32  ;;  %2554 = vmatprep.subr.bf16.mxu0 %v11938_v45  ;;  %v11954_v32 = vld [vmem:[#allocation35_spill] sm:$0xff]  ;;  %v11955_v45 = vld [vmem:[#allocation36_spill] sm:$0xff] }
 0xb5a   :  { %2596 = vmatpush1.bf16.msra.mxu1 %v11939_v51  ;;  %2555 = vmatpush1.bf16.msra.mxu0 %v11940_v4  ;;  %v11956_v51 = vld [vmem:[#allocation37_spill] sm:$0xff]  ;;  %v11957_v4 = vld [vmem:[#allocation38_spill] sm:$0xff] }
 0xb5b   :  { %2597 = vmatprep.subr.bf16.mxu1 %v11941_v47  ;;  %2556 = vmatprep.subr.bf16.mxu0 %v11942_v49  ;;  %v11958_v47 = vld [vmem:[#allocation39_spill] sm:$0xff]  ;;  %v11959_v49 = vld [vmem:[#allocation40_spill] sm:$0xff] }
 0xb5e   :  { %2598 = vmatpush1.bf16.msra.mxu1 %v11943_v52  ;;  %2557 = vmatpush1.bf16.msra.mxu0 %v11944_v56  ;;  %v11960_v52 = vld [vmem:[#allocation41_spill] sm:$0xff]  ;;  %v11961_v56 = vld [vmem:[#allocation42_spill] sm:$0xff] }
 0xb5f   :  { %2599 = vmatprep.subr.bf16.mxu1 %v11945_v17  ;;  %2558 = vmatprep.subr.bf16.mxu0 %v11946_v16  ;;  %v11962_v17 = vld [vmem:[#allocation43_spill] sm:$0xff]  ;;  %v11963_v16 = vld [vmem:[#allocation44_spill] sm:$0xff] }
 0xb62   :  { %2600 = vmatpush1.bf16.msra.mxu1 %v11947_v9  ;;  %2559 = vmatpush1.bf16.msra.mxu0 %v11948_v24  ;;  %v11964_v9 = vld [vmem:[#allocation45_spill] sm:$0xff]  ;;  %v11965_v24 = vld [vmem:[#allocation46_spill] sm:$0xff] }
 0xb63   :  { %2601 = vmatprep.subr.bf16.mxu1 %v11949_v43  ;;  %2560 = vmatprep.subr.bf16.mxu0 %v11950_v25  ;;  %v11966_v43 = vld [vmem:[#allocation47_spill] sm:$0xff]  ;;  %v11967_v25 = vld [vmem:[#allocation48_spill] sm:$0xff] }
 0xb66   :  { %2602 = vmatpush1.bf16.msra.mxu1 %v11951_v40  ;;  %2561 = vmatpush1.bf16.msra.mxu0 %v11952_v37  ;;  %v11968_v40 = vld [vmem:[#allocation49_spill] sm:$0xff]  ;;  %v11969_v37 = vld [vmem:[#allocation50_spill] sm:$0xff] }
 0xb67   :  { %2603 = vmatprep.subr.bf16.mxu1 %v11953_v26  ;;  %2562 = vmatprep.subr.bf16.mxu0 %v11954_v32  ;;  %v11970_v26 = vld [vmem:[#allocation51_spill] sm:$0xff]  ;;  %v11971_v32 = vld [vmem:[#allocation52_spill] sm:$0xff] }
 0xb6a   :  { %2604 = vmatpush1.bf16.msra.mxu1 %v11955_v45  ;;  %2563 = vmatpush1.bf16.msra.mxu0 %v11956_v51  ;;  %v11972_v45 = vld [vmem:[#allocation53_spill] sm:$0xff]  ;;  %v11973_v51 = vld [vmem:[#allocation54_spill] sm:$0xff] }
 0xb6b   :  { %2605 = vmatprep.subr.bf16.mxu1 %v11957_v4  ;;  %2564 = vmatprep.subr.bf16.mxu0 %v11958_v47  ;;  %v11974_v4 = vld [vmem:[#allocation55_spill] sm:$0xff]  ;;  %v11975_v47 = vld [vmem:[#allocation56_spill] sm:$0xff] }
 0xb6e   :  { %2606 = vmatpush1.bf16.msra.mxu1 %v11959_v49  ;;  %2565 = vmatpush1.bf16.msra.mxu0 %v11960_v52  ;;  %v11976_v49 = vld [vmem:[#allocation57_spill] sm:$0xff]  ;;  %v11977_v52 = vld [vmem:[#allocation58_spill] sm:$0xff] }
 0xb6f   :  { %2607 = vmatprep.subr.bf16.mxu1 %v11961_v56  ;;  %2566 = vmatprep.subr.bf16.mxu0 %v11962_v17  ;;  %v11978_v56 = vld [vmem:[#allocation59_spill] sm:$0xff]  ;;  %v11979_v17 = vld [vmem:[#allocation60_spill] sm:$0xff] }
 0xb72   :  { %2608 = vmatpush1.bf16.msra.mxu1 %v11963_v16  ;;  %2567 = vmatpush1.bf16.msra.mxu0 %v11964_v9  ;;  %v11980_v16 = vld [vmem:[#allocation61_spill] sm:$0xff]  ;;  %v11981_v9 = vld [vmem:[#allocation62_spill] sm:$0xff] }
 0xb73   :  { %2609 = vmatprep.subr.bf16.mxu1 %v11965_v24  ;;  %2568 = vmatprep.subr.bf16.mxu0 %v11966_v43  ;;  %v11982_v24 = vld [vmem:[#allocation63_spill] sm:$0xff]  ;;  %v11983_v43 = vld [vmem:[#allocation64_spill] sm:$0xff] }
 0xb76   :  { %2610 = vmatpush1.bf16.msra.mxu1 %v11967_v25  ;;  %2569 = vmatpush1.bf16.msra.mxu0 %v11968_v40  ;;  %v11984_v25 = vld [vmem:[#allocation65_spill] sm:$0xff]  ;;  %v11985_v40 = vld [vmem:[#allocation66_spill] sm:$0xff] }
 0xb77   :  { %2611 = vmatprep.subr.bf16.mxu1 %v11969_v37  ;;  %2570 = vmatprep.subr.bf16.mxu0 %v11970_v26  ;;  %v11986_v37 = vld [vmem:[#allocation67_spill] sm:$0xff]  ;;  %v11987_v26 = vld [vmem:[#allocation68_spill] sm:$0xff] }
 0xb7a   :  { %2612 = vmatpush1.bf16.msra.mxu1 %v11971_v32  ;;  %2571 = vmatpush1.bf16.msra.mxu0 %v11972_v45  ;;  %v11988_v32 = vld [vmem:[#allocation69_spill] sm:$0xff]  ;;  %v11989_v45 = vld [vmem:[#allocation71_spill] sm:$0xff] }
 0xb7b   :  { %2613 = vmatprep.subr.bf16.mxu1 %v11973_v51  ;;  %2572 = vmatprep.subr.bf16.mxu0 %v11974_v4  ;;  %v11990_v51 = vld [vmem:[#allocation72_spill] sm:$0xff]  ;;  %v11991_v4 = vld [vmem:[#allocation73_spill] sm:$0xff] }
 0xb7e   :  { %2614 = vmatpush1.bf16.msra.mxu1 %v11975_v47  ;;  %2573 = vmatpush1.bf16.msra.mxu0 %v11976_v49  ;;  %v11992_v47 = vld [vmem:[#allocation74_spill] sm:$0xff]  ;;  %v11993_v49 = vld [vmem:[#allocation76_spill] sm:$0xff] }
 0xb7f   :  { %2615 = vmatprep.subr.bf16.mxu1 %v11977_v52  ;;  %2574 = vmatprep.subr.bf16.mxu0 %v11978_v56  ;;  %v11994_v52 = vld [vmem:[#allocation77_spill] sm:$0xff]  ;;  %v11995_v56 = vld [vmem:[#allocation78_spill] sm:$0xff] }
 0xb82   :  { %2616 = vmatpush1.bf16.msra.mxu1 %v11979_v17  ;;  %2575 = vmatpush1.bf16.msra.mxu0 %v11980_v16  ;;  %v11996_v17 = vld [vmem:[#allocation79_spill] sm:$0xff]  ;;  %v11997_v16 = vld [vmem:[#allocation80_spill] sm:$0xff] }
 0xb83   :  { %2617 = vmatprep.subr.bf16.mxu1 %v11981_v9  ;;  %2576 = vmatprep.subr.bf16.mxu0 %v11982_v24 }
 0xb86   :  { %2618 = vmatpush1.bf16.msra.mxu1 %v11983_v43  ;;  %2577 = vmatpush1.bf16.msra.mxu0 %v11984_v25  ;;  %v11998_v43 = vld [vmem:[#allocation70_spill] sm:$0xff] }
 0xb87   :  { %2619 = vmatprep.subr.bf16.mxu1 %v11985_v40  ;;  %2578 = vmatprep.subr.bf16.mxu0 %v11986_v37 }
 0xb8a   :  { %2620 = vmatpush1.bf16.msra.mxu1 %v11987_v26  ;;  %2579 = vmatpush1.bf16.msra.mxu0 %v11988_v32 }
 0xb8b   :  { %2621 = vmatprep.subr.bf16.mxu1 %v11989_v45  ;;  %2580 = vmatprep.subr.bf16.mxu0 %v11990_v51 }
 0xb8e   :  { %2622 = vmatpush1.bf16.msra.mxu1 %v11991_v4  ;;  %2581 = vmatpush1.bf16.msra.mxu0 %v11992_v47 }
 0xb8f   :  { %2623 = vmatprep.subr.bf16.mxu1 %v11993_v49  ;;  %2582 = vmatprep.subr.bf16.mxu0 %v11994_v52 }
 0xb92   :  { %2624 = vmatpush1.bf16.msra.mxu1 %v11995_v56  ;;  %2583 = vmatpush1.bf16.msra.mxu0 %v11996_v17 }
 0xb93   :  { %2701 = vmatprep.subr.bf16.mxu1 %v11997_v16  ;;  %4575 = vmatprep.subr.bf16.mxu0 %v11670_v39 }
 0xc27   :  { %v2479_v9 = vpop.f32.mrb[48].mxu0  ;;  %v2520_v24 = vpop.f32.mrb[48].mxu1 }
 0xc28   :  { %v2480_v25 = vadd.f32 %v2479_v9, %v11998_v43  ;;  %v2481_v40 = vpop.f32.mrb[49].mxu0  ;;  %v2522_v37 = vpop.f32.mrb[49].mxu1  ;;  %v2521_v17 = vadd.f32 %v2520_v24, %v6833_v5 }
 0xc29   :  { %v2482_v26 = vadd.f32 %v2481_v40, %v6824_v19  ;;  %v2483_v32 = vpop.f32.mrb[50].mxu0  ;;  %v2524_v45 = vpop.f32.mrb[50].mxu1  ;;  %v2523_v52 = vadd.f32 %v2522_v37, %v11777_v34 }
 0xc2a   :  { %v4367_v51 = vmul.f32 -1.442695, %v2480_v25  ;;  %v2484_v4 = vpop.f32.mrb[51].mxu0  ;;  %v2525_v47 = vpop.f32.mrb[51].mxu1 }
 0xc2b   :  { %v4368_v49 = vmul.f32 -1.442695, %v2482_v26  ;;  %v4369_v56 = vmul.f32 -1.442695, %v2523_v52 }
 0xc2c   :  { %5094 = vpow2.f32 %v4367_v51 }
 0xc2d   :  { %5096 = vpow2.f32 %v4368_v49 }
 0xc2e   :  { %5098 = vpow2.f32 %v4369_v56  ;;  %v8842_v56 = vld [vmem:[%s11181_s5 + $0xc0] ss:$16 sps:$4 sm:$0xff]  }
 0xc2f   :  { %5100 = vtanh.f32 %v2521_v17  ;;  %v8848_v17 = vld [vmem:[%s11181_s5 + $0xe4] ss:$16 sps:$4 sm:$0xff]  }
 0xc36   :  { %v5095_v16 = vpop.eup %5094 }
 0xc37   :  { %v5097_v21 = vpop.eup %5096  ;;  %v2530_v9 = vadd.f32 1.0, %v5095_v16  ;;  %v8854_v16 = vld [vmem:[%s11181_s5 + $0xe0] ss:$16 sps:$4 sm:$0xff]  }
 0xc38   :  { %v2536_v43 = vadd.f32 1.0, %v5097_v21  ;;  %v5099_v40 = vpop.eup %5098  ;;  %v11999_v21 = vld [vmem:[#allocation81_spill] sm:$0xff] }
 0xc39   :  { %5102 = vrcp.f32 %v2530_v9  ;;  %v5101_v25 = vpop.eup %5100  ;;  %v2543_v51 = vadd.f32 1.0, %v5099_v40  ;;  %v8860_v9 = vld [vmem:[%s11181_s5 + $0x104] ss:$16 sps:$4 sm:$0xff]   ;;  %v8866_v40 = vld [vmem:[%s11181_s5 + $0x100] ss:$16 sps:$4 sm:$0xff]  }
 0xc3a   :  { %5104 = vrcp.f32 %v2536_v43  ;;  %v8836_v43 = vld [vmem:[%s11181_s5 + $0xc4] ss:$16 sps:$4 sm:$0xff]  }
 0xc3b   :  { %5106 = vrcp.f32 %v2543_v51  ;;  %v8896_v51 = vld [vmem:[%s11181_s5 + $0x164] ss:$16 sps:$4 sm:$0xff]  }
 0xc3c   :  { %12011 = vst [vmem:[#allocation19_spill] sm:$0xff] %v8896_v51 }
 0xc43   :  { %v5103_v32 = vpop.eup %5102 }
 0xc44   :  { %v5105_v45 = vpop.eup %5104  ;;  %v2547_v26 = vmul.f32 %v5103_v32, %v5101_v25  ;;  %v8872_v25 = vld [vmem:[%s11181_s5 + $0x124] ss:$16 sps:$4 sm:$0xff]   ;;  %v8878_v32 = vld [vmem:[%s11181_s5 + $0x120] ss:$16 sps:$4 sm:$0xff]  }
 0xc45   :  { %v2546_v4 = vmul.f32 %v5105_v45, %v8157_v18  ;;  %v5107_v24 = vpop.eup %5106  ;;  %v12000_v18 = vld [vmem:[#allocation82_spill] sm:$0xff]  ;;  %12007 = vst [vmem:[#allocation15_spill] sm:$0xff] %v8872_v25  ;;  %12008 = vst [vmem:[#allocation16_spill] sm:$0xff] %v8878_v32 }
 0xc46   :  { %v8884_v45 = vld [vmem:[%s11181_s5 + $0x144] ss:$16 sps:$4 sm:$0xff]  }
 0xc47   :  { %v8723_v37 = vadd.f32 %v2547_v26, %v2546_v4  ;;  %12009 = vst [vmem:[#allocation17_spill] sm:$0xff] %v8884_v45  ;;  %v8890_v26 = vld [vmem:[%s11181_s5 + $0x140] ss:$16 sps:$4 sm:$0xff]  }
 0xc48   :  { %12010 = vst [vmem:[#allocation18_spill] sm:$0xff] %v8890_v26  ;;  %v8902_v4 = vld [vmem:[%s11181_s5 + $0x160] ss:$16 sps:$4 sm:$0xff]  }
 0xc49   :  { %5108 = vtanh.f32 %v8723_v37  ;;  %12012 = vst [vmem:[#allocation20_spill] sm:$0xff] %v8902_v4 }
 0xc53   :  { %v5109_v47 = vpop.eup %5108 }
 0xc54   :  { %v2550_v49 = vmul.f32 %v5109_v47, %v5107_v24  ;;  %v8908_v24 = vld [vmem:[%s11181_s5 + $0x184] ss:$16 sps:$4 sm:$0xff]   ;;  %v8914_v47 = vld [vmem:[%s11181_s5 + $0x180] ss:$16 sps:$4 sm:$0xff]  }
 0xc55   :  { %12013 = vst [vmem:[#allocation21_spill] sm:$0xff] %v8908_v24  ;;  %12014 = vst [vmem:[#allocation22_spill] sm:$0xff] %v8914_v47 }
 0xc56   :  { %v8726_v52 = vpack.c.bf16 %v2550_v49, %v2550_v49  ;;  %v8920_v49 = vld [vmem:[%s11181_s5 + $0x1a4] ss:$16 sps:$4 sm:$0xff]  }
 0xc57   :  { %12015 = vst [vmem:[#allocation23_spill] sm:$0xff] %v8920_v49 }
 0xc58   :  { %2585 = vmatmul.mubr.bf16.vlgmr.msra.gmra.mrb[52].mxu0 %v8726_v52  ;;  %2626 = vmatmul.mubr.bf16.vlgmr.msra.gmra.mrb[52].mxu1 %v8726_v52 }
 0xc59   :  { %2702 = vmatpush1.bf16.msra.mxu1 %v8167_v28  ;;  %2733 = vmatprep.mubr.bf16.mxu1 %v11673_v35  ;;  %v12001_v28 = vld [vmem:[#allocation83_spill] sm:$0xff] }
 0xc5a   :  { %2703 = vmatprep.subr.bf16.mxu1 %v8174_v8  ;;  %4576 = vmatpush3.bf16.msra.mxu0 %v8180_v22  ;;  %v12002_v8 = vld [vmem:[#allocation84_spill] sm:$0xff]  ;;  %v12003_v22 = vld [vmem:[#allocation85_spill] sm:$0xff] }
 0xc5b   :  { %4577 = vmatprep.subr.bf16.mxu0 %v11670_v39  ;;  %4591 = vmatprep.mubr.msk.bf16.mxu0 %vm5885_vm0, %v11670_v39 }
 0xc5d   :  { %2704 = vmatpush1.bf16.msra.mxu1 %v8189_v50  ;;  %v12004_v50 = vld [vmem:[#allocation86_spill] sm:$0xff] }
 0xc5e   :  { %2705 = vmatprep.subr.bf16.mxu1 %v8195_v48  ;;  %4578 = vmatpush3.bf16.msra.mxu0 %v8201_v36  ;;  %v12005_v48 = vld [vmem:[#allocation87_spill] sm:$0xff]  ;;  %v12006_v36 = vld [vmem:[#allocation88_spill] sm:$0xff] }
 0xc5f   :  { %4579 = vmatprep.subr.bf16.mxu0 %v11670_v39 }
 0xc61   :  { %2706 = vmatpush1.bf16.msra.mxu1 %v8208_v46  ;;  %v8770_v46 = vld [vmem:[%s11181_s5] ss:$16 sps:$4 sm:$0xff]  }
 0xc62   :  { %2707 = vmatprep.subr.bf16.mxu1 %v8214_v3  ;;  %4580 = vmatpush3.bf16.msra.mxu0 %v8220_v13  ;;  %v8776_v3 = vld [vmem:[%s11181_s5 + $0x24] ss:$16 sps:$4 sm:$0xff]   ;;  %v8782_v13 = vld [vmem:[%s11181_s5 + $0x20] ss:$16 sps:$4 sm:$0xff]  }
 0xc63   :  { %4581 = vmatprep.subr.bf16.mxu0 %v11670_v39 }
 0xc65   :  { %2708 = vmatpush1.bf16.msra.mxu1 %v8227_v41  ;;  %v8788_v41 = vld [vmem:[%s11181_s5 + $0x44] ss:$16 sps:$4 sm:$0xff]  }
 0xc66   :  { %2709 = vmatprep.subr.bf16.mxu1 %v8233_v62  ;;  %4582 = vmatpush3.bf16.msra.mxu0 %v8239_v14  ;;  %v8794_v62 = vld [vmem:[%s11181_s5 + $0x40] ss:$16 sps:$4 sm:$0xff]   ;;  %v8800_v14 = vld [vmem:[%s11181_s5 + $0x64] ss:$16 sps:$4 sm:$0xff]  }
 0xc67   :  { %4583 = vmatprep.subr.bf16.mxu0 %v11670_v39 }
 0xc69   :  { %2710 = vmatpush1.bf16.msra.mxu1 %v8246_v20  ;;  %v8806_v20 = vld [vmem:[%s11181_s5 + $0x60] ss:$16 sps:$4 sm:$0xff]  }
 0xc6a   :  { %2711 = vmatprep.subr.bf16.mxu1 %v11999_v21  ;;  %4584 = vmatpush3.bf16.msra.mxu0 %v12000_v18  ;;  %v8926_v21 = vld [vmem:[%s11181_s5 + $0x1a0] ss:$16 sps:$4 sm:$0xff]   ;;  %v8932_v18 = vld [vmem:[%s11181_s5 + $0x1c4] ss:$16 sps:$4 sm:$0xff]  }
 0xc6b   :  { %4585 = vmatprep.subr.bf16.mxu0 %v11670_v39  ;;  %12016 = vst [vmem:[#allocation24_spill] sm:$0xff] %v8926_v21  ;;  %12017 = vst [vmem:[#allocation25_spill] sm:$0xff] %v8932_v18 }
 0xc6d   :  { %2712 = vmatpush1.bf16.msra.mxu1 %v12001_v28  ;;  %v8938_v28 = vld [vmem:[%s11181_s5 + $0x1c0] ss:$16 sps:$4 sm:$0xff]  }
 0xc6e   :  { %2713 = vmatprep.subr.bf16.mxu1 %v12002_v8  ;;  %4586 = vmatpush3.bf16.msra.mxu0 %v12003_v22  ;;  %12018 = vst [vmem:[#allocation26_spill] sm:$0xff] %v8938_v28  ;;  %v8944_v8 = vld [vmem:[%s11181_s5 + $0x1e4] ss:$16 sps:$4 sm:$0xff]   ;;  %v8950_v22 = vld [vmem:[%s11181_s5 + $0x1e0] ss:$16 sps:$4 sm:$0xff]  }
 0xc6f   :  { %4587 = vmatprep.subr.bf16.mxu0 %v11670_v39  ;;  %12019 = vst [vmem:[#allocation27_spill] sm:$0xff] %v8944_v8  ;;  %12020 = vst [vmem:[#allocation28_spill] sm:$0xff] %v8950_v22 }
 0xc71   :  { %2714 = vmatpush1.bf16.msra.mxu1 %v12004_v50  ;;  %v8956_v50 = vld [vmem:[%s11183_s7 + $0x4] ss:$16 sps:$4 sm:$0xff]  }
 0xc72   :  { %2715 = vmatprep.subr.bf16.mxu1 %v12005_v48  ;;  %4588 = vmatpush3.bf16.msra.mxu0 %v12006_v36  ;;  %12021 = vst [vmem:[#allocation29_spill] sm:$0xff] %v8956_v50 }
 0xc73   :  { %4589 = vmatprep.subr.bf16.mxu0 %v11670_v39 }
 0xc75   :  { %2716 = vmatpush1.bf16.msra.mxu1 %v8303_v10  ;;  %v8824_v10 = vld [vmem:[%s11181_s5 + $0xa4] ss:$16 sps:$4 sm:$0xff]  }
 0xc76   :  { %4590 = vmatpush3.bf16.msra.mxu0 %v8309_v54  ;;  %2808 = vmatprep.subr.bf16.mxu1 %v8315_v30  ;;  %v8818_v30 = vld [vmem:[%s11181_s5 + $0x80] ss:$16 sps:$4 sm:$0xff]  }
 0xc77   :  { %2742 = vmatprep.subr.bf16.mxu0 %v8321_v7  ;;  %v8812_v7 = vld [vmem:[%s11181_s5 + $0x84] ss:$16 sps:$4 sm:$0xff]   ;;  %v8830_v54 = vld [vmem:[%s11181_s5 + $0xa0] ss:$16 sps:$4 sm:$0xff]  }
 0xc78   :  { %2734 = vmatmul.mubr.bf16.vlgmr.msra.gmra.mrb[56].mxu1 %v8648_v53 }
 0xc79   :  { %2840 = vmatprep.mubr.bf16.mxu1 %v8726_v52  ;;  %2809 = vmatpush1.bf16.msra.mxu1 %v8770_v46 }
 0xc7a   :  { %2810 = vmatprep.subr.bf16.mxu1 %v8776_v3 }
 0xc7d   :  { %2811 = vmatpush1.bf16.msra.mxu1 %v8782_v13 }
 0xc7e   :  { %2812 = vmatprep.subr.bf16.mxu1 %v8788_v41 }
 0xc81   :  { %2813 = vmatpush1.bf16.msra.mxu1 %v8794_v62 }
 0xc82   :  { %2814 = vmatprep.subr.bf16.mxu1 %v8800_v14 }
 0xc85   :  { %2815 = vmatpush1.bf16.msra.mxu1 %v8806_v20 }
 0xc86   :  { %2816 = vmatprep.subr.bf16.mxu1 %v8812_v7 }
 0xc89   :  { %2817 = vmatpush1.bf16.msra.mxu1 %v8818_v30 }
 0xc8a   :  { %2818 = vmatprep.subr.bf16.mxu1 %v8824_v10 }
 0xc8d   :  { %2819 = vmatpush1.bf16.msra.mxu1 %v8830_v54 }
 0xc8e   :  { %2820 = vmatprep.subr.bf16.mxu1 %v8836_v43 }
 0xc91   :  { %2821 = vmatpush1.bf16.msra.mxu1 %v8842_v56 }
 0xc92   :  { %2822 = vmatprep.subr.bf16.mxu1 %v8848_v17 }
 0xc95   :  { %2823 = vmatpush1.bf16.msra.mxu1 %v8854_v16 }
 0xc96   :  { %2824 = vmatprep.subr.bf16.mxu1 %v8860_v9 }
 0xc99   :  { %2825 = vmatpush1.bf16.msra.mxu1 %v8866_v40 }
 0xc9a   :  { %2826 = vmatprep.subr.bf16.mxu1 %v8872_v25 }
 0xc9d   :  { %2827 = vmatpush1.bf16.msra.mxu1 %v8878_v32 }
 0xc9e   :  { %2828 = vmatprep.subr.bf16.mxu1 %v8884_v45 }
 0xca1   :  { %2829 = vmatpush1.bf16.msra.mxu1 %v8890_v26 }
 0xca2   :  { %2830 = vmatprep.subr.bf16.mxu1 %v8896_v51 }
 0xca5   :  { %2831 = vmatpush1.bf16.msra.mxu1 %v8902_v4 }
 0xca6   :  { %2832 = vmatprep.subr.bf16.mxu1 %v8908_v24 }
 0xca9   :  { %2833 = vmatpush1.bf16.msra.mxu1 %v8914_v47 }
 0xcaa   :  { %2834 = vmatprep.subr.bf16.mxu1 %v8920_v49 }
 0xcad   :  { %2835 = vmatpush1.bf16.msra.mxu1 %v8926_v21 }
 0xcae   :  { %2836 = vmatprep.subr.bf16.mxu1 %v8932_v18 }
 0xcb1   :  { %2837 = vmatpush1.bf16.msra.mxu1 %v8938_v28 }
 0xcb2   :  { %2838 = vmatprep.subr.bf16.mxu1 %v8944_v8 }
 0xcb5   :  { %2839 = vmatpush1.bf16.msra.mxu1 %v8950_v22 }
 0xcb6   :  { %2915 = vmatprep.subr.bf16.mxu1 %v8956_v50 }
 0xd2b   :  { %v2586_v48 = vpop.f32.mrb[52].mxu0  ;;  %v2627_v36 = vpop.f32.mrb[52].mxu1 }
 0xd2c   :  { %v2587_v28 = vadd.f32 %v2586_v48, %v11907_v55  ;;  %v2588_v18 = vpop.f32.mrb[53].mxu0  ;;  %v2629_v8 = vpop.f32.mrb[53].mxu1  ;;  %v2628_v50 = vadd.f32 %v2627_v36, %v7053_v42  ;;  %v12040_v36 = vld [vmem:[#allocation4_spill] sm:$0xff] }
 0xd2d   :  { %v2589_v21 = vadd.f32 %v2588_v18, %v7044_v12  ;;  %v2590_v49 = vpop.f32.mrb[54].mxu0  ;;  %v2631_v47 = vpop.f32.mrb[54].mxu1  ;;  %v2630_v26 = vadd.f32 %v2629_v8, %v7049_v38 }
 0xd2e   :  { %v4370_v24 = vmul.f32 -1.442695, %v2587_v28  ;;  %v2591_v4 = vpop.f32.mrb[55].mxu0  ;;  %v2632_v22 = vpop.f32.mrb[55].mxu1 }
 0xd2f   :  { %v4371_v51 = vmul.f32 -1.442695, %v2589_v21  ;;  %v4372_v45 = vmul.f32 -1.442695, %v2630_v26 }
 0xd30   :  { %5110 = vpow2.f32 %v4370_v24 }
 0xd31   :  { %5112 = vpow2.f32 %v4371_v51 }
 0xd32   :  { %5114 = vpow2.f32 %v4372_v45 }
 0xd33   :  { %5116 = vtanh.f32 %v2628_v50 }
 0xd3a   :  { %v5111_v32 = vpop.eup %5110 }
 0xd3b   :  { %v5113_v25 = vpop.eup %5112  ;;  %v2637_v48 = vadd.f32 1.0, %v5111_v32 }
 0xd3c   :  { %v2643_v55 = vadd.f32 1.0, %v5113_v25  ;;  %v5115_v47 = vpop.eup %5114 }
 0xd3d   :  { %5118 = vrcp.f32 %v2637_v48  ;;  %v5117_v49 = vpop.eup %5116  ;;  %v2650_v24 = vadd.f32 1.0, %v5115_v47  ;;  %v12041_v48 = vld [vmem:[#allocation6_spill] sm:$0xff]  ;;  %v12042_v47 = vld [vmem:[#allocation7_spill] sm:$0xff] }
 0xd3e   :  { %5120 = vrcp.f32 %v2643_v55 }
 0xd3f   :  { %5122 = vrcp.f32 %v2650_v24  ;;  %v12047_v24 = vld [vmem:[#allocation12_spill] sm:$0xff] }
 0xd47   :  { %v5119_v4 = vpop.eup %5118 }
 0xd48   :  { %v5121_v18 = vpop.eup %5120  ;;  %v2654_v21 = vmul.f32 %v5119_v4, %v5117_v49  ;;  %v12043_v49 = vld [vmem:[#allocation8_spill] sm:$0xff]  ;;  %v12044_v4 = vld [vmem:[#allocation9_spill] sm:$0xff] }
 0xd49   :  { %v2653_v51 = vmul.f32 %v5121_v18, %v8363_v61  ;;  %v5123_v55 = vpop.eup %5122  ;;  %v12022_v61 = vld [vmem:[#allocation89_spill] sm:$0xff]  ;;  %v12045_v18 = vld [vmem:[#allocation10_spill] sm:$0xff] }
 0xd4b   :  { %v8964_v28 = vadd.f32 %v2654_v21, %v2653_v51  ;;  %v8966_v26 = vpop.f32.mrb[56].mxu1  ;;  %v12046_v21 = vld [vmem:[#allocation11_spill] sm:$0xff] }
 0xd4c   :  { %v8968_v8 = vpop.f32.mrb[57].mxu1  ;;  %v9021_v51 = vld [vmem:[%s11181_s5 + $0x1ac] ss:$16 sps:$4 sm:$0xff]  }
 0xd4d   :  { %v2739_v32 = vpop.f32.mrb[58].mxu1  ;;  %5124 = vtanh.f32 %v8964_v28 }
 0xd4e   :  { %v2740_v25 = vpop.f32.mrb[59].mxu1  ;;  %v9027_v32 = vld [vmem:[%s11181_s5 + $0x1a8] ss:$16 sps:$4 sm:$0xff]  }
 0xd4f   :  { %v9033_v25 = vld [vmem:[%s11181_s5 + $0x1cc] ss:$16 sps:$4 sm:$0xff]  }
 0xd57   :  { %v5125_v45 = vpop.eup %5124 }
 0xd58   :  { %v2657_v22 = vmul.f32 %v5125_v45, %v5123_v55  ;;  %v9039_v55 = vld [vmem:[%s11181_s5 + $0x1c8] ss:$16 sps:$4 sm:$0xff]   ;;  %v9045_v45 = vld [vmem:[%s11181_s5 + $0x1ec] ss:$16 sps:$4 sm:$0xff]  }
 0xd5a   :  { %v8971_v50 = vpack.c.bf16 %v2657_v22, %v2657_v22  ;;  %v9051_v22 = vld [vmem:[%s11181_s5 + $0x1e8] ss:$16 sps:$4 sm:$0xff]  }
 0xd5c   :  { %4592 = vmatmul.mubr.bf16.vlgmr.msra.gmra.mrb[56].mxu0 %v8971_v50 }
 0xd5d   :  { %2743 = vmatpush1.bf16.msra.mxu0 %v8376_v33  ;;  %2774 = vmatprep.mubr.bf16.mxu0 %v11673_v35  ;;  %v12023_v33 = vld [vmem:[#allocation90_spill] sm:$0xff] }
 0xd5e   :  { %2744 = vmatprep.subr.bf16.mxu0 %v8383_v29  ;;  %v12024_v29 = vld [vmem:[#allocation91_spill] sm:$0xff] }
 0xd61   :  { %2745 = vmatpush1.bf16.msra.mxu0 %v8389_v0  ;;  %v12025_v0 = vld [vmem:[#allocation92_spill] sm:$0xff] }
 0xd62   :  { %2746 = vmatprep.subr.bf16.mxu0 %v8395_v1  ;;  %v12026_v1 = vld [vmem:[#allocation93_spill] sm:$0xff] }
 0xd65   :  { %2747 = vmatpush1.bf16.msra.mxu0 %v8401_v23  ;;  %v12027_v23 = vld [vmem:[#allocation94_spill] sm:$0xff] }
 0xd66   :  { %2748 = vmatprep.subr.bf16.mxu0 %v8407_v27  ;;  %v12028_v27 = vld [vmem:[#allocation95_spill] sm:$0xff] }
 0xd69   :  { %2749 = vmatpush1.bf16.msra.mxu0 %v8413_v58  ;;  %v12029_v58 = vld [vmem:[#allocation96_spill] sm:$0xff] }
 0xd6a   :  { %2750 = vmatprep.subr.bf16.mxu0 %v8419_v11  ;;  %v12030_v11 = vld [vmem:[#allocation97_spill] sm:$0xff] }
 0xd6d   :  { %2751 = vmatpush1.bf16.msra.mxu0 %v8425_v60  ;;  %v12031_v60 = vld [vmem:[#allocation98_spill] sm:$0xff] }
 0xd6e   :  { %2752 = vmatprep.subr.bf16.mxu0 %v8431_v57  ;;  %v12032_v57 = vld [vmem:[#allocation99_spill] sm:$0xff] }
 0xd71   :  { %2753 = vmatpush1.bf16.msra.mxu0 %v8437_v59  ;;  %v12033_v59 = vld [vmem:[#allocation100_spill] sm:$0xff] }
 0xd72   :  { %2754 = vmatprep.subr.bf16.mxu0 %v8443_v63  ;;  %v12034_v63 = vld [vmem:[#allocation101_spill] sm:$0xff] }
 0xd75   :  { %2755 = vmatpush1.bf16.msra.mxu0 %v8449_v2  ;;  %v12035_v2 = vld [vmem:[#allocation102_spill] sm:$0xff] }
 0xd76   :  { %2756 = vmatprep.subr.bf16.mxu0 %v8455_v6  ;;  %v12036_v6 = vld [vmem:[#allocation103_spill] sm:$0xff] }
 0xd79   :  { %2757 = vmatpush1.bf16.msra.mxu0 %v8461_v31  ;;  %v12037_v31 = vld [vmem:[#allocation104_spill] sm:$0xff] }
 0xd7a   :  { %2849 = vmatprep.subr.bf16.mxu0 %v12022_v61  ;;  %v9057_v61 = vld [vmem:[%s11183_s7 + $0xc] ss:$16 sps:$4 sm:$0xff]  }
 0xd7c   :  { %2775 = vmatmul.mubr.bf16.vlgmr.msra.gmra.mrb[60].mxu0 %v8648_v53  ;;  %v12038_v53 = vld [vmem:[#allocation105_spill] sm:$0xff] }
 0xd7d   :  { %2881 = vmatprep.mubr.bf16.mxu0 %v8726_v52  ;;  %2850 = vmatpush1.bf16.msra.mxu0 %v12023_v33  ;;  %v12039_v52 = vld [vmem:[#allocation5_spill] sm:$0xff] }
 0xd7e   :  { %2851 = vmatprep.subr.bf16.mxu0 %v12024_v29  ;;  %v12048_v29 = vld [vmem:[#allocation13_spill] sm:$0xff] }
 0xd81   :  { %2852 = vmatpush1.bf16.msra.mxu0 %v12025_v0 }
 0xd82   :  { %2853 = vmatprep.subr.bf16.mxu0 %v12026_v1 }
 0xd85   :  { %2854 = vmatpush1.bf16.msra.mxu0 %v12027_v23 }
 0xd86   :  { %2855 = vmatprep.subr.bf16.mxu0 %v12028_v27 }
 0xd89   :  { %2856 = vmatpush1.bf16.msra.mxu0 %v12029_v58  ;;  %v12049_v58 = vld [vmem:[#allocation3_spill] sm:$0xff] }
 0xd8a   :  { %2857 = vmatprep.subr.bf16.mxu0 %v12030_v11  ;;  %v2738_v11 = vadd.f32 %v8968_v8, %v12049_v58 }
 0xd8d   :  { %2858 = vmatpush1.bf16.msra.mxu0 %v12031_v60  ;;  %v12050_v60 = vld [vmem:[#allocation2_spill] sm:$0xff] }
 0xd8e   :  { %2859 = vmatprep.subr.bf16.mxu0 %v12032_v57  ;;  %v2736_v57 = vadd.f32 %v8966_v26, %v12050_v60 }
 0xd91   :  { %2860 = vmatpush1.bf16.msra.mxu0 %v12033_v59  ;;  %v4375_v59 = vmul.f32 -1.442695, %v2738_v11 }
 0xd92   :  { %2861 = vmatprep.subr.bf16.mxu0 %v12034_v63  ;;  %v4374_v63 = vmul.f32 -1.442695, %v2736_v57 }
 0xd93   :  { %5126 = vpow2.f32 %v4375_v59 }
 0xd94   :  { %5128 = vpow2.f32 %v4374_v63  ;;  %v9083_v63 = vld [vmem:[%s11183_s7 + $0x8] ss:$16 sps:$4 sm:$0xff]  }
 0xd95   :  { %2862 = vmatpush1.bf16.msra.mxu0 %v12035_v2 }
 0xd96   :  { %2863 = vmatprep.subr.bf16.mxu0 %v12036_v6 }
 0xd99   :  { %2864 = vmatpush1.bf16.msra.mxu0 %v12037_v31 }
 0xd9a   :  { %2865 = vmatprep.subr.bf16.mxu0 %v12038_v53 }
 0xd9d   :  { %2866 = vmatpush1.bf16.msra.mxu0 %v12039_v52  ;;  %v5127_v2 = vpop.eup %5126 }
 0xd9e   :  { %2867 = vmatprep.subr.bf16.mxu0 %v12040_v36  ;;  %v5129_v6 = vpop.eup %5128  ;;  %v2792_v31 = vadd.f32 1.0, %v5127_v2  ;;  %v9089_v2 = vld [vmem:[%s11183_s7] ss:$16 sps:$4 sm:$0xff]  }
 0xd9f   :  { %v2786_v53 = vadd.f32 1.0, %v5129_v6  ;;  %v9095_v6 = vld [vmem:[%s11183_s7 + $0x2c] ss:$16 sps:$4 sm:$0xff]  }
 0xda0   :  { %5130 = vrcp.f32 %v2792_v31  ;;  %v9107_v31 = vld [vmem:[%s11183_s7 + $0x28] ss:$16 sps:$4 sm:$0xff]  }
 0xda1   :  { %2868 = vmatpush1.bf16.msra.mxu0 %v12041_v48  ;;  %5132 = vrcp.f32 %v2786_v53  ;;  %v9113_v53 = vld [vmem:[%s11183_s7 + $0x20] ss:$16 sps:$4 sm:$0xff]  }
 0xda2   :  { %2869 = vmatprep.subr.bf16.mxu0 %v12042_v47 }
 0xda5   :  { %2870 = vmatpush1.bf16.msra.mxu0 %v12043_v49 }
 0xda6   :  { %2871 = vmatprep.subr.bf16.mxu0 %v12044_v4 }
 0xda9   :  { %2872 = vmatpush1.bf16.msra.mxu0 %v12045_v18 }
 0xdaa   :  { %2873 = vmatprep.subr.bf16.mxu0 %v12046_v21  ;;  %v5131_v4 = vpop.eup %5130 }
 0xdab   :  { %v5133_v18 = vpop.eup %5132 }
 0xdad   :  { %2874 = vmatpush1.bf16.msra.mxu0 %v12047_v24  ;;  %v12051_v24 = vld [vmem:[#allocation14_spill] sm:$0xff] }
 0xdae   :  { %2875 = vmatprep.subr.bf16.mxu0 %v9021_v51 }
 0xdb1   :  { %2876 = vmatpush1.bf16.msra.mxu0 %v9027_v32 }
 0xdb2   :  { %2877 = vmatprep.subr.bf16.mxu0 %v9033_v25 }
 0xdb5   :  { %2878 = vmatpush1.bf16.msra.mxu0 %v9039_v55 }
 0xdb6   :  { %2879 = vmatprep.subr.bf16.mxu0 %v9045_v45 }
 0xdb9   :  { %2880 = vmatpush1.bf16.msra.mxu0 %v9051_v22 }
 0xdba   :  { %2956 = vmatprep.subr.bf16.mxu0 %v9057_v61 }
 0xe2f   :  { %v2693_v33 = vpop.f32.mrb[56].mxu0 }
 0xe30   :  { %v2694_v0 = vadd.f32 %v12048_v29, %v2693_v33  ;;  %v4593_v1 = vpop.f32.mrb[57].mxu0  ;;  %v2802_v33 = vmul.f32 %v5131_v4, %v12051_v24  ;;  %v9161_v4 = vld [vmem:[%s11183_s7 + $0x60] ss:$16 sps:$4 sm:$0xff]   ;;  %v9179_v24 = vld [vmem:[%s11183_s7 + $0x88] ss:$16 sps:$4 sm:$0xff]  }
 0xe31   :  { %v2696_v23 = vpop.f32.mrb[58].mxu0  ;;  %12059 = vst [vmem:[#allocation37_spill] sm:$0xff] %v9161_v4  ;;  %12062 = vst [vmem:[#allocation40_spill] sm:$0xff] %v9179_v24 }
 0xe32   :  { %4373 = vst [vmem:[%s11189_s11 + $0x18] sm:$0xff] %v2694_v0  ;;  %v4594_v27 = vpop.f32.mrb[59].mxu0 }
 0xe4f   :  { %v2776_v52 = vpop.f32.mrb[60].mxu0 }
 0xe50   :  { %v2777_v36 = vadd.f32 %v2776_v52, %v11823_v15  ;;  %v2778_v48 = vpop.f32.mrb[61].mxu0  ;;  %v9119_v52 = vld [vmem:[%s11183_s7 + $0x4c] ss:$16 sps:$4 sm:$0xff]  }
 0xe51   :  { %v2779_v47 = vadd.f32 %v2778_v48, %v11824_v44  ;;  %v2780_v8 = vpop.f32.mrb[62].mxu0  ;;  %12052 = vst [vmem:[#allocation30_spill] sm:$0xff] %v9119_v52  ;;  %v9131_v48 = vld [vmem:[%s11183_s7 + $0x48] ss:$16 sps:$4 sm:$0xff]  }
 0xe52   :  { %5134 = vtanh.f32 %v2777_v36  ;;  %v2781_v49 = vpop.f32.mrb[63].mxu0  ;;  %v9125_v36 = vld [vmem:[%s11183_s7 + $0x44] ss:$16 sps:$4 sm:$0xff]   ;;  %12054 = vst [vmem:[#allocation32_spill] sm:$0xff] %v9131_v48  ;;  %v9143_v8 = vld [vmem:[%s11183_s7 + $0x6c] ss:$16 sps:$4 sm:$0xff]  }
 0xe53   :  { %v4376_v26 = vmul.f32 -1.442695, %v2779_v47  ;;  %12053 = vst [vmem:[#allocation31_spill] sm:$0xff] %v9125_v36  ;;  %v9137_v47 = vld [vmem:[%s11183_s7 + $0x40] ss:$16 sps:$4 sm:$0xff]   ;;  %12056 = vst [vmem:[#allocation34_spill] sm:$0xff] %v9143_v8 }
 0xe54   :  { %12055 = vst [vmem:[#allocation33_spill] sm:$0xff] %v9137_v47  ;;  %v9149_v49 = vld [vmem:[%s11183_s7 + $0x64] ss:$16 sps:$4 sm:$0xff]  }
 0xe55   :  { %5136 = vpow2.f32 %v4376_v26  ;;  %12057 = vst [vmem:[#allocation35_spill] sm:$0xff] %v9149_v49  ;;  %v9155_v26 = vld [vmem:[%s11183_s7 + $0x68] ss:$16 sps:$4 sm:$0xff]  }
 0xe56   :  { %12058 = vst [vmem:[#allocation36_spill] sm:$0xff] %v9155_v26 }
 0xe5c   :  { %v5135_v21 = vpop.eup %5134 }
 0xe5d   :  { %v2803_v29 = vmul.f32 %v5135_v21, %v5133_v18  ;;  %v9167_v18 = vld [vmem:[%s11183_s7 + $0x8c] ss:$16 sps:$4 sm:$0xff]   ;;  %v9173_v21 = vld [vmem:[%s11183_s7 + $0x84] ss:$16 sps:$4 sm:$0xff]  }
 0xe5e   :  { %12060 = vst [vmem:[#allocation38_spill] sm:$0xff] %v9167_v18  ;;  %12061 = vst [vmem:[#allocation39_spill] sm:$0xff] %v9173_v21 }
 0xe5f   :  { %v5137_v0 = vpop.eup %5136  ;;  %v9071_v1 = vadd.f32 %v2803_v29, %v2802_v33  ;;  %v9185_v33 = vld [vmem:[%s11183_s7 + $0x80] ss:$16 sps:$4 sm:$0xff]   ;;  %v9191_v29 = vld [vmem:[%s11183_s7 + $0xac] ss:$16 sps:$4 sm:$0xff]  }
 0xe60   :  { %v2799_v23 = vadd.f32 1.0, %v5137_v0  ;;  %12063 = vst [vmem:[#allocation41_spill] sm:$0xff] %v9185_v33  ;;  %12064 = vst [vmem:[#allocation42_spill] sm:$0xff] %v9191_v29  ;;  %v9197_v0 = vld [vmem:[%s11183_s7 + $0xa4] ss:$16 sps:$4 sm:$0xff]  }
 0xe61   :  { %5138 = vtanh.f32 %v9071_v1  ;;  %12065 = vst [vmem:[#allocation43_spill] sm:$0xff] %v9197_v0 }
 0xe62   :  { %5140 = vrcp.f32 %v2799_v23  ;;  %v9203_v23 = vld [vmem:[%s11183_s7 + $0xa8] ss:$16 sps:$4 sm:$0xff]  }
 0xe63   :  { %12066 = vst [vmem:[#allocation44_spill] sm:$0xff] %v9203_v23 }
 0xe6b   :  { %v5139_v27 = vpop.eup %5138 }
 0xe6c   :  { %v5141_v11 = vpop.eup %5140 }
 0xe6d   :  { %v2806_v57 = vmul.f32 %v5141_v11, %v5139_v27  ;;  %v9209_v27 = vld [vmem:[%s11183_s7 + $0xa0] ss:$16 sps:$4 sm:$0xff]   ;;  %v9215_v11 = vld [vmem:[%s11183_s7 + $0xcc] ss:$16 sps:$4 sm:$0xff]  }
 0xe6e   :  { %12067 = vst [vmem:[#allocation45_spill] sm:$0xff] %v9209_v27  ;;  %12068 = vst [vmem:[#allocation46_spill] sm:$0xff] %v9215_v11 }
 0xe6f   :  { %v9074_v59 = vpack.c.bf16 %v2806_v57, %v2806_v57  ;;  %v9221_v57 = vld [vmem:[%s11183_s7 + $0xc4] ss:$16 sps:$4 sm:$0xff]  }
 0xe70   :  { %12069 = vst [vmem:[#allocation47_spill] sm:$0xff] %v9221_v57 }
 0xe71   :  { %2841 = vmatmul.mubr.bf16.vlgmr.msra.gmra.mrb[60].mxu1 %v9074_v59  ;;  %2882 = vmatmul.mubr.bf16.vlgmr.msra.gmra.mrb[64].mxu0 %v9074_v59 }
 0xe72   :  { %2947 = vmatprep.mubr.bf16.mxu1 %v8971_v50  ;;  %2988 = vmatprep.mubr.bf16.mxu0 %v8971_v50  ;;  %v9101_v50 = vld [vmem:[%s11183_s7 + $0x24] ss:$16 sps:$4 sm:$0xff]  }
 0xe73   :  { %2957 = vmatpush1.bf16.msra.mxu0 %v9083_v63  ;;  %2916 = vmatpush1.bf16.msra.mxu1 %v9089_v2 }
 0xe74   :  { %2958 = vmatprep.subr.bf16.mxu0 %v9095_v6  ;;  %2917 = vmatprep.subr.bf16.mxu1 %v9101_v50 }
 0xe77   :  { %2959 = vmatpush1.bf16.msra.mxu0 %v9107_v31  ;;  %2918 = vmatpush1.bf16.msra.mxu1 %v9113_v53 }
 0xe78   :  { %2960 = vmatprep.subr.bf16.mxu0 %v9119_v52  ;;  %2919 = vmatprep.subr.bf16.mxu1 %v9125_v36 }
 0xe7b   :  { %2961 = vmatpush1.bf16.msra.mxu0 %v9131_v48  ;;  %2920 = vmatpush1.bf16.msra.mxu1 %v9137_v47 }
 0xe7c   :  { %2962 = vmatprep.subr.bf16.mxu0 %v9143_v8  ;;  %2921 = vmatprep.subr.bf16.mxu1 %v9149_v49 }
 0xe7f   :  { %2963 = vmatpush1.bf16.msra.mxu0 %v9155_v26  ;;  %2922 = vmatpush1.bf16.msra.mxu1 %v9161_v4 }
 0xe80   :  { %2964 = vmatprep.subr.bf16.mxu0 %v9167_v18  ;;  %2923 = vmatprep.subr.bf16.mxu1 %v9173_v21 }
 0xe83   :  { %2965 = vmatpush1.bf16.msra.mxu0 %v9179_v24  ;;  %2924 = vmatpush1.bf16.msra.mxu1 %v9185_v33 }
 0xe84   :  { %2966 = vmatprep.subr.bf16.mxu0 %v9191_v29  ;;  %2925 = vmatprep.subr.bf16.mxu1 %v9197_v0  ;;  %v12109_v29 = vld [vmem:[#allocation70_spill] sm:$0xff] }
 0xe87   :  { %2967 = vmatpush1.bf16.msra.mxu0 %v9203_v23  ;;  %2926 = vmatpush1.bf16.msra.mxu1 %v9209_v27  ;;  %v9227_v23 = vld [vmem:[%s11183_s7 + $0xc8] ss:$16 sps:$4 sm:$0xff]   ;;  %v9233_v27 = vld [vmem:[%s11183_s7 + $0xc0] ss:$16 sps:$4 sm:$0xff]  }
 0xe88   :  { %2968 = vmatprep.subr.bf16.mxu0 %v9215_v11  ;;  %2927 = vmatprep.subr.bf16.mxu1 %v9221_v57  ;;  %12070 = vst [vmem:[#allocation48_spill] sm:$0xff] %v9227_v23  ;;  %12071 = vst [vmem:[#allocation49_spill] sm:$0xff] %v9233_v27  ;;  %v9239_v11 = vld [vmem:[%s11183_s7 + $0xec] ss:$16 sps:$4 sm:$0xff]   ;;  %v9245_v57 = vld [vmem:[%s11183_s7 + $0xe4] ss:$16 sps:$4 sm:$0xff]  }
 0xe89   :  { %12072 = vst [vmem:[#allocation50_spill] sm:$0xff] %v9239_v11  ;;  %12073 = vst [vmem:[#allocation51_spill] sm:$0xff] %v9245_v57 }
 0xe8b   :  { %2969 = vmatpush1.bf16.msra.mxu0 %v9227_v23  ;;  %2928 = vmatpush1.bf16.msra.mxu1 %v9233_v27  ;;  %v9251_v23 = vld [vmem:[%s11183_s7 + $0xe8] ss:$16 sps:$4 sm:$0xff]   ;;  %v9257_v27 = vld [vmem:[%s11183_s7 + $0xe0] ss:$16 sps:$4 sm:$0xff]  }
 0xe8c   :  { %2970 = vmatprep.subr.bf16.mxu0 %v9239_v11  ;;  %2929 = vmatprep.subr.bf16.mxu1 %v9245_v57  ;;  %12074 = vst [vmem:[#allocation52_spill] sm:$0xff] %v9251_v23  ;;  %12075 = vst [vmem:[#allocation53_spill] sm:$0xff] %v9257_v27  ;;  %v9263_v11 = vld [vmem:[%s11183_s7 + $0x10c] ss:$16 sps:$4 sm:$0xff]   ;;  %v9269_v57 = vld [vmem:[%s11183_s7 + $0x104] ss:$16 sps:$4 sm:$0xff]  }
 0xe8d   :  { %12076 = vst [vmem:[#allocation54_spill] sm:$0xff] %v9263_v11  ;;  %12077 = vst [vmem:[#allocation55_spill] sm:$0xff] %v9269_v57 }
 0xe8f   :  { %2971 = vmatpush1.bf16.msra.mxu0 %v9251_v23  ;;  %2930 = vmatpush1.bf16.msra.mxu1 %v9257_v27  ;;  %v9275_v23 = vld [vmem:[%s11183_s7 + $0x108] ss:$16 sps:$4 sm:$0xff]   ;;  %v9281_v27 = vld [vmem:[%s11183_s7 + $0x100] ss:$16 sps:$4 sm:$0xff]  }
 0xe90   :  { %2972 = vmatprep.subr.bf16.mxu0 %v9263_v11  ;;  %2931 = vmatprep.subr.bf16.mxu1 %v9269_v57  ;;  %12078 = vst [vmem:[#allocation56_spill] sm:$0xff] %v9275_v23  ;;  %12079 = vst [vmem:[#allocation57_spill] sm:$0xff] %v9281_v27  ;;  %v9287_v11 = vld [vmem:[%s11183_s7 + $0x12c] ss:$16 sps:$4 sm:$0xff]   ;;  %v9293_v57 = vld [vmem:[%s11183_s7 + $0x124] ss:$16 sps:$4 sm:$0xff]  }
 0xe91   :  { %12080 = vst [vmem:[#allocation58_spill] sm:$0xff] %v9287_v11  ;;  %12081 = vst [vmem:[#allocation59_spill] sm:$0xff] %v9293_v57 }
 0xe93   :  { %2973 = vmatpush1.bf16.msra.mxu0 %v9275_v23  ;;  %2932 = vmatpush1.bf16.msra.mxu1 %v9281_v27  ;;  %v9299_v23 = vld [vmem:[%s11183_s7 + $0x128] ss:$16 sps:$4 sm:$0xff]   ;;  %v9305_v27 = vld [vmem:[%s11183_s7 + $0x120] ss:$16 sps:$4 sm:$0xff]  }
 0xe94   :  { %2974 = vmatprep.subr.bf16.mxu0 %v9287_v11  ;;  %2933 = vmatprep.subr.bf16.mxu1 %v9293_v57  ;;  %12082 = vst [vmem:[#allocation60_spill] sm:$0xff] %v9299_v23  ;;  %12083 = vst [vmem:[#allocation61_spill] sm:$0xff] %v9305_v27  ;;  %v9311_v11 = vld [vmem:[%s11183_s7 + $0x14c] ss:$16 sps:$4 sm:$0xff]   ;;  %v9317_v57 = vld [vmem:[%s11183_s7 + $0x144] ss:$16 sps:$4 sm:$0xff]  }
 0xe95   :  { %12084 = vst [vmem:[#allocation62_spill] sm:$0xff] %v9311_v11  ;;  %12085 = vst [vmem:[#allocation63_spill] sm:$0xff] %v9317_v57 }
 0xe97   :  { %2975 = vmatpush1.bf16.msra.mxu0 %v9299_v23  ;;  %2934 = vmatpush1.bf16.msra.mxu1 %v9305_v27  ;;  %v9323_v23 = vld [vmem:[%s11183_s7 + $0x148] ss:$16 sps:$4 sm:$0xff]   ;;  %v9329_v27 = vld [vmem:[%s11183_s7 + $0x140] ss:$16 sps:$4 sm:$0xff]  }
 0xe98   :  { %2976 = vmatprep.subr.bf16.mxu0 %v9311_v11  ;;  %2935 = vmatprep.subr.bf16.mxu1 %v9317_v57  ;;  %12086 = vst [vmem:[#allocation64_spill] sm:$0xff] %v9323_v23  ;;  %12087 = vst [vmem:[#allocation65_spill] sm:$0xff] %v9329_v27  ;;  %v9335_v11 = vld [vmem:[%s11183_s7 + $0x16c] ss:$16 sps:$4 sm:$0xff]   ;;  %v9341_v57 = vld [vmem:[%s11183_s7 + $0x164] ss:$16 sps:$4 sm:$0xff]  }
 0xe99   :  { %12088 = vst [vmem:[#allocation66_spill] sm:$0xff] %v9335_v11  ;;  %12089 = vst [vmem:[#allocation67_spill] sm:$0xff] %v9341_v57 }
 0xe9b   :  { %2977 = vmatpush1.bf16.msra.mxu0 %v9323_v23  ;;  %2936 = vmatpush1.bf16.msra.mxu1 %v9329_v27  ;;  %v9347_v23 = vld [vmem:[%s11183_s7 + $0x168] ss:$16 sps:$4 sm:$0xff]   ;;  %v9353_v27 = vld [vmem:[%s11183_s7 + $0x160] ss:$16 sps:$4 sm:$0xff]  }
 0xe9c   :  { %2978 = vmatprep.subr.bf16.mxu0 %v9335_v11  ;;  %2937 = vmatprep.subr.bf16.mxu1 %v9341_v57  ;;  %12090 = vst [vmem:[#allocation68_spill] sm:$0xff] %v9347_v23  ;;  %12091 = vst [vmem:[#allocation69_spill] sm:$0xff] %v9353_v27  ;;  %v9359_v11 = vld [vmem:[%s11183_s7 + $0x18c] ss:$16 sps:$4 sm:$0xff]   ;;  %v9365_v57 = vld [vmem:[%s11183_s7 + $0x184] ss:$16 sps:$4 sm:$0xff]  }
 0xe9d   :  { %12092 = vst [vmem:[#allocation71_spill] sm:$0xff] %v9359_v11  ;;  %12093 = vst [vmem:[#allocation72_spill] sm:$0xff] %v9365_v57 }
 0xe9f   :  { %2979 = vmatpush1.bf16.msra.mxu0 %v9347_v23  ;;  %2938 = vmatpush1.bf16.msra.mxu1 %v9353_v27  ;;  %v9371_v23 = vld [vmem:[%s11183_s7 + $0x188] ss:$16 sps:$4 sm:$0xff]   ;;  %v9377_v27 = vld [vmem:[%s11183_s7 + $0x180] ss:$16 sps:$4 sm:$0xff]  }
 0xea0   :  { %2980 = vmatprep.subr.bf16.mxu0 %v9359_v11  ;;  %2939 = vmatprep.subr.bf16.mxu1 %v9365_v57  ;;  %12094 = vst [vmem:[#allocation73_spill] sm:$0xff] %v9371_v23  ;;  %12095 = vst [vmem:[#allocation74_spill] sm:$0xff] %v9377_v27  ;;  %v9383_v11 = vld [vmem:[%s11183_s7 + $0x1ac] ss:$16 sps:$4 sm:$0xff]   ;;  %v9389_v57 = vld [vmem:[%s11183_s7 + $0x1a4] ss:$16 sps:$4 sm:$0xff]  }
 0xea1   :  { %12096 = vst [vmem:[#allocation76_spill] sm:$0xff] %v9383_v11  ;;  %12097 = vst [vmem:[#allocation77_spill] sm:$0xff] %v9389_v57 }
 0xea3   :  { %2981 = vmatpush1.bf16.msra.mxu0 %v9371_v23  ;;  %2940 = vmatpush1.bf16.msra.mxu1 %v9377_v27  ;;  %v9395_v23 = vld [vmem:[%s11183_s7 + $0x1a8] ss:$16 sps:$4 sm:$0xff]   ;;  %v9401_v27 = vld [vmem:[%s11183_s7 + $0x1a0] ss:$16 sps:$4 sm:$0xff]  }
 0xea4   :  { %2982 = vmatprep.subr.bf16.mxu0 %v9383_v11  ;;  %2941 = vmatprep.subr.bf16.mxu1 %v9389_v57  ;;  %12098 = vst [vmem:[#allocation78_spill] sm:$0xff] %v9395_v23  ;;  %12099 = vst [vmem:[#allocation79_spill] sm:$0xff] %v9401_v27  ;;  %v9407_v11 = vld [vmem:[%s11183_s7 + $0x1cc] ss:$16 sps:$4 sm:$0xff]   ;;  %v9413_v57 = vld [vmem:[%s11183_s7 + $0x1c4] ss:$16 sps:$4 sm:$0xff]  }
 0xea5   :  { %12100 = vst [vmem:[#allocation80_spill] sm:$0xff] %v9407_v11  ;;  %12101 = vst [vmem:[#allocation81_spill] sm:$0xff] %v9413_v57 }
 0xea7   :  { %2983 = vmatpush1.bf16.msra.mxu0 %v9395_v23  ;;  %2942 = vmatpush1.bf16.msra.mxu1 %v9401_v27  ;;  %v9419_v23 = vld [vmem:[%s11183_s7 + $0x1c8] ss:$16 sps:$4 sm:$0xff]   ;;  %v9425_v27 = vld [vmem:[%s11183_s7 + $0x1c0] ss:$16 sps:$4 sm:$0xff]  }
 0xea8   :  { %2984 = vmatprep.subr.bf16.mxu0 %v9407_v11  ;;  %2943 = vmatprep.subr.bf16.mxu1 %v9413_v57  ;;  %12102 = vst [vmem:[#allocation82_spill] sm:$0xff] %v9419_v23  ;;  %12103 = vst [vmem:[#allocation83_spill] sm:$0xff] %v9425_v27  ;;  %v9431_v11 = vld [vmem:[%s11183_s7 + $0x1ec] ss:$16 sps:$4 sm:$0xff]   ;;  %v9437_v57 = vld [vmem:[%s11183_s7 + $0x1e4] ss:$16 sps:$4 sm:$0xff]  }
 0xea9   :  { %12104 = vst [vmem:[#allocation84_spill] sm:$0xff] %v9431_v11  ;;  %12105 = vst [vmem:[#allocation85_spill] sm:$0xff] %v9437_v57 }
 0xeab   :  { %2985 = vmatpush1.bf16.msra.mxu0 %v9419_v23  ;;  %2944 = vmatpush1.bf16.msra.mxu1 %v9425_v27  ;;  %v9443_v23 = vld [vmem:[%s11183_s7 + $0x1e8] ss:$16 sps:$4 sm:$0xff]   ;;  %v9449_v27 = vld [vmem:[%s11183_s7 + $0x1e0] ss:$16 sps:$4 sm:$0xff]  }
 0xeac   :  { %2986 = vmatprep.subr.bf16.mxu0 %v9431_v11  ;;  %2945 = vmatprep.subr.bf16.mxu1 %v9437_v57  ;;  %12106 = vst [vmem:[#allocation86_spill] sm:$0xff] %v9443_v23  ;;  %12107 = vst [vmem:[#allocation87_spill] sm:$0xff] %v9449_v27  ;;  %v9455_v11 = vld [vmem:[%s11179_s3 + $0x4] ss:$16 sps:$4 sm:$0xff]  }
 0xead   :  { %12108 = vst [vmem:[#allocation88_spill] sm:$0xff] %v9455_v11 }
 0xeaf   :  { %2987 = vmatpush1.bf16.msra.mxu0 %v9443_v23  ;;  %2946 = vmatpush1.bf16.msra.mxu1 %v9449_v27 }
 0xeb0   :  { %3064 = vmatprep.subr.bf16.mxu0 %v9455_v11  ;;  %4595 = vmatprep.subr.bf16.mxu1 %v11670_v39 }
 0xf44   :  { %v2842_v57 = vpop.f32.mrb[60].mxu1  ;;  %v2883_v0 = vpop.f32.mrb[64].mxu0 }
 0xf45   :  { %v2843_v23 = vadd.f32 %v2842_v57, %v12109_v29  ;;  %v2844_v33 = vpop.f32.mrb[61].mxu1  ;;  %v2885_v24 = vpop.f32.mrb[65].mxu0  ;;  %v2884_v48 = vadd.f32 %v2883_v0, %v6833_v5 }
 0xf46   :  { %v2845_v21 = vadd.f32 %v2844_v33, %v6824_v19  ;;  %v2846_v18 = vpop.f32.mrb[62].mxu1  ;;  %v2887_v4 = vpop.f32.mrb[66].mxu0  ;;  %v2886_v11 = vadd.f32 %v2885_v24, %v11777_v34 }
 0xf47   :  { %v4377_v27 = vmul.f32 -1.442695, %v2843_v23  ;;  %v2847_v26 = vpop.f32.mrb[63].mxu1  ;;  %v2888_v49 = vpop.f32.mrb[67].mxu0  ;;  %v9496_v23 = vld [vmem:[%s11179_s3 + $0x20] ss:$16 sps:$4 sm:$0xff]  }
 0xf48   :  { %v4378_v8 = vmul.f32 -1.442695, %v2845_v21  ;;  %v4379_v47 = vmul.f32 -1.442695, %v2886_v11  ;;  %v9508_v11 = vld [vmem:[%s11186_s9 + $0x8] sm:$0xff]  }
 0xf49   :  { %5142 = vpow2.f32 %v4377_v27  ;;  %v9502_v27 = vld [vmem:[%s11179_s3 + $0x44] ss:$16 sps:$4 sm:$0xff]  }
 0xf4a   :  { %5144 = vpow2.f32 %v4378_v8 }
 0xf4b   :  { %5146 = vpow2.f32 %v4379_v47 }
 0xf4c   :  { %5148 = vtanh.f32 %v2884_v48 }
 0xf53   :  { %v5143_v36 = vpop.eup %5142 }
 0xf54   :  { %v5145_v52 = vpop.eup %5144  ;;  %v2893_v57 = vadd.f32 1.0, %v5143_v36 }
 0xf55   :  { %v2899_v29 = vadd.f32 1.0, %v5145_v52  ;;  %v5147_v4 = vpop.eup %5146  ;;  %v9474_v52 = vld [vmem:[%s11179_s3] ss:$16 sps:$4 sm:$0xff]  }
 0xf56   :  { %5150 = vrcp.f32 %v2893_v57  ;;  %v5149_v18 = vpop.eup %5148  ;;  %v2906_v33 = vadd.f32 1.0, %v5147_v4  ;;  %v9515_v57 = vld [vmem:[%s11179_s3 + $0x40] ss:$16 sps:$4 sm:$0xff]   ;;  %v9521_v4 = vld [vmem:[%s11179_s3 + $0x64] ss:$16 sps:$4 sm:$0xff]  }
 0xf57   :  { %5152 = vrcp.f32 %v2899_v29  ;;  %v9487_v29 = vld [vmem:[%s11186_s9] sm:$0xff]  }
 0xf58   :  { %5154 = vrcp.f32 %v2906_v33  ;;  %v9553_v33 = vld [vmem:[%s11179_s3 + $0x80] ss:$16 sps:$4 sm:$0xff]  }
 0xf60   :  { %v5151_v26 = vpop.eup %5150 }
 0xf61   :  { %v5153_v49 = vpop.eup %5152  ;;  %v2910_v21 = vmul.f32 %v5151_v26, %v5149_v18  ;;  %v9527_v18 = vld [vmem:[%s11186_s9 + $0x10] sm:$0xff]  }
 0xf62   :  { %v2909_v8 = vmul.f32 %v5153_v49, %v8723_v37  ;;  %v5155_v0 = vpop.eup %5154  ;;  %v9481_v37 = vld [vmem:[%s11179_s3 + $0x24] ss:$16 sps:$4 sm:$0xff]   ;;  %v9534_v26 = vld [vmem:[%s11179_s3 + $0x60] ss:$16 sps:$4 sm:$0xff]  }
 0xf63   :  { %v9540_v49 = vld [vmem:[%s11179_s3 + $0x84] ss:$16 sps:$4 sm:$0xff]  }
 0xf64   :  { %v9464_v24 = vadd.f32 %v2910_v21, %v2909_v8  ;;  %v9546_v21 = vld [vmem:[%s11186_s9 + $0x18] sm:$0xff]   ;;  %v9559_v8 = vld [vmem:[%s11179_s3 + $0xa4] ss:$16 sps:$4 sm:$0xff]  }
 0xf65   :  { %12110 = vst [vmem:[#allocation89_spill] sm:$0xff] %v9559_v8 }
 0xf66   :  { %5156 = vtanh.f32 %v9464_v24 }
 0xf70   :  { %v5157_v36 = vpop.eup %5156 }
 0xf71   :  { %v2913_v47 = vmul.f32 %v5157_v36, %v5155_v0  ;;  %v9565_v0 = vld [vmem:[%s11186_s9 + $0x20] sm:$0xff]  }
 0xf72   :  { %12111 = vst [vmem:[#allocation90_spill] sm:$0xff] %v9565_v0  ;;  %v9572_v36 = vld [vmem:[%s11179_s3 + $0xa0] ss:$16 sps:$4 sm:$0xff]  }
 0xf73   :  { %v9467_v48 = vpack.c.bf16 %v2913_v47, %v2913_v47  ;;  %12112 = vst [vmem:[#allocation91_spill] sm:$0xff] %v9572_v36  ;;  %v9578_v47 = vld [vmem:[%s11179_s3 + $0xc4] ss:$16 sps:$4 sm:$0xff]  }
 0xf74   :  { %12113 = vst [vmem:[#allocation92_spill] sm:$0xff] %v9578_v47 }
 0xf75   :  { %2948 = vmatmul.mubr.bf16.vlgmr.msra.gmra.mrb[64].mxu1 %v9467_v48  ;;  %2989 = vmatmul.mubr.bf16.vlgmr.msra.gmra.mrb[68].mxu0 %v9467_v48 }
 0xf76   :  { %3065 = vmatpush1.bf16.msra.mxu0 %v9474_v52  ;;  %3096 = vmatprep.mubr.bf16.mxu0 %v11673_v35 }
 0xf77   :  { %3066 = vmatprep.subr.bf16.mxu0 %v9481_v37  ;;  %4596 = vmatpush3.bf16.msra.mxu1 %v9487_v29 }
 0xf78   :  { %4597 = vmatprep.subr.bf16.mxu1 %v11670_v39  ;;  %4611 = vmatprep.mubr.msk.bf16.mxu1 %vm5885_vm0, %v11670_v39 }
 0xf7a   :  { %3067 = vmatpush1.bf16.msra.mxu0 %v9496_v23 }
 0xf7b   :  { %3068 = vmatprep.subr.bf16.mxu0 %v9502_v27  ;;  %4598 = vmatpush3.bf16.msra.mxu1 %v9508_v11 }
 0xf7c   :  { %4599 = vmatprep.subr.bf16.mxu1 %v11670_v39 }
 0xf7e   :  { %3069 = vmatpush1.bf16.msra.mxu0 %v9515_v57 }
 0xf7f   :  { %3070 = vmatprep.subr.bf16.mxu0 %v9521_v4  ;;  %4600 = vmatpush3.bf16.msra.mxu1 %v9527_v18 }
 0xf80   :  { %4601 = vmatprep.subr.bf16.mxu1 %v11670_v39 }
 0xf82   :  { %3071 = vmatpush1.bf16.msra.mxu0 %v9534_v26 }
 0xf83   :  { %3072 = vmatprep.subr.bf16.mxu0 %v9540_v49  ;;  %4602 = vmatpush3.bf16.msra.mxu1 %v9546_v21 }
 0xf84   :  { %4603 = vmatprep.subr.bf16.mxu1 %v11670_v39 }
 0xf86   :  { %3073 = vmatpush1.bf16.msra.mxu0 %v9553_v33 }
 0xf87   :  { %3074 = vmatprep.subr.bf16.mxu0 %v9559_v8  ;;  %4604 = vmatpush3.bf16.msra.mxu1 %v9565_v0  ;;  %v9584_v0 = vld [vmem:[%s11186_s9 + $0x28] sm:$0xff]  }
 0xf88   :  { %4605 = vmatprep.subr.bf16.mxu1 %v11670_v39  ;;  %12114 = vst [vmem:[#allocation93_spill] sm:$0xff] %v9584_v0  ;;  %v9628_v8 = vld [vmem:[%s11179_s3 + $0xc] ss:$16 sps:$4 sm:$0xff]  }
 0xf89   :  { %12118 = vst [vmem:[#allocation97_spill] sm:$0xff] %v9628_v8 }
 0xf8a   :  { %3075 = vmatpush1.bf16.msra.mxu0 %v9572_v36  ;;  %v9591_v36 = vld [vmem:[%s11179_s3 + $0xc0] ss:$16 sps:$4 sm:$0xff]  }
 0xf8b   :  { %3076 = vmatprep.subr.bf16.mxu0 %v9578_v47  ;;  %4606 = vmatpush3.bf16.msra.mxu1 %v9584_v0  ;;  %12115 = vst [vmem:[#allocation94_spill] sm:$0xff] %v9591_v36  ;;  %v9597_v47 = vld [vmem:[%s11179_s3 + $0xe4] ss:$16 sps:$4 sm:$0xff]  }
 0xf8c   :  { %4607 = vmatprep.subr.bf16.mxu1 %v11670_v39  ;;  %12116 = vst [vmem:[#allocation95_spill] sm:$0xff] %v9597_v47  ;;  %v9603_v0 = vld [vmem:[%s11186_s9 + $0x30] sm:$0xff]  }
 0xf8d   :  { %12117 = vst [vmem:[#allocation96_spill] sm:$0xff] %v9603_v0 }
 0xf8e   :  { %3077 = vmatpush1.bf16.msra.mxu0 %v9591_v36  ;;  %v9610_v36 = vld [vmem:[%s11179_s3 + $0xe0] ss:$16 sps:$4 sm:$0xff]  }
 0xf8f   :  { %3078 = vmatprep.subr.bf16.mxu0 %v9597_v47  ;;  %4608 = vmatpush3.bf16.msra.mxu1 %v9603_v0  ;;  %v9616_v47 = vld [vmem:[%s11186_s9 + $0x38] sm:$0xff]   ;;  %v9622_v0 = vld [vmem:[%s11181_s5 + $0x4] ss:$16 sps:$4 sm:$0xff]  }
 0xf90   :  { %4609 = vmatprep.subr.bf16.mxu1 %v11670_v39 }
 0xf92   :  { %3079 = vmatpush1.bf16.msra.mxu0 %v9610_v36 }
 0xf93   :  { %4610 = vmatpush3.bf16.msra.mxu1 %v9616_v47  ;;  %3171 = vmatprep.subr.bf16.mxu0 %v9622_v0 }
 0xf94   :  { %3105 = vmatprep.subr.bf16.mxu1 %v9628_v8 }
 0xf95   :  { %3097 = vmatmul.mubr.bf16.vlgmr.msra.gmra.mrb[72].mxu0 %v9074_v59 }
 0xf96   :  { %3203 = vmatprep.mubr.bf16.mxu0 %v9467_v48  ;;  %3172 = vmatpush1.bf16.msra.mxu0 %v8770_v46  ;;  %v12119_v46 = vld [vmem:[#allocation15_spill] sm:$0xff] }
 0xf97   :  { %3173 = vmatprep.subr.bf16.mxu0 %v8776_v3  ;;  %v12120_v3 = vld [vmem:[#allocation16_spill] sm:$0xff] }
 0xf9a   :  { %3174 = vmatpush1.bf16.msra.mxu0 %v8782_v13  ;;  %v12121_v13 = vld [vmem:[#allocation17_spill] sm:$0xff] }
 0xf9b   :  { %3175 = vmatprep.subr.bf16.mxu0 %v8788_v41  ;;  %v12122_v41 = vld [vmem:[#allocation18_spill] sm:$0xff] }
 0xf9e   :  { %3176 = vmatpush1.bf16.msra.mxu0 %v8794_v62  ;;  %v12123_v62 = vld [vmem:[#allocation19_spill] sm:$0xff] }
 0xf9f   :  { %3177 = vmatprep.subr.bf16.mxu0 %v8800_v14  ;;  %v12124_v14 = vld [vmem:[#allocation20_spill] sm:$0xff] }
 0xfa2   :  { %3178 = vmatpush1.bf16.msra.mxu0 %v8806_v20  ;;  %v12125_v20 = vld [vmem:[#allocation21_spill] sm:$0xff] }
 0xfa3   :  { %3179 = vmatprep.subr.bf16.mxu0 %v8812_v7  ;;  %v12126_v7 = vld [vmem:[#allocation22_spill] sm:$0xff] }
 0xfa6   :  { %3180 = vmatpush1.bf16.msra.mxu0 %v8818_v30  ;;  %v12127_v30 = vld [vmem:[#allocation23_spill] sm:$0xff] }
 0xfa7   :  { %3181 = vmatprep.subr.bf16.mxu0 %v8824_v10  ;;  %v12128_v10 = vld [vmem:[#allocation24_spill] sm:$0xff] }
 0xfaa   :  { %3182 = vmatpush1.bf16.msra.mxu0 %v8830_v54  ;;  %v12129_v54 = vld [vmem:[#allocation25_spill] sm:$0xff] }
 0xfab   :  { %3183 = vmatprep.subr.bf16.mxu0 %v8836_v43  ;;  %v12130_v43 = vld [vmem:[#allocation26_spill] sm:$0xff] }
 0xfae   :  { %3184 = vmatpush1.bf16.msra.mxu0 %v8842_v56  ;;  %v12131_v56 = vld [vmem:[#allocation27_spill] sm:$0xff] }
 0xfaf   :  { %3185 = vmatprep.subr.bf16.mxu0 %v8848_v17  ;;  %v12132_v17 = vld [vmem:[#allocation28_spill] sm:$0xff] }
 0xfb2   :  { %3186 = vmatpush1.bf16.msra.mxu0 %v8854_v16  ;;  %v12133_v16 = vld [vmem:[#allocation29_spill] sm:$0xff] }
 0xfb3   :  { %3187 = vmatprep.subr.bf16.mxu0 %v8860_v9 }
 0xfb6   :  { %3188 = vmatpush1.bf16.msra.mxu0 %v8866_v40 }
 0xfb7   :  { %3189 = vmatprep.subr.bf16.mxu0 %v12119_v46  ;;  %v12134_v46 = vld [vmem:[#allocation75_spill] sm:$0xff] }
 0xfba   :  { %3190 = vmatpush1.bf16.msra.mxu0 %v12120_v3 }
 0xfbb   :  { %3191 = vmatprep.subr.bf16.mxu0 %v12121_v13 }
 0xfbe   :  { %3192 = vmatpush1.bf16.msra.mxu0 %v12122_v41 }
 0xfbf   :  { %3193 = vmatprep.subr.bf16.mxu0 %v12123_v62 }
 0xfc2   :  { %3194 = vmatpush1.bf16.msra.mxu0 %v12124_v14 }
 0xfc3   :  { %3195 = vmatprep.subr.bf16.mxu0 %v12125_v20 }
 0xfc6   :  { %3196 = vmatpush1.bf16.msra.mxu0 %v12126_v7 }
 0xfc7   :  { %3197 = vmatprep.subr.bf16.mxu0 %v12127_v30 }
 0xfca   :  { %3198 = vmatpush1.bf16.msra.mxu0 %v12128_v10 }
 0xfcb   :  { %3199 = vmatprep.subr.bf16.mxu0 %v12129_v54 }
 0xfce   :  { %3200 = vmatpush1.bf16.msra.mxu0 %v12130_v43 }
 0xfcf   :  { %3201 = vmatprep.subr.bf16.mxu0 %v12131_v56 }
 0xfd2   :  { %3202 = vmatpush1.bf16.msra.mxu0 %v12132_v17 }
 0xfd3   :  { %3278 = vmatprep.subr.bf16.mxu0 %v12133_v16 }
0x1048   :  { %v2949_v9 = vpop.f32.mrb[64].mxu1  ;;  %v2990_v40 = vpop.f32.mrb[68].mxu0 }
0x1049   :  { %v2950_v3 = vadd.f32 %v2949_v9, %v12134_v46  ;;  %v2951_v13 = vpop.f32.mrb[65].mxu1  ;;  %v2992_v41 = vpop.f32.mrb[69].mxu0  ;;  %v2991_v17 = vadd.f32 %v2990_v40, %v7053_v42 }
0x104a   :  { %v2952_v62 = vadd.f32 %v2951_v13, %v7044_v12  ;;  %v2953_v14 = vpop.f32.mrb[66].mxu1  ;;  %v2994_v20 = vpop.f32.mrb[70].mxu0  ;;  %v2993_v43 = vadd.f32 %v2992_v41, %v7049_v38 }
0x104b   :  { %v4380_v7 = vmul.f32 -1.442695, %v2950_v3  ;;  %v2954_v30 = vpop.f32.mrb[67].mxu1  ;;  %v2995_v10 = vpop.f32.mrb[71].mxu0 }
0x104c   :  { %v4381_v54 = vmul.f32 -1.442695, %v2952_v62  ;;  %v4382_v56 = vmul.f32 -1.442695, %v2993_v43 }
0x104d   :  { %5158 = vpow2.f32 %v4380_v7 }
0x104e   :  { %5160 = vpow2.f32 %v4381_v54 }
0x104f   :  { %5162 = vpow2.f32 %v4382_v56 }
0x1050   :  { %5164 = vtanh.f32 %v2991_v17 }
0x1057   :  { %v5159_v16 = vpop.eup %5158 }
0x1058   :  { %v5161_v8 = vpop.eup %5160  ;;  %v3000_v9 = vadd.f32 1.0, %v5159_v16  ;;  %v9690_v16 = vld [vmem:[%s11179_s3 + $0x2c] ss:$16 sps:$4 sm:$0xff]  }
0x1059   :  { %v3006_v46 = vadd.f32 1.0, %v5161_v8  ;;  %v5163_v13 = vpop.eup %5162 }
0x105a   :  { %5166 = vrcp.f32 %v3000_v9  ;;  %v5165_v3 = vpop.eup %5164  ;;  %v3013_v7 = vadd.f32 1.0, %v5163_v13  ;;  %v9696_v9 = vld [vmem:[%s11179_s3 + $0x28] ss:$16 sps:$4 sm:$0xff]   ;;  %v9702_v13 = vld [vmem:[%s11179_s3 + $0x4c] ss:$16 sps:$4 sm:$0xff]  }
0x105b   :  { %5168 = vrcp.f32 %v3006_v46 }
0x105c   :  { %5170 = vrcp.f32 %v3013_v7  ;;  %v9732_v7 = vld [vmem:[%s11179_s3 + $0x88] ss:$16 sps:$4 sm:$0xff]  }
0x1064   :  { %v5167_v14 = vpop.eup %5166 }
0x1065   :  { %v5169_v20 = vpop.eup %5168  ;;  %v3017_v62 = vmul.f32 %v5167_v14, %v5165_v3  ;;  %v9708_v3 = vld [vmem:[%s11179_s3 + $0x48] ss:$16 sps:$4 sm:$0xff]   ;;  %v9714_v14 = vld [vmem:[%s11179_s3 + $0x6c] ss:$16 sps:$4 sm:$0xff]  }
0x1066   :  { %v3016_v30 = vmul.f32 %v5169_v20, %v8964_v28  ;;  %v5171_v46 = vpop.eup %5170  ;;  %v9683_v28 = vld [vmem:[%s11179_s3 + $0x8] ss:$16 sps:$4 sm:$0xff]  }
0x1067   :  { %v9720_v20 = vld [vmem:[%s11179_s3 + $0x68] ss:$16 sps:$4 sm:$0xff]  }
0x1068   :  { %v9670_v41 = vadd.f32 %v3017_v62, %v3016_v30  ;;  %v9672_v10 = vpop.f32.mrb[72].mxu0  ;;  %v9726_v62 = vld [vmem:[%s11179_s3 + $0x8c] ss:$16 sps:$4 sm:$0xff]  }
0x1069   :  { %v9674_v40 = vpop.f32.mrb[73].mxu0  ;;  %v9738_v30 = vld [vmem:[%s11179_s3 + $0xac] ss:$16 sps:$4 sm:$0xff]  }
0x106a   :  { %v3102_v54 = vpop.f32.mrb[74].mxu0  ;;  %5172 = vtanh.f32 %v9670_v41 }
0x106b   :  { %v3103_v8 = vpop.f32.mrb[75].mxu0  ;;  %v9744_v54 = vld [vmem:[%s11179_s3 + $0xa8] ss:$16 sps:$4 sm:$0xff]  }
0x106c   :  { %v9750_v8 = vld [vmem:[%s11179_s3 + $0xcc] ss:$16 sps:$4 sm:$0xff]  }
0x106d   :  { %12135 = vst [vmem:[#allocation98_spill] sm:$0xff] %v9750_v8 }
0x1074   :  { %v5173_v43 = vpop.eup %5172 }
0x1075   :  { %v3020_v56 = vmul.f32 %v5173_v43, %v5171_v46  ;;  %v9756_v46 = vld [vmem:[%s11179_s3 + $0xc8] ss:$16 sps:$4 sm:$0xff]   ;;  %v9762_v43 = vld [vmem:[%s11179_s3 + $0xec] ss:$16 sps:$4 sm:$0xff]  }
0x1076   :  { %12136 = vst [vmem:[#allocation99_spill] sm:$0xff] %v9762_v43 }
0x1077   :  { %v9677_v17 = vpack.c.bf16 %v3020_v56, %v3020_v56  ;;  %v9768_v56 = vld [vmem:[%s11179_s3 + $0xe8] ss:$16 sps:$4 sm:$0xff]  }
0x1078   :  { %12137 = vst [vmem:[#allocation100_spill] sm:$0xff] %v9768_v56 }
0x1079   :  { %4612 = vmatmul.mubr.bf16.vlgmr.msra.gmra.mrb[68].mxu1 %v9677_v17 }
0x107a   :  { %3106 = vmatpush1.bf16.msra.mxu1 %v9683_v28  ;;  %3137 = vmatprep.mubr.bf16.mxu1 %v11673_v35 }
0x107b   :  { %3107 = vmatprep.subr.bf16.mxu1 %v9690_v16 }
0x107e   :  { %3108 = vmatpush1.bf16.msra.mxu1 %v9696_v9 }
0x107f   :  { %3109 = vmatprep.subr.bf16.mxu1 %v9702_v13 }
0x1082   :  { %3110 = vmatpush1.bf16.msra.mxu1 %v9708_v3 }
0x1083   :  { %3111 = vmatprep.subr.bf16.mxu1 %v9714_v14 }
0x1086   :  { %3112 = vmatpush1.bf16.msra.mxu1 %v9720_v20 }
0x1087   :  { %3113 = vmatprep.subr.bf16.mxu1 %v9726_v62 }
0x108a   :  { %3114 = vmatpush1.bf16.msra.mxu1 %v9732_v7 }
0x108b   :  { %3115 = vmatprep.subr.bf16.mxu1 %v9738_v30 }
0x108e   :  { %3116 = vmatpush1.bf16.msra.mxu1 %v9744_v54 }
0x108f   :  { %3117 = vmatprep.subr.bf16.mxu1 %v9750_v8  ;;  %v9774_v8 = vld [vmem:[%s11181_s5 + $0xc] ss:$16 sps:$4 sm:$0xff]  }
0x1090   :  { %12138 = vst [vmem:[#allocation101_spill] sm:$0xff] %v9774_v8 }
0x1092   :  { %3118 = vmatpush1.bf16.msra.mxu1 %v9756_v46 }
0x1093   :  { %3119 = vmatprep.subr.bf16.mxu1 %v9762_v43  ;;  %v9782_v43 = vld [vmem:[%s11181_s5 + $0x8] ss:$16 sps:$4 sm:$0xff]  }
0x1094   :  { %12139 = vst [vmem:[#allocation102_spill] sm:$0xff] %v9782_v43 }
0x1096   :  { %3120 = vmatpush1.bf16.msra.mxu1 %v9768_v56  ;;  %v9788_v56 = vld [vmem:[%s11181_s5 + $0x2c] ss:$16 sps:$4 sm:$0xff]  }
0x1097   :  { %3212 = vmatprep.subr.bf16.mxu1 %v9774_v8  ;;  %12140 = vst [vmem:[#allocation103_spill] sm:$0xff] %v9788_v56 }
0x1099   :  { %3138 = vmatmul.mubr.bf16.vlgmr.msra.gmra.mrb[72].mxu1 %v9074_v59  ;;  %v9794_v59 = vld [vmem:[%s11181_s5 + $0x28] ss:$16 sps:$4 sm:$0xff]  }
0x109a   :  { %3244 = vmatprep.mubr.bf16.mxu1 %v9467_v48  ;;  %3213 = vmatpush1.bf16.msra.mxu1 %v9782_v43  ;;  %12141 = vst [vmem:[#allocation104_spill] sm:$0xff] %v9794_v59  ;;  %v9800_v48 = vld [vmem:[%s11181_s5 + $0x4c] ss:$16 sps:$4 sm:$0xff]   ;;  %v9806_v43 = vld [vmem:[%s11181_s5 + $0x48] ss:$16 sps:$4 sm:$0xff]  }
0x109b   :  { %3214 = vmatprep.subr.bf16.mxu1 %v9788_v56  ;;  %12142 = vst [vmem:[#allocation105_spill] sm:$0xff] %v9800_v48  ;;  %12143 = vst [vmem:[#allocation5_spill] sm:$0xff] %v9806_v43  ;;  %v9812_v56 = vld [vmem:[%s11181_s5 + $0x6c] ss:$16 sps:$4 sm:$0xff]  }
0x109c   :  { %12144 = vst [vmem:[#allocation4_spill] sm:$0xff] %v9812_v56 }
0x109e   :  { %3215 = vmatpush1.bf16.msra.mxu1 %v9794_v59  ;;  %v9818_v59 = vld [vmem:[%s11181_s5 + $0x68] ss:$16 sps:$4 sm:$0xff]  }
0x109f   :  { %3216 = vmatprep.subr.bf16.mxu1 %v9800_v48  ;;  %12145 = vst [vmem:[#allocation6_spill] sm:$0xff] %v9818_v59  ;;  %v9824_v48 = vld [vmem:[%s11181_s5 + $0x8c] ss:$16 sps:$4 sm:$0xff]  }
0x10a0   :  { %12146 = vst [vmem:[#allocation7_spill] sm:$0xff] %v9824_v48 }
0x10a2   :  { %3217 = vmatpush1.bf16.msra.mxu1 %v9806_v43  ;;  %v9830_v43 = vld [vmem:[%s11181_s5 + $0x88] ss:$16 sps:$4 sm:$0xff]  }
0x10a3   :  { %3218 = vmatprep.subr.bf16.mxu1 %v9812_v56  ;;  %12147 = vst [vmem:[#allocation8_spill] sm:$0xff] %v9830_v43  ;;  %v9836_v56 = vld [vmem:[%s11181_s5 + $0xac] ss:$16 sps:$4 sm:$0xff]  }
0x10a4   :  { %12148 = vst [vmem:[#allocation9_spill] sm:$0xff] %v9836_v56 }
0x10a6   :  { %3219 = vmatpush1.bf16.msra.mxu1 %v9818_v59  ;;  %v9842_v59 = vld [vmem:[%s11181_s5 + $0xa8] ss:$16 sps:$4 sm:$0xff]  }
0x10a7   :  { %3220 = vmatprep.subr.bf16.mxu1 %v9824_v48  ;;  %12149 = vst [vmem:[#allocation10_spill] sm:$0xff] %v9842_v59  ;;  %v9848_v48 = vld [vmem:[%s11181_s5 + $0xcc] ss:$16 sps:$4 sm:$0xff]  }
0x10a8   :  { %12150 = vst [vmem:[#allocation11_spill] sm:$0xff] %v9848_v48 }
0x10aa   :  { %3221 = vmatpush1.bf16.msra.mxu1 %v9830_v43  ;;  %v9854_v43 = vld [vmem:[%s11181_s5 + $0xc8] ss:$16 sps:$4 sm:$0xff]  }
0x10ab   :  { %3222 = vmatprep.subr.bf16.mxu1 %v9836_v56  ;;  %12151 = vst [vmem:[#allocation12_spill] sm:$0xff] %v9854_v43  ;;  %v9860_v56 = vld [vmem:[%s11181_s5 + $0xec] ss:$16 sps:$4 sm:$0xff]  }
0x10ac   :  { %12152 = vst [vmem:[#allocation13_spill] sm:$0xff] %v9860_v56 }
0x10ae   :  { %3223 = vmatpush1.bf16.msra.mxu1 %v9842_v59  ;;  %v9866_v59 = vld [vmem:[%s11181_s5 + $0xe8] ss:$16 sps:$4 sm:$0xff]  }
0x10af   :  { %3224 = vmatprep.subr.bf16.mxu1 %v9848_v48  ;;  %12153 = vst [vmem:[#allocation14_spill] sm:$0xff] %v9866_v59  ;;  %v9872_v48 = vld [vmem:[%s11181_s5 + $0x10c] ss:$16 sps:$4 sm:$0xff]  }
0x10b0   :  { %12154 = vst [vmem:[#allocation15_spill] sm:$0xff] %v9872_v48 }
0x10b2   :  { %3225 = vmatpush1.bf16.msra.mxu1 %v9854_v43  ;;  %v9878_v43 = vld [vmem:[%s11181_s5 + $0x108] ss:$16 sps:$4 sm:$0xff]  }
0x10b3   :  { %3226 = vmatprep.subr.bf16.mxu1 %v9860_v56  ;;  %12155 = vst [vmem:[#allocation16_spill] sm:$0xff] %v9878_v43  ;;  %v9884_v56 = vld [vmem:[%s11181_s5 + $0x12c] ss:$16 sps:$4 sm:$0xff]  }
0x10b4   :  { %12156 = vst [vmem:[#allocation17_spill] sm:$0xff] %v9884_v56 }
0x10b6   :  { %3227 = vmatpush1.bf16.msra.mxu1 %v9866_v59  ;;  %v9890_v59 = vld [vmem:[%s11181_s5 + $0x128] ss:$16 sps:$4 sm:$0xff]  }
0x10b7   :  { %3228 = vmatprep.subr.bf16.mxu1 %v9872_v48  ;;  %12157 = vst [vmem:[#allocation18_spill] sm:$0xff] %v9890_v59  ;;  %v9896_v48 = vld [vmem:[%s11181_s5 + $0x14c] ss:$16 sps:$4 sm:$0xff]  }
0x10b8   :  { %12158 = vst [vmem:[#allocation19_spill] sm:$0xff] %v9896_v48 }
0x10ba   :  { %3229 = vmatpush1.bf16.msra.mxu1 %v9878_v43  ;;  %v9902_v43 = vld [vmem:[%s11181_s5 + $0x148] ss:$16 sps:$4 sm:$0xff]  }
0x10bb   :  { %3230 = vmatprep.subr.bf16.mxu1 %v9884_v56  ;;  %12159 = vst [vmem:[#allocation20_spill] sm:$0xff] %v9902_v43  ;;  %v9908_v56 = vld [vmem:[%s11181_s5 + $0x16c] ss:$16 sps:$4 sm:$0xff]  }
0x10bc   :  { %12160 = vst [vmem:[#allocation21_spill] sm:$0xff] %v9908_v56 }
0x10be   :  { %3231 = vmatpush1.bf16.msra.mxu1 %v9890_v59  ;;  %v9914_v59 = vld [vmem:[%s11181_s5 + $0x168] ss:$16 sps:$4 sm:$0xff]  }
0x10bf   :  { %3232 = vmatprep.subr.bf16.mxu1 %v9896_v48  ;;  %12161 = vst [vmem:[#allocation22_spill] sm:$0xff] %v9914_v59  ;;  %v9920_v48 = vld [vmem:[%s11181_s5 + $0x18c] ss:$16 sps:$4 sm:$0xff]  }
0x10c0   :  { %12162 = vst [vmem:[#allocation23_spill] sm:$0xff] %v9920_v48 }
0x10c2   :  { %3233 = vmatpush1.bf16.msra.mxu1 %v9902_v43  ;;  %v9926_v43 = vld [vmem:[%s11181_s5 + $0x188] ss:$16 sps:$4 sm:$0xff]  }
0x10c3   :  { %3234 = vmatprep.subr.bf16.mxu1 %v9908_v56  ;;  %12163 = vst [vmem:[#allocation24_spill] sm:$0xff] %v9926_v43 }
0x10c6   :  { %3235 = vmatpush1.bf16.msra.mxu1 %v9914_v59  ;;  %v9939_v59 = vld [vmem:[%s11188_s10] ss:$0 sm:$0xff] }
0x10c7   :  { %3236 = vmatprep.subr.bf16.mxu1 %v9920_v48  ;;  %12164 = vst [vmem:[#allocation25_spill] sm:$0xff] %v9939_v59 }
0x10ca   :  { %3237 = vmatpush1.bf16.msra.mxu1 %v9926_v43 }
0x10cb   :  { %3238 = vmatprep.subr.bf16.mxu1 %v9021_v51 }
0x10ce   :  { %3239 = vmatpush1.bf16.msra.mxu1 %v9027_v32 }
0x10cf   :  { %3240 = vmatprep.subr.bf16.mxu1 %v9033_v25 }
0x10d2   :  { %3241 = vmatpush1.bf16.msra.mxu1 %v9039_v55  ;;  %v3101_v55 = vadd.f32 %v9674_v40, %v12049_v58 }
0x10d3   :  { %3242 = vmatprep.subr.bf16.mxu1 %v9045_v45  ;;  %v3099_v45 = vadd.f32 %v9672_v10, %v12050_v60 }
0x10d6   :  { %3243 = vmatpush1.bf16.msra.mxu1 %v9051_v22  ;;  %v4385_v22 = vmul.f32 -1.442695, %v3101_v55 }
0x10d7   :  { %3319 = vmatprep.subr.bf16.mxu1 %v9057_v61  ;;  %v4384_v61 = vmul.f32 -1.442695, %v3099_v45 }
0x10d8   :  { %5174 = vpow2.f32 %v4385_v22 }
0x10d9   :  { %5176 = vpow2.f32 %v4384_v61 }
0x10e2   :  { %v5175_v56 = vpop.eup %5174 }
0x10e3   :  { %v5177_v8 = vpop.eup %5176 }
0x114c   :  { %v3056_v48 = vpop.f32.mrb[68].mxu1 }
0x114d   :  { %v3057_v51 = vadd.f32 %v9939_v59, %v3056_v48  ;;  %v4613_v43 = vpop.f32.mrb[69].mxu1  ;;  %v3155_v48 = vadd.f32 1.0, %v5175_v56 }
0x114e   :  { %v3059_v32 = vpop.f32.mrb[70].mxu1  ;;  %v3149_v43 = vadd.f32 1.0, %v5177_v8 }
0x114f   :  { %4383 = vst [vmem:[%s11189_s11 + $0x20] sm:$0xff] %v3057_v51  ;;  %v4614_v25 = vpop.f32.mrb[71].mxu1  ;;  %5178 = vrcp.f32 %v3155_v48 }
0x1150   :  { %5180 = vrcp.f32 %v3149_v43 }
0x1159   :  { %v5179_v55 = vpop.eup %5178 }
0x115a   :  { %v5181_v45 = vpop.eup %5180  ;;  %v3165_v61 = vmul.f32 %v5179_v55, %v9071_v1  ;;  %v12166_v1 = vld [vmem:[#allocation31_spill] sm:$0xff]  ;;  %v12177_v55 = vld [vmem:[#allocation42_spill] sm:$0xff] }
0x116c   :  { %v3139_v32 = vpop.f32.mrb[72].mxu1 }
0x116d   :  { %v3140_v59 = vadd.f32 %v3139_v32, %v11823_v15  ;;  %v3141_v51 = vpop.f32.mrb[73].mxu1 }
0x116e   :  { %v3142_v25 = vadd.f32 %v3141_v51, %v11824_v44  ;;  %v3143_v40 = vpop.f32.mrb[74].mxu1 }
0x116f   :  { %5182 = vtanh.f32 %v3140_v59  ;;  %v3144_v58 = vpop.f32.mrb[75].mxu1  ;;  %v12168_v40 = vld [vmem:[#allocation33_spill] sm:$0xff] }
0x1170   :  { %v4386_v10 = vmul.f32 -1.442695, %v3142_v25  ;;  %v12165_v58 = vld [vmem:[#allocation30_spill] sm:$0xff]  ;;  %v12167_v25 = vld [vmem:[#allocation32_spill] sm:$0xff] }
0x1172   :  { %5184 = vpow2.f32 %v4386_v10  ;;  %v12176_v10 = vld [vmem:[#allocation41_spill] sm:$0xff] }
0x1179   :  { %v5183_v22 = vpop.eup %5182 }
0x117a   :  { %v3166_v56 = vmul.f32 %v5183_v22, %v5181_v45  ;;  %v12178_v45 = vld [vmem:[#allocation43_spill] sm:$0xff]  ;;  %v12179_v22 = vld [vmem:[#allocation44_spill] sm:$0xff] }
0x117c   :  { %v5185_v8 = vpop.eup %5184  ;;  %v9952_v60 = vadd.f32 %v3166_v56, %v3165_v61  ;;  %v12180_v61 = vld [vmem:[#allocation45_spill] sm:$0xff]  ;;  %v12181_v56 = vld [vmem:[#allocation46_spill] sm:$0xff] }
0x117d   :  { %v3162_v48 = vadd.f32 1.0, %v5185_v8  ;;  %v12182_v8 = vld [vmem:[#allocation47_spill] sm:$0xff] }
0x117e   :  { %5186 = vtanh.f32 %v9952_v60 }
0x117f   :  { %5188 = vrcp.f32 %v3162_v48  ;;  %v12183_v48 = vld [vmem:[#allocation48_spill] sm:$0xff] }
0x1188   :  { %v5187_v43 = vpop.eup %5186 }
0x1189   :  { %v5189_v32 = vpop.eup %5188 }
0x118a   :  { %v3169_v51 = vmul.f32 %v5189_v32, %v5187_v43  ;;  %v12184_v43 = vld [vmem:[#allocation49_spill] sm:$0xff]  ;;  %v12185_v32 = vld [vmem:[#allocation50_spill] sm:$0xff] }
0x118c   :  { %v9955_v59 = vpack.c.bf16 %v3169_v51, %v3169_v51  ;;  %v12186_v51 = vld [vmem:[#allocation51_spill] sm:$0xff] }
0x118e   :  { %3204 = vmatmul.mubr.bf16.vlgmr.msra.gmra.mrb[76].mxu0 %v9955_v59  ;;  %3245 = vmatmul.mubr.bf16.vlgmr.msra.gmra.mrb[76].mxu1 %v9955_v59 }
0x118f   :  { %3310 = vmatprep.mubr.bf16.mxu0 %v9677_v17  ;;  %3351 = vmatprep.mubr.bf16.mxu1 %v9677_v17  ;;  %v12169_v17 = vld [vmem:[#allocation34_spill] sm:$0xff] }
0x1190   :  { %3320 = vmatpush1.bf16.msra.mxu1 %v9083_v63  ;;  %3279 = vmatpush1.bf16.msra.mxu0 %v9089_v2  ;;  %v12170_v63 = vld [vmem:[#allocation35_spill] sm:$0xff]  ;;  %v12171_v2 = vld [vmem:[#allocation36_spill] sm:$0xff] }
0x1191   :  { %3321 = vmatprep.subr.bf16.mxu1 %v9095_v6  ;;  %3280 = vmatprep.subr.bf16.mxu0 %v9101_v50  ;;  %v12172_v6 = vld [vmem:[#allocation37_spill] sm:$0xff]  ;;  %v12173_v50 = vld [vmem:[#allocation38_spill] sm:$0xff] }
0x1194   :  { %3322 = vmatpush1.bf16.msra.mxu1 %v9107_v31  ;;  %3281 = vmatpush1.bf16.msra.mxu0 %v9113_v53  ;;  %v12174_v31 = vld [vmem:[#allocation39_spill] sm:$0xff]  ;;  %v12175_v53 = vld [vmem:[#allocation40_spill] sm:$0xff] }
0x1195   :  { %3323 = vmatprep.subr.bf16.mxu1 %v12165_v58  ;;  %3282 = vmatprep.subr.bf16.mxu0 %v12166_v1  ;;  %v12187_v58 = vld [vmem:[#allocation52_spill] sm:$0xff]  ;;  %v12188_v1 = vld [vmem:[#allocation53_spill] sm:$0xff] }
0x1198   :  { %3324 = vmatpush1.bf16.msra.mxu1 %v12167_v25  ;;  %3283 = vmatpush1.bf16.msra.mxu0 %v12168_v40  ;;  %v12189_v25 = vld [vmem:[#allocation54_spill] sm:$0xff]  ;;  %v12190_v40 = vld [vmem:[#allocation55_spill] sm:$0xff] }
0x1199   :  { %3325 = vmatprep.subr.bf16.mxu1 %v12169_v17  ;;  %3284 = vmatprep.subr.bf16.mxu0 %v12170_v63  ;;  %v12191_v17 = vld [vmem:[#allocation56_spill] sm:$0xff]  ;;  %v12192_v63 = vld [vmem:[#allocation57_spill] sm:$0xff] }
0x119c   :  { %3326 = vmatpush1.bf16.msra.mxu1 %v12171_v2  ;;  %3285 = vmatpush1.bf16.msra.mxu0 %v12172_v6  ;;  %v12193_v2 = vld [vmem:[#allocation58_spill] sm:$0xff]  ;;  %v12194_v6 = vld [vmem:[#allocation59_spill] sm:$0xff] }
0x119d   :  { %3327 = vmatprep.subr.bf16.mxu1 %v12173_v50  ;;  %3286 = vmatprep.subr.bf16.mxu0 %v12174_v31  ;;  %v12195_v50 = vld [vmem:[#allocation60_spill] sm:$0xff]  ;;  %v12196_v31 = vld [vmem:[#allocation61_spill] sm:$0xff] }
0x11a0   :  { %3328 = vmatpush1.bf16.msra.mxu1 %v12175_v53  ;;  %3287 = vmatpush1.bf16.msra.mxu0 %v12176_v10  ;;  %v12197_v53 = vld [vmem:[#allocation62_spill] sm:$0xff]  ;;  %v12198_v10 = vld [vmem:[#allocation63_spill] sm:$0xff] }
0x11a1   :  { %3329 = vmatprep.subr.bf16.mxu1 %v12177_v55  ;;  %3288 = vmatprep.subr.bf16.mxu0 %v12178_v45  ;;  %v12199_v55 = vld [vmem:[#allocation64_spill] sm:$0xff]  ;;  %v12200_v45 = vld [vmem:[#allocation65_spill] sm:$0xff] }
0x11a4   :  { %3330 = vmatpush1.bf16.msra.mxu1 %v12179_v22  ;;  %3289 = vmatpush1.bf16.msra.mxu0 %v12180_v61  ;;  %v12201_v22 = vld [vmem:[#allocation66_spill] sm:$0xff]  ;;  %v12202_v61 = vld [vmem:[#allocation67_spill] sm:$0xff] }
0x11a5   :  { %3331 = vmatprep.subr.bf16.mxu1 %v12181_v56  ;;  %3290 = vmatprep.subr.bf16.mxu0 %v12182_v8  ;;  %v12203_v56 = vld [vmem:[#allocation68_spill] sm:$0xff]  ;;  %v12204_v8 = vld [vmem:[#allocation69_spill] sm:$0xff] }
0x11a8   :  { %3332 = vmatpush1.bf16.msra.mxu1 %v12183_v48  ;;  %3291 = vmatpush1.bf16.msra.mxu0 %v12184_v43  ;;  %v12205_v48 = vld [vmem:[#allocation71_spill] sm:$0xff]  ;;  %v12206_v43 = vld [vmem:[#allocation72_spill] sm:$0xff] }
0x11a9   :  { %3333 = vmatprep.subr.bf16.mxu1 %v12185_v32  ;;  %3292 = vmatprep.subr.bf16.mxu0 %v12186_v51  ;;  %v12207_v32 = vld [vmem:[#allocation73_spill] sm:$0xff]  ;;  %v12208_v51 = vld [vmem:[#allocation74_spill] sm:$0xff] }
0x11ac   :  { %3334 = vmatpush1.bf16.msra.mxu1 %v12187_v58  ;;  %3293 = vmatpush1.bf16.msra.mxu0 %v12188_v1  ;;  %v12209_v58 = vld [vmem:[#allocation76_spill] sm:$0xff]  ;;  %v12210_v1 = vld [vmem:[#allocation77_spill] sm:$0xff] }
0x11ad   :  { %3335 = vmatprep.subr.bf16.mxu1 %v12189_v25  ;;  %3294 = vmatprep.subr.bf16.mxu0 %v12190_v40  ;;  %v12211_v25 = vld [vmem:[#allocation78_spill] sm:$0xff]  ;;  %v12212_v40 = vld [vmem:[#allocation79_spill] sm:$0xff] }
0x11b0   :  { %3336 = vmatpush1.bf16.msra.mxu1 %v12191_v17  ;;  %3295 = vmatpush1.bf16.msra.mxu0 %v12192_v63  ;;  %v12213_v17 = vld [vmem:[#allocation80_spill] sm:$0xff]  ;;  %v12214_v63 = vld [vmem:[#allocation81_spill] sm:$0xff] }
0x11b1   :  { %3337 = vmatprep.subr.bf16.mxu1 %v12193_v2  ;;  %3296 = vmatprep.subr.bf16.mxu0 %v12194_v6  ;;  %v12215_v2 = vld [vmem:[#allocation82_spill] sm:$0xff]  ;;  %v12216_v6 = vld [vmem:[#allocation83_spill] sm:$0xff] }
0x11b4   :  { %3338 = vmatpush1.bf16.msra.mxu1 %v12195_v50  ;;  %3297 = vmatpush1.bf16.msra.mxu0 %v12196_v31  ;;  %v12217_v50 = vld [vmem:[#allocation84_spill] sm:$0xff]  ;;  %v12218_v31 = vld [vmem:[#allocation85_spill] sm:$0xff] }
0x11b5   :  { %3339 = vmatprep.subr.bf16.mxu1 %v12197_v53  ;;  %3298 = vmatprep.subr.bf16.mxu0 %v12198_v10  ;;  %v12219_v53 = vld [vmem:[#allocation86_spill] sm:$0xff]  ;;  %v12220_v10 = vld [vmem:[#allocation87_spill] sm:$0xff] }
0x11b8   :  { %3340 = vmatpush1.bf16.msra.mxu1 %v12199_v55  ;;  %3299 = vmatpush1.bf16.msra.mxu0 %v12200_v45  ;;  %v12221_v55 = vld [vmem:[#allocation88_spill] sm:$0xff] }
0x11b9   :  { %3341 = vmatprep.subr.bf16.mxu1 %v12201_v22  ;;  %3300 = vmatprep.subr.bf16.mxu0 %v12202_v61  ;;  %v12222_v61 = vld [vmem:[#allocation70_spill] sm:$0xff] }
0x11bc   :  { %3342 = vmatpush1.bf16.msra.mxu1 %v12203_v56  ;;  %3301 = vmatpush1.bf16.msra.mxu0 %v12204_v8 }
0x11bd   :  { %3343 = vmatprep.subr.bf16.mxu1 %v12205_v48  ;;  %3302 = vmatprep.subr.bf16.mxu0 %v12206_v43 }
0x11c0   :  { %3344 = vmatpush1.bf16.msra.mxu1 %v12207_v32  ;;  %3303 = vmatpush1.bf16.msra.mxu0 %v12208_v51 }
0x11c1   :  { %3345 = vmatprep.subr.bf16.mxu1 %v12209_v58  ;;  %3304 = vmatprep.subr.bf16.mxu0 %v12210_v1 }
0x11c4   :  { %3346 = vmatpush1.bf16.msra.mxu1 %v12211_v25  ;;  %3305 = vmatpush1.bf16.msra.mxu0 %v12212_v40 }
0x11c5   :  { %3347 = vmatprep.subr.bf16.mxu1 %v12213_v17  ;;  %3306 = vmatprep.subr.bf16.mxu0 %v12214_v63 }
0x11c8   :  { %3348 = vmatpush1.bf16.msra.mxu1 %v12215_v2  ;;  %3307 = vmatpush1.bf16.msra.mxu0 %v12216_v6 }
0x11c9   :  { %3349 = vmatprep.subr.bf16.mxu1 %v12217_v50  ;;  %3308 = vmatprep.subr.bf16.mxu0 %v12218_v31 }
0x11cc   :  { %3350 = vmatpush1.bf16.msra.mxu1 %v12219_v53  ;;  %3309 = vmatpush1.bf16.msra.mxu0 %v12220_v10 }
0x11cd   :  { %3427 = vmatprep.subr.bf16.mxu1 %v12221_v55  ;;  %4615 = vmatprep.subr.bf16.mxu0 %v11670_v39 }
0x1261   :  { %v3205_v45 = vpop.f32.mrb[76].mxu0  ;;  %v3246_v22 = vpop.f32.mrb[76].mxu1 }
0x1262   :  { %v3206_v56 = vadd.f32 %v3205_v45, %v12222_v61  ;;  %v3207_v8 = vpop.f32.mrb[77].mxu0  ;;  %v3248_v48 = vpop.f32.mrb[77].mxu1  ;;  %v3247_v2 = vadd.f32 %v3246_v22, %v6833_v5 }
0x1263   :  { %v3208_v43 = vadd.f32 %v3207_v8, %v6824_v19  ;;  %v3209_v32 = vpop.f32.mrb[78].mxu0  ;;  %v3250_v51 = vpop.f32.mrb[78].mxu1  ;;  %v3249_v17 = vadd.f32 %v3248_v48, %v11777_v34 }
0x1264   :  { %v4387_v58 = vmul.f32 -1.442695, %v3206_v56  ;;  %v3210_v1 = vpop.f32.mrb[79].mxu0  ;;  %v3251_v25 = vpop.f32.mrb[79].mxu1 }
0x1265   :  { %v4388_v40 = vmul.f32 -1.442695, %v3208_v43  ;;  %v4389_v63 = vmul.f32 -1.442695, %v3249_v17  ;;  %v10125_v25 = vld [vmem:[%s11181_s5 + $0x80] ss:$16 sps:$4 sm:$0xff]  }
0x1266   :  { %5190 = vpow2.f32 %v4387_v58  ;;  %v10137_v17 = vld [vmem:[%s11181_s5 + $0xa0] ss:$16 sps:$4 sm:$0xff]  }
0x1267   :  { %5192 = vpow2.f32 %v4388_v40  ;;  %v10131_v40 = vld [vmem:[%s11181_s5 + $0xa4] ss:$16 sps:$4 sm:$0xff]  }
0x1268   :  { %5194 = vpow2.f32 %v4389_v63  ;;  %v10143_v63 = vld [vmem:[%s11181_s5 + $0xc4] ss:$16 sps:$4 sm:$0xff]  }
0x1269   :  { %5196 = vtanh.f32 %v3247_v2  ;;  %v10149_v2 = vld [vmem:[%s11181_s5 + $0xc0] ss:$16 sps:$4 sm:$0xff]  }
0x1270   :  { %v5191_v6 = vpop.eup %5190 }
0x1271   :  { %v5193_v50 = vpop.eup %5192  ;;  %v3256_v31 = vadd.f32 1.0, %v5191_v6  ;;  %v10155_v6 = vld [vmem:[%s11181_s5 + $0xe4] ss:$16 sps:$4 sm:$0xff]  }
0x1272   :  { %v3262_v53 = vadd.f32 1.0, %v5193_v50  ;;  %v5195_v10 = vpop.eup %5194  ;;  %v10161_v50 = vld [vmem:[%s11181_s5 + $0xe0] ss:$16 sps:$4 sm:$0xff]  }
0x1273   :  { %5198 = vrcp.f32 %v3256_v31  ;;  %v5197_v55 = vpop.eup %5196  ;;  %v3269_v43 = vadd.f32 1.0, %v5195_v10  ;;  %v10167_v31 = vld [vmem:[%s11181_s5 + $0x104] ss:$16 sps:$4 sm:$0xff]  }
0x1274   :  { %5200 = vrcp.f32 %v3262_v53  ;;  %v10173_v53 = vld [vmem:[%s11181_s5 + $0x100] ss:$16 sps:$4 sm:$0xff]   ;;  %v10179_v10 = vld [vmem:[%s11181_s5 + $0x124] ss:$16 sps:$4 sm:$0xff]  }
0x1275   :  { %5202 = vrcp.f32 %v3269_v43  ;;  %v10209_v43 = vld [vmem:[%s11181_s5 + $0x160] ss:$16 sps:$4 sm:$0xff]  }
0x1276   :  { %12236 = vst [vmem:[#allocation30_spill] sm:$0xff] %v10209_v43 }
0x127d   :  { %v5199_v45 = vpop.eup %5198 }
0x127e   :  { %v5201_v56 = vpop.eup %5200  ;;  %v3273_v8 = vmul.f32 %v5199_v45, %v5197_v55  ;;  %v10185_v55 = vld [vmem:[%s11181_s5 + $0x120] ss:$16 sps:$4 sm:$0xff]   ;;  %v10191_v45 = vld [vmem:[%s11181_s5 + $0x144] ss:$16 sps:$4 sm:$0xff]  }
0x127f   :  { %v3272_v32 = vmul.f32 %v5201_v56, %v9464_v24  ;;  %v5203_v22 = vpop.eup %5202  ;;  %v12223_v24 = vld [vmem:[#allocation89_spill] sm:$0xff]  ;;  %12232 = vst [vmem:[#allocation26_spill] sm:$0xff] %v10185_v55  ;;  %12233 = vst [vmem:[#allocation27_spill] sm:$0xff] %v10191_v45  ;;  %v10197_v56 = vld [vmem:[%s11181_s5 + $0x140] ss:$16 sps:$4 sm:$0xff]  }
0x1280   :  { %12234 = vst [vmem:[#allocation28_spill] sm:$0xff] %v10197_v56 }
0x1281   :  { %v10030_v48 = vadd.f32 %v3273_v8, %v3272_v32  ;;  %v10203_v8 = vld [vmem:[%s11181_s5 + $0x164] ss:$16 sps:$4 sm:$0xff]  }
0x1282   :  { %12235 = vst [vmem:[#allocation29_spill] sm:$0xff] %v10203_v8  ;;  %v10215_v32 = vld [vmem:[%s11181_s5 + $0x184] ss:$16 sps:$4 sm:$0xff]  }
0x1283   :  { %5204 = vtanh.f32 %v10030_v48  ;;  %12237 = vst [vmem:[#allocation31_spill] sm:$0xff] %v10215_v32 }
0x128d   :  { %v5205_v51 = vpop.eup %5204 }
0x128e   :  { %v3276_v58 = vmul.f32 %v5205_v51, %v5203_v22  ;;  %v10221_v22 = vld [vmem:[%s11181_s5 + $0x180] ss:$16 sps:$4 sm:$0xff]   ;;  %v10227_v51 = vld [vmem:[%s11181_s5 + $0x1a4] ss:$16 sps:$4 sm:$0xff]  }
0x128f   :  { %12238 = vst [vmem:[#allocation32_spill] sm:$0xff] %v10221_v22  ;;  %12239 = vst [vmem:[#allocation33_spill] sm:$0xff] %v10227_v51 }
0x1290   :  { %v10033_v1 = vpack.c.bf16 %v3276_v58, %v3276_v58  ;;  %v10233_v58 = vld [vmem:[%s11181_s5 + $0x1a0] ss:$16 sps:$4 sm:$0xff]  }
0x1291   :  { %12240 = vst [vmem:[#allocation34_spill] sm:$0xff] %v10233_v58 }
0x1292   :  { %3311 = vmatmul.mubr.bf16.vlgmr.msra.gmra.mrb[80].mxu0 %v10033_v1  ;;  %3352 = vmatmul.mubr.bf16.vlgmr.msra.gmra.mrb[80].mxu1 %v10033_v1 }
0x1293   :  { %3428 = vmatpush1.bf16.msra.mxu1 %v9474_v52  ;;  %3459 = vmatprep.mubr.bf16.mxu1 %v11673_v35  ;;  %v12224_v52 = vld [vmem:[#allocation90_spill] sm:$0xff] }
0x1294   :  { %3429 = vmatprep.subr.bf16.mxu1 %v9481_v37  ;;  %4616 = vmatpush3.bf16.msra.mxu0 %v9487_v29  ;;  %v12225_v37 = vld [vmem:[#allocation91_spill] sm:$0xff]  ;;  %v12226_v29 = vld [vmem:[#allocation92_spill] sm:$0xff] }
0x1295   :  { %4617 = vmatprep.subr.bf16.mxu0 %v11670_v39  ;;  %4631 = vmatprep.mubr.msk.bf16.mxu0 %vm5885_vm0, %v11670_v39 }
0x1297   :  { %3430 = vmatpush1.bf16.msra.mxu1 %v9496_v23  ;;  %v12227_v23 = vld [vmem:[#allocation93_spill] sm:$0xff] }
0x1298   :  { %3431 = vmatprep.subr.bf16.mxu1 %v9502_v27  ;;  %4618 = vmatpush3.bf16.msra.mxu0 %v9508_v11  ;;  %v12228_v27 = vld [vmem:[#allocation94_spill] sm:$0xff]  ;;  %v12229_v11 = vld [vmem:[#allocation95_spill] sm:$0xff] }
0x1299   :  { %4619 = vmatprep.subr.bf16.mxu0 %v11670_v39 }
0x129b   :  { %3432 = vmatpush1.bf16.msra.mxu1 %v9515_v57  ;;  %v12230_v57 = vld [vmem:[#allocation96_spill] sm:$0xff] }
0x129c   :  { %3433 = vmatprep.subr.bf16.mxu1 %v9521_v4  ;;  %4620 = vmatpush3.bf16.msra.mxu0 %v9527_v18  ;;  %v12231_v4 = vld [vmem:[#allocation97_spill] sm:$0xff]  ;;  %v10077_v18 = vld [vmem:[%s11181_s5] ss:$16 sps:$4 sm:$0xff]  }
0x129d   :  { %4621 = vmatprep.subr.bf16.mxu0 %v11670_v39 }
0x129f   :  { %3434 = vmatpush1.bf16.msra.mxu1 %v9534_v26  ;;  %v10083_v26 = vld [vmem:[%s11181_s5 + $0x24] ss:$16 sps:$4 sm:$0xff]  }
0x12a0   :  { %3435 = vmatprep.subr.bf16.mxu1 %v9540_v49  ;;  %4622 = vmatpush3.bf16.msra.mxu0 %v9546_v21  ;;  %v10089_v49 = vld [vmem:[%s11181_s5 + $0x20] ss:$16 sps:$4 sm:$0xff]   ;;  %v10095_v21 = vld [vmem:[%s11181_s5 + $0x44] ss:$16 sps:$4 sm:$0xff]  }
0x12a1   :  { %4623 = vmatprep.subr.bf16.mxu0 %v11670_v39 }
0x12a3   :  { %3436 = vmatpush1.bf16.msra.mxu1 %v9553_v33  ;;  %v10101_v33 = vld [vmem:[%s11181_s5 + $0x40] ss:$16 sps:$4 sm:$0xff]  }
0x12a4   :  { %3437 = vmatprep.subr.bf16.mxu1 %v12223_v24  ;;  %4624 = vmatpush3.bf16.msra.mxu0 %v12224_v52  ;;  %v10239_v24 = vld [vmem:[%s11181_s5 + $0x1c4] ss:$16 sps:$4 sm:$0xff]   ;;  %v10245_v52 = vld [vmem:[%s11181_s5 + $0x1c0] ss:$16 sps:$4 sm:$0xff]  }
0x12a5   :  { %4625 = vmatprep.subr.bf16.mxu0 %v11670_v39  ;;  %12241 = vst [vmem:[#allocation35_spill] sm:$0xff] %v10239_v24  ;;  %12242 = vst [vmem:[#allocation36_spill] sm:$0xff] %v10245_v52 }
0x12a7   :  { %3438 = vmatpush1.bf16.msra.mxu1 %v12225_v37  ;;  %v10251_v37 = vld [vmem:[%s11181_s5 + $0x1e4] ss:$16 sps:$4 sm:$0xff]  }
0x12a8   :  { %3439 = vmatprep.subr.bf16.mxu1 %v12226_v29  ;;  %4626 = vmatpush3.bf16.msra.mxu0 %v12227_v23  ;;  %12243 = vst [vmem:[#allocation37_spill] sm:$0xff] %v10251_v37  ;;  %v10257_v29 = vld [vmem:[%s11181_s5 + $0x1e0] ss:$16 sps:$4 sm:$0xff]   ;;  %v10263_v23 = vld [vmem:[%s11183_s7 + $0x4] ss:$16 sps:$4 sm:$0xff]  }
0x12a9   :  { %4627 = vmatprep.subr.bf16.mxu0 %v11670_v39  ;;  %12244 = vst [vmem:[#allocation38_spill] sm:$0xff] %v10257_v29  ;;  %12245 = vst [vmem:[#allocation39_spill] sm:$0xff] %v10263_v23 }
0x12ab   :  { %3440 = vmatpush1.bf16.msra.mxu1 %v12228_v27 }
0x12ac   :  { %3441 = vmatprep.subr.bf16.mxu1 %v12229_v11  ;;  %4628 = vmatpush3.bf16.msra.mxu0 %v12230_v57  ;;  %v12246_v57 = vld [vmem:[#allocation75_spill] sm:$0xff] }
0x12ad   :  { %4629 = vmatprep.subr.bf16.mxu0 %v11670_v39 }
0x12af   :  { %3442 = vmatpush1.bf16.msra.mxu1 %v9610_v36  ;;  %v10113_v36 = vld [vmem:[%s11181_s5 + $0x60] ss:$16 sps:$4 sm:$0xff]  }
0x12b0   :  { %4630 = vmatpush3.bf16.msra.mxu0 %v9616_v47  ;;  %3534 = vmatprep.subr.bf16.mxu1 %v9622_v0  ;;  %v10107_v0 = vld [vmem:[%s11181_s5 + $0x64] ss:$16 sps:$4 sm:$0xff]  }
0x12b1   :  { %3468 = vmatprep.subr.bf16.mxu0 %v12231_v4  ;;  %v10119_v47 = vld [vmem:[%s11181_s5 + $0x84] ss:$16 sps:$4 sm:$0xff]  }
0x12b2   :  { %3460 = vmatmul.mubr.bf16.vlgmr.msra.gmra.mrb[84].mxu1 %v9955_v59 }
0x12b3   :  { %3566 = vmatprep.mubr.bf16.mxu1 %v10033_v1  ;;  %3535 = vmatpush1.bf16.msra.mxu1 %v10077_v18 }
0x12b4   :  { %3536 = vmatprep.subr.bf16.mxu1 %v10083_v26 }
0x12b7   :  { %3537 = vmatpush1.bf16.msra.mxu1 %v10089_v49 }
0x12b8   :  { %3538 = vmatprep.subr.bf16.mxu1 %v10095_v21 }
0x12bb   :  { %3539 = vmatpush1.bf16.msra.mxu1 %v10101_v33 }
0x12bc   :  { %3540 = vmatprep.subr.bf16.mxu1 %v10107_v0 }
0x12bf   :  { %3541 = vmatpush1.bf16.msra.mxu1 %v10113_v36 }
0x12c0   :  { %3542 = vmatprep.subr.bf16.mxu1 %v10119_v47 }
0x12c3   :  { %3543 = vmatpush1.bf16.msra.mxu1 %v10125_v25 }
0x12c4   :  { %3544 = vmatprep.subr.bf16.mxu1 %v10131_v40 }
0x12c7   :  { %3545 = vmatpush1.bf16.msra.mxu1 %v10137_v17 }
0x12c8   :  { %3546 = vmatprep.subr.bf16.mxu1 %v10143_v63 }
0x12cb   :  { %3547 = vmatpush1.bf16.msra.mxu1 %v10149_v2 }
0x12cc   :  { %3548 = vmatprep.subr.bf16.mxu1 %v10155_v6 }
0x12cf   :  { %3549 = vmatpush1.bf16.msra.mxu1 %v10161_v50 }
0x12d0   :  { %3550 = vmatprep.subr.bf16.mxu1 %v10167_v31 }
0x12d3   :  { %3551 = vmatpush1.bf16.msra.mxu1 %v10173_v53 }
0x12d4   :  { %3552 = vmatprep.subr.bf16.mxu1 %v10179_v10 }
0x12d7   :  { %3553 = vmatpush1.bf16.msra.mxu1 %v10185_v55 }
0x12d8   :  { %3554 = vmatprep.subr.bf16.mxu1 %v10191_v45 }
0x12db   :  { %3555 = vmatpush1.bf16.msra.mxu1 %v10197_v56 }
0x12dc   :  { %3556 = vmatprep.subr.bf16.mxu1 %v10203_v8 }
0x12df   :  { %3557 = vmatpush1.bf16.msra.mxu1 %v10209_v43 }
0x12e0   :  { %3558 = vmatprep.subr.bf16.mxu1 %v10215_v32 }
0x12e3   :  { %3559 = vmatpush1.bf16.msra.mxu1 %v10221_v22 }
0x12e4   :  { %3560 = vmatprep.subr.bf16.mxu1 %v10227_v51 }
0x12e7   :  { %3561 = vmatpush1.bf16.msra.mxu1 %v10233_v58 }
0x12e8   :  { %3562 = vmatprep.subr.bf16.mxu1 %v10239_v24 }
0x12eb   :  { %3563 = vmatpush1.bf16.msra.mxu1 %v10245_v52 }
0x12ec   :  { %3564 = vmatprep.subr.bf16.mxu1 %v10251_v37 }
0x12ef   :  { %3565 = vmatpush1.bf16.msra.mxu1 %v10257_v29 }
0x12f0   :  { %3641 = vmatprep.subr.bf16.mxu1 %v10263_v23 }
0x1365   :  { %v3312_v27 = vpop.f32.mrb[80].mxu0  ;;  %v3353_v11 = vpop.f32.mrb[80].mxu1 }
0x1366   :  { %v3313_v4 = vadd.f32 %v3312_v27, %v12246_v57  ;;  %v3314_v52 = vpop.f32.mrb[81].mxu0  ;;  %v3355_v37 = vpop.f32.mrb[81].mxu1  ;;  %v3354_v23 = vadd.f32 %v3353_v11, %v7053_v42 }
0x1367   :  { %v3315_v24 = vadd.f32 %v3314_v52, %v7044_v12  ;;  %v3316_v58 = vpop.f32.mrb[82].mxu0  ;;  %v3357_v51 = vpop.f32.mrb[82].mxu1  ;;  %v3356_v8 = vadd.f32 %v3355_v37, %v7049_v38 }
0x1368   :  { %v4390_v22 = vmul.f32 -1.442695, %v3313_v4  ;;  %v3317_v32 = vpop.f32.mrb[83].mxu0  ;;  %v3358_v29 = vpop.f32.mrb[83].mxu1  ;;  %v12262_v4 = vld [vmem:[#allocation11_spill] sm:$0xff] }
0x1369   :  { %v4391_v43 = vmul.f32 -1.442695, %v3315_v24  ;;  %v4392_v56 = vmul.f32 -1.442695, %v3356_v8 }
0x136a   :  { %5206 = vpow2.f32 %v4390_v22 }
0x136b   :  { %5208 = vpow2.f32 %v4391_v43 }
0x136c   :  { %5210 = vpow2.f32 %v4392_v56 }
0x136d   :  { %5212 = vtanh.f32 %v3354_v23 }
0x1374   :  { %v5207_v45 = vpop.eup %5206 }
0x1375   :  { %v5209_v55 = vpop.eup %5208  ;;  %v3363_v27 = vadd.f32 1.0, %v5207_v45 }
0x1376   :  { %v3369_v57 = vadd.f32 1.0, %v5209_v55  ;;  %v5211_v51 = vpop.eup %5210 }
0x1377   :  { %5214 = vrcp.f32 %v3363_v27  ;;  %v5213_v58 = vpop.eup %5212  ;;  %v3376_v22 = vadd.f32 1.0, %v5211_v51  ;;  %v12263_v27 = vld [vmem:[#allocation12_spill] sm:$0xff]  ;;  %v12264_v51 = vld [vmem:[#allocation13_spill] sm:$0xff] }
0x1378   :  { %5216 = vrcp.f32 %v3369_v57 }
0x1379   :  { %5218 = vrcp.f32 %v3376_v22  ;;  %v12269_v22 = vld [vmem:[#allocation18_spill] sm:$0xff] }
0x1381   :  { %v5215_v32 = vpop.eup %5214 }
0x1382   :  { %v5217_v52 = vpop.eup %5216  ;;  %v3380_v24 = vmul.f32 %v5215_v32, %v5213_v58  ;;  %v12265_v58 = vld [vmem:[#allocation14_spill] sm:$0xff]  ;;  %v12266_v32 = vld [vmem:[#allocation15_spill] sm:$0xff] }
0x1383   :  { %v3379_v43 = vmul.f32 %v5217_v52, %v9670_v41  ;;  %v5219_v56 = vpop.eup %5218  ;;  %v12247_v41 = vld [vmem:[#allocation98_spill] sm:$0xff]  ;;  %v12267_v52 = vld [vmem:[#allocation16_spill] sm:$0xff] }
0x1385   :  { %v10271_v37 = vadd.f32 %v3380_v24, %v3379_v43  ;;  %v10273_v8 = vpop.f32.mrb[84].mxu1  ;;  %v12268_v24 = vld [vmem:[#allocation17_spill] sm:$0xff]  ;;  %v12270_v43 = vld [vmem:[#allocation19_spill] sm:$0xff] }
0x1386   :  { %v10275_v29 = vpop.f32.mrb[85].mxu1 }
0x1387   :  { %v3465_v45 = vpop.f32.mrb[86].mxu1  ;;  %5220 = vtanh.f32 %v10271_v37 }
0x1388   :  { %v3466_v55 = vpop.f32.mrb[87].mxu1  ;;  %v12271_v45 = vld [vmem:[#allocation20_spill] sm:$0xff] }
0x1389   :  { %v12272_v55 = vld [vmem:[#allocation21_spill] sm:$0xff] }
0x1391   :  { %v5221_v23 = vpop.eup %5220 }
0x1392   :  { %v3383_v11 = vmul.f32 %v5221_v23, %v5219_v56  ;;  %v12273_v56 = vld [vmem:[#allocation22_spill] sm:$0xff]  ;;  %v12274_v23 = vld [vmem:[#allocation23_spill] sm:$0xff] }
0x1394   :  { %v10278_v57 = vpack.c.bf16 %v3383_v11, %v3383_v11  ;;  %v12275_v11 = vld [vmem:[#allocation24_spill] sm:$0xff] }
0x1396   :  { %4632 = vmatmul.mubr.bf16.vlgmr.msra.gmra.mrb[84].mxu0 %v10278_v57 }
0x1397   :  { %3469 = vmatpush1.bf16.msra.mxu0 %v9683_v28  ;;  %3500 = vmatprep.mubr.bf16.mxu0 %v11673_v35  ;;  %v12248_v28 = vld [vmem:[#allocation99_spill] sm:$0xff] }
0x1398   :  { %3470 = vmatprep.subr.bf16.mxu0 %v9690_v16  ;;  %v12249_v16 = vld [vmem:[#allocation100_spill] sm:$0xff] }
0x139b   :  { %3471 = vmatpush1.bf16.msra.mxu0 %v9696_v9  ;;  %v12250_v9 = vld [vmem:[#allocation101_spill] sm:$0xff] }
0x139c   :  { %3472 = vmatprep.subr.bf16.mxu0 %v9702_v13  ;;  %v12251_v13 = vld [vmem:[#allocation102_spill] sm:$0xff] }
0x139f   :  { %3473 = vmatpush1.bf16.msra.mxu0 %v9708_v3  ;;  %v12252_v3 = vld [vmem:[#allocation103_spill] sm:$0xff] }
0x13a0   :  { %3474 = vmatprep.subr.bf16.mxu0 %v9714_v14  ;;  %v12253_v14 = vld [vmem:[#allocation104_spill] sm:$0xff] }
0x13a3   :  { %3475 = vmatpush1.bf16.msra.mxu0 %v9720_v20  ;;  %v12254_v20 = vld [vmem:[#allocation105_spill] sm:$0xff] }
0x13a4   :  { %3476 = vmatprep.subr.bf16.mxu0 %v9726_v62  ;;  %v12255_v62 = vld [vmem:[#allocation5_spill] sm:$0xff] }
0x13a7   :  { %3477 = vmatpush1.bf16.msra.mxu0 %v9732_v7  ;;  %v12256_v7 = vld [vmem:[#allocation4_spill] sm:$0xff] }
0x13a8   :  { %3478 = vmatprep.subr.bf16.mxu0 %v9738_v30  ;;  %v12257_v30 = vld [vmem:[#allocation6_spill] sm:$0xff] }
0x13ab   :  { %3479 = vmatpush1.bf16.msra.mxu0 %v9744_v54  ;;  %v12258_v54 = vld [vmem:[#allocation7_spill] sm:$0xff] }
0x13ac   :  { %3480 = vmatprep.subr.bf16.mxu0 %v12247_v41  ;;  %v10328_v41 = vld [vmem:[%s11181_s5 + $0x1ac] ss:$16 sps:$4 sm:$0xff]  }
0x13af   :  { %3481 = vmatpush1.bf16.msra.mxu0 %v9756_v46  ;;  %v12259_v46 = vld [vmem:[#allocation8_spill] sm:$0xff] }
0x13b0   :  { %3482 = vmatprep.subr.bf16.mxu0 %v12248_v28  ;;  %v10334_v28 = vld [vmem:[%s11181_s5 + $0x1a8] ss:$16 sps:$4 sm:$0xff]  }
0x13b3   :  { %3483 = vmatpush1.bf16.msra.mxu0 %v12249_v16  ;;  %v10340_v16 = vld [vmem:[%s11181_s5 + $0x1cc] ss:$16 sps:$4 sm:$0xff]  }
0x13b4   :  { %3575 = vmatprep.subr.bf16.mxu0 %v12250_v9  ;;  %v10346_v9 = vld [vmem:[%s11181_s5 + $0x1c8] ss:$16 sps:$4 sm:$0xff]  }
0x13b6   :  { %3501 = vmatmul.mubr.bf16.vlgmr.msra.gmra.mrb[88].mxu0 %v9955_v59  ;;  %v12260_v59 = vld [vmem:[#allocation9_spill] sm:$0xff] }
0x13b7   :  { %3607 = vmatprep.mubr.bf16.mxu0 %v10033_v1  ;;  %3576 = vmatpush1.bf16.msra.mxu0 %v12251_v13  ;;  %v12261_v1 = vld [vmem:[#allocation10_spill] sm:$0xff]  ;;  %v10352_v13 = vld [vmem:[%s11181_s5 + $0x1ec] ss:$16 sps:$4 sm:$0xff]  }
0x13b8   :  { %3577 = vmatprep.subr.bf16.mxu0 %v12252_v3  ;;  %v10358_v3 = vld [vmem:[%s11181_s5 + $0x1e8] ss:$16 sps:$4 sm:$0xff]  }
0x13bb   :  { %3578 = vmatpush1.bf16.msra.mxu0 %v12253_v14  ;;  %v10364_v14 = vld [vmem:[%s11183_s7 + $0xc] ss:$16 sps:$4 sm:$0xff]  }
0x13bc   :  { %3579 = vmatprep.subr.bf16.mxu0 %v12254_v20 }
0x13bf   :  { %3580 = vmatpush1.bf16.msra.mxu0 %v12255_v62  ;;  %v12276_v62 = vld [vmem:[#allocation25_spill] sm:$0xff] }
0x13c0   :  { %3581 = vmatprep.subr.bf16.mxu0 %v12256_v7 }
0x13c3   :  { %3582 = vmatpush1.bf16.msra.mxu0 %v12257_v30 }
0x13c4   :  { %3583 = vmatprep.subr.bf16.mxu0 %v12258_v54 }
0x13c7   :  { %3584 = vmatpush1.bf16.msra.mxu0 %v12259_v46 }
0x13c8   :  { %3585 = vmatprep.subr.bf16.mxu0 %v12260_v59  ;;  %v12277_v59 = vld [vmem:[#allocation3_spill] sm:$0xff] }
0x13cb   :  { %3586 = vmatpush1.bf16.msra.mxu0 %v12261_v1  ;;  %v3464_v1 = vadd.f32 %v10275_v29, %v12277_v59 }
0x13cc   :  { %3587 = vmatprep.subr.bf16.mxu0 %v12262_v4  ;;  %v12278_v4 = vld [vmem:[#allocation2_spill] sm:$0xff] }
0x13cf   :  { %3588 = vmatpush1.bf16.msra.mxu0 %v12263_v27  ;;  %v3462_v27 = vadd.f32 %v10273_v8, %v12278_v4 }
0x13d0   :  { %3589 = vmatprep.subr.bf16.mxu0 %v12264_v51  ;;  %v4395_v51 = vmul.f32 -1.442695, %v3464_v1 }
0x13d2   :  { %5222 = vpow2.f32 %v4395_v51 }
0x13d3   :  { %3590 = vmatpush1.bf16.msra.mxu0 %v12265_v58  ;;  %v4394_v58 = vmul.f32 -1.442695, %v3462_v27 }
0x13d4   :  { %3591 = vmatprep.subr.bf16.mxu0 %v12266_v32 }
0x13d5   :  { %5224 = vpow2.f32 %v4394_v58 }
0x13d7   :  { %3592 = vmatpush1.bf16.msra.mxu0 %v12267_v52 }
0x13d8   :  { %3593 = vmatprep.subr.bf16.mxu0 %v12268_v24 }
0x13db   :  { %3594 = vmatpush1.bf16.msra.mxu0 %v12269_v22 }
0x13dc   :  { %3595 = vmatprep.subr.bf16.mxu0 %v12270_v43  ;;  %v5223_v32 = vpop.eup %5222 }
0x13dd   :  { %v3518_v24 = vadd.f32 1.0, %v5223_v32 }
0x13df   :  { %3596 = vmatpush1.bf16.msra.mxu0 %v12271_v45  ;;  %v5225_v52 = vpop.eup %5224  ;;  %5226 = vrcp.f32 %v3518_v24  ;;  %v10402_v24 = vld [vmem:[%s11183_s7 + $0x2c] ss:$16 sps:$4 sm:$0xff]  }
0x13e0   :  { %3597 = vmatprep.subr.bf16.mxu0 %v12272_v55  ;;  %v3512_v22 = vadd.f32 1.0, %v5225_v52  ;;  %v10396_v52 = vld [vmem:[%s11183_s7] ss:$16 sps:$4 sm:$0xff]  }
0x13e2   :  { %5228 = vrcp.f32 %v3512_v22  ;;  %v10414_v22 = vld [vmem:[%s11183_s7 + $0x28] ss:$16 sps:$4 sm:$0xff]  }
0x13e3   :  { %3598 = vmatpush1.bf16.msra.mxu0 %v12273_v56  ;;  %12279 = vst [vmem:[#allocation40_spill] sm:$0xff] %v10414_v22 }
0x13e4   :  { %3599 = vmatprep.subr.bf16.mxu0 %v12274_v23 }
0x13e7   :  { %3600 = vmatpush1.bf16.msra.mxu0 %v12275_v11 }
0x13e8   :  { %3601 = vmatprep.subr.bf16.mxu0 %v10328_v41 }
0x13e9   :  { %v5227_v11 = vpop.eup %5226 }
0x13eb   :  { %3602 = vmatpush1.bf16.msra.mxu0 %v10334_v28 }
0x13ec   :  { %3603 = vmatprep.subr.bf16.mxu0 %v10340_v16 }
0x13ef   :  { %3604 = vmatpush1.bf16.msra.mxu0 %v10346_v9 }
0x13f0   :  { %3605 = vmatprep.subr.bf16.mxu0 %v10352_v13 }
0x13f3   :  { %3606 = vmatpush1.bf16.msra.mxu0 %v10358_v3 }
0x13f4   :  { %3682 = vmatprep.subr.bf16.mxu0 %v10364_v14 }
0x1469   :  { %v3419_v20 = vpop.f32.mrb[84].mxu0 }
0x146a   :  { %v3420_v7 = vadd.f32 %v12276_v62, %v3419_v20  ;;  %v4633_v30 = vpop.f32.mrb[85].mxu0  ;;  %v5229_v20 = vpop.eup %5228 }
0x146b   :  { %v3422_v54 = vpop.f32.mrb[86].mxu0 }
0x146c   :  { %4393 = vst [vmem:[%s11189_s11 + $0x28] sm:$0xff] %v3420_v7  ;;  %v4634_v46 = vpop.f32.mrb[87].mxu0  ;;  %v3528_v7 = vmul.f32 %v5227_v11, %v9952_v60  ;;  %v10390_v60 = vld [vmem:[%s11183_s7 + $0x8] ss:$16 sps:$4 sm:$0xff]  }
0x146d   :  { %v10462_v11 = vld [vmem:[%s11183_s7 + $0x68] ss:$16 sps:$4 sm:$0xff]  }
0x146e   :  { %12286 = vst [vmem:[#allocation47_spill] sm:$0xff] %v10462_v11 }
0x1489   :  { %v3502_v43 = vpop.f32.mrb[88].mxu0 }
0x148a   :  { %v3503_v45 = vadd.f32 %v3502_v43, %v11823_v15  ;;  %v3504_v55 = vpop.f32.mrb[89].mxu0  ;;  %v10420_v43 = vld [vmem:[%s11183_s7 + $0x20] ss:$16 sps:$4 sm:$0xff]  }
0x148b   :  { %v3505_v56 = vadd.f32 %v3504_v55, %v11824_v44  ;;  %v3506_v29 = vpop.f32.mrb[90].mxu0  ;;  %v10432_v55 = vld [vmem:[%s11183_s7 + $0x44] ss:$16 sps:$4 sm:$0xff]  }
0x148c   :  { %5230 = vtanh.f32 %v3503_v45  ;;  %v3507_v23 = vpop.f32.mrb[91].mxu0  ;;  %v10426_v45 = vld [vmem:[%s11183_s7 + $0x4c] ss:$16 sps:$4 sm:$0xff]   ;;  %12281 = vst [vmem:[#allocation42_spill] sm:$0xff] %v10432_v55  ;;  %v10444_v29 = vld [vmem:[%s11183_s7 + $0x40] ss:$16 sps:$4 sm:$0xff]  }
0x148d   :  { %v4396_v8 = vmul.f32 -1.442695, %v3505_v56  ;;  %12280 = vst [vmem:[#allocation41_spill] sm:$0xff] %v10426_v45  ;;  %v10438_v56 = vld [vmem:[%s11183_s7 + $0x48] ss:$16 sps:$4 sm:$0xff]   ;;  %12283 = vst [vmem:[#allocation44_spill] sm:$0xff] %v10444_v29 }
0x148e   :  { %12282 = vst [vmem:[#allocation43_spill] sm:$0xff] %v10438_v56  ;;  %v10450_v23 = vld [vmem:[%s11183_s7 + $0x6c] ss:$16 sps:$4 sm:$0xff]  }
0x148f   :  { %5232 = vpow2.f32 %v4396_v8  ;;  %12284 = vst [vmem:[#allocation45_spill] sm:$0xff] %v10450_v23  ;;  %v10456_v8 = vld [vmem:[%s11183_s7 + $0x64] ss:$16 sps:$4 sm:$0xff]  }
0x1490   :  { %12285 = vst [vmem:[#allocation46_spill] sm:$0xff] %v10456_v8 }
0x1496   :  { %v5231_v62 = vpop.eup %5230 }
0x1497   :  { %v3529_v30 = vmul.f32 %v5231_v62, %v5229_v20  ;;  %v10468_v20 = vld [vmem:[%s11183_s7 + $0x60] ss:$16 sps:$4 sm:$0xff]   ;;  %v10474_v62 = vld [vmem:[%s11183_s7 + $0x8c] ss:$16 sps:$4 sm:$0xff]  }
0x1498   :  { %12287 = vst [vmem:[#allocation48_spill] sm:$0xff] %v10468_v20  ;;  %12288 = vst [vmem:[#allocation49_spill] sm:$0xff] %v10474_v62 }
0x1499   :  { %v5233_v54 = vpop.eup %5232  ;;  %v10378_v46 = vadd.f32 %v3529_v30, %v3528_v7  ;;  %v10480_v7 = vld [vmem:[%s11183_s7 + $0x84] ss:$16 sps:$4 sm:$0xff]   ;;  %v10486_v30 = vld [vmem:[%s11183_s7 + $0x88] ss:$16 sps:$4 sm:$0xff]  }
0x149a   :  { %v3525_v1 = vadd.f32 1.0, %v5233_v54  ;;  %12289 = vst [vmem:[#allocation50_spill] sm:$0xff] %v10480_v7  ;;  %12290 = vst [vmem:[#allocation51_spill] sm:$0xff] %v10486_v30  ;;  %v10492_v54 = vld [vmem:[%s11183_s7 + $0x80] ss:$16 sps:$4 sm:$0xff]  }
0x149b   :  { %5234 = vtanh.f32 %v10378_v46  ;;  %12291 = vst [vmem:[#allocation52_spill] sm:$0xff] %v10492_v54 }
0x149c   :  { %5236 = vrcp.f32 %v3525_v1  ;;  %v10498_v1 = vld [vmem:[%s11183_s7 + $0xac] ss:$16 sps:$4 sm:$0xff]  }
0x149d   :  { %12292 = vst [vmem:[#allocation53_spill] sm:$0xff] %v10498_v1 }
0x14a5   :  { %v5235_v27 = vpop.eup %5234 }
0x14a6   :  { %v5237_v51 = vpop.eup %5236 }
0x14a7   :  { %v3532_v58 = vmul.f32 %v5237_v51, %v5235_v27  ;;  %v10504_v27 = vld [vmem:[%s11183_s7 + $0xa4] ss:$16 sps:$4 sm:$0xff]   ;;  %v10510_v51 = vld [vmem:[%s11183_s7 + $0xa8] ss:$16 sps:$4 sm:$0xff]  }
0x14a8   :  { %12293 = vst [vmem:[#allocation54_spill] sm:$0xff] %v10504_v27  ;;  %12294 = vst [vmem:[#allocation55_spill] sm:$0xff] %v10510_v51 }
0x14a9   :  { %v10381_v32 = vpack.c.bf16 %v3532_v58, %v3532_v58  ;;  %v10516_v58 = vld [vmem:[%s11183_s7 + $0xa0] ss:$16 sps:$4 sm:$0xff]  }
0x14aa   :  { %12295 = vst [vmem:[#allocation56_spill] sm:$0xff] %v10516_v58 }
0x14ab   :  { %3567 = vmatmul.mubr.bf16.vlgmr.msra.gmra.mrb[88].mxu1 %v10381_v32  ;;  %3608 = vmatmul.mubr.bf16.vlgmr.msra.gmra.mrb[92].mxu0 %v10381_v32 }
0x14ac   :  { %3673 = vmatprep.mubr.bf16.mxu1 %v10278_v57  ;;  %3714 = vmatprep.mubr.bf16.mxu0 %v10278_v57  ;;  %v10408_v57 = vld [vmem:[%s11183_s7 + $0x24] ss:$16 sps:$4 sm:$0xff]  }
0x14ad   :  { %3683 = vmatpush1.bf16.msra.mxu0 %v10390_v60  ;;  %3642 = vmatpush1.bf16.msra.mxu1 %v10396_v52 }
0x14ae   :  { %3684 = vmatprep.subr.bf16.mxu0 %v10402_v24  ;;  %3643 = vmatprep.subr.bf16.mxu1 %v10408_v57 }
0x14b1   :  { %3685 = vmatpush1.bf16.msra.mxu0 %v10414_v22  ;;  %3644 = vmatpush1.bf16.msra.mxu1 %v10420_v43 }
0x14b2   :  { %3686 = vmatprep.subr.bf16.mxu0 %v10426_v45  ;;  %3645 = vmatprep.subr.bf16.mxu1 %v10432_v55 }
0x14b5   :  { %3687 = vmatpush1.bf16.msra.mxu0 %v10438_v56  ;;  %3646 = vmatpush1.bf16.msra.mxu1 %v10444_v29 }
0x14b6   :  { %3688 = vmatprep.subr.bf16.mxu0 %v10450_v23  ;;  %3647 = vmatprep.subr.bf16.mxu1 %v10456_v8 }
0x14b9   :  { %3689 = vmatpush1.bf16.msra.mxu0 %v10462_v11  ;;  %3648 = vmatpush1.bf16.msra.mxu1 %v10468_v20 }
0x14ba   :  { %3690 = vmatprep.subr.bf16.mxu0 %v10474_v62  ;;  %3649 = vmatprep.subr.bf16.mxu1 %v10480_v7 }
0x14bd   :  { %3691 = vmatpush1.bf16.msra.mxu0 %v10486_v30  ;;  %3650 = vmatpush1.bf16.msra.mxu1 %v10492_v54 }
0x14be   :  { %3692 = vmatprep.subr.bf16.mxu0 %v10498_v1  ;;  %3651 = vmatprep.subr.bf16.mxu1 %v10504_v27  ;;  %v10522_v1 = vld [vmem:[%s11183_s7 + $0xcc] ss:$16 sps:$4 sm:$0xff]   ;;  %v10528_v27 = vld [vmem:[%s11183_s7 + $0xc4] ss:$16 sps:$4 sm:$0xff]  }
0x14bf   :  { %12296 = vst [vmem:[#allocation57_spill] sm:$0xff] %v10522_v1  ;;  %12297 = vst [vmem:[#allocation58_spill] sm:$0xff] %v10528_v27 }
0x14c1   :  { %3693 = vmatpush1.bf16.msra.mxu0 %v10510_v51  ;;  %3652 = vmatpush1.bf16.msra.mxu1 %v10516_v58  ;;  %v10534_v51 = vld [vmem:[%s11183_s7 + $0xc8] ss:$16 sps:$4 sm:$0xff]   ;;  %v10540_v58 = vld [vmem:[%s11183_s7 + $0xc0] ss:$16 sps:$4 sm:$0xff]  }
0x14c2   :  { %3694 = vmatprep.subr.bf16.mxu0 %v10522_v1  ;;  %3653 = vmatprep.subr.bf16.mxu1 %v10528_v27  ;;  %12298 = vst [vmem:[#allocation59_spill] sm:$0xff] %v10534_v51  ;;  %12299 = vst [vmem:[#allocation60_spill] sm:$0xff] %v10540_v58  ;;  %v10546_v1 = vld [vmem:[%s11183_s7 + $0xec] ss:$16 sps:$4 sm:$0xff]   ;;  %v10552_v27 = vld [vmem:[%s11183_s7 + $0xe4] ss:$16 sps:$4 sm:$0xff]  }
0x14c3   :  { %12300 = vst [vmem:[#allocation61_spill] sm:$0xff] %v10546_v1  ;;  %12301 = vst [vmem:[#allocation62_spill] sm:$0xff] %v10552_v27 }
0x14c5   :  { %3695 = vmatpush1.bf16.msra.mxu0 %v10534_v51  ;;  %3654 = vmatpush1.bf16.msra.mxu1 %v10540_v58  ;;  %v10558_v51 = vld [vmem:[%s11183_s7 + $0xe8] ss:$16 sps:$4 sm:$0xff]   ;;  %v10564_v58 = vld [vmem:[%s11183_s7 + $0xe0] ss:$16 sps:$4 sm:$0xff]  }
0x14c6   :  { %3696 = vmatprep.subr.bf16.mxu0 %v10546_v1  ;;  %3655 = vmatprep.subr.bf16.mxu1 %v10552_v27  ;;  %12302 = vst [vmem:[#allocation63_spill] sm:$0xff] %v10558_v51  ;;  %12303 = vst [vmem:[#allocation64_spill] sm:$0xff] %v10564_v58  ;;  %v10570_v1 = vld [vmem:[%s11183_s7 + $0x10c] ss:$16 sps:$4 sm:$0xff]   ;;  %v10576_v27 = vld [vmem:[%s11183_s7 + $0x104] ss:$16 sps:$4 sm:$0xff]  }
0x14c7   :  { %12304 = vst [vmem:[#allocation65_spill] sm:$0xff] %v10570_v1  ;;  %12305 = vst [vmem:[#allocation66_spill] sm:$0xff] %v10576_v27 }
0x14c9   :  { %3697 = vmatpush1.bf16.msra.mxu0 %v10558_v51  ;;  %3656 = vmatpush1.bf16.msra.mxu1 %v10564_v58  ;;  %v10582_v51 = vld [vmem:[%s11183_s7 + $0x108] ss:$16 sps:$4 sm:$0xff]   ;;  %v10588_v58 = vld [vmem:[%s11183_s7 + $0x100] ss:$16 sps:$4 sm:$0xff]  }
0x14ca   :  { %3698 = vmatprep.subr.bf16.mxu0 %v10570_v1  ;;  %3657 = vmatprep.subr.bf16.mxu1 %v10576_v27  ;;  %12306 = vst [vmem:[#allocation67_spill] sm:$0xff] %v10582_v51  ;;  %12307 = vst [vmem:[#allocation68_spill] sm:$0xff] %v10588_v58  ;;  %v10594_v1 = vld [vmem:[%s11183_s7 + $0x12c] ss:$16 sps:$4 sm:$0xff]   ;;  %v10600_v27 = vld [vmem:[%s11183_s7 + $0x124] ss:$16 sps:$4 sm:$0xff]  }
0x14cb   :  { %12308 = vst [vmem:[#allocation69_spill] sm:$0xff] %v10594_v1  ;;  %12309 = vst [vmem:[#allocation71_spill] sm:$0xff] %v10600_v27 }
0x14cd   :  { %3699 = vmatpush1.bf16.msra.mxu0 %v10582_v51  ;;  %3658 = vmatpush1.bf16.msra.mxu1 %v10588_v58  ;;  %v10606_v51 = vld [vmem:[%s11183_s7 + $0x128] ss:$16 sps:$4 sm:$0xff]   ;;  %v10612_v58 = vld [vmem:[%s11183_s7 + $0x120] ss:$16 sps:$4 sm:$0xff]  }
0x14ce   :  { %3700 = vmatprep.subr.bf16.mxu0 %v10594_v1  ;;  %3659 = vmatprep.subr.bf16.mxu1 %v10600_v27  ;;  %12310 = vst [vmem:[#allocation72_spill] sm:$0xff] %v10606_v51  ;;  %12311 = vst [vmem:[#allocation73_spill] sm:$0xff] %v10612_v58  ;;  %v10618_v1 = vld [vmem:[%s11183_s7 + $0x14c] ss:$16 sps:$4 sm:$0xff]   ;;  %v10624_v27 = vld [vmem:[%s11183_s7 + $0x144] ss:$16 sps:$4 sm:$0xff]  }
0x14cf   :  { %12312 = vst [vmem:[#allocation74_spill] sm:$0xff] %v10618_v1  ;;  %12313 = vst [vmem:[#allocation76_spill] sm:$0xff] %v10624_v27 }
0x14d1   :  { %3701 = vmatpush1.bf16.msra.mxu0 %v10606_v51  ;;  %3660 = vmatpush1.bf16.msra.mxu1 %v10612_v58  ;;  %v10630_v51 = vld [vmem:[%s11183_s7 + $0x148] ss:$16 sps:$4 sm:$0xff]   ;;  %v10636_v58 = vld [vmem:[%s11183_s7 + $0x140] ss:$16 sps:$4 sm:$0xff]  }
0x14d2   :  { %3702 = vmatprep.subr.bf16.mxu0 %v10618_v1  ;;  %3661 = vmatprep.subr.bf16.mxu1 %v10624_v27  ;;  %12314 = vst [vmem:[#allocation77_spill] sm:$0xff] %v10630_v51  ;;  %12315 = vst [vmem:[#allocation78_spill] sm:$0xff] %v10636_v58  ;;  %v10642_v1 = vld [vmem:[%s11183_s7 + $0x16c] ss:$16 sps:$4 sm:$0xff]   ;;  %v10648_v27 = vld [vmem:[%s11183_s7 + $0x164] ss:$16 sps:$4 sm:$0xff]  }
0x14d3   :  { %12316 = vst [vmem:[#allocation79_spill] sm:$0xff] %v10642_v1  ;;  %12317 = vst [vmem:[#allocation80_spill] sm:$0xff] %v10648_v27 }
0x14d5   :  { %3703 = vmatpush1.bf16.msra.mxu0 %v10630_v51  ;;  %3662 = vmatpush1.bf16.msra.mxu1 %v10636_v58  ;;  %v10654_v51 = vld [vmem:[%s11183_s7 + $0x168] ss:$16 sps:$4 sm:$0xff]   ;;  %v10660_v58 = vld [vmem:[%s11183_s7 + $0x160] ss:$16 sps:$4 sm:$0xff]  }
0x14d6   :  { %3704 = vmatprep.subr.bf16.mxu0 %v10642_v1  ;;  %3663 = vmatprep.subr.bf16.mxu1 %v10648_v27  ;;  %12318 = vst [vmem:[#allocation81_spill] sm:$0xff] %v10654_v51  ;;  %12319 = vst [vmem:[#allocation82_spill] sm:$0xff] %v10660_v58  ;;  %v10666_v1 = vld [vmem:[%s11183_s7 + $0x18c] ss:$16 sps:$4 sm:$0xff]   ;;  %v10672_v27 = vld [vmem:[%s11183_s7 + $0x184] ss:$16 sps:$4 sm:$0xff]  }
0x14d7   :  { %12320 = vst [vmem:[#allocation83_spill] sm:$0xff] %v10666_v1  ;;  %12321 = vst [vmem:[#allocation84_spill] sm:$0xff] %v10672_v27 }
0x14d9   :  { %3705 = vmatpush1.bf16.msra.mxu0 %v10654_v51  ;;  %3664 = vmatpush1.bf16.msra.mxu1 %v10660_v58  ;;  %v10678_v51 = vld [vmem:[%s11183_s7 + $0x188] ss:$16 sps:$4 sm:$0xff]   ;;  %v10684_v58 = vld [vmem:[%s11183_s7 + $0x180] ss:$16 sps:$4 sm:$0xff]  }
0x14da   :  { %3706 = vmatprep.subr.bf16.mxu0 %v10666_v1  ;;  %3665 = vmatprep.subr.bf16.mxu1 %v10672_v27  ;;  %12322 = vst [vmem:[#allocation85_spill] sm:$0xff] %v10678_v51  ;;  %12323 = vst [vmem:[#allocation86_spill] sm:$0xff] %v10684_v58  ;;  %v10690_v1 = vld [vmem:[%s11183_s7 + $0x1ac] ss:$16 sps:$4 sm:$0xff]   ;;  %v10696_v27 = vld [vmem:[%s11183_s7 + $0x1a4] ss:$16 sps:$4 sm:$0xff]  }
0x14db   :  { %12324 = vst [vmem:[#allocation87_spill] sm:$0xff] %v10690_v1  ;;  %12325 = vst [vmem:[#allocation88_spill] sm:$0xff] %v10696_v27 }
0x14dd   :  { %3707 = vmatpush1.bf16.msra.mxu0 %v10678_v51  ;;  %3666 = vmatpush1.bf16.msra.mxu1 %v10684_v58  ;;  %v10702_v51 = vld [vmem:[%s11183_s7 + $0x1a8] ss:$16 sps:$4 sm:$0xff]   ;;  %v10708_v58 = vld [vmem:[%s11183_s7 + $0x1a0] ss:$16 sps:$4 sm:$0xff]  }
0x14de   :  { %3708 = vmatprep.subr.bf16.mxu0 %v10690_v1  ;;  %3667 = vmatprep.subr.bf16.mxu1 %v10696_v27  ;;  %12326 = vst [vmem:[#allocation89_spill] sm:$0xff] %v10702_v51  ;;  %12327 = vst [vmem:[#allocation90_spill] sm:$0xff] %v10708_v58  ;;  %v10714_v1 = vld [vmem:[%s11183_s7 + $0x1cc] ss:$16 sps:$4 sm:$0xff]   ;;  %v10720_v27 = vld [vmem:[%s11183_s7 + $0x1c4] ss:$16 sps:$4 sm:$0xff]  }
0x14df   :  { %12328 = vst [vmem:[#allocation91_spill] sm:$0xff] %v10714_v1  ;;  %12329 = vst [vmem:[#allocation92_spill] sm:$0xff] %v10720_v27 }
0x14e1   :  { %3709 = vmatpush1.bf16.msra.mxu0 %v10702_v51  ;;  %3668 = vmatpush1.bf16.msra.mxu1 %v10708_v58  ;;  %v10726_v51 = vld [vmem:[%s11183_s7 + $0x1c8] ss:$16 sps:$4 sm:$0xff]   ;;  %v10732_v58 = vld [vmem:[%s11183_s7 + $0x1c0] ss:$16 sps:$4 sm:$0xff]  }
0x14e2   :  { %3710 = vmatprep.subr.bf16.mxu0 %v10714_v1  ;;  %3669 = vmatprep.subr.bf16.mxu1 %v10720_v27  ;;  %12330 = vst [vmem:[#allocation93_spill] sm:$0xff] %v10726_v51  ;;  %12331 = vst [vmem:[#allocation94_spill] sm:$0xff] %v10732_v58  ;;  %v10738_v1 = vld [vmem:[%s11183_s7 + $0x1ec] ss:$16 sps:$4 sm:$0xff]   ;;  %v10744_v27 = vld [vmem:[%s11183_s7 + $0x1e4] ss:$16 sps:$4 sm:$0xff]  }
0x14e3   :  { %12332 = vst [vmem:[#allocation95_spill] sm:$0xff] %v10738_v1  ;;  %12333 = vst [vmem:[#allocation96_spill] sm:$0xff] %v10744_v27 }
0x14e5   :  { %3711 = vmatpush1.bf16.msra.mxu0 %v10726_v51  ;;  %3670 = vmatpush1.bf16.msra.mxu1 %v10732_v58  ;;  %v10750_v51 = vld [vmem:[%s11183_s7 + $0x1e8] ss:$16 sps:$4 sm:$0xff]   ;;  %v10756_v58 = vld [vmem:[%s11183_s7 + $0x1e0] ss:$16 sps:$4 sm:$0xff]  }
0x14e6   :  { %3712 = vmatprep.subr.bf16.mxu0 %v10738_v1  ;;  %3671 = vmatprep.subr.bf16.mxu1 %v10744_v27  ;;  %12334 = vst [vmem:[#allocation97_spill] sm:$0xff] %v10750_v51  ;;  %12335 = vst [vmem:[#allocation98_spill] sm:$0xff] %v10756_v58  ;;  %v5816_v1 = vld [vmem:[%s11179_s3 + $0x4] ss:$16 sps:$4 sm:$0xff]  }
0x14e9   :  { %3713 = vmatpush1.bf16.msra.mxu0 %v10750_v51  ;;  %3672 = vmatpush1.bf16.msra.mxu1 %v10756_v58 }
0x14ea   :  { %3790 = vmatprep.subr.bf16.mxu0 %v5816_v1  ;;  %4635 = vmatprep.subr.bf16.mxu1 %v11670_v39 }
0x157e   :  { %v3568_v27 = vpop.f32.mrb[88].mxu1  ;;  %v3609_v30 = vpop.f32.mrb[92].mxu0 }
0x157f   :  { %v3569_v54 = vadd.f32 %v3568_v27, %v12222_v61  ;;  %v3570_v62 = vpop.f32.mrb[89].mxu1  ;;  %v3611_v51 = vpop.f32.mrb[93].mxu0  ;;  %v3610_v45 = vadd.f32 %v3609_v30, %v6833_v5 }
0x1580   :  { %v3571_v7 = vadd.f32 %v3570_v62, %v6824_v19  ;;  %v3572_v11 = vpop.f32.mrb[90].mxu1  ;;  %v3613_v20 = vpop.f32.mrb[94].mxu0  ;;  %v3612_v1 = vadd.f32 %v3611_v51, %v11777_v34  ;;  %v5820_v51 = vld [vmem:[%s11179_s3 + $0x20] ss:$16 sps:$4 sm:$0xff]  }
0x1581   :  { %v4397_v23 = vmul.f32 -1.442695, %v3569_v54  ;;  %v3573_v8 = vpop.f32.mrb[91].mxu1  ;;  %v3614_v58 = vpop.f32.mrb[95].mxu0 }
0x1582   :  { %v4398_v56 = vmul.f32 -1.442695, %v3571_v7  ;;  %v4399_v29 = vmul.f32 -1.442695, %v3612_v1  ;;  %v5821_v58 = vld [vmem:[%s11179_s3 + $0x44] ss:$16 sps:$4 sm:$0xff]  }
0x1583   :  { %5238 = vpow2.f32 %v4397_v23  ;;  %v10800_v1 = vld [vmem:[%s11186_s9 + $0x8] sm:$0xff]  }
0x1584   :  { %5240 = vpow2.f32 %v4398_v56 }
0x1585   :  { %5242 = vpow2.f32 %v4399_v29 }
0x1586   :  { %5244 = vtanh.f32 %v3610_v45 }
0x158d   :  { %v5239_v55 = vpop.eup %5238 }
0x158e   :  { %v5241_v22 = vpop.eup %5240  ;;  %v3619_v27 = vadd.f32 1.0, %v5239_v55 }
0x158f   :  { %v3625_v61 = vadd.f32 1.0, %v5241_v22  ;;  %v5243_v11 = vpop.eup %5242  ;;  %v10785_v22 = vld [vmem:[%s11186_s9] sm:$0xff]  }
0x1590   :  { %5246 = vrcp.f32 %v3619_v27  ;;  %v5245_v20 = vpop.eup %5244  ;;  %v3632_v23 = vadd.f32 1.0, %v5243_v11  ;;  %v5823_v27 = vld [vmem:[%s11179_s3 + $0x40] ss:$16 sps:$4 sm:$0xff]   ;;  %v5824_v11 = vld [vmem:[%s11179_s3 + $0x64] ss:$16 sps:$4 sm:$0xff]  }
0x1591   :  { %5248 = vrcp.f32 %v3625_v61  ;;  %v5817_v61 = vld [vmem:[%s11179_s3] ss:$16 sps:$4 sm:$0xff]  }
0x1592   :  { %5250 = vrcp.f32 %v3632_v23  ;;  %v5829_v23 = vld [vmem:[%s11179_s3 + $0x80] ss:$16 sps:$4 sm:$0xff]  }
0x159a   :  { %v5247_v8 = vpop.eup %5246 }
0x159b   :  { %v5249_v62 = vpop.eup %5248  ;;  %v3636_v7 = vmul.f32 %v5247_v8, %v5245_v20  ;;  %v10813_v20 = vld [vmem:[%s11186_s9 + $0x10] sm:$0xff]  }
0x159c   :  { %v3635_v56 = vmul.f32 %v5249_v62, %v10030_v48  ;;  %v5251_v30 = vpop.eup %5250  ;;  %v5818_v48 = vld [vmem:[%s11179_s3 + $0x24] ss:$16 sps:$4 sm:$0xff]   ;;  %v5826_v8 = vld [vmem:[%s11179_s3 + $0x60] ss:$16 sps:$4 sm:$0xff]  }
0x159d   :  { %v5827_v62 = vld [vmem:[%s11179_s3 + $0x84] ss:$16 sps:$4 sm:$0xff]  }
0x159e   :  { %v10768_v54 = vadd.f32 %v3636_v7, %v3635_v56  ;;  %v10826_v7 = vld [vmem:[%s11186_s9 + $0x18] sm:$0xff]   ;;  %v5830_v56 = vld [vmem:[%s11179_s3 + $0xa4] ss:$16 sps:$4 sm:$0xff]  }
0x15a0   :  { %5252 = vtanh.f32 %v10768_v54 }
0x15aa   :  { %v5253_v55 = vpop.eup %5252 }
0x15ab   :  { %v3639_v29 = vmul.f32 %v5253_v55, %v5251_v30  ;;  %v10839_v30 = vld [vmem:[%s11186_s9 + $0x20] sm:$0xff]  }
0x15ac   :  { %v5832_v55 = vld [vmem:[%s11179_s3 + $0xa0] ss:$16 sps:$4 sm:$0xff]  }
0x15ad   :  { %v10771_v45 = vpack.c.bf16 %v3639_v29, %v3639_v29  ;;  %v5833_v29 = vld [vmem:[%s11179_s3 + $0xc4] ss:$16 sps:$4 sm:$0xff]  }
0x15af   :  { %3674 = vmatmul.mubr.bf16.vlgmr.msra.gmra.mrb[92].mxu1 %v10771_v45  ;;  %3715 = vmatmul.mubr.bf16.vlgmr.msra.gmra.mrb[96].mxu0 %v10771_v45 }
0x15b0   :  { %3791 = vmatpush1.bf16.msra.mxu0 %v5817_v61  ;;  %3822 = vmatprep.mubr.bf16.mxu0 %v11673_v35  ;;  %v10852_v61 = vld [vmem:[%s11186_s9 + $0x28] sm:$0xff]  }
0x15b1   :  { %3792 = vmatprep.subr.bf16.mxu0 %v5818_v48  ;;  %4636 = vmatpush3.bf16.msra.mxu1 %v10785_v22  ;;  %v5835_v48 = vld [vmem:[%s11179_s3 + $0xc0] ss:$16 sps:$4 sm:$0xff]  }
0x15b2   :  { %4637 = vmatprep.subr.bf16.mxu1 %v11670_v39  ;;  %4651 = vmatprep.mubr.msk.bf16.mxu1 %vm5885_vm0, %v11670_v39 }
0x15b4   :  { %3793 = vmatpush1.bf16.msra.mxu0 %v5820_v51  ;;  %v5836_v51 = vld [vmem:[%s11179_s3 + $0xe4] ss:$16 sps:$4 sm:$0xff]  }
0x15b5   :  { %3794 = vmatprep.subr.bf16.mxu0 %v5821_v58  ;;  %4638 = vmatpush3.bf16.msra.mxu1 %v10800_v1  ;;  %v10865_v58 = vld [vmem:[%s11186_s9 + $0x30] sm:$0xff]  }
0x15b6   :  { %4639 = vmatprep.subr.bf16.mxu1 %v11670_v39 }
0x15b8   :  { %3795 = vmatpush1.bf16.msra.mxu0 %v5823_v27  ;;  %v5838_v27 = vld [vmem:[%s11179_s3 + $0xe0] ss:$16 sps:$4 sm:$0xff]  }
0x15b9   :  { %3796 = vmatprep.subr.bf16.mxu0 %v5824_v11  ;;  %4640 = vmatpush3.bf16.msra.mxu1 %v10813_v20  ;;  %v10875_v11 = vld [vmem:[%s11186_s9 + $0x38] sm:$0xff]  }
0x15ba   :  { %4641 = vmatprep.subr.bf16.mxu1 %v11670_v39 }
0x15bc   :  { %3797 = vmatpush1.bf16.msra.mxu0 %v5826_v8  ;;  %v5840_v8 = vld [vmem:[%s11181_s5 + $0x4] ss:$16 sps:$4 sm:$0xff]  }
0x15bd   :  { %3798 = vmatprep.subr.bf16.mxu0 %v5827_v62  ;;  %4642 = vmatpush3.bf16.msra.mxu1 %v10826_v7  ;;  %v5841_v62 = vld [vmem:[%s11179_s3 + $0xc] ss:$16 sps:$4 sm:$0xff]  }
0x15be   :  { %4643 = vmatprep.subr.bf16.mxu1 %v11670_v39 }
0x15c0   :  { %3799 = vmatpush1.bf16.msra.mxu0 %v5829_v23 }
0x15c1   :  { %3800 = vmatprep.subr.bf16.mxu0 %v5830_v56  ;;  %4644 = vmatpush3.bf16.msra.mxu1 %v10839_v30 }
0x15c2   :  { %4645 = vmatprep.subr.bf16.mxu1 %v11670_v39 }
0x15c4   :  { %3801 = vmatpush1.bf16.msra.mxu0 %v5832_v55 }
0x15c5   :  { %3802 = vmatprep.subr.bf16.mxu0 %v5833_v29  ;;  %4646 = vmatpush3.bf16.msra.mxu1 %v10852_v61 }
0x15c6   :  { %4647 = vmatprep.subr.bf16.mxu1 %v11670_v39 }
0x15c8   :  { %3803 = vmatpush1.bf16.msra.mxu0 %v5835_v48 }
0x15c9   :  { %3804 = vmatprep.subr.bf16.mxu0 %v5836_v51  ;;  %4648 = vmatpush3.bf16.msra.mxu1 %v10865_v58 }
0x15ca   :  { %4649 = vmatprep.subr.bf16.mxu1 %v11670_v39 }
0x15cc   :  { %3805 = vmatpush1.bf16.msra.mxu0 %v5838_v27 }
0x15cd   :  { %4650 = vmatpush3.bf16.msra.mxu1 %v10875_v11  ;;  %3897 = vmatprep.subr.bf16.mxu0 %v5840_v8 }
0x15ce   :  { %3831 = vmatprep.subr.bf16.mxu1 %v5841_v62 }
0x15cf   :  { %3823 = vmatmul.mubr.bf16.vlgmr.msra.gmra.mrb[100].mxu0 %v10381_v32 }
0x15d0   :  { %3929 = vmatprep.mubr.bf16.mxu0 %v10771_v45  ;;  %3898 = vmatpush1.bf16.msra.mxu0 %v10077_v18  ;;  %v12336_v18 = vld [vmem:[#allocation26_spill] sm:$0xff] }
0x15d1   :  { %3899 = vmatprep.subr.bf16.mxu0 %v10083_v26  ;;  %v12337_v26 = vld [vmem:[#allocation27_spill] sm:$0xff] }
0x15d4   :  { %3900 = vmatpush1.bf16.msra.mxu0 %v10089_v49  ;;  %v12338_v49 = vld [vmem:[#allocation28_spill] sm:$0xff] }
0x15d5   :  { %3901 = vmatprep.subr.bf16.mxu0 %v10095_v21  ;;  %v12339_v21 = vld [vmem:[#allocation29_spill] sm:$0xff] }
0x15d8   :  { %3902 = vmatpush1.bf16.msra.mxu0 %v10101_v33  ;;  %v12340_v33 = vld [vmem:[#allocation30_spill] sm:$0xff] }
0x15d9   :  { %3903 = vmatprep.subr.bf16.mxu0 %v10107_v0  ;;  %v12341_v0 = vld [vmem:[#allocation31_spill] sm:$0xff] }
0x15dc   :  { %3904 = vmatpush1.bf16.msra.mxu0 %v10113_v36  ;;  %v12342_v36 = vld [vmem:[#allocation32_spill] sm:$0xff] }
0x15dd   :  { %3905 = vmatprep.subr.bf16.mxu0 %v10119_v47  ;;  %v12343_v47 = vld [vmem:[#allocation33_spill] sm:$0xff] }
0x15e0   :  { %3906 = vmatpush1.bf16.msra.mxu0 %v10125_v25  ;;  %v12344_v25 = vld [vmem:[#allocation34_spill] sm:$0xff] }
0x15e1   :  { %3907 = vmatprep.subr.bf16.mxu0 %v10131_v40  ;;  %v12345_v40 = vld [vmem:[#allocation35_spill] sm:$0xff] }
0x15e4   :  { %3908 = vmatpush1.bf16.msra.mxu0 %v10137_v17  ;;  %v12346_v17 = vld [vmem:[#allocation36_spill] sm:$0xff] }
0x15e5   :  { %3909 = vmatprep.subr.bf16.mxu0 %v10143_v63  ;;  %v12347_v63 = vld [vmem:[#allocation37_spill] sm:$0xff] }
0x15e8   :  { %3910 = vmatpush1.bf16.msra.mxu0 %v10149_v2  ;;  %v12348_v2 = vld [vmem:[#allocation38_spill] sm:$0xff] }
0x15e9   :  { %3911 = vmatprep.subr.bf16.mxu0 %v10155_v6  ;;  %v12349_v6 = vld [vmem:[#allocation39_spill] sm:$0xff] }
0x15ec   :  { %3912 = vmatpush1.bf16.msra.mxu0 %v10161_v50 }
0x15ed   :  { %3913 = vmatprep.subr.bf16.mxu0 %v10167_v31 }
0x15f0   :  { %3914 = vmatpush1.bf16.msra.mxu0 %v10173_v53  ;;  %v12350_v53 = vld [vmem:[#allocation75_spill] sm:$0xff] }
0x15f1   :  { %3915 = vmatprep.subr.bf16.mxu0 %v10179_v10 }
0x15f4   :  { %3916 = vmatpush1.bf16.msra.mxu0 %v12336_v18 }
0x15f5   :  { %3917 = vmatprep.subr.bf16.mxu0 %v12337_v26 }
0x15f8   :  { %3918 = vmatpush1.bf16.msra.mxu0 %v12338_v49 }
0x15f9   :  { %3919 = vmatprep.subr.bf16.mxu0 %v12339_v21 }
0x15fc   :  { %3920 = vmatpush1.bf16.msra.mxu0 %v12340_v33 }
0x15fd   :  { %3921 = vmatprep.subr.bf16.mxu0 %v12341_v0 }
0x1600   :  { %3922 = vmatpush1.bf16.msra.mxu0 %v12342_v36 }
0x1601   :  { %3923 = vmatprep.subr.bf16.mxu0 %v12343_v47 }
0x1604   :  { %3924 = vmatpush1.bf16.msra.mxu0 %v12344_v25 }
0x1605   :  { %3925 = vmatprep.subr.bf16.mxu0 %v12345_v40 }
0x1608   :  { %3926 = vmatpush1.bf16.msra.mxu0 %v12346_v17 }
0x1609   :  { %3927 = vmatprep.subr.bf16.mxu0 %v12347_v63 }
0x160c   :  { %3928 = vmatpush1.bf16.msra.mxu0 %v12348_v2 }
0x160d   :  { %4004 = vmatprep.subr.bf16.mxu0 %v12349_v6 }
0x1682   :  { %v3675_v50 = vpop.f32.mrb[92].mxu1  ;;  %v3716_v31 = vpop.f32.mrb[96].mxu0 }
0x1683   :  { %v3676_v10 = vadd.f32 %v3675_v50, %v12350_v53  ;;  %v3677_v23 = vpop.f32.mrb[93].mxu1  ;;  %v3718_v56 = vpop.f32.mrb[97].mxu0  ;;  %v3717_v49 = vadd.f32 %v3716_v31, %v7053_v42 }
0x1684   :  { %v3678_v55 = vadd.f32 %v3677_v23, %v7044_v12  ;;  %v3679_v29 = vpop.f32.mrb[94].mxu1  ;;  %v3720_v48 = vpop.f32.mrb[98].mxu0  ;;  %v3719_v18 = vadd.f32 %v3718_v56, %v7049_v38 }
0x1685   :  { %v4400_v51 = vmul.f32 -1.442695, %v3676_v10  ;;  %v3680_v27 = vpop.f32.mrb[95].mxu1  ;;  %v3721_v8 = vpop.f32.mrb[99].mxu0 }
0x1686   :  { %v4401_v62 = vmul.f32 -1.442695, %v3678_v55  ;;  %v4402_v26 = vmul.f32 -1.442695, %v3719_v18  ;;  %v5843_v27 = vld [vmem:[%s11179_s3 + $0x2c] ss:$16 sps:$4 sm:$0xff]  }
0x1687   :  { %5254 = vpow2.f32 %v4400_v51  ;;  %v5844_v8 = vld [vmem:[%s11179_s3 + $0x28] ss:$16 sps:$4 sm:$0xff]  }
0x1688   :  { %5256 = vpow2.f32 %v4401_v62  ;;  %v5845_v62 = vld [vmem:[%s11179_s3 + $0x4c] ss:$16 sps:$4 sm:$0xff]   ;;  %v5846_v18 = vld [vmem:[%s11179_s3 + $0x48] ss:$16 sps:$4 sm:$0xff]  }
0x1689   :  { %5258 = vpow2.f32 %v4402_v26  ;;  %v5848_v26 = vld [vmem:[%s11179_s3 + $0x68] ss:$16 sps:$4 sm:$0xff]  }
0x168a   :  { %5260 = vtanh.f32 %v3717_v49  ;;  %v5849_v49 = vld [vmem:[%s11179_s3 + $0x8c] ss:$16 sps:$4 sm:$0xff]  }
0x1691   :  { %v5255_v21 = vpop.eup %5254 }
0x1692   :  { %v5257_v33 = vpop.eup %5256  ;;  %v3726_v0 = vadd.f32 1.0, %v5255_v21  ;;  %v5850_v21 = vld [vmem:[%s11179_s3 + $0x88] ss:$16 sps:$4 sm:$0xff]  }
0x1693   :  { %v3732_v36 = vadd.f32 1.0, %v5257_v33  ;;  %v5259_v47 = vpop.eup %5258  ;;  %v5851_v33 = vld [vmem:[%s11179_s3 + $0xac] ss:$16 sps:$4 sm:$0xff]  }
0x1694   :  { %5262 = vrcp.f32 %v3726_v0  ;;  %v5261_v25 = vpop.eup %5260  ;;  %v3739_v2 = vadd.f32 1.0, %v5259_v47  ;;  %v5852_v0 = vld [vmem:[%s11179_s3 + $0xa8] ss:$16 sps:$4 sm:$0xff]  }
0x1695   :  { %5264 = vrcp.f32 %v3732_v36  ;;  %v5853_v36 = vld [vmem:[%s11179_s3 + $0xcc] ss:$16 sps:$4 sm:$0xff]   ;;  %v5854_v47 = vld [vmem:[%s11179_s3 + $0xc8] ss:$16 sps:$4 sm:$0xff]  }
0x1696   :  { %5266 = vrcp.f32 %v3739_v2  ;;  %v5859_v2 = vld [vmem:[%s11181_s5 + $0x2c] ss:$16 sps:$4 sm:$0xff]  }
0x169e   :  { %v5263_v40 = vpop.eup %5262 }
0x169f   :  { %v5265_v17 = vpop.eup %5264  ;;  %v3743_v63 = vmul.f32 %v5263_v40, %v5261_v25  ;;  %v5855_v25 = vld [vmem:[%s11179_s3 + $0xec] ss:$16 sps:$4 sm:$0xff]   ;;  %v5856_v40 = vld [vmem:[%s11179_s3 + $0xe8] ss:$16 sps:$4 sm:$0xff]  }
0x16a0   :  { %v3742_v6 = vmul.f32 %v5265_v17, %v10271_v37  ;;  %v5267_v55 = vpop.eup %5266  ;;  %v5842_v37 = vld [vmem:[%s11179_s3 + $0x8] ss:$16 sps:$4 sm:$0xff]   ;;  %v5857_v17 = vld [vmem:[%s11181_s5 + $0xc] ss:$16 sps:$4 sm:$0xff]  }
0x16a2   :  { %v10923_v50 = vadd.f32 %v3743_v63, %v3742_v6  ;;  %v10925_v10 = vpop.f32.mrb[100].mxu0  ;;  %v5858_v63 = vld [vmem:[%s11181_s5 + $0x8] ss:$16 sps:$4 sm:$0xff]  }
0x16a3   :  { %v10927_v31 = vpop.f32.mrb[101].mxu0  ;;  %v5860_v6 = vld [vmem:[%s11181_s5 + $0x28] ss:$16 sps:$4 sm:$0xff]  }
0x16a4   :  { %v3828_v23 = vpop.f32.mrb[102].mxu0  ;;  %5268 = vtanh.f32 %v10923_v50 }
0x16a5   :  { %v3829_v56 = vpop.f32.mrb[103].mxu0  ;;  %v5863_v23 = vld [vmem:[%s11181_s5 + $0x6c] ss:$16 sps:$4 sm:$0xff]  }
0x16a6   :  { %v5864_v56 = vld [vmem:[%s11181_s5 + $0x68] ss:$16 sps:$4 sm:$0xff]  }
0x16ae   :  { %v5269_v29 = vpop.eup %5268 }
0x16af   :  { %v3746_v48 = vmul.f32 %v5269_v29, %v5267_v55  ;;  %v5865_v55 = vld [vmem:[%s11181_s5 + $0x8c] ss:$16 sps:$4 sm:$0xff]   ;;  %v5866_v29 = vld [vmem:[%s11181_s5 + $0x88] ss:$16 sps:$4 sm:$0xff]  }
0x16b1   :  { %v10930_v51 = vpack.c.bf16 %v3746_v48, %v3746_v48  ;;  %v5867_v48 = vld [vmem:[%s11181_s5 + $0xac] ss:$16 sps:$4 sm:$0xff]  }
0x16b3   :  { %4652 = vmatmul.mubr.bf16.vlgmr.msra.gmra.mrb[96].mxu1 %v10930_v51 }
0x16b4   :  { %3832 = vmatpush1.bf16.msra.mxu1 %v5842_v37  ;;  %3863 = vmatprep.mubr.bf16.mxu1 %v11673_v35  ;;  %v5847_v35 = vld [vmem:[%s11179_s3 + $0x6c] ss:$16 sps:$4 sm:$0xff]   ;;  %v5868_v37 = vld [vmem:[%s11181_s5 + $0xa8] ss:$16 sps:$4 sm:$0xff]  }
0x16b5   :  { %3833 = vmatprep.subr.bf16.mxu1 %v5843_v27  ;;  %v5869_v27 = vld [vmem:[%s11181_s5 + $0xcc] ss:$16 sps:$4 sm:$0xff]  }
0x16b8   :  { %3834 = vmatpush1.bf16.msra.mxu1 %v5844_v8  ;;  %v5870_v8 = vld [vmem:[%s11181_s5 + $0xc8] ss:$16 sps:$4 sm:$0xff]  }
0x16b9   :  { %3835 = vmatprep.subr.bf16.mxu1 %v5845_v62  ;;  %v5871_v62 = vld [vmem:[%s11181_s5 + $0xec] ss:$16 sps:$4 sm:$0xff]  }
0x16bc   :  { %3836 = vmatpush1.bf16.msra.mxu1 %v5846_v18  ;;  %v5872_v18 = vld [vmem:[%s11181_s5 + $0xe8] ss:$16 sps:$4 sm:$0xff]  }
0x16bd   :  { %3837 = vmatprep.subr.bf16.mxu1 %v5847_v35  ;;  %v5873_v35 = vld [vmem:[%s11181_s5 + $0x10c] ss:$16 sps:$4 sm:$0xff]  }
0x16c0   :  { %3838 = vmatpush1.bf16.msra.mxu1 %v5848_v26  ;;  %v5874_v26 = vld [vmem:[%s11181_s5 + $0x108] ss:$16 sps:$4 sm:$0xff]  }
0x16c1   :  { %3839 = vmatprep.subr.bf16.mxu1 %v5849_v49  ;;  %v5875_v49 = vld [vmem:[%s11181_s5 + $0x12c] ss:$16 sps:$4 sm:$0xff]  }
0x16c4   :  { %3840 = vmatpush1.bf16.msra.mxu1 %v5850_v21  ;;  %v5876_v21 = vld [vmem:[%s11181_s5 + $0x128] ss:$16 sps:$4 sm:$0xff]  }
0x16c5   :  { %3841 = vmatprep.subr.bf16.mxu1 %v5851_v33  ;;  %v5877_v33 = vld [vmem:[%s11181_s5 + $0x14c] ss:$16 sps:$4 sm:$0xff]  }
0x16c8   :  { %3842 = vmatpush1.bf16.msra.mxu1 %v5852_v0  ;;  %v5878_v0 = vld [vmem:[%s11181_s5 + $0x148] ss:$16 sps:$4 sm:$0xff]  }
0x16c9   :  { %3843 = vmatprep.subr.bf16.mxu1 %v5853_v36  ;;  %v5879_v36 = vld [vmem:[%s11181_s5 + $0x16c] ss:$16 sps:$4 sm:$0xff]  }
0x16cc   :  { %3844 = vmatpush1.bf16.msra.mxu1 %v5854_v47  ;;  %v5880_v47 = vld [vmem:[%s11181_s5 + $0x168] ss:$16 sps:$4 sm:$0xff]  }
0x16cd   :  { %3845 = vmatprep.subr.bf16.mxu1 %v5855_v25  ;;  %v5881_v25 = vld [vmem:[%s11181_s5 + $0x18c] ss:$16 sps:$4 sm:$0xff]  }
0x16d0   :  { %3846 = vmatpush1.bf16.msra.mxu1 %v5856_v40  ;;  %v5882_v40 = vld [vmem:[%s11181_s5 + $0x188] ss:$16 sps:$4 sm:$0xff]  }
0x16d1   :  { %3938 = vmatprep.subr.bf16.mxu1 %v5857_v17 }
0x16d3   :  { %3864 = vmatmul.mubr.bf16.vlgmr.msra.gmra.mrb[100].mxu1 %v10381_v32  ;;  %v5861_v32 = vld [vmem:[%s11181_s5 + $0x4c] ss:$16 sps:$4 sm:$0xff]  }
0x16d4   :  { %3970 = vmatprep.mubr.bf16.mxu1 %v10771_v45  ;;  %3939 = vmatpush1.bf16.msra.mxu1 %v5858_v63  ;;  %v5862_v45 = vld [vmem:[%s11181_s5 + $0x48] ss:$16 sps:$4 sm:$0xff]   ;;  %v11069_v63 = vld [vmem:[%s11188_s10] ss:$0 sm:$0xff] }
0x16d5   :  { %3940 = vmatprep.subr.bf16.mxu1 %v5859_v2 }
0x16d8   :  { %3941 = vmatpush1.bf16.msra.mxu1 %v5860_v6 }
0x16d9   :  { %3942 = vmatprep.subr.bf16.mxu1 %v5861_v32 }
0x16dc   :  { %3943 = vmatpush1.bf16.msra.mxu1 %v5862_v45 }
0x16dd   :  { %3944 = vmatprep.subr.bf16.mxu1 %v5863_v23 }
0x16e0   :  { %3945 = vmatpush1.bf16.msra.mxu1 %v5864_v56 }
0x16e1   :  { %3946 = vmatprep.subr.bf16.mxu1 %v5865_v55 }
0x16e4   :  { %3947 = vmatpush1.bf16.msra.mxu1 %v5866_v29 }
0x16e5   :  { %3948 = vmatprep.subr.bf16.mxu1 %v5867_v48 }
0x16e8   :  { %3949 = vmatpush1.bf16.msra.mxu1 %v5868_v37 }
0x16e9   :  { %3950 = vmatprep.subr.bf16.mxu1 %v5869_v27 }
0x16ec   :  { %3951 = vmatpush1.bf16.msra.mxu1 %v5870_v8 }
0x16ed   :  { %3952 = vmatprep.subr.bf16.mxu1 %v5871_v62 }
0x16f0   :  { %3953 = vmatpush1.bf16.msra.mxu1 %v5872_v18 }
0x16f1   :  { %3954 = vmatprep.subr.bf16.mxu1 %v5873_v35 }
0x16f4   :  { %3955 = vmatpush1.bf16.msra.mxu1 %v5874_v26 }
0x16f5   :  { %3956 = vmatprep.subr.bf16.mxu1 %v5875_v49 }
0x16f8   :  { %3957 = vmatpush1.bf16.msra.mxu1 %v5876_v21 }
0x16f9   :  { %3958 = vmatprep.subr.bf16.mxu1 %v5877_v33  ;;  %v12352_v33 = vld [vmem:[#allocation42_spill] sm:$0xff] }
0x16fc   :  { %3959 = vmatpush1.bf16.msra.mxu1 %v5878_v0  ;;  %v12353_v0 = vld [vmem:[#allocation41_spill] sm:$0xff] }
0x16fd   :  { %3960 = vmatprep.subr.bf16.mxu1 %v5879_v36  ;;  %v12354_v36 = vld [vmem:[#allocation44_spill] sm:$0xff] }
0x1700   :  { %3961 = vmatpush1.bf16.msra.mxu1 %v5880_v47  ;;  %v12355_v47 = vld [vmem:[#allocation43_spill] sm:$0xff] }
0x1701   :  { %3962 = vmatprep.subr.bf16.mxu1 %v5881_v25  ;;  %v12362_v25 = vld [vmem:[#allocation52_spill] sm:$0xff] }
0x1704   :  { %3963 = vmatpush1.bf16.msra.mxu1 %v5882_v40  ;;  %v12363_v40 = vld [vmem:[#allocation51_spill] sm:$0xff] }
0x1705   :  { %3964 = vmatprep.subr.bf16.mxu1 %v10328_v41 }
0x1708   :  { %3965 = vmatpush1.bf16.msra.mxu1 %v10334_v28 }
0x1709   :  { %3966 = vmatprep.subr.bf16.mxu1 %v10340_v16 }
0x170c   :  { %3967 = vmatpush1.bf16.msra.mxu1 %v10346_v9  ;;  %v3827_v9 = vadd.f32 %v10927_v31, %v12277_v59 }
0x170d   :  { %3968 = vmatprep.subr.bf16.mxu1 %v10352_v13  ;;  %v3825_v13 = vadd.f32 %v10925_v10, %v12278_v4 }
0x1710   :  { %3969 = vmatpush1.bf16.msra.mxu1 %v10358_v3  ;;  %v4405_v3 = vmul.f32 -1.442695, %v3827_v9  ;;  %v12369_v9 = vld [vmem:[#allocation57_spill] sm:$0xff] }
0x1711   :  { %4045 = vmatprep.subr.bf16.mxu1 %v10364_v14  ;;  %v4404_v14 = vmul.f32 -1.442695, %v3825_v13  ;;  %v12370_v13 = vld [vmem:[#allocation60_spill] sm:$0xff] }
0x1712   :  { %5270 = vpow2.f32 %v4405_v3  ;;  %v12371_v3 = vld [vmem:[#allocation59_spill] sm:$0xff] }
0x1713   :  { %5272 = vpow2.f32 %v4404_v14  ;;  %v12372_v14 = vld [vmem:[#allocation62_spill] sm:$0xff] }
0x171c   :  { %v5271_v6 = vpop.eup %5270 }
0x171d   :  { %v5273_v32 = vpop.eup %5272  ;;  %v3881_v45 = vadd.f32 1.0, %v5271_v6  ;;  %v12373_v6 = vld [vmem:[#allocation61_spill] sm:$0xff] }
0x171e   :  { %v3875_v23 = vadd.f32 1.0, %v5273_v32  ;;  %v12374_v32 = vld [vmem:[#allocation64_spill] sm:$0xff] }
0x171f   :  { %5274 = vrcp.f32 %v3881_v45  ;;  %v12375_v45 = vld [vmem:[#allocation63_spill] sm:$0xff] }
0x1720   :  { %5276 = vrcp.f32 %v3875_v23  ;;  %v12376_v23 = vld [vmem:[#allocation66_spill] sm:$0xff] }
0x1729   :  { %v5275_v10 = vpop.eup %5274 }
0x172a   :  { %v5277_v37 = vpop.eup %5276  ;;  %v3891_v8 = vmul.f32 %v5275_v10, %v10378_v46  ;;  %v12351_v46 = vld [vmem:[#allocation40_spill] sm:$0xff] }
0x172b   :  { %v12384_v10 = vld [vmem:[#allocation76_spill] sm:$0xff] }
0x1786   :  { %v3782_v17 = vpop.f32.mrb[96].mxu1 }
0x1787   :  { %v3783_v41 = vadd.f32 %v11069_v63, %v3782_v17  ;;  %v4653_v2 = vpop.f32.mrb[97].mxu1  ;;  %v12364_v17 = vld [vmem:[#allocation54_spill] sm:$0xff] }
0x1788   :  { %v3785_v28 = vpop.f32.mrb[98].mxu1  ;;  %v12366_v2 = vld [vmem:[#allocation56_spill] sm:$0xff] }
0x1789   :  { %4403 = vst [vmem:[%s11189_s11 + $0x30] sm:$0xff] %v3783_v41  ;;  %v4654_v16 = vpop.f32.mrb[99].mxu1  ;;  %v12365_v41 = vld [vmem:[#allocation53_spill] sm:$0xff]  ;;  %v12367_v28 = vld [vmem:[#allocation55_spill] sm:$0xff] }
0x178a   :  { %v12368_v16 = vld [vmem:[#allocation58_spill] sm:$0xff] }
0x17a6   :  { %v3865_v56 = vpop.f32.mrb[100].mxu1 }
0x17a7   :  { %v3866_v55 = vadd.f32 %v3865_v56, %v11823_v15  ;;  %v3867_v29 = vpop.f32.mrb[101].mxu1  ;;  %v12377_v56 = vld [vmem:[#allocation65_spill] sm:$0xff] }
0x17a8   :  { %v3868_v48 = vadd.f32 %v3867_v29, %v11824_v44  ;;  %v3869_v59 = vpop.f32.mrb[102].mxu1  ;;  %v12379_v29 = vld [vmem:[#allocation67_spill] sm:$0xff] }
0x17a9   :  { %5278 = vtanh.f32 %v3866_v55  ;;  %v3870_v31 = vpop.f32.mrb[103].mxu1  ;;  %v12378_v55 = vld [vmem:[#allocation68_spill] sm:$0xff]  ;;  %v12381_v59 = vld [vmem:[#allocation69_spill] sm:$0xff] }
0x17aa   :  { %v4406_v4 = vmul.f32 -1.442695, %v3868_v48  ;;  %v12380_v48 = vld [vmem:[#allocation71_spill] sm:$0xff]  ;;  %v12382_v31 = vld [vmem:[#allocation73_spill] sm:$0xff] }
0x17ac   :  { %5280 = vpow2.f32 %v4406_v4  ;;  %v12383_v4 = vld [vmem:[#allocation72_spill] sm:$0xff] }
0x17b3   :  { %v5279_v27 = vpop.eup %5278 }
0x17b4   :  { %v3892_v62 = vmul.f32 %v5279_v27, %v5277_v37  ;;  %v12385_v37 = vld [vmem:[#allocation74_spill] sm:$0xff] }
0x17b5   :  { %v12386_v27 = vld [vmem:[#allocation78_spill] sm:$0xff] }
0x17b6   :  { %v5281_v18 = vpop.eup %5280  ;;  %v3893_v35 = vadd.f32 %v3892_v62, %v3891_v8  ;;  %v12387_v8 = vld [vmem:[#allocation77_spill] sm:$0xff]  ;;  %v12388_v62 = vld [vmem:[#allocation80_spill] sm:$0xff] }
0x17b7   :  { %v3888_v26 = vadd.f32 1.0, %v5281_v18  ;;  %v12389_v18 = vld [vmem:[#allocation79_spill] sm:$0xff] }
0x17b8   :  { %5282 = vtanh.f32 %v3893_v35  ;;  %v12390_v35 = vld [vmem:[#allocation82_spill] sm:$0xff] }
0x17b9   :  { %5284 = vrcp.f32 %v3888_v26  ;;  %v12391_v26 = vld [vmem:[#allocation81_spill] sm:$0xff] }
0x17c2   :  { %v5283_v15 = vpop.eup %5282 }
0x17c3   :  { %v5285_v49 = vpop.eup %5284 }
0x17c4   :  { %v3895_v21 = vmul.f32 %v5285_v49, %v5283_v15  ;;  %v12392_v15 = vld [vmem:[#allocation84_spill] sm:$0xff]  ;;  %v12393_v49 = vld [vmem:[#allocation83_spill] sm:$0xff] }
0x17c6   :  { %v3896_v44 = vpack.c.bf16 %v3895_v21, %v3895_v21  ;;  %v12394_v21 = vld [vmem:[#allocation86_spill] sm:$0xff] }
0x17c8   :  { %3930 = vmatmul.mubr.bf16.vlgmr.msra.gmra.mrb[104].mxu0 %v3896_v44  ;;  %3971 = vmatmul.mubr.bf16.vlgmr.msra.gmra.mrb[104].mxu1 %v3896_v44  ;;  %v12395_v44 = vld [vmem:[#allocation85_spill] sm:$0xff] }
0x17c9   :  { %4036 = vmatprep.mubr.bf16.mxu0 %v10930_v51  ;;  %4077 = vmatprep.mubr.bf16.mxu1 %v10930_v51  ;;  %v12356_v51 = vld [vmem:[#allocation46_spill] sm:$0xff] }
0x17ca   :  { %4005 = vmatpush1.bf16.msra.mxu0 %v10396_v52  ;;  %4046 = vmatpush1.bf16.msra.mxu1 %v10390_v60  ;;  %v12357_v52 = vld [vmem:[#allocation45_spill] sm:$0xff]  ;;  %v12358_v60 = vld [vmem:[#allocation48_spill] sm:$0xff] }
0x17cb   :  { %4006 = vmatprep.subr.bf16.mxu0 %v10408_v57  ;;  %4047 = vmatprep.subr.bf16.mxu1 %v10402_v24  ;;  %v12359_v57 = vld [vmem:[#allocation47_spill] sm:$0xff]  ;;  %v12360_v24 = vld [vmem:[#allocation50_spill] sm:$0xff] }
0x17ce   :  { %4007 = vmatpush1.bf16.msra.mxu0 %v10420_v43  ;;  %4048 = vmatpush1.bf16.msra.mxu1 %v12351_v46  ;;  %v12361_v43 = vld [vmem:[#allocation49_spill] sm:$0xff]  ;;  %v12396_v46 = vld [vmem:[#allocation88_spill] sm:$0xff] }
0x17cf   :  { %4008 = vmatprep.subr.bf16.mxu0 %v12352_v33  ;;  %4049 = vmatprep.subr.bf16.mxu1 %v12353_v0  ;;  %v12397_v33 = vld [vmem:[#allocation87_spill] sm:$0xff]  ;;  %v12398_v0 = vld [vmem:[#allocation90_spill] sm:$0xff] }
0x17d2   :  { %4009 = vmatpush1.bf16.msra.mxu0 %v12354_v36  ;;  %4050 = vmatpush1.bf16.msra.mxu1 %v12355_v47  ;;  %v12399_v36 = vld [vmem:[#allocation89_spill] sm:$0xff]  ;;  %v12400_v47 = vld [vmem:[#allocation92_spill] sm:$0xff] }
0x17d3   :  { %4010 = vmatprep.subr.bf16.mxu0 %v12356_v51  ;;  %4051 = vmatprep.subr.bf16.mxu1 %v12357_v52  ;;  %v12401_v51 = vld [vmem:[#allocation91_spill] sm:$0xff]  ;;  %v12402_v52 = vld [vmem:[#allocation94_spill] sm:$0xff] }
0x17d6   :  { %4011 = vmatpush1.bf16.msra.mxu0 %v12358_v60  ;;  %4052 = vmatpush1.bf16.msra.mxu1 %v12359_v57  ;;  %v12403_v60 = vld [vmem:[#allocation93_spill] sm:$0xff]  ;;  %v12404_v57 = vld [vmem:[#allocation96_spill] sm:$0xff] }
0x17d7   :  { %4012 = vmatprep.subr.bf16.mxu0 %v12360_v24  ;;  %4053 = vmatprep.subr.bf16.mxu1 %v12361_v43  ;;  %v12405_v24 = vld [vmem:[#allocation95_spill] sm:$0xff]  ;;  %v12406_v43 = vld [vmem:[#allocation98_spill] sm:$0xff] }
0x17da   :  { %4013 = vmatpush1.bf16.msra.mxu0 %v12362_v25  ;;  %4054 = vmatpush1.bf16.msra.mxu1 %v12363_v40  ;;  %v12407_v25 = vld [vmem:[#allocation97_spill] sm:$0xff] }
0x17db   :  { %4014 = vmatprep.subr.bf16.mxu0 %v12364_v17  ;;  %4055 = vmatprep.subr.bf16.mxu1 %v12365_v41  ;;  %v12408_v41 = vld [vmem:[#allocation70_spill] sm:$0xff] }
0x17de   :  { %4015 = vmatpush1.bf16.msra.mxu0 %v12366_v2  ;;  %4056 = vmatpush1.bf16.msra.mxu1 %v12367_v28 }
0x17df   :  { %4016 = vmatprep.subr.bf16.mxu0 %v12368_v16  ;;  %4057 = vmatprep.subr.bf16.mxu1 %v12369_v9 }
0x17e2   :  { %4017 = vmatpush1.bf16.msra.mxu0 %v12370_v13  ;;  %4058 = vmatpush1.bf16.msra.mxu1 %v12371_v3 }
0x17e3   :  { %4018 = vmatprep.subr.bf16.mxu0 %v12372_v14  ;;  %4059 = vmatprep.subr.bf16.mxu1 %v12373_v6 }
0x17e6   :  { %4019 = vmatpush1.bf16.msra.mxu0 %v12374_v32  ;;  %4060 = vmatpush1.bf16.msra.mxu1 %v12375_v45 }
0x17e7   :  { %4020 = vmatprep.subr.bf16.mxu0 %v12376_v23  ;;  %4061 = vmatprep.subr.bf16.mxu1 %v12377_v56 }
0x17ea   :  { %4021 = vmatpush1.bf16.msra.mxu0 %v12378_v55  ;;  %4062 = vmatpush1.bf16.msra.mxu1 %v12379_v29 }
0x17eb   :  { %4022 = vmatprep.subr.bf16.mxu0 %v12380_v48  ;;  %4063 = vmatprep.subr.bf16.mxu1 %v12381_v59 }
0x17ee   :  { %4023 = vmatpush1.bf16.msra.mxu0 %v12382_v31  ;;  %4064 = vmatpush1.bf16.msra.mxu1 %v12383_v4 }
0x17ef   :  { %4024 = vmatprep.subr.bf16.mxu0 %v12384_v10  ;;  %4065 = vmatprep.subr.bf16.mxu1 %v12385_v37 }
0x17f2   :  { %4025 = vmatpush1.bf16.msra.mxu0 %v12386_v27  ;;  %4066 = vmatpush1.bf16.msra.mxu1 %v12387_v8 }
0x17f3   :  { %4026 = vmatprep.subr.bf16.mxu0 %v12388_v62  ;;  %4067 = vmatprep.subr.bf16.mxu1 %v12389_v18 }
0x17f6   :  { %4027 = vmatpush1.bf16.msra.mxu0 %v12390_v35  ;;  %4068 = vmatpush1.bf16.msra.mxu1 %v12391_v26 }
0x17f7   :  { %4028 = vmatprep.subr.bf16.mxu0 %v12392_v15  ;;  %4069 = vmatprep.subr.bf16.mxu1 %v12393_v49 }
0x17fa   :  { %4029 = vmatpush1.bf16.msra.mxu0 %v12394_v21  ;;  %4070 = vmatpush1.bf16.msra.mxu1 %v12395_v44 }
0x17fb   :  { %4030 = vmatprep.subr.bf16.mxu0 %v12396_v46  ;;  %4071 = vmatprep.subr.bf16.mxu1 %v12397_v33 }
0x17fe   :  { %4031 = vmatpush1.bf16.msra.mxu0 %v12398_v0  ;;  %4072 = vmatpush1.bf16.msra.mxu1 %v12399_v36 }
0x17ff   :  { %4032 = vmatprep.subr.bf16.mxu0 %v12400_v47  ;;  %4073 = vmatprep.subr.bf16.mxu1 %v12401_v51 }
0x1802   :  { %4033 = vmatpush1.bf16.msra.mxu0 %v12402_v52  ;;  %4074 = vmatpush1.bf16.msra.mxu1 %v12403_v60 }
0x1803   :  { %4034 = vmatprep.subr.bf16.mxu0 %v12404_v57  ;;  %4075 = vmatprep.subr.bf16.mxu1 %v12405_v24 }
0x1806   :  { %4035 = vmatpush1.bf16.msra.mxu0 %v12406_v43  ;;  %4076 = vmatpush1.bf16.msra.mxu1 %v12407_v25 }
0x1807   :  { %4655 = vmatprep.subr.bf16.mxu0 %v11670_v39 }
0x189b   :  { %v3931_v40 = vpop.f32.mrb[104].mxu0  ;;  %v3972_v17 = vpop.f32.mrb[104].mxu1 }
0x189c   :  { %v3932_v2 = vadd.f32 %v3931_v40, %v12408_v41  ;;  %v3933_v28 = vpop.f32.mrb[105].mxu0  ;;  %v3974_v16 = vpop.f32.mrb[105].mxu1  ;;  %v3973_v55 = vadd.f32 %v3972_v17, %v6833_v5 }
0x189d   :  { %v3934_v9 = vadd.f32 %v3933_v28, %v6824_v19  ;;  %v3935_v13 = vpop.f32.mrb[106].mxu0  ;;  %v3976_v3 = vpop.f32.mrb[106].mxu1  ;;  %v3975_v23 = vadd.f32 %v3974_v16, %v11777_v34 }
0x189e   :  { %v4407_v14 = vmul.f32 -1.442695, %v3932_v2  ;;  %v3936_v6 = vpop.f32.mrb[107].mxu0  ;;  %v3977_v32 = vpop.f32.mrb[107].mxu1 }
0x189f   :  { %v4408_v45 = vmul.f32 -1.442695, %v3934_v9  ;;  %v4409_v56 = vmul.f32 -1.442695, %v3975_v23 }
0x18a0   :  { %5286 = vpow2.f32 %v4407_v14 }
0x18a1   :  { %5288 = vpow2.f32 %v4408_v45 }
0x18a2   :  { %5290 = vpow2.f32 %v4409_v56 }
0x18a3   :  { %5292 = vtanh.f32 %v3973_v55 }
0x18aa   :  { %v5287_v29 = vpop.eup %5286 }
0x18ab   :  { %v5289_v48 = vpop.eup %5288  ;;  %v3982_v59 = vadd.f32 1.0, %v5287_v29 }
0x18ac   :  { %v3988_v31 = vadd.f32 1.0, %v5289_v48  ;;  %v5291_v19 = vpop.eup %5290 }
0x18ad   :  { %5294 = vrcp.f32 %v3982_v59  ;;  %v5293_v4 = vpop.eup %5292  ;;  %v3995_v8 = vadd.f32 1.0, %v5291_v19 }
0x18ae   :  { %5296 = vrcp.f32 %v3988_v31 }
0x18af   :  { %5298 = vrcp.f32 %v3995_v8 }
0x18b7   :  { %v5295_v10 = vpop.eup %5294 }
0x18b8   :  { %v5297_v37 = vpop.eup %5296  ;;  %v3999_v27 = vmul.f32 %v5295_v10, %v5293_v4 }
0x18b9   :  { %v3998_v62 = vmul.f32 %v5297_v37, %v10768_v54  ;;  %v5299_v5 = vpop.eup %5298 }
0x18bb   :  { %v4000_v34 = vadd.f32 %v3999_v27, %v3998_v62 }
0x18bd   :  { %5300 = vtanh.f32 %v4000_v34 }
0x18c7   :  { %v5301_v18 = vpop.eup %5300 }
0x18c8   :  { %v4002_v35 = vmul.f32 %v5301_v18, %v5299_v5 }
0x18ca   :  { %v4003_v26 = vpack.c.bf16 %v4002_v35, %v4002_v35 }
0x18cc   :  { %4037 = vmatmul.mubr.bf16.vlgmr.msra.gmra.mrb[108].mxu0 %v4003_v26  ;;  %4078 = vmatmul.mubr.bf16.vlgmr.msra.gmra.mrb[108].mxu1 %v4003_v26 }
0x18cd   :  { %4656 = vmatpush3.bf16.msra.mxu0 %v10785_v22  ;;  %4671 = vmatprep.mubr.msk.bf16.mxu0 %vm5885_vm0, %v11670_v39 }
0x18ce   :  { %4657 = vmatprep.subr.bf16.mxu0 %v11670_v39 }
0x18d1   :  { %4658 = vmatpush3.bf16.msra.mxu0 %v10800_v1 }
0x18d2   :  { %4659 = vmatprep.subr.bf16.mxu0 %v11670_v39 }
0x18d5   :  { %4660 = vmatpush3.bf16.msra.mxu0 %v10813_v20 }
0x18d6   :  { %4661 = vmatprep.subr.bf16.mxu0 %v11670_v39 }
0x18d9   :  { %4662 = vmatpush3.bf16.msra.mxu0 %v10826_v7 }
0x18da   :  { %4663 = vmatprep.subr.bf16.mxu0 %v11670_v39 }
0x18dd   :  { %4664 = vmatpush3.bf16.msra.mxu0 %v10839_v30 }
0x18de   :  { %4665 = vmatprep.subr.bf16.mxu0 %v11670_v39 }
0x18e1   :  { %4666 = vmatpush3.bf16.msra.mxu0 %v10852_v61 }
0x18e2   :  { %4667 = vmatprep.subr.bf16.mxu0 %v11670_v39 }
0x18e5   :  { %4668 = vmatpush3.bf16.msra.mxu0 %v10865_v58 }
0x18e6   :  { %4669 = vmatprep.subr.bf16.mxu0 %v11670_v39 }
0x18e9   :  { %4670 = vmatpush3.bf16.msra.mxu0 %v10875_v11 }
0x199f   :  { %v4038_v54 = vpop.f32.mrb[108].mxu0  ;;  %v4079_v22 = vpop.f32.mrb[108].mxu1 }
0x19a0   :  { %v4039_v1 = vadd.f32 %v4038_v54, %v12350_v53  ;;  %v4040_v20 = vpop.f32.mrb[109].mxu0  ;;  %v4081_v7 = vpop.f32.mrb[109].mxu1  ;;  %v4080_v11 = vadd.f32 %v4079_v22, %v7053_v42 }
0x19a1   :  { %v4041_v30 = vadd.f32 %v4040_v20, %v7044_v12  ;;  %v4042_v15 = vpop.f32.mrb[110].mxu0  ;;  %v4083_v49 = vpop.f32.mrb[110].mxu1  ;;  %v4082_v39 = vadd.f32 %v4081_v7, %v7049_v38 }
0x19a2   :  { %v4410_v21 = vmul.f32 -1.442695, %v4039_v1  ;;  %v4043_v61 = vpop.f32.mrb[111].mxu0  ;;  %v4084_v44 = vpop.f32.mrb[111].mxu1 }
0x19a3   :  { %v4411_v46 = vmul.f32 -1.442695, %v4041_v30  ;;  %v4412_v58 = vmul.f32 -1.442695, %v4082_v39 }
0x19a4   :  { %5302 = vpow2.f32 %v4410_v21 }
0x19a5   :  { %5304 = vpow2.f32 %v4411_v46 }
0x19a6   :  { %5306 = vpow2.f32 %v4412_v58 }
0x19a7   :  { %5308 = vtanh.f32 %v4080_v11 }
0x19ae   :  { %v5303_v33 = vpop.eup %5302 }
0x19af   :  { %v5305_v0 = vpop.eup %5304  ;;  %v4089_v53 = vadd.f32 1.0, %v5303_v33 }
0x19b0   :  { %v4095_v36 = vadd.f32 1.0, %v5305_v0  ;;  %v5307_v12 = vpop.eup %5306 }
0x19b1   :  { %5310 = vrcp.f32 %v4089_v53  ;;  %v5309_v47 = vpop.eup %5308  ;;  %v4102_v57 = vadd.f32 1.0, %v5307_v12 }
0x19b2   :  { %5312 = vrcp.f32 %v4095_v36 }
0x19b3   :  { %5314 = vrcp.f32 %v4102_v57 }
0x19bb   :  { %v5311_v51 = vpop.eup %5310 }
0x19bc   :  { %v5313_v52 = vpop.eup %5312  ;;  %v4106_v60 = vmul.f32 %v5311_v51, %v5309_v47 }
0x19bd   :  { %v4105_v24 = vmul.f32 %v5313_v52, %v10923_v50  ;;  %v5315_v42 = vpop.eup %5314 }
0x19bf   :  { %v4107_v38 = vadd.f32 %v4106_v60, %v4105_v24 }
0x19c1   :  { %5316 = vtanh.f32 %v4107_v38 }
0x19cb   :  { %v5317_v43 = vpop.eup %5316 }
0x19cc   :  { %v4109_v25 = vmul.f32 %v5317_v43, %v5315_v42 }
0x19ce   :  { %v4110_v40 = vpack.c.bf16 %v4109_v25, %v4109_v25 }
0x19d0   :  { %4672 = vmatmul.mubr.bf16.vlgmr.msra.gmra.mrb[112].mxu0 %v4110_v40 }
0x1aa3   :  { %v4145_v17 = vpop.f32.mrb[112].mxu0 }
0x1aa4   :  { %v4146_v41 = vadd.f32 %v11069_v63, %v4145_v17  ;;  %v4673_v2 = vpop.f32.mrb[113].mxu0 }
0x1aa5   :  { %v4148_v28 = vpop.f32.mrb[114].mxu0 }
0x1aa6   :  { %4413 = vst [vmem:[%s11189_s11 + $0x38] sm:$0xff] %v4146_v41  ;;  %v4674_v16 = vpop.f32.mrb[115].mxu0 }

</bundles_post_ra>
